<compile_context>
chip_gen: v7x
topology: tpu7x:2x2x1
jax: 0.10.0
libtpu: 0.0.40
codegen_flags: <defaults>
</compile_context>

<pallas_src>
import functools
import math

import jax
import jax.numpy as jnp
from jax import lax
from jax.experimental import pallas as pl
from jax.experimental.pallas import tpu as pltpu

LANE = 128            # feature dims padded to multiples of the lane width
ROW_TILE_CAP = 1024   # streaming row-tile cap (mem-bound MLP stages)
NODE_TILE_CAP = 1024  # node accumulator tile cap (acc scratch = tn x latent f32)
LN_EPS = 1e-5         # torch.nn.LayerNorm default eps


def _round_up(x, m):
    return ((x + m - 1) // m) * m


def _bytes(shape, dtype):
    n = 1
    for s in shape:
        n *= int(s)
    return n * jnp.dtype(dtype).itemsize


def _vmem_limit(est_bytes):
    """Scoped-VMEM limit from an estimated working set (clamped to [16, 64] MiB)."""
    est = int(1.5 * est_bytes) + (4 << 20)
    return max(min(est, 64 << 20), 16 << 20)


def _pick_node_tile(n):
    t = min(NODE_TILE_CAP, _round_up(n, 8))
    # ensure >= 2 grid steps along the parallel node axis (v7x has 2 TensorCores)
    if _round_up(n, t) == t and t >= 16:
        t = _round_up((t + 1) // 2, 8)
    return t


def _pick_edge_tile(e):
    # Edge one-hot block: must be a multiple of 128 (lane dim of the (1,E) index
    # layout) and <= 256 so bf16 one-hot row-sums (segment counts) stay exact.
    return 128 if _round_up(e, 128) <= 256 else 256


def _stream_tile(rows, base, cap=ROW_TILE_CAP):
    """Grow the streaming row tile while it divides `rows` and >= 2 tiles remain."""
    t = base
    while t * 2 <= cap and rows % (t * 2) == 0 and rows // (t * 2) >= 2:
        t *= 2
    return t


# ---------------------------------------------------------------------------
# Kernel 1: fused multi-layer Linear (+ optional LayerNorm) over row tiles.
# ---------------------------------------------------------------------------
def _mlp_ln_kernel(x_ref, *refs, num_layers, has_ln):
    out_ref = refs[-1]
    h = x_ref[...]
    for li in range(num_layers):               # reference MLP has no activations
        w = refs[2 * li][...]                  # bf16 [K, N], VMEM resident
        b = refs[2 * li + 1][...]              # f32  [1, N]
        h = jnp.dot(h.astype(jnp.bfloat16), w,
                    preferred_element_type=jnp.float32) + b
    if has_ln:
        gamma = refs[2 * num_layers][...]
        beta = refs[2 * num_layers + 1][...]
        mean = jnp.mean(h, axis=-1, keepdims=True)
        var = jnp.mean(jnp.square(h - mean), axis=-1, keepdims=True)
        h = (h - mean) * lax.rsqrt(var + LN_EPS)
        h = h * gamma + beta
    out_ref[...] = h.astype(out_ref.dtype)


def fused_mlp(x, weights, biases, gamma=None, beta=None, *, row_tile,
              out_dtype=jnp.bfloat16):
    rows, f_in = x.shape
    tile = _stream_tile(rows, row_tile)
    grid = (rows // tile,)
    has_ln = gamma is not None
    out_dim = weights[-1].shape[1]

    in_specs = [pl.BlockSpec((tile, f_in), lambda i: (i, 0))]
    args = [x]
    for w, b in zip(weights, biases):
        in_specs.append(pl.BlockSpec(w.shape, lambda i: (0, 0)))
        in_specs.append(pl.BlockSpec(b.shape, lambda i: (0, 0)))
        args += [w, b]
    if has_ln:
        in_specs.append(pl.BlockSpec(gamma.shape, lambda i: (0, 0)))
        in_specs.append(pl.BlockSpec(beta.shape, lambda i: (0, 0)))
        args += [gamma, beta]

    est = 2 * (_bytes((tile, f_in), x.dtype) + _bytes((tile, out_dim), out_dtype)
               + sum(_bytes(a.shape, a.dtype) for a in args[1:]))
    kernel = functools.partial(_mlp_ln_kernel, num_layers=len(weights), has_ln=has_ln)
    return pl.pallas_call(
        kernel,
        out_shape=jax.ShapeDtypeStruct((rows, out_dim), out_dtype),
        grid=grid,
        in_specs=in_specs,
        out_specs=pl.BlockSpec((tile, out_dim), lambda i: (i, 0)),
        compiler_params=pltpu.CompilerParams(
            dimension_semantics=("parallel",),
            vmem_limit_bytes=_vmem_limit(est)),
    )(*args)


# ---------------------------------------------------------------------------
# Kernel 2: encode-stage  x += scatter_mean(e, senders)  (bf16 one-hot MXU reduce).
# ---------------------------------------------------------------------------
def _scatter_mean_add_kernel(x_ref, e_ref, idx_ref, out_ref, acc_ref, cnt_ref, *, tn):
    j = pl.program_id(1)

    @pl.when(j == 0)
    def _():
        acc_ref[...] = jnp.zeros_like(acc_ref)
        cnt_ref[...] = jnp.zeros_like(cnt_ref)

    te = idx_ref.shape[1]
    node_base = pl.program_id(0) * tn
    ids = idx_ref[...]                                               # (1, te) int32
    niota = node_base + lax.broadcasted_iota(jnp.int32, (tn, te), 0)
    onehot = (niota == ids).astype(jnp.bfloat16)                     # (tn, te) bf16
    acc_ref[...] += jnp.dot(onehot, e_ref[...], preferred_element_type=jnp.float32)
    cnt_ref[...] += jnp.sum(onehot, axis=1, keepdims=True).astype(jnp.float32)

    @pl.when(j == pl.num_programs(1) - 1)
    def _():
        inv = pl.reciprocal(jnp.maximum(cnt_ref[...], 1.0), approx=True)
        out_ref[...] = (x_ref[...].astype(jnp.float32)
                        + acc_ref[...] * inv).astype(out_ref.dtype)


def scatter_mean_add(x, e, idx_row, *, tn, te):
    """x: [N_pad, F] bf16, e: [E_pad, F] bf16, idx_row: [1, E_pad] int32 (pad >= N_pad)."""
    n_pad, f = x.shape
    e_pad = e.shape[0]
    grid = (n_pad // tn, e_pad // te)

    est = (2 * (2 * _bytes((tn, f), x.dtype) + _bytes((te, f), e.dtype)
                + _bytes((1, te), jnp.int32))
           + _bytes((tn, f), jnp.float32) + _bytes((tn, 1), jnp.float32))
    kernel = functools.partial(_scatter_mean_add_kernel, tn=tn)
    return pl.pallas_call(
        kernel,
        out_shape=jax.ShapeDtypeStruct((n_pad, f), x.dtype),
        grid=grid,
        in_specs=[
            pl.BlockSpec((tn, f), lambda i, j: (i, 0)),
            pl.BlockSpec((te, f), lambda i, j: (j, 0)),
            pl.BlockSpec((1, te), lambda i, j: (0, j)),
        ],
        out_specs=pl.BlockSpec((tn, f), lambda i, j: (i, 0)),
        scratch_shapes=[pltpu.VMEM((tn, f), jnp.float32),
                        pltpu.VMEM((tn, 1), jnp.float32)],
        input_output_aliases={0: 0},
        compiler_params=pltpu.CompilerParams(
            dimension_semantics=("parallel", "arbitrary"),
            vmem_limit_bytes=_vmem_limit(est)),
    )(x, e, idx_row)


# ---------------------------------------------------------------------------
# Kernel 3: edge update = MLP_LN(cat([x[src], x[dst], e])), residual fused.
# Gather is a one-hot MXU matmul against a bf16 VMEM-resident node table; the
# concat is staged into one (te, 3F) bf16 scratch so the first layer is a single
# K=3F matmul.
# ---------------------------------------------------------------------------
def _edge_update_kernel(s_ref, r_ref, x_ref, e_ref, *refs, num_rest, n_pad):
    w1, b1 = refs[0], refs[1]
    rest = refs[2:2 + 2 * num_rest]
    gamma = refs[2 + 2 * num_rest]
    beta = refs[3 + 2 * num_rest]
    up_ref, new_ref, cat_ref = refs[-3], refs[-2], refs[-1]

    te, f = e_ref.shape
    niota = lax.broadcasted_iota(jnp.int32, (te, n_pad), 1)
    oh_s = (s_ref[...] == niota).astype(jnp.bfloat16)     # (te, n_pad) bf16
    oh_d = (r_ref[...] == niota).astype(jnp.bfloat16)
    x_tab = x_ref[...]                                      # (n_pad, f) bf16, resident
    xs = jnp.dot(oh_s, x_tab, preferred_element_type=jnp.float32)   # MXU gather
    xd = jnp.dot(oh_d, x_tab, preferred_element_type=jnp.float32)
    e_tile = e_ref[...]                                     # (te, f) bf16

    cat_ref[:, 0:f] = xs.astype(jnp.bfloat16)
    cat_ref[:, f:2 * f] = xd.astype(jnp.bfloat16)
    cat_ref[:, 2 * f:3 * f] = e_tile

    h = jnp.dot(cat_ref[...], w1[...], preferred_element_type=jnp.float32) + b1[...]
    for li in range(num_rest):
        w = rest[2 * li][...]
        b = rest[2 * li + 1][...]
        h = jnp.dot(h.astype(jnp.bfloat16), w, preferred_element_type=jnp.float32) + b
    mean = jnp.mean(h, axis=-1, keepdims=True)
    var = jnp.mean(jnp.square(h - mean), axis=-1, keepdims=True)
    y = (h - mean) * lax.rsqrt(var + LN_EPS)
    y = y * gamma[...] + beta[...]

    up_ref[...] = y.astype(up_ref.dtype)                     # aggregated by NodeModel
    new_ref[...] = (e_tile.astype(jnp.float32) + y).astype(new_ref.dtype)  # residual


def edge_update(x, e, send_col, recv_col, p, *, te):
    n_pad, f = x.shape
    e_pad = e.shape[0]
    grid = (e_pad // te,)

    weight_args = [p['w1'], p['b1']]
    for w, b in p['rest']:
        weight_args += [w, b]
    weight_args += [p['gamma'], p['beta']]

    const = lambda i: (0, 0)
    in_specs = [
        pl.BlockSpec((te, 1), lambda i: (i, 0)),      # senders (column layout)
        pl.BlockSpec((te, 1), lambda i: (i, 0)),      # receivers
        pl.BlockSpec((n_pad, f), const),              # bf16 node table, VMEM resident
        pl.BlockSpec((te, f), lambda i: (i, 0)),      # edge tile
    ] + [pl.BlockSpec(a.shape, const) for a in weight_args]

    est = (2 * (2 * _bytes((te, 1), jnp.int32) + _bytes((n_pad, f), x.dtype)
                + 3 * _bytes((te, f), e.dtype)
                + sum(_bytes(a.shape, a.dtype) for a in weight_args))
           + _bytes((te, 3 * f), jnp.bfloat16))

    kernel = functools.partial(_edge_update_kernel, num_rest=len(p['rest']), n_pad=n_pad)
    up, new_e = pl.pallas_call(
        kernel,
        out_shape=(jax.ShapeDtypeStruct((e_pad, f), jnp.bfloat16),
                   jax.ShapeDtypeStruct((e_pad, f), jnp.bfloat16)),
        grid=grid,
        in_specs=in_specs,
        out_specs=[pl.BlockSpec((te, f), lambda i: (i, 0)),
                   pl.BlockSpec((te, f), lambda i: (i, 0))],
        scratch_shapes=[pltpu.VMEM((te, 3 * f), jnp.bfloat16)],
        compiler_params=pltpu.CompilerParams(
            dimension_semantics=("parallel",),
            vmem_limit_bytes=_vmem_limit(est)),
    )(send_col, recv_col, x, e, *weight_args)
    return up, new_e


# ---------------------------------------------------------------------------
# Kernel 4: node update = x + MLP_LN(cat([x, mean_agg(e_upd, recv)])); the
# aggregation (bf16 one-hot MXU reduce, edge axis last / "arbitrary"), the single
# K=2F first-layer matmul, LN and the residual are fused; output aliased in place.
# ---------------------------------------------------------------------------
def _node_update_kernel(x_ref, eup_ref, idx_ref, *refs, num_rest, tn):
    w1, b1 = refs[0], refs[1]
    rest = refs[2:2 + 2 * num_rest]
    gamma = refs[2 + 2 * num_rest]
    beta = refs[3 + 2 * num_rest]
    out_ref, acc_ref, cnt_ref, cat_ref = refs[-4], refs[-3], refs[-2], refs[-1]

    j = pl.program_id(1)

    @pl.when(j == 0)
    def _():
        acc_ref[...] = jnp.zeros_like(acc_ref)
        cnt_ref[...] = jnp.zeros_like(cnt_ref)

    te = idx_ref.shape[1]
    node_base = pl.program_id(0) * tn
    ids = idx_ref[...]                                               # (1, te) int32
    niota = node_base + lax.broadcasted_iota(jnp.int32, (tn, te), 0)
    onehot = (niota == ids).astype(jnp.bfloat16)                     # (tn, te) bf16
    acc_ref[...] += jnp.dot(onehot, eup_ref[...], preferred_element_type=jnp.float32)
    cnt_ref[...] += jnp.sum(onehot, axis=1, keepdims=True).astype(jnp.float32)

    @pl.when(j == pl.num_programs(1) - 1)
    def _():
        f = x_ref.shape[1]
        agg = acc_ref[...] * pl.reciprocal(jnp.maximum(cnt_ref[...], 1.0), approx=True)
        x_tile = x_ref[...]                                          # (tn, f) bf16
        cat_ref[:, 0:f] = x_tile
        cat_ref[:, f:2 * f] = agg.astype(jnp.bfloat16)
        h = jnp.dot(cat_ref[...], w1[...], preferred_element_type=jnp.float32) + b1[...]
        for li in range(num_rest):
            w = rest[2 * li][...]
            b = rest[2 * li + 1][...]
            h = jnp.dot(h.astype(jnp.bfloat16), w, preferred_element_type=jnp.float32) + b
        mean = jnp.mean(h, axis=-1, keepdims=True)
        var = jnp.mean(jnp.square(h - mean), axis=-1, keepdims=True)
        y = (h - mean) * lax.rsqrt(var + LN_EPS)
        y = y * gamma[...] + beta[...]
        out_ref[...] = (x_tile.astype(jnp.float32) + y).astype(out_ref.dtype)


def node_update(x, e_upd, recv_row, p, *, tn, te):
    n_pad, f = x.shape
    e_pad = e_upd.shape[0]
    grid = (n_pad // tn, e_pad // te)

    weight_args = [p['w1'], p['b1']]
    for w, b in p['rest']:
        weight_args += [w, b]
    weight_args += [p['gamma'], p['beta']]

    const = lambda i, j: (0, 0)
    in_specs = [
        pl.BlockSpec((tn, f), lambda i, j: (i, 0)),
        pl.BlockSpec((te, f), lambda i, j: (j, 0)),
        pl.BlockSpec((1, te), lambda i, j: (0, j)),
    ] + [pl.BlockSpec(a.shape, const) for a in weight_args]

    est = (2 * (2 * _bytes((tn, f), x.dtype) + _bytes((te, f), e_upd.dtype)
                + _bytes((1, te), jnp.int32)
                + sum(_bytes(a.shape, a.dtype) for a in weight_args))
           + _bytes((tn, f), jnp.float32) + _bytes((tn, 1), jnp.float32)
           + _bytes((tn, 2 * f), jnp.bfloat16))

    kernel = functools.partial(_node_update_kernel, num_rest=len(p['rest']), tn=tn)
    return pl.pallas_call(
        kernel,
        out_shape=jax.ShapeDtypeStruct((n_pad, f), x.dtype),
        grid=grid,
        in_specs=in_specs,
        out_specs=pl.BlockSpec((tn, f), lambda i, j: (i, 0)),
        scratch_shapes=[pltpu.VMEM((tn, f), jnp.float32),
                        pltpu.VMEM((tn, 1), jnp.float32),
                        pltpu.VMEM((tn, 2 * f), jnp.bfloat16)],
        input_output_aliases={0: 0},    # update node features in place across steps
        compiler_params=pltpu.CompilerParams(
            dimension_semantics=("parallel", "arbitrary"),
            vmem_limit_bytes=_vmem_limit(est)),
    )(x, e_upd, recv_row, *weight_args)


# ---------------------------------------------------------------------------
# Parameter construction (PyTorch-style Linear init, padded for the kernels).
# ---------------------------------------------------------------------------
def _pad2(a, rows, cols):
    return jnp.pad(a, ((0, rows - a.shape[0]), (0, cols - a.shape[1])))


def _init_linear(key, fan_in, fan_out):
    kw, kb = jax.random.split(key)
    bound = 1.0 / math.sqrt(fan_in)
    w = jax.random.uniform(kw, (fan_in, fan_out), jnp.float32, -bound, bound)
    b = jax.random.uniform(kb, (fan_out,), jnp.float32, -bound, bound)
    return w, b


def _make_mlp(key, sizes):
    ws, bs = [], []
    for i in range(len(sizes) - 1):
        key, sub = jax.random.split(key)
        w, b = _init_linear(sub, sizes[i], sizes[i + 1])
        ws.append(w)
        bs.append(b)
    return ws, bs


def _make_padded_mlp(key, sizes, in_pad, out_pad):
    ws, bs = _make_mlp(key, sizes)
    ws_p, bs_p = [], []
    n_lin = len(ws)
    for li, (w, b) in enumerate(zip(ws, bs)):
        rows = in_pad if li == 0 else w.shape[0]
        cols = out_pad if li == n_lin - 1 else w.shape[1]
        ws_p.append(_pad2(w, rows, cols).astype(jnp.bfloat16))
        bs_p.append(jnp.pad(b, (0, cols - b.shape[0])).reshape(1, cols).astype(jnp.float32))
    return ws_p, bs_p


def _make_processor_step(key, latent, sizes_fn):
    k_e, k_n = jax.random.split(key)
    e_ws, e_bs = _make_mlp(k_e, sizes_fn(3 * latent))
    n_ws, n_bs = _make_mlp(k_n, sizes_fn(2 * latent))

    def pack(ws, bs):
        return {
            'w1': ws[0].astype(jnp.bfloat16),               # full (kF, latent) weight
            'b1': bs[0].reshape(1, -1).astype(jnp.float32),
            'rest': [(w.astype(jnp.bfloat16), b.reshape(1, -1).astype(jnp.float32))
                     for w, b in zip(ws[1:], bs[1:])],
            'gamma': jnp.ones((1, latent), jnp.float32),
            'beta': jnp.zeros((1, latent), jnp.float32),
        }

    return {'edge': pack(e_ws, e_bs), 'node': pack(n_ws, n_bs)}


def init_params(key, node_in, edge_in, latent, hidden, num_hidden_layers, steps, out_size):
    assert latent % LANE == 0, "latent_size must be a multiple of 128 (lane width)"
    assert hidden % LANE == 0, "mlp_hidden_size must be a multiple of 128"
    k_ne, k_ee, k_dec, k_proc = jax.random.split(key, 4)

    def sizes(in_size, out=latent):
        if num_hidden_layers == 0:
            return [in_size, out]
        return [in_size] + [hidden] * num_hidden_layers + [out]

    node_ws, node_bs = _make_padded_mlp(k_ne, sizes(node_in),
                                        _round_up(node_in, LANE), latent)
    edge_ws, edge_bs = _make_padded_mlp(k_ee, sizes(edge_in),
                                        _round_up(edge_in, LANE), latent)
    dec_ws, dec_bs = _make_padded_mlp(k_dec, sizes(latent, out_size),
                                      latent, _round_up(out_size, LANE))

    processor = [_make_processor_step(k, latent, sizes)
                 for k in jax.random.split(k_proc, steps)]

    return {
        'node_enc': {'ws': node_ws, 'bs': node_bs,
                     'gamma': jnp.ones((1, latent), jnp.float32),
                     'beta': jnp.zeros((1, latent), jnp.float32)},
        'edge_enc': {'ws': edge_ws, 'bs': edge_bs,
                     'gamma': jnp.ones((1, latent), jnp.float32),
                     'beta': jnp.zeros((1, latent), jnp.float32)},
        'processor': processor,
        'decoder': {'ws': dec_ws, 'bs': dec_bs},
    }


# ---------------------------------------------------------------------------
# Full EncodeProcessDecode forward pass.
# ---------------------------------------------------------------------------
def epd_forward(params, node_feat, edge_feat, edge_index, *, output_size):
    n, node_in = node_feat.shape
    e_cnt, edge_in = edge_feat.shape

    node_in_pad = params['node_enc']['ws'][0].shape[0]
    edge_in_pad = params['edge_enc']['ws'][0].shape[0]

    tn = _pick_node_tile(n)
    n_pad = _round_up(n, tn)
    te = _pick_edge_tile(e_cnt)
    e_pad = _round_up(e_cnt, te)

    x_in = jnp.pad(node_feat.astype(jnp.float32),
                   ((0, n_pad - n), (0, node_in_pad - node_in)))
    e_in = jnp.pad(edge_feat.astype(jnp.float32),
                   ((0, e_pad - e_cnt), (0, edge_in_pad - edge_in)))

    senders = edge_index[0].astype(jnp.int32)
    receivers = edge_index[1].astype(jnp.int32)
    # padded edges get id = n_pad, which matches no node (zero one-hot row/col)
    send_pad = jnp.pad(senders, (0, e_pad - e_cnt), constant_values=n_pad)
    recv_pad = jnp.pad(receivers, (0, e_pad - e_cnt), constant_values=n_pad)
    send_row = send_pad.reshape(1, e_pad)     # lane layout (scatter one-hot)
    recv_row = recv_pad.reshape(1, e_pad)
    send_col = send_pad.reshape(e_pad, 1)     # sublane layout (gather one-hot)
    recv_col = recv_pad.reshape(e_pad, 1)

    # ---- encode ----
    ne, ee = params['node_enc'], params['edge_enc']
    x = fused_mlp(x_in, ne['ws'], ne['bs'], ne['gamma'], ne['beta'],
                  row_tile=tn, out_dtype=jnp.bfloat16)
    e = fused_mlp(e_in, ee['ws'], ee['bs'], ee['gamma'], ee['beta'],
                  row_tile=te, out_dtype=jnp.bfloat16)
    # node_feat += scatter_mean(edge_feat, edge_index[0])
    x = scatter_mean_add(x, e, send_row, tn=tn, te=te)

    # ---- process (K interaction-network steps, residual) ----
    for step in params['processor']:
        e_upd, e_new = edge_update(x, e, send_col, recv_col, step['edge'], te=te)
        x = node_update(x, e_upd, recv_row, step['node'], tn=tn, te=te)
        e = e_new

    # ---- decode ----
    dec = params['decoder']
    y = fused_mlp(x, dec['ws'], dec['bs'], row_tile=tn, out_dtype=jnp.float32)
    return y[:n, :output_size]


# ---------------------------------------------------------------------------
# Demo / smoke test.
# ---------------------------------------------------------------------------
if __name__ == "__main__":
    NODE_IN, EDGE_IN = 12, 4
    LATENT, HIDDEN = 128, 128
    NUM_HIDDEN_LAYERS = 2
    STEPS = 3
    OUT_SIZE = 3
    N, E = 60, 200

    key = jax.random.PRNGKey(0)
    k_nf, k_ef, k_s, k_r, k_p = jax.random.split(key, 5)
    node_feat = jax.random.normal(k_nf, (N, NODE_IN), jnp.float32)
    edge_feat = jax.random.normal(k_ef, (E, EDGE_IN), jnp.float32)
    senders = jax.random.randint(k_s, (E,), 0, N, dtype=jnp.int32)
    receivers = jax.random.randint(k_r, (E,), 0, N, dtype=jnp.int32)
    edge_index = jnp.stack([senders, receivers])

    params = init_params(k_p, NODE_IN, EDGE_IN, LATENT, HIDDEN,
                         NUM_HIDDEN_LAYERS, STEPS, OUT_SIZE)

    fwd = jax.jit(functools.partial(epd_forward, output_size=OUT_SIZE))
    out = fwd(params, node_feat, edge_feat, edge_index)
    out = jax.block_until_ready(out)

    assert out.shape == (N, OUT_SIZE), out.shape
    assert bool(jnp.all(jnp.isfinite(out)))
    print("KERNEL_OK")
</pallas_src>

<mosaic_0001>
module attributes {stable_mosaic.version = 11 : i64} {
  func.func @_mlp_ln_kernel(%arg0: i32, %arg1: memref<128x128xf32, #tpu.memory_space<vmem>>, %arg2: memref<128x128xbf16, #tpu.memory_space<vmem>>, %arg3: memref<1x128xf32, #tpu.memory_space<vmem>>, %arg4: memref<128x128xbf16, #tpu.memory_space<vmem>>, %arg5: memref<1x128xf32, #tpu.memory_space<vmem>>, %arg6: memref<128x128xbf16, #tpu.memory_space<vmem>>, %arg7: memref<1x128xf32, #tpu.memory_space<vmem>>, %arg8: memref<1x128xf32, #tpu.memory_space<vmem>>, %arg9: memref<1x128xf32, #tpu.memory_space<vmem>>, %arg10: memref<128x128xbf16, #tpu.memory_space<vmem>>) attributes {dimension_semantics = [#tpu.dimension_semantics<parallel>], iteration_bounds = array<i64: 2>, scalar_prefetch = 0 : i64, scratch_operands = 0 : i64, tpu.core_type = #tpu.core_type<tc>, window_params = [{transform_indices = @transform_0, window_bounds = array<i64: 128, 128>}, {pipeline_mode = #tpu.pipeline_mode<synchronous>, transform_indices = @transform_1, window_bounds = array<i64: 128, 128>}, {pipeline_mode = #tpu.pipeline_mode<synchronous>, transform_indices = @transform_2, window_bounds = array<i64: 1, 128>}, {pipeline_mode = #tpu.pipeline_mode<synchronous>, transform_indices = @transform_3, window_bounds = array<i64: 128, 128>}, {pipeline_mode = #tpu.pipeline_mode<synchronous>, transform_indices = @transform_4, window_bounds = array<i64: 1, 128>}, {pipeline_mode = #tpu.pipeline_mode<synchronous>, transform_indices = @transform_5, window_bounds = array<i64: 128, 128>}, {pipeline_mode = #tpu.pipeline_mode<synchronous>, transform_indices = @transform_6, window_bounds = array<i64: 1, 128>}, {pipeline_mode = #tpu.pipeline_mode<synchronous>, transform_indices = @transform_7, window_bounds = array<i64: 1, 128>}, {pipeline_mode = #tpu.pipeline_mode<synchronous>, transform_indices = @transform_8, window_bounds = array<i64: 1, 128>}, {transform_indices = @transform_9, window_bounds = array<i64: 128, 128>}]} {
    %c0 = arith.constant 0 : index
    %c0_0 = arith.constant 0 : index
    %0 = vector.load %arg1[%c0, %c0_0] : memref<128x128xf32, #tpu.memory_space<vmem>>, vector<128x128xf32>
    %c0_1 = arith.constant 0 : index
    %c0_2 = arith.constant 0 : index
    %1 = vector.load %arg2[%c0_1, %c0_2] : memref<128x128xbf16, #tpu.memory_space<vmem>>, vector<128x128xbf16>
    %c0_3 = arith.constant 0 : index
    %c0_4 = arith.constant 0 : index
    %2 = vector.load %arg3[%c0_3, %c0_4] : memref<1x128xf32, #tpu.memory_space<vmem>>, vector<1x128xf32>
    %3 = arith.truncf %0 : vector<128x128xf32> to vector<128x128xbf16>
    %cst = arith.constant dense<0.000000e+00> : vector<128x128xf32>
    %4 = tpu.matmul %3, %1, %cst {dimension_numbers = #tpu.dot_dimension_numbers<[1], [0], [0], [1], [0, 0, 1, 1], [], []>} : vector<128x128xbf16>, vector<128x128xbf16>, vector<128x128xf32> -> vector<128x128xf32>
    %5 = vector.broadcast %2 : vector<1x128xf32> to vector<128x128xf32>
    %6 = arith.addf %4, %5 : vector<128x128xf32>
    %c0_5 = arith.constant 0 : index
    %c0_6 = arith.constant 0 : index
    %7 = vector.load %arg4[%c0_5, %c0_6] : memref<128x128xbf16, #tpu.memory_space<vmem>>, vector<128x128xbf16>
    %c0_7 = arith.constant 0 : index
    %c0_8 = arith.constant 0 : index
    %8 = vector.load %arg5[%c0_7, %c0_8] : memref<1x128xf32, #tpu.memory_space<vmem>>, vector<1x128xf32>
    %9 = arith.truncf %6 : vector<128x128xf32> to vector<128x128xbf16>
    %cst_9 = arith.constant dense<0.000000e+00> : vector<128x128xf32>
    %10 = tpu.matmul %9, %7, %cst_9 {dimension_numbers = #tpu.dot_dimension_numbers<[1], [0], [0], [1], [0, 0, 1, 1], [], []>} : vector<128x128xbf16>, vector<128x128xbf16>, vector<128x128xf32> -> vector<128x128xf32>
    %11 = vector.broadcast %8 : vector<1x128xf32> to vector<128x128xf32>
    %12 = arith.addf %10, %11 : vector<128x128xf32>
    %c0_10 = arith.constant 0 : index
    %c0_11 = arith.constant 0 : index
    %13 = vector.load %arg6[%c0_10, %c0_11] : memref<128x128xbf16, #tpu.memory_space<vmem>>, vector<128x128xbf16>
    %c0_12 = arith.constant 0 : index
    %c0_13 = arith.constant 0 : index
    %14 = vector.load %arg7[%c0_12, %c0_13] : memref<1x128xf32, #tpu.memory_space<vmem>>, vector<1x128xf32>
    %15 = arith.truncf %12 : vector<128x128xf32> to vector<128x128xbf16>
    %cst_14 = arith.constant dense<0.000000e+00> : vector<128x128xf32>
    %16 = tpu.matmul %15, %13, %cst_14 {dimension_numbers = #tpu.dot_dimension_numbers<[1], [0], [0], [1], [0, 0, 1, 1], [], []>} : vector<128x128xbf16>, vector<128x128xbf16>, vector<128x128xf32> -> vector<128x128xf32>
    %17 = vector.broadcast %14 : vector<1x128xf32> to vector<128x128xf32>
    %18 = arith.addf %16, %17 : vector<128x128xf32>
    %c0_15 = arith.constant 0 : index
    %c0_16 = arith.constant 0 : index
    %19 = vector.load %arg8[%c0_15, %c0_16] : memref<1x128xf32, #tpu.memory_space<vmem>>, vector<1x128xf32>
    %c0_17 = arith.constant 0 : index
    %c0_18 = arith.constant 0 : index
    %20 = vector.load %arg9[%c0_17, %c0_18] : memref<1x128xf32, #tpu.memory_space<vmem>>, vector<1x128xf32>
    %cst_19 = arith.constant dense<0.000000e+00> : vector<128xf32>
    %21 = vector.multi_reduction <add>, %18, %cst_19 [1] : vector<128x128xf32> to vector<128xf32>
    %22 = vector.shape_cast %21 : vector<128xf32> to vector<128x1xf32>
    %cst_20 = arith.constant 1.280000e+02 : f32
    %23 = vector.broadcast %cst_20 : f32 to vector<128x1xf32>
    %24 = arith.divf %22, %23 : vector<128x1xf32>
    %25 = vector.broadcast %24 : vector<128x1xf32> to vector<128x128xf32>
    %26 = arith.subf %18, %25 : vector<128x128xf32>
    %27 = arith.mulf %26, %26 : vector<128x128xf32>
    %cst_21 = arith.constant dense<0.000000e+00> : vector<128xf32>
    %28 = vector.multi_reduction <add>, %27, %cst_21 [1] : vector<128x128xf32> to vector<128xf32>
    %29 = vector.shape_cast %28 : vector<128xf32> to vector<128x1xf32>
    %cst_22 = arith.constant 1.280000e+02 : f32
    %30 = vector.broadcast %cst_22 : f32 to vector<128x1xf32>
    %31 = arith.divf %29, %30 : vector<128x1xf32>
    %32 = vector.broadcast %24 : vector<128x1xf32> to vector<128x128xf32>
    %33 = arith.subf %18, %32 : vector<128x128xf32>
    %cst_23 = arith.constant 9.99999974E-6 : f32
    %34 = vector.broadcast %cst_23 : f32 to vector<128x1xf32>
    %35 = arith.addf %31, %34 : vector<128x1xf32>
    %36 = math.rsqrt %35 : vector<128x1xf32>
    %37 = vector.broadcast %36 : vector<128x1xf32> to vector<128x128xf32>
    %38 = arith.mulf %33, %37 : vector<128x128xf32>
    %39 = vector.broadcast %19 : vector<1x128xf32> to vector<128x128xf32>
    %40 = arith.mulf %38, %39 : vector<128x128xf32>
    %41 = vector.broadcast %20 : vector<1x128xf32> to vector<128x128xf32>
    %42 = arith.addf %40, %41 : vector<128x128xf32>
    %43 = arith.truncf %42 : vector<128x128xf32> to vector<128x128xbf16>
    %c0_24 = arith.constant 0 : index
    %c0_25 = arith.constant 0 : index
    %44 = vector.load %arg10[%c0_24, %c0_25] : memref<128x128xbf16, #tpu.memory_space<vmem>>, vector<128x128xbf16>
    tpu.vector_store %arg10[%c0_24, %c0_25], %43 {strides = array<i32>} : memref<128x128xbf16, #tpu.memory_space<vmem>>, vector<128x128xbf16>,
    return
  }
  func.func @transform_0(%arg0: i32) -> (i32, i32) {
    %c0_i32 = arith.constant 0 : i32
    %c0_i32_0 = arith.constant 0 : i32
    return %arg0, %c0_i32 : i32, i32
  }
  func.func @transform_1(%arg0: i32) -> (i32, i32) {
    %c0_i32 = arith.constant 0 : i32
    %c0_i32_0 = arith.constant 0 : i32
    %c0_i32_1 = arith.constant 0 : i32
    return %c0_i32, %c0_i32_0 : i32, i32
  }
  func.func @transform_2(%arg0: i32) -> (i32, i32) {
    %c0_i32 = arith.constant 0 : i32
    %c0_i32_0 = arith.constant 0 : i32
    %c0_i32_1 = arith.constant 0 : i32
    return %c0_i32, %c0_i32_0 : i32, i32
  }
  func.func @transform_3(%arg0: i32) -> (i32, i32) {
    %c0_i32 = arith.constant 0 : i32
    %c0_i32_0 = arith.constant 0 : i32
    %c0_i32_1 = arith.constant 0 : i32
    return %c0_i32, %c0_i32_0 : i32, i32
  }
  func.func @transform_4(%arg0: i32) -> (i32, i32) {
    %c0_i32 = arith.constant 0 : i32
    %c0_i32_0 = arith.constant 0 : i32
    %c0_i32_1 = arith.constant 0 : i32
    return %c0_i32, %c0_i32_0 : i32, i32
  }
  func.func @transform_5(%arg0: i32) -> (i32, i32) {
    %c0_i32 = arith.constant 0 : i32
    %c0_i32_0 = arith.constant 0 : i32
    %c0_i32_1 = arith.constant 0 : i32
    return %c0_i32, %c0_i32_0 : i32, i32
  }
  func.func @transform_6(%arg0: i32) -> (i32, i32) {
    %c0_i32 = arith.constant 0 : i32
    %c0_i32_0 = arith.constant 0 : i32
    %c0_i32_1 = arith.constant 0 : i32
    return %c0_i32, %c0_i32_0 : i32, i32
  }
  func.func @transform_7(%arg0: i32) -> (i32, i32) {
    %c0_i32 = arith.constant 0 : i32
    %c0_i32_0 = arith.constant 0 : i32
    %c0_i32_1 = arith.constant 0 : i32
    return %c0_i32, %c0_i32_0 : i32, i32
  }
  func.func @transform_8(%arg0: i32) -> (i32, i32) {
    %c0_i32 = arith.constant 0 : i32
    %c0_i32_0 = arith.constant 0 : i32
    %c0_i32_1 = arith.constant 0 : i32
    return %c0_i32, %c0_i32_0 : i32, i32
  }
  func.func @transform_9(%arg0: i32) -> (i32, i32) {
    %c0_i32 = arith.constant 0 : i32
    %c0_i32_0 = arith.constant 0 : i32
    return %arg0, %c0_i32 : i32, i32
  }
}

module attributes {stable_mosaic.version = 11 : i64} {
  func.func @_mlp_ln_kernel(%arg0: i32, %arg1: memref<32x128xf32, #tpu.memory_space<vmem>>, %arg2: memref<128x128xbf16, #tpu.memory_space<vmem>>, %arg3: memref<1x128xf32, #tpu.memory_space<vmem>>, %arg4: memref<128x128xbf16, #tpu.memory_space<vmem>>, %arg5: memref<1x128xf32, #tpu.memory_space<vmem>>, %arg6: memref<128x128xbf16, #tpu.memory_space<vmem>>, %arg7: memref<1x128xf32, #tpu.memory_space<vmem>>, %arg8: memref<1x128xf32, #tpu.memory_space<vmem>>, %arg9: memref<1x128xf32, #tpu.memory_space<vmem>>, %arg10: memref<32x128xbf16, #tpu.memory_space<vmem>>) attributes {dimension_semantics = [#tpu.dimension_semantics<parallel>], iteration_bounds = array<i64: 2>, scalar_prefetch = 0 : i64, scratch_operands = 0 : i64, tpu.core_type = #tpu.core_type<tc>, window_params = [{transform_indices = @transform_0, window_bounds = array<i64: 32, 128>}, {pipeline_mode = #tpu.pipeline_mode<synchronous>, transform_indices = @transform_1, window_bounds = array<i64: 128, 128>}, {pipeline_mode = #tpu.pipeline_mode<synchronous>, transform_indices = @transform_2, window_bounds = array<i64: 1, 128>}, {pipeline_mode = #tpu.pipeline_mode<synchronous>, transform_indices = @transform_3, window_bounds = array<i64: 128, 128>}, {pipeline_mode = #tpu.pipeline_mode<synchronous>, transform_indices = @transform_4, window_bounds = array<i64: 1, 128>}, {pipeline_mode = #tpu.pipeline_mode<synchronous>, transform_indices = @transform_5, window_bounds = array<i64: 128, 128>}, {pipeline_mode = #tpu.pipeline_mode<synchronous>, transform_indices = @transform_6, window_bounds = array<i64: 1, 128>}, {pipeline_mode = #tpu.pipeline_mode<synchronous>, transform_indices = @transform_7, window_bounds = array<i64: 1, 128>}, {pipeline_mode = #tpu.pipeline_mode<synchronous>, transform_indices = @transform_8, window_bounds = array<i64: 1, 128>}, {transform_indices = @transform_9, window_bounds = array<i64: 32, 128>}]} {
    %c0 = arith.constant 0 : index
    %c0_0 = arith.constant 0 : index
    %0 = vector.load %arg1[%c0, %c0_0] : memref<32x128xf32, #tpu.memory_space<vmem>>, vector<32x128xf32>
    %c0_1 = arith.constant 0 : index
    %c0_2 = arith.constant 0 : index
    %1 = vector.load %arg2[%c0_1, %c0_2] : memref<128x128xbf16, #tpu.memory_space<vmem>>, vector<128x128xbf16>
    %c0_3 = arith.constant 0 : index
    %c0_4 = arith.constant 0 : index
    %2 = vector.load %arg3[%c0_3, %c0_4] : memref<1x128xf32, #tpu.memory_space<vmem>>, vector<1x128xf32>
    %3 = arith.truncf %0 : vector<32x128xf32> to vector<32x128xbf16>
    %cst = arith.constant dense<0.000000e+00> : vector<32x128xf32>
    %4 = tpu.matmul %3, %1, %cst {dimension_numbers = #tpu.dot_dimension_numbers<[1], [0], [0], [1], [0, 0, 1, 1], [], []>} : vector<32x128xbf16>, vector<128x128xbf16>, vector<32x128xf32> -> vector<32x128xf32>
    %5 = vector.broadcast %2 : vector<1x128xf32> to vector<32x128xf32>
    %6 = arith.addf %4, %5 : vector<32x128xf32>
    %c0_5 = arith.constant 0 : index
    %c0_6 = arith.constant 0 : index
    %7 = vector.load %arg4[%c0_5, %c0_6] : memref<128x128xbf16, #tpu.memory_space<vmem>>, vector<128x128xbf16>
    %c0_7 = arith.constant 0 : index
    %c0_8 = arith.constant 0 : index
    %8 = vector.load %arg5[%c0_7, %c0_8] : memref<1x128xf32, #tpu.memory_space<vmem>>, vector<1x128xf32>
    %9 = arith.truncf %6 : vector<32x128xf32> to vector<32x128xbf16>
    %cst_9 = arith.constant dense<0.000000e+00> : vector<32x128xf32>
    %10 = tpu.matmul %9, %7, %cst_9 {dimension_numbers = #tpu.dot_dimension_numbers<[1], [0], [0], [1], [0, 0, 1, 1], [], []>} : vector<32x128xbf16>, vector<128x128xbf16>, vector<32x128xf32> -> vector<32x128xf32>
    %11 = vector.broadcast %8 : vector<1x128xf32> to vector<32x128xf32>
    %12 = arith.addf %10, %11 : vector<32x128xf32>
    %c0_10 = arith.constant 0 : index
    %c0_11 = arith.constant 0 : index
    %13 = vector.load %arg6[%c0_10, %c0_11] : memref<128x128xbf16, #tpu.memory_space<vmem>>, vector<128x128xbf16>
    %c0_12 = arith.constant 0 : index
    %c0_13 = arith.constant 0 : index
    %14 = vector.load %arg7[%c0_12, %c0_13] : memref<1x128xf32, #tpu.memory_space<vmem>>, vector<1x128xf32>
    %15 = arith.truncf %12 : vector<32x128xf32> to vector<32x128xbf16>
    %cst_14 = arith.constant dense<0.000000e+00> : vector<32x128xf32>
    %16 = tpu.matmul %15, %13, %cst_14 {dimension_numbers = #tpu.dot_dimension_numbers<[1], [0], [0], [1], [0, 0, 1, 1], [], []>} : vector<32x128xbf16>, vector<128x128xbf16>, vector<32x128xf32> -> vector<32x128xf32>
    %17 = vector.broadcast %14 : vector<1x128xf32> to vector<32x128xf32>
    %18 = arith.addf %16, %17 : vector<32x128xf32>
    %c0_15 = arith.constant 0 : index
    %c0_16 = arith.constant 0 : index
    %19 = vector.load %arg8[%c0_15, %c0_16] : memref<1x128xf32, #tpu.memory_space<vmem>>, vector<1x128xf32>
    %c0_17 = arith.constant 0 : index
    %c0_18 = arith.constant 0 : index
    %20 = vector.load %arg9[%c0_17, %c0_18] : memref<1x128xf32, #tpu.memory_space<vmem>>, vector<1x128xf32>
    %cst_19 = arith.constant dense<0.000000e+00> : vector<32xf32>
    %21 = vector.multi_reduction <add>, %18, %cst_19 [1] : vector<32x128xf32> to vector<32xf32>
    %22 = vector.shape_cast %21 : vector<32xf32> to vector<32x1xf32>
    %cst_20 = arith.constant 1.280000e+02 : f32
    %23 = vector.broadcast %cst_20 : f32 to vector<32x1xf32>
    %24 = arith.divf %22, %23 : vector<32x1xf32>
    %25 = vector.broadcast %24 : vector<32x1xf32> to vector<32x128xf32>
    %26 = arith.subf %18, %25 : vector<32x128xf32>
    %27 = arith.mulf %26, %26 : vector<32x128xf32>
    %cst_21 = arith.constant dense<0.000000e+00> : vector<32xf32>
    %28 = vector.multi_reduction <add>, %27, %cst_21 [1] : vector<32x128xf32> to vector<32xf32>
    %29 = vector.shape_cast %28 : vector<32xf32> to vector<32x1xf32>
    %cst_22 = arith.constant 1.280000e+02 : f32
    %30 = vector.broadcast %cst_22 : f32 to vector<32x1xf32>
    %31 = arith.divf %29, %30 : vector<32x1xf32>
    %32 = vector.broadcast %24 : vector<32x1xf32> to vector<32x128xf32>
    %33 = arith.subf %18, %32 : vector<32x128xf32>
    %cst_23 = arith.constant 9.99999974E-6 : f32
    %34 = vector.broadcast %cst_23 : f32 to vector<32x1xf32>
    %35 = arith.addf %31, %34 : vector<32x1xf32>
    %36 = math.rsqrt %35 : vector<32x1xf32>
    %37 = vector.broadcast %36 : vector<32x1xf32> to vector<32x128xf32>
    %38 = arith.mulf %33, %37 : vector<32x128xf32>
    %39 = vector.broadcast %19 : vector<1x128xf32> to vector<32x128xf32>
    %40 = arith.mulf %38, %39 : vector<32x128xf32>
    %41 = vector.broadcast %20 : vector<1x128xf32> to vector<32x128xf32>
    %42 = arith.addf %40, %41 : vector<32x128xf32>
    %43 = arith.truncf %42 : vector<32x128xf32> to vector<32x128xbf16>
    %c0_24 = arith.constant 0 : index
    %c0_25 = arith.constant 0 : index
    %44 = vector.load %arg10[%c0_24, %c0_25] : memref<32x128xbf16, #tpu.memory_space<vmem>>, vector<32x128xbf16>
    tpu.vector_store %arg10[%c0_24, %c0_25], %43 {strides = array<i32>} : memref<32x128xbf16, #tpu.memory_space<vmem>>, vector<32x128xbf16>,
    return
  }
  func.func @transform_0(%arg0: i32) -> (i32, i32) {
    %c0_i32 = arith.constant 0 : i32
    %c0_i32_0 = arith.constant 0 : i32
    return %arg0, %c0_i32 : i32, i32
  }
  func.func @transform_1(%arg0: i32) -> (i32, i32) {
    %c0_i32 = arith.constant 0 : i32
    %c0_i32_0 = arith.constant 0 : i32
    %c0_i32_1 = arith.constant 0 : i32
    return %c0_i32, %c0_i32_0 : i32, i32
  }
  func.func @transform_2(%arg0: i32) -> (i32, i32) {
    %c0_i32 = arith.constant 0 : i32
    %c0_i32_0 = arith.constant 0 : i32
    %c0_i32_1 = arith.constant 0 : i32
    return %c0_i32, %c0_i32_0 : i32, i32
  }
  func.func @transform_3(%arg0: i32) -> (i32, i32) {
    %c0_i32 = arith.constant 0 : i32
    %c0_i32_0 = arith.constant 0 : i32
    %c0_i32_1 = arith.constant 0 : i32
    return %c0_i32, %c0_i32_0 : i32, i32
  }
  func.func @transform_4(%arg0: i32) -> (i32, i32) {
    %c0_i32 = arith.constant 0 : i32
    %c0_i32_0 = arith.constant 0 : i32
    %c0_i32_1 = arith.constant 0 : i32
    return %c0_i32, %c0_i32_0 : i32, i32
  }
  func.func @transform_5(%arg0: i32) -> (i32, i32) {
    %c0_i32 = arith.constant 0 : i32
    %c0_i32_0 = arith.constant 0 : i32
    %c0_i32_1 = arith.constant 0 : i32
    return %c0_i32, %c0_i32_0 : i32, i32
  }
  func.func @transform_6(%arg0: i32) -> (i32, i32) {
    %c0_i32 = arith.constant 0 : i32
    %c0_i32_0 = arith.constant 0 : i32
    %c0_i32_1 = arith.constant 0 : i32
    return %c0_i32, %c0_i32_0 : i32, i32
  }
  func.func @transform_7(%arg0: i32) -> (i32, i32) {
    %c0_i32 = arith.constant 0 : i32
    %c0_i32_0 = arith.constant 0 : i32
    %c0_i32_1 = arith.constant 0 : i32
    return %c0_i32, %c0_i32_0 : i32, i32
  }
  func.func @transform_8(%arg0: i32) -> (i32, i32) {
    %c0_i32 = arith.constant 0 : i32
    %c0_i32_0 = arith.constant 0 : i32
    %c0_i32_1 = arith.constant 0 : i32
    return %c0_i32, %c0_i32_0 : i32, i32
  }
  func.func @transform_9(%arg0: i32) -> (i32, i32) {
    %c0_i32 = arith.constant 0 : i32
    %c0_i32_0 = arith.constant 0 : i32
    return %arg0, %c0_i32 : i32, i32
  }
}

module attributes {stable_mosaic.version = 11 : i64} {
  func.func @_scatter_mean_add_kernel(%arg0: i32, %arg1: i32, %arg2: memref<32x128xbf16, #tpu.memory_space<vmem>>, %arg3: memref<128x128xbf16, #tpu.memory_space<vmem>>, %arg4: memref<1x128xi32, #tpu.memory_space<vmem>>, %arg5: memref<32x128xbf16, #tpu.memory_space<vmem>>, %arg6: memref<32x128xf32, #tpu.memory_space<vmem>>, %arg7: memref<32x1xf32, #tpu.memory_space<vmem>>) attributes {dimension_semantics = [#tpu.dimension_semantics<parallel>, #tpu.dimension_semantics<arbitrary>], iteration_bounds = array<i64: 2, 2>, scalar_prefetch = 0 : i64, scratch_operands = 2 : i64, tpu.core_type = #tpu.core_type<tc>, window_params = [{transform_indices = @transform_0, window_bounds = array<i64: 32, 128>}, {transform_indices = @transform_1, window_bounds = array<i64: 128, 128>}, {transform_indices = @transform_2, window_bounds = array<i64: 1, 128>}, {transform_indices = @transform_3, window_bounds = array<i64: 32, 128>}]} {
    %c0_i32 = arith.constant 0 : i32
    %0 = arith.cmpi eq, %arg1, %c0_i32 : i32
    %1 = arith.extui %0 : i1 to i32
    %c0_i32_0 = arith.constant 0 : i32
    %2 = arith.cmpi ne, %1, %c0_i32_0 : i32
    scf.if %2 {
      %cst_14 = arith.constant 0.000000e+00 : f32
      %29 = vector.broadcast %cst_14 : f32 to vector<32x128xf32>
      %c0_15 = arith.constant 0 : index
      %c0_16 = arith.constant 0 : index
      %30 = vector.load %arg6[%c0_15, %c0_16] : memref<32x128xf32, #tpu.memory_space<vmem>>, vector<32x128xf32>
      tpu.vector_store %arg6[%c0_15, %c0_16], %29 {strides = array<i32>} : memref<32x128xf32, #tpu.memory_space<vmem>>, vector<32x128xf32>,
      %cst_17 = arith.constant 0.000000e+00 : f32
      %31 = vector.broadcast %cst_17 : f32 to vector<32x1xf32>
      %c0_18 = arith.constant 0 : index
      %c0_19 = arith.constant 0 : index
      %32 = vector.load %arg7[%c0_18, %c0_19] : memref<32x1xf32, #tpu.memory_space<vmem>>, vector<32x1xf32>
      tpu.vector_store %arg7[%c0_18, %c0_19], %31 {strides = array<i32>} : memref<32x1xf32, #tpu.memory_space<vmem>>, vector<32x1xf32>,
    } else {
    }
    %c32_i32 = arith.constant 32 : i32
    %3 = arith.muli %arg0, %c32_i32 : i32
    %c0 = arith.constant 0 : index
    %c0_1 = arith.constant 0 : index
    %4 = vector.load %arg4[%c0, %c0_1] : memref<1x128xi32, #tpu.memory_space<vmem>>, vector<1x128xi32>
    %5 = tpu.iota {dimensions = array<i32: 0>} : vector<32x128xi32>
    %6 = vector.broadcast %3 : i32 to vector<32x128xi32>
    %7 = arith.addi %6, %5 : vector<32x128xi32>
    %8 = vector.broadcast %4 : vector<1x128xi32> to vector<32x128xi32>
    %9 = arith.cmpi eq, %7, %8 : vector<32x128xi32>
    %10 = arith.extui %9 : vector<32x128xi1> to vector<32x128xi32>
    %11 = arith.sitofp %10 : vector<32x128xi32> to vector<32x128xf32>
    %12 = arith.truncf %11 : vector<32x128xf32> to vector<32x128xbf16>
    %c0_2 = arith.constant 0 : index
    %c0_3 = arith.constant 0 : index
    %13 = vector.load %arg6[%c0_2, %c0_3] : memref<32x128xf32, #tpu.memory_space<vmem>>, vector<32x128xf32>
    %c0_4 = arith.constant 0 : index
    %c0_5 = arith.constant 0 : index
    %14 = vector.load %arg3[%c0_4, %c0_5] : memref<128x128xbf16, #tpu.memory_space<vmem>>, vector<128x128xbf16>
    %cst = arith.constant dense<0.000000e+00> : vector<32x128xf32>
    %15 = tpu.matmul %12, %14, %cst {dimension_numbers = #tpu.dot_dimension_numbers<[1], [0], [0], [1], [0, 0, 1, 1], [], []>} : vector<32x128xbf16>, vector<128x128xbf16>, vector<32x128xf32> -> vector<32x128xf32>
    %16 = arith.addf %13, %15 : vector<32x128xf32>
    %c0_6 = arith.constant 0 : index
    %c0_7 = arith.constant 0 : index
    %17 = vector.load %arg6[%c0_6, %c0_7] : memref<32x128xf32, #tpu.memory_space<vmem>>, vector<32x128xf32>
    tpu.vector_store %arg6[%c0_6, %c0_7], %16 {strides = array<i32>} : memref<32x128xf32, #tpu.memory_space<vmem>>, vector<32x128xf32>,
    %c0_8 = arith.constant 0 : index
    %c0_9 = arith.constant 0 : index
    %18 = vector.load %arg7[%c0_8, %c0_9] : memref<32x1xf32, #tpu.memory_space<vmem>>, vector<32x1xf32>
    %19 = arith.extf %12 : vector<32x128xbf16> to vector<32x128xf32>
    %cst_10 = arith.constant dense<0.000000e+00> : vector<32xf32>
    %20 = vector.multi_reduction <add>, %19, %cst_10 [1] : vector<32x128xf32> to vector<32xf32>
    %21 = vector.shape_cast %20 : vector<32xf32> to vector<32x1xf32>
    %22 = arith.truncf %21 : vector<32x1xf32> to vector<32x1xbf16>
    %23 = arith.extf %22 : vector<32x1xbf16> to vector<32x1xf32>
    %24 = arith.addf %18, %23 : vector<32x1xf32>
    %c0_11 = arith.constant 0 : index
    %c0_12 = arith.constant 0 : index
    %25 = vector.load %arg7[%c0_11, %c0_12] : memref<32x1xf32, #tpu.memory_space<vmem>>, vector<32x1xf32>
    tpu.vector_store %arg7[%c0_11, %c0_12], %24 {strides = array<i32>} : memref<32x1xf32, #tpu.memory_space<vmem>>, vector<32x1xf32>,
    %c1_i32 = arith.constant 1 : i32
    %26 = arith.cmpi eq, %arg1, %c1_i32 : i32
    %27 = arith.extui %26 : i1 to i32
    %c0_i32_13 = arith.constant 0 : i32
    %28 = arith.cmpi ne, %27, %c0_i32_13 : i32
    scf.if %28 {
      %c0_14 = arith.constant 0 : index
      %c0_15 = arith.constant 0 : index
      %29 = vector.load %arg7[%c0_14, %c0_15] : memref<32x1xf32, #tpu.memory_space<vmem>>, vector<32x1xf32>
      %cst_16 = arith.constant 1.000000e+00 : f32
      %30 = vector.broadcast %cst_16 : f32 to vector<32x1xf32>
      %31 = arith.maximumf %29, %30 : vector<32x1xf32>
      %32 = tpu.reciprocal %31 {approx = true} : vector<32x1xf32> -> vector<32x1xf32>
      %c0_17 = arith.constant 0 : index
      %c0_18 = arith.constant 0 : index
      %33 = vector.load %arg2[%c0_17, %c0_18] : memref<32x128xbf16, #tpu.memory_space<vmem>>, vector<32x128xbf16>
      %34 = arith.extf %33 : vector<32x128xbf16> to vector<32x128xf32>
      %c0_19 = arith.constant 0 : index
      %c0_20 = arith.constant 0 : index
      %35 = vector.load %arg6[%c0_19, %c0_20] : memref<32x128xf32, #tpu.memory_space<vmem>>, vector<32x128xf32>
      %36 = vector.broadcast %32 : vector<32x1xf32> to vector<32x128xf32>
      %37 = arith.mulf %35, %36 : vector<32x128xf32>
      %38 = arith.addf %34, %37 : vector<32x128xf32>
      %39 = arith.truncf %38 : vector<32x128xf32> to vector<32x128xbf16>
      %c0_21 = arith.constant 0 : index
      %c0_22 = arith.constant 0 : index
      %40 = vector.load %arg5[%c0_21, %c0_22] : memref<32x128xbf16, #tpu.memory_space<vmem>>, vector<32x128xbf16>
      tpu.vector_store %arg5[%c0_21, %c0_22], %39 {strides = array<i32>} : memref<32x128xbf16, #tpu.memory_space<vmem>>, vector<32x128xbf16>,
    } else {
    }
    return
  }
  func.func @transform_0(%arg0: i32, %arg1: i32) -> (i32, i32) {
    %c0_i32 = arith.constant 0 : i32
    %c0_i32_0 = arith.constant 0 : i32
    return %arg0, %c0_i32 : i32, i32
  }
  func.func @transform_1(%arg0: i32, %arg1: i32) -> (i32, i32) {
    %c0_i32 = arith.constant 0 : i32
    %c0_i32_0 = arith.constant 0 : i32
    return %arg1, %c0_i32 : i32, i32
  }
  func.func @transform_2(%arg0: i32, %arg1: i32) -> (i32, i32) {
    %c0_i32 = arith.constant 0 : i32
    %c0_i32_0 = arith.constant 0 : i32
    return %c0_i32, %arg1 : i32, i32
  }
  func.func @transform_3(%arg0: i32, %arg1: i32) -> (i32, i32) {
    %c0_i32 = arith.constant 0 : i32
    %c0_i32_0 = arith.constant 0 : i32
    return %arg0, %c0_i32 : i32, i32
  }
}

module attributes {stable_mosaic.version = 11 : i64} {
  func.func @_edge_update_kernel(%arg0: i32, %arg1: memref<128x1xi32, #tpu.memory_space<vmem>>, %arg2: memref<128x1xi32, #tpu.memory_space<vmem>>, %arg3: memref<64x128xbf16, #tpu.memory_space<vmem>>, %arg4: memref<128x128xbf16, #tpu.memory_space<vmem>>, %arg5: memref<384x128xbf16, #tpu.memory_space<vmem>>, %arg6: memref<1x128xf32, #tpu.memory_space<vmem>>, %arg7: memref<128x128xbf16, #tpu.memory_space<vmem>>, %arg8: memref<1x128xf32, #tpu.memory_space<vmem>>, %arg9: memref<128x128xbf16, #tpu.memory_space<vmem>>, %arg10: memref<1x128xf32, #tpu.memory_space<vmem>>, %arg11: memref<1x128xf32, #tpu.memory_space<vmem>>, %arg12: memref<1x128xf32, #tpu.memory_space<vmem>>, %arg13: memref<128x128xbf16, #tpu.memory_space<vmem>>, %arg14: memref<128x128xbf16, #tpu.memory_space<vmem>>, %arg15: memref<128x384xbf16, #tpu.memory_space<vmem>>) attributes {dimension_semantics = [#tpu.dimension_semantics<parallel>], iteration_bounds = array<i64: 2>, scalar_prefetch = 0 : i64, scratch_operands = 1 : i64, tpu.core_type = #tpu.core_type<tc>, window_params = [{transform_indices = @transform_0, window_bounds = array<i64: 128, 1>}, {transform_indices = @transform_1, window_bounds = array<i64: 128, 1>}, {pipeline_mode = #tpu.pipeline_mode<synchronous>, transform_indices = @transform_2, window_bounds = array<i64: 64, 128>}, {transform_indices = @transform_3, window_bounds = array<i64: 128, 128>}, {pipeline_mode = #tpu.pipeline_mode<synchronous>, transform_indices = @transform_4, window_bounds = array<i64: 384, 128>}, {pipeline_mode = #tpu.pipeline_mode<synchronous>, transform_indices = @transform_5, window_bounds = array<i64: 1, 128>}, {pipeline_mode = #tpu.pipeline_mode<synchronous>, transform_indices = @transform_6, window_bounds = array<i64: 128, 128>}, {pipeline_mode = #tpu.pipeline_mode<synchronous>, transform_indices = @transform_7, window_bounds = array<i64: 1, 128>}, {pipeline_mode = #tpu.pipeline_mode<synchronous>, transform_indices = @transform_8, window_bounds = array<i64: 128, 128>}, {pipeline_mode = #tpu.pipeline_mode<synchronous>, transform_indices = @transform_9, window_bounds = array<i64: 1, 128>}, {pipeline_mode = #tpu.pipeline_mode<synchronous>, transform_indices = @transform_10, window_bounds = array<i64: 1, 128>}, {pipeline_mode = #tpu.pipeline_mode<synchronous>, transform_indices = @transform_11, window_bounds = array<i64: 1, 128>}, {transform_indices = @transform_12, window_bounds = array<i64: 128, 128>}, {transform_indices = @transform_13, window_bounds = array<i64: 128, 128>}]} {
    %0 = tpu.iota {dimensions = array<i32: 1>} : vector<128x64xi32>
    %c0 = arith.constant 0 : index
    %c0_0 = arith.constant 0 : index
    %1 = vector.load %arg1[%c0, %c0_0] : memref<128x1xi32, #tpu.memory_space<vmem>>, vector<128x1xi32>
    %2 = vector.broadcast %1 : vector<128x1xi32> to vector<128x64xi32>
    %3 = arith.cmpi eq, %2, %0 : vector<128x64xi32>
    %4 = arith.extui %3 : vector<128x64xi1> to vector<128x64xi32>
    %5 = arith.sitofp %4 : vector<128x64xi32> to vector<128x64xf32>
    %6 = arith.truncf %5 : vector<128x64xf32> to vector<128x64xbf16>
    %c0_1 = arith.constant 0 : index
    %c0_2 = arith.constant 0 : index
    %7 = vector.load %arg2[%c0_1, %c0_2] : memref<128x1xi32, #tpu.memory_space<vmem>>, vector<128x1xi32>
    %8 = vector.broadcast %7 : vector<128x1xi32> to vector<128x64xi32>
    %9 = arith.cmpi eq, %8, %0 : vector<128x64xi32>
    %10 = arith.extui %9 : vector<128x64xi1> to vector<128x64xi32>
    %11 = arith.sitofp %10 : vector<128x64xi32> to vector<128x64xf32>
    %12 = arith.truncf %11 : vector<128x64xf32> to vector<128x64xbf16>
    %c0_3 = arith.constant 0 : index
    %c0_4 = arith.constant 0 : index
    %13 = vector.load %arg3[%c0_3, %c0_4] : memref<64x128xbf16, #tpu.memory_space<vmem>>, vector<64x128xbf16>
    %cst = arith.constant dense<0.000000e+00> : vector<128x128xf32>
    %14 = tpu.matmul %6, %13, %cst {dimension_numbers = #tpu.dot_dimension_numbers<[1], [0], [0], [1], [0, 0, 1, 1], [], []>} : vector<128x64xbf16>, vector<64x128xbf16>, vector<128x128xf32> -> vector<128x128xf32>
    %cst_5 = arith.constant dense<0.000000e+00> : vector<128x128xf32>
    %15 = tpu.matmul %12, %13, %cst_5 {dimension_numbers = #tpu.dot_dimension_numbers<[1], [0], [0], [1], [0, 0, 1, 1], [], []>} : vector<128x64xbf16>, vector<64x128xbf16>, vector<128x128xf32> -> vector<128x128xf32>
    %c0_6 = arith.constant 0 : index
    %c0_7 = arith.constant 0 : index
    %16 = vector.load %arg4[%c0_6, %c0_7] : memref<128x128xbf16, #tpu.memory_space<vmem>>, vector<128x128xbf16>
    %17 = arith.truncf %14 : vector<128x128xf32> to vector<128x128xbf16>
    %c0_8 = arith.constant 0 : index
    %c0_9 = arith.constant 0 : index
    %18 = vector.load %arg15[%c0_8, %c0_9] : memref<128x384xbf16, #tpu.memory_space<vmem>>, vector<128x128xbf16>
    tpu.vector_store %arg15[%c0_8, %c0_9], %17 {strides = array<i32>} : memref<128x384xbf16, #tpu.memory_space<vmem>>, vector<128x128xbf16>,
    %19 = arith.truncf %15 : vector<128x128xf32> to vector<128x128xbf16>
    %c0_10 = arith.constant 0 : index
    %c128 = arith.constant 128 : index
    %20 = vector.load %arg15[%c0_10, %c128] : memref<128x384xbf16, #tpu.memory_space<vmem>>, vector<128x128xbf16>
    tpu.vector_store %arg15[%c0_10, %c128], %19 {strides = array<i32>} : memref<128x384xbf16, #tpu.memory_space<vmem>>, vector<128x128xbf16>,
    %c0_11 = arith.constant 0 : index
    %c256 = arith.constant 256 : index
    %21 = vector.load %arg15[%c0_11, %c256] : memref<128x384xbf16, #tpu.memory_space<vmem>>, vector<128x128xbf16>
    tpu.vector_store %arg15[%c0_11, %c256], %16 {strides = array<i32>} : memref<128x384xbf16, #tpu.memory_space<vmem>>, vector<128x128xbf16>,
    %c0_12 = arith.constant 0 : index
    %c0_13 = arith.constant 0 : index
    %22 = vector.load %arg15[%c0_12, %c0_13] : memref<128x384xbf16, #tpu.memory_space<vmem>>, vector<128x384xbf16>
    %c0_14 = arith.constant 0 : index
    %c0_15 = arith.constant 0 : index
    %23 = vector.load %arg5[%c0_14, %c0_15] : memref<384x128xbf16, #tpu.memory_space<vmem>>, vector<384x128xbf16>
    %cst_16 = arith.constant dense<0.000000e+00> : vector<128x128xf32>
    %24 = tpu.matmul %22, %23, %cst_16 {dimension_numbers = #tpu.dot_dimension_numbers<[1], [0], [0], [1], [0, 0, 1, 1], [], []>} : vector<128x384xbf16>, vector<384x128xbf16>, vector<128x128xf32> -> vector<128x128xf32>
    %c0_17 = arith.constant 0 : index
    %c0_18 = arith.constant 0 : index
    %25 = vector.load %arg6[%c0_17, %c0_18] : memref<1x128xf32, #tpu.memory_space<vmem>>, vector<1x128xf32>
    %26 = vector.broadcast %25 : vector<1x128xf32> to vector<128x128xf32>
    %27 = arith.addf %24, %26 : vector<128x128xf32>
    %c0_19 = arith.constant 0 : index
    %c0_20 = arith.constant 0 : index
    %28 = vector.load %arg7[%c0_19, %c0_20] : memref<128x128xbf16, #tpu.memory_space<vmem>>, vector<128x128xbf16>
    %c0_21 = arith.constant 0 : index
    %c0_22 = arith.constant 0 : index
    %29 = vector.load %arg8[%c0_21, %c0_22] : memref<1x128xf32, #tpu.memory_space<vmem>>, vector<1x128xf32>
    %30 = arith.truncf %27 : vector<128x128xf32> to vector<128x128xbf16>
    %cst_23 = arith.constant dense<0.000000e+00> : vector<128x128xf32>
    %31 = tpu.matmul %30, %28, %cst_23 {dimension_numbers = #tpu.dot_dimension_numbers<[1], [0], [0], [1], [0, 0, 1, 1], [], []>} : vector<128x128xbf16>, vector<128x128xbf16>, vector<128x128xf32> -> vector<128x128xf32>
    %32 = vector.broadcast %29 : vector<1x128xf32> to vector<128x128xf32>
    %33 = arith.addf %31, %32 : vector<128x128xf32>
    %c0_24 = arith.constant 0 : index
    %c0_25 = arith.constant 0 : index
    %34 = vector.load %arg9[%c0_24, %c0_25] : memref<128x128xbf16, #tpu.memory_space<vmem>>, vector<128x128xbf16>
    %c0_26 = arith.constant 0 : index
    %c0_27 = arith.constant 0 : index
    %35 = vector.load %arg10[%c0_26, %c0_27] : memref<1x128xf32, #tpu.memory_space<vmem>>, vector<1x128xf32>
    %36 = arith.truncf %33 : vector<128x128xf32> to vector<128x128xbf16>
    %cst_28 = arith.constant dense<0.000000e+00> : vector<128x128xf32>
    %37 = tpu.matmul %36, %34, %cst_28 {dimension_numbers = #tpu.dot_dimension_numbers<[1], [0], [0], [1], [0, 0, 1, 1], [], []>} : vector<128x128xbf16>, vector<128x128xbf16>, vector<128x128xf32> -> vector<128x128xf32>
    %38 = vector.broadcast %35 : vector<1x128xf32> to vector<128x128xf32>
    %39 = arith.addf %37, %38 : vector<128x128xf32>
    %cst_29 = arith.constant dense<0.000000e+00> : vector<128xf32>
    %40 = vector.multi_reduction <add>, %39, %cst_29 [1] : vector<128x128xf32> to vector<128xf32>
    %41 = vector.shape_cast %40 : vector<128xf32> to vector<128x1xf32>
    %cst_30 = arith.constant 1.280000e+02 : f32
    %42 = vector.broadcast %cst_30 : f32 to vector<128x1xf32>
    %43 = arith.divf %41, %42 : vector<128x1xf32>
    %44 = vector.broadcast %43 : vector<128x1xf32> to vector<128x128xf32>
    %45 = arith.subf %39, %44 : vector<128x128xf32>
    %46 = arith.mulf %45, %45 : vector<128x128xf32>
    %cst_31 = arith.constant dense<0.000000e+00> : vector<128xf32>
    %47 = vector.multi_reduction <add>, %46, %cst_31 [1] : vector<128x128xf32> to vector<128xf32>
    %48 = vector.shape_cast %47 : vector<128xf32> to vector<128x1xf32>
    %cst_32 = arith.constant 1.280000e+02 : f32
    %49 = vector.broadcast %cst_32 : f32 to vector<128x1xf32>
    %50 = arith.divf %48, %49 : vector<128x1xf32>
    %51 = vector.broadcast %43 : vector<128x1xf32> to vector<128x128xf32>
    %52 = arith.subf %39, %51 : vector<128x128xf32>
    %cst_33 = arith.constant 9.99999974E-6 : f32
    %53 = vector.broadcast %cst_33 : f32 to vector<128x1xf32>
    %54 = arith.addf %50, %53 : vector<128x1xf32>
    %55 = math.rsqrt %54 : vector<128x1xf32>
    %56 = vector.broadcast %55 : vector<128x1xf32> to vector<128x128xf32>
    %57 = arith.mulf %52, %56 : vector<128x128xf32>
    %c0_34 = arith.constant 0 : index
    %c0_35 = arith.constant 0 : index
    %58 = vector.load %arg11[%c0_34, %c0_35] : memref<1x128xf32, #tpu.memory_space<vmem>>, vector<1x128xf32>
    %59 = vector.broadcast %58 : vector<1x128xf32> to vector<128x128xf32>
    %60 = arith.mulf %57, %59 : vector<128x128xf32>
    %c0_36 = arith.constant 0 : index
    %c0_37 = arith.constant 0 : index
    %61 = vector.load %arg12[%c0_36, %c0_37] : memref<1x128xf32, #tpu.memory_space<vmem>>, vector<1x128xf32>
    %62 = vector.broadcast %61 : vector<1x128xf32> to vector<128x128xf32>
    %63 = arith.addf %60, %62 : vector<128x128xf32>
    %64 = arith.truncf %63 : vector<128x128xf32> to vector<128x128xbf16>
    %c0_38 = arith.constant 0 : index
    %c0_39 = arith.constant 0 : index
    %65 = vector.load %arg13[%c0_38, %c0_39] : memref<128x128xbf16, #tpu.memory_space<vmem>>, vector<128x128xbf16>
    tpu.vector_store %arg13[%c0_38, %c0_39], %64 {strides = array<i32>} : memref<128x128xbf16, #tpu.memory_space<vmem>>, vector<128x128xbf16>,
    %66 = arith.extf %16 : vector<128x128xbf16> to vector<128x128xf32>
    %67 = arith.addf %66, %63 : vector<128x128xf32>
    %68 = arith.truncf %67 : vector<128x128xf32> to vector<128x128xbf16>
    %c0_40 = arith.constant 0 : index
    %c0_41 = arith.constant 0 : index
    %69 = vector.load %arg14[%c0_40, %c0_41] : memref<128x128xbf16, #tpu.memory_space<vmem>>, vector<128x128xbf16>
    tpu.vector_store %arg14[%c0_40, %c0_41], %68 {strides = array<i32>} : memref<128x128xbf16, #tpu.memory_space<vmem>>, vector<128x128xbf16>,
    return
  }
  func.func @transform_0(%arg0: i32) -> (i32, i32) {
    %c0_i32 = arith.constant 0 : i32
    %c0_i32_0 = arith.constant 0 : i32
    return %arg0, %c0_i32 : i32, i32
  }
  func.func @transform_1(%arg0: i32) -> (i32, i32) {
    %c0_i32 = arith.constant 0 : i32
    %c0_i32_0 = arith.constant 0 : i32
    return %arg0, %c0_i32 : i32, i32
  }
  func.func @transform_2(%arg0: i32) -> (i32, i32) {
    %c0_i32 = arith.constant 0 : i32
    %c0_i32_0 = arith.constant 0 : i32
    %c0_i32_1 = arith.constant 0 : i32
    return %c0_i32, %c0_i32_0 : i32, i32
  }
  func.func @transform_3(%arg0: i32) -> (i32, i32) {
    %c0_i32 = arith.constant 0 : i32
    %c0_i32_0 = arith.constant 0 : i32
    return %arg0, %c0_i32 : i32, i32
  }
  func.func @transform_4(%arg0: i32) -> (i32, i32) {
    %c0_i32 = arith.constant 0 : i32
    %c0_i32_0 = arith.constant 0 : i32
    %c0_i32_1 = arith.constant 0 : i32
    return %c0_i32, %c0_i32_0 : i32, i32
  }
  func.func @transform_5(%arg0: i32) -> (i32, i32) {
    %c0_i32 = arith.constant 0 : i32
    %c0_i32_0 = arith.constant 0 : i32
    %c0_i32_1 = arith.constant 0 : i32
    return %c0_i32, %c0_i32_0 : i32, i32
  }
  func.func @transform_6(%arg0: i32) -> (i32, i32) {
    %c0_i32 = arith.constant 0 : i32
    %c0_i32_0 = arith.constant 0 : i32
    %c0_i32_1 = arith.constant 0 : i32
    return %c0_i32, %c0_i32_0 : i32, i32
  }
  func.func @transform_7(%arg0: i32) -> (i32, i32) {
    %c0_i32 = arith.constant 0 : i32
    %c0_i32_0 = arith.constant 0 : i32
    %c0_i32_1 = arith.constant 0 : i32
    return %c0_i32, %c0_i32_0 : i32, i32
  }
  func.func @transform_8(%arg0: i32) -> (i32, i32) {
    %c0_i32 = arith.constant 0 : i32
    %c0_i32_0 = arith.constant 0 : i32
    %c0_i32_1 = arith.constant 0 : i32
    return %c0_i32, %c0_i32_0 : i32, i32
  }
  func.func @transform_9(%arg0: i32) -> (i32, i32) {
    %c0_i32 = arith.constant 0 : i32
    %c0_i32_0 = arith.constant 0 : i32
    %c0_i32_1 = arith.constant 0 : i32
    return %c0_i32, %c0_i32_0 : i32, i32
  }
  func.func @transform_10(%arg0: i32) -> (i32, i32) {
    %c0_i32 = arith.constant 0 : i32
    %c0_i32_0 = arith.constant 0 : i32
    %c0_i32_1 = arith.constant 0 : i32
    return %c0_i32, %c0_i32_0 : i32, i32
  }
  func.func @transform_11(%arg0: i32) -> (i32, i32) {
    %c0_i32 = arith.constant 0 : i32
    %c0_i32_0 = arith.constant 0 : i32
    %c0_i32_1 = arith.constant 0 : i32
    return %c0_i32, %c0_i32_0 : i32, i32
  }
  func.func @transform_12(%arg0: i32) -> (i32, i32) {
    %c0_i32 = arith.constant 0 : i32
    %c0_i32_0 = arith.constant 0 : i32
    return %arg0, %c0_i32 : i32, i32
  }
  func.func @transform_13(%arg0: i32) -> (i32, i32) {
    %c0_i32 = arith.constant 0 : i32
    %c0_i32_0 = arith.constant 0 : i32
    return %arg0, %c0_i32 : i32, i32
  }
}

module attributes {stable_mosaic.version = 11 : i64} {
  func.func @_node_update_kernel(%arg0: i32, %arg1: i32, %arg2: memref<32x128xbf16, #tpu.memory_space<vmem>>, %arg3: memref<128x128xbf16, #tpu.memory_space<vmem>>, %arg4: memref<1x128xi32, #tpu.memory_space<vmem>>, %arg5: memref<256x128xbf16, #tpu.memory_space<vmem>>, %arg6: memref<1x128xf32, #tpu.memory_space<vmem>>, %arg7: memref<128x128xbf16, #tpu.memory_space<vmem>>, %arg8: memref<1x128xf32, #tpu.memory_space<vmem>>, %arg9: memref<128x128xbf16, #tpu.memory_space<vmem>>, %arg10: memref<1x128xf32, #tpu.memory_space<vmem>>, %arg11: memref<1x128xf32, #tpu.memory_space<vmem>>, %arg12: memref<1x128xf32, #tpu.memory_space<vmem>>, %arg13: memref<32x128xbf16, #tpu.memory_space<vmem>>, %arg14: memref<32x128xf32, #tpu.memory_space<vmem>>, %arg15: memref<32x1xf32, #tpu.memory_space<vmem>>, %arg16: memref<32x256xbf16, #tpu.memory_space<vmem>>) attributes {dimension_semantics = [#tpu.dimension_semantics<parallel>, #tpu.dimension_semantics<arbitrary>], iteration_bounds = array<i64: 2, 2>, scalar_prefetch = 0 : i64, scratch_operands = 3 : i64, tpu.core_type = #tpu.core_type<tc>, window_params = [{transform_indices = @transform_0, window_bounds = array<i64: 32, 128>}, {transform_indices = @transform_1, window_bounds = array<i64: 128, 128>}, {transform_indices = @transform_2, window_bounds = array<i64: 1, 128>}, {pipeline_mode = #tpu.pipeline_mode<synchronous>, transform_indices = @transform_3, window_bounds = array<i64: 256, 128>}, {pipeline_mode = #tpu.pipeline_mode<synchronous>, transform_indices = @transform_4, window_bounds = array<i64: 1, 128>}, {pipeline_mode = #tpu.pipeline_mode<synchronous>, transform_indices = @transform_5, window_bounds = array<i64: 128, 128>}, {pipeline_mode = #tpu.pipeline_mode<synchronous>, transform_indices = @transform_6, window_bounds = array<i64: 1, 128>}, {pipeline_mode = #tpu.pipeline_mode<synchronous>, transform_indices = @transform_7, window_bounds = array<i64: 128, 128>}, {pipeline_mode = #tpu.pipeline_mode<synchronous>, transform_indices = @transform_8, window_bounds = array<i64: 1, 128>}, {pipeline_mode = #tpu.pipeline_mode<synchronous>, transform_indices = @transform_9, window_bounds = array<i64: 1, 128>}, {pipeline_mode = #tpu.pipeline_mode<synchronous>, transform_indices = @transform_10, window_bounds = array<i64: 1, 128>}, {transform_indices = @transform_11, window_bounds = array<i64: 32, 128>}]} {
    %c0_i32 = arith.constant 0 : i32
    %0 = arith.cmpi eq, %arg1, %c0_i32 : i32
    %1 = arith.extui %0 : i1 to i32
    %c0_i32_0 = arith.constant 0 : i32
    %2 = arith.cmpi ne, %1, %c0_i32_0 : i32
    scf.if %2 {
      %cst_14 = arith.constant 0.000000e+00 : f32
      %29 = vector.broadcast %cst_14 : f32 to vector<32x128xf32>
      %c0_15 = arith.constant 0 : index
      %c0_16 = arith.constant 0 : index
      %30 = vector.load %arg14[%c0_15, %c0_16] : memref<32x128xf32, #tpu.memory_space<vmem>>, vector<32x128xf32>
      tpu.vector_store %arg14[%c0_15, %c0_16], %29 {strides = array<i32>} : memref<32x128xf32, #tpu.memory_space<vmem>>, vector<32x128xf32>,
      %cst_17 = arith.constant 0.000000e+00 : f32
      %31 = vector.broadcast %cst_17 : f32 to vector<32x1xf32>
      %c0_18 = arith.constant 0 : index
      %c0_19 = arith.constant 0 : index
      %32 = vector.load %arg15[%c0_18, %c0_19] : memref<32x1xf32, #tpu.memory_space<vmem>>, vector<32x1xf32>
      tpu.vector_store %arg15[%c0_18, %c0_19], %31 {strides = array<i32>} : memref<32x1xf32, #tpu.memory_space<vmem>>, vector<32x1xf32>,
    } else {
    }
    %c32_i32 = arith.constant 32 : i32
    %3 = arith.muli %arg0, %c32_i32 : i32
    %c0 = arith.constant 0 : index
    %c0_1 = arith.constant 0 : index
    %4 = vector.load %arg4[%c0, %c0_1] : memref<1x128xi32, #tpu.memory_space<vmem>>, vector<1x128xi32>
    %5 = tpu.iota {dimensions = array<i32: 0>} : vector<32x128xi32>
    %6 = vector.broadcast %3 : i32 to vector<32x128xi32>
    %7 = arith.addi %6, %5 : vector<32x128xi32>
    %8 = vector.broadcast %4 : vector<1x128xi32> to vector<32x128xi32>
    %9 = arith.cmpi eq, %7, %8 : vector<32x128xi32>
    %10 = arith.extui %9 : vector<32x128xi1> to vector<32x128xi32>
    %11 = arith.sitofp %10 : vector<32x128xi32> to vector<32x128xf32>
    %12 = arith.truncf %11 : vector<32x128xf32> to vector<32x128xbf16>
    %c0_2 = arith.constant 0 : index
    %c0_3 = arith.constant 0 : index
    %13 = vector.load %arg14[%c0_2, %c0_3] : memref<32x128xf32, #tpu.memory_space<vmem>>, vector<32x128xf32>
    %c0_4 = arith.constant 0 : index
    %c0_5 = arith.constant 0 : index
    %14 = vector.load %arg3[%c0_4, %c0_5] : memref<128x128xbf16, #tpu.memory_space<vmem>>, vector<128x128xbf16>
    %cst = arith.constant dense<0.000000e+00> : vector<32x128xf32>
    %15 = tpu.matmul %12, %14, %cst {dimension_numbers = #tpu.dot_dimension_numbers<[1], [0], [0], [1], [0, 0, 1, 1], [], []>} : vector<32x128xbf16>, vector<128x128xbf16>, vector<32x128xf32> -> vector<32x128xf32>
    %16 = arith.addf %13, %15 : vector<32x128xf32>
    %c0_6 = arith.constant 0 : index
    %c0_7 = arith.constant 0 : index
    %17 = vector.load %arg14[%c0_6, %c0_7] : memref<32x128xf32, #tpu.memory_space<vmem>>, vector<32x128xf32>
    tpu.vector_store %arg14[%c0_6, %c0_7], %16 {strides = array<i32>} : memref<32x128xf32, #tpu.memory_space<vmem>>, vector<32x128xf32>,
    %c0_8 = arith.constant 0 : index
    %c0_9 = arith.constant 0 : index
    %18 = vector.load %arg15[%c0_8, %c0_9] : memref<32x1xf32, #tpu.memory_space<vmem>>, vector<32x1xf32>
    %19 = arith.extf %12 : vector<32x128xbf16> to vector<32x128xf32>
    %cst_10 = arith.constant dense<0.000000e+00> : vector<32xf32>
    %20 = vector.multi_reduction <add>, %19, %cst_10 [1] : vector<32x128xf32> to vector<32xf32>
    %21 = vector.shape_cast %20 : vector<32xf32> to vector<32x1xf32>
    %22 = arith.truncf %21 : vector<32x1xf32> to vector<32x1xbf16>
    %23 = arith.extf %22 : vector<32x1xbf16> to vector<32x1xf32>
    %24 = arith.addf %18, %23 : vector<32x1xf32>
    %c0_11 = arith.constant 0 : index
    %c0_12 = arith.constant 0 : index
    %25 = vector.load %arg15[%c0_11, %c0_12] : memref<32x1xf32, #tpu.memory_space<vmem>>, vector<32x1xf32>
    tpu.vector_store %arg15[%c0_11, %c0_12], %24 {strides = array<i32>} : memref<32x1xf32, #tpu.memory_space<vmem>>, vector<32x1xf32>,
    %c1_i32 = arith.constant 1 : i32
    %26 = arith.cmpi eq, %arg1, %c1_i32 : i32
    %27 = arith.extui %26 : i1 to i32
    %c0_i32_13 = arith.constant 0 : i32
    %28 = arith.cmpi ne, %27, %c0_i32_13 : i32
    scf.if %28 {
      %c0_14 = arith.constant 0 : index
      %c0_15 = arith.constant 0 : index
      %29 = vector.load %arg14[%c0_14, %c0_15] : memref<32x128xf32, #tpu.memory_space<vmem>>, vector<32x128xf32>
      %c0_16 = arith.constant 0 : index
      %c0_17 = arith.constant 0 : index
      %30 = vector.load %arg15[%c0_16, %c0_17] : memref<32x1xf32, #tpu.memory_space<vmem>>, vector<32x1xf32>
      %cst_18 = arith.constant 1.000000e+00 : f32
      %31 = vector.broadcast %cst_18 : f32 to vector<32x1xf32>
      %32 = arith.maximumf %30, %31 : vector<32x1xf32>
      %33 = tpu.reciprocal %32 {approx = true} : vector<32x1xf32> -> vector<32x1xf32>
      %34 = vector.broadcast %33 : vector<32x1xf32> to vector<32x128xf32>
      %35 = arith.mulf %29, %34 : vector<32x128xf32>
      %c0_19 = arith.constant 0 : index
      %c0_20 = arith.constant 0 : index
      %36 = vector.load %arg2[%c0_19, %c0_20] : memref<32x128xbf16, #tpu.memory_space<vmem>>, vector<32x128xbf16>
      %c0_21 = arith.constant 0 : index
      %c0_22 = arith.constant 0 : index
      %37 = vector.load %arg16[%c0_21, %c0_22] : memref<32x256xbf16, #tpu.memory_space<vmem>>, vector<32x128xbf16>
      tpu.vector_store %arg16[%c0_21, %c0_22], %36 {strides = array<i32>} : memref<32x256xbf16, #tpu.memory_space<vmem>>, vector<32x128xbf16>,
      %38 = arith.truncf %35 : vector<32x128xf32> to vector<32x128xbf16>
      %c0_23 = arith.constant 0 : index
      %c128 = arith.constant 128 : index
      %39 = vector.load %arg16[%c0_23, %c128] : memref<32x256xbf16, #tpu.memory_space<vmem>>, vector<32x128xbf16>
      tpu.vector_store %arg16[%c0_23, %c128], %38 {strides = array<i32>} : memref<32x256xbf16, #tpu.memory_space<vmem>>, vector<32x128xbf16>,
      %c0_24 = arith.constant 0 : index
      %c0_25 = arith.constant 0 : index
      %40 = vector.load %arg16[%c0_24, %c0_25] : memref<32x256xbf16, #tpu.memory_space<vmem>>, vector<32x256xbf16>
      %c0_26 = arith.constant 0 : index
      %c0_27 = arith.constant 0 : index
      %41 = vector.load %arg5[%c0_26, %c0_27] : memref<256x128xbf16, #tpu.memory_space<vmem>>, vector<256x128xbf16>
      %cst_28 = arith.constant dense<0.000000e+00> : vector<32x128xf32>
      %42 = tpu.matmul %40, %41, %cst_28 {dimension_numbers = #tpu.dot_dimension_numbers<[1], [0], [0], [1], [0, 0, 1, 1], [], []>} : vector<32x256xbf16>, vector<256x128xbf16>, vector<32x128xf32> -> vector<32x128xf32>
      %c0_29 = arith.constant 0 : index
      %c0_30 = arith.constant 0 : index
      %43 = vector.load %arg6[%c0_29, %c0_30] : memref<1x128xf32, #tpu.memory_space<vmem>>, vector<1x128xf32>
      %44 = vector.broadcast %43 : vector<1x128xf32> to vector<32x128xf32>
      %45 = arith.addf %42, %44 : vector<32x128xf32>
      %c0_31 = arith.constant 0 : index
      %c0_32 = arith.constant 0 : index
      %46 = vector.load %arg7[%c0_31, %c0_32] : memref<128x128xbf16, #tpu.memory_space<vmem>>, vector<128x128xbf16>
      %c0_33 = arith.constant 0 : index
      %c0_34 = arith.constant 0 : index
      %47 = vector.load %arg8[%c0_33, %c0_34] : memref<1x128xf32, #tpu.memory_space<vmem>>, vector<1x128xf32>
      %48 = arith.truncf %45 : vector<32x128xf32> to vector<32x128xbf16>
      %cst_35 = arith.constant dense<0.000000e+00> : vector<32x128xf32>
      %49 = tpu.matmul %48, %46, %cst_35 {dimension_numbers = #tpu.dot_dimension_numbers<[1], [0], [0], [1], [0, 0, 1, 1], [], []>} : vector<32x128xbf16>, vector<128x128xbf16>, vector<32x128xf32> -> vector<32x128xf32>
      %50 = vector.broadcast %47 : vector<1x128xf32> to vector<32x128xf32>
      %51 = arith.addf %49, %50 : vector<32x128xf32>
      %c0_36 = arith.constant 0 : index
      %c0_37 = arith.constant 0 : index
      %52 = vector.load %arg9[%c0_36, %c0_37] : memref<128x128xbf16, #tpu.memory_space<vmem>>, vector<128x128xbf16>
      %c0_38 = arith.constant 0 : index
      %c0_39 = arith.constant 0 : index
      %53 = vector.load %arg10[%c0_38, %c0_39] : memref<1x128xf32, #tpu.memory_space<vmem>>, vector<1x128xf32>
      %54 = arith.truncf %51 : vector<32x128xf32> to vector<32x128xbf16>
      %cst_40 = arith.constant dense<0.000000e+00> : vector<32x128xf32>
      %55 = tpu.matmul %54, %52, %cst_40 {dimension_numbers = #tpu.dot_dimension_numbers<[1], [0], [0], [1], [0, 0, 1, 1], [], []>} : vector<32x128xbf16>, vector<128x128xbf16>, vector<32x128xf32> -> vector<32x128xf32>
      %56 = vector.broadcast %53 : vector<1x128xf32> to vector<32x128xf32>
      %57 = arith.addf %55, %56 : vector<32x128xf32>
      %cst_41 = arith.constant dense<0.000000e+00> : vector<32xf32>
      %58 = vector.multi_reduction <add>, %57, %cst_41 [1] : vector<32x128xf32> to vector<32xf32>
      %59 = vector.shape_cast %58 : vector<32xf32> to vector<32x1xf32>
      %cst_42 = arith.constant 1.280000e+02 : f32
      %60 = vector.broadcast %cst_42 : f32 to vector<32x1xf32>
      %61 = arith.divf %59, %60 : vector<32x1xf32>
      %62 = vector.broadcast %61 : vector<32x1xf32> to vector<32x128xf32>
      %63 = arith.subf %57, %62 : vector<32x128xf32>
      %64 = arith.mulf %63, %63 : vector<32x128xf32>
      %cst_43 = arith.constant dense<0.000000e+00> : vector<32xf32>
      %65 = vector.multi_reduction <add>, %64, %cst_43 [1] : vector<32x128xf32> to vector<32xf32>
      %66 = vector.shape_cast %65 : vector<32xf32> to vector<32x1xf32>
      %cst_44 = arith.constant 1.280000e+02 : f32
      %67 = vector.broadcast %cst_44 : f32 to vector<32x1xf32>
      %68 = arith.divf %66, %67 : vector<32x1xf32>
      %69 = vector.broadcast %61 : vector<32x1xf32> to vector<32x128xf32>
      %70 = arith.subf %57, %69 : vector<32x128xf32>
      %cst_45 = arith.constant 9.99999974E-6 : f32
      %71 = vector.broadcast %cst_45 : f32 to vector<32x1xf32>
      %72 = arith.addf %68, %71 : vector<32x1xf32>
      %73 = math.rsqrt %72 : vector<32x1xf32>
      %74 = vector.broadcast %73 : vector<32x1xf32> to vector<32x128xf32>
      %75 = arith.mulf %70, %74 : vector<32x128xf32>
      %c0_46 = arith.constant 0 : index
      %c0_47 = arith.constant 0 : index
      %76 = vector.load %arg11[%c0_46, %c0_47] : memref<1x128xf32, #tpu.memory_space<vmem>>, vector<1x128xf32>
      %77 = vector.broadcast %76 : vector<1x128xf32> to vector<32x128xf32>
      %78 = arith.mulf %75, %77 : vector<32x128xf32>
      %c0_48 = arith.constant 0 : index
      %c0_49 = arith.constant 0 : index
      %79 = vector.load %arg12[%c0_48, %c0_49] : memref<1x128xf32, #tpu.memory_space<vmem>>, vector<1x128xf32>
      %80 = vector.broadcast %79 : vector<1x128xf32> to vector<32x128xf32>
      %81 = arith.addf %78, %80 : vector<32x128xf32>
      %82 = arith.extf %36 : vector<32x128xbf16> to vector<32x128xf32>
      %83 = arith.addf %82, %81 : vector<32x128xf32>
      %84 = arith.truncf %83 : vector<32x128xf32> to vector<32x128xbf16>
      %c0_50 = arith.constant 0 : index
      %c0_51 = arith.constant 0 : index
      %85 = vector.load %arg13[%c0_50, %c0_51] : memref<32x128xbf16, #tpu.memory_space<vmem>>, vector<32x128xbf16>
      tpu.vector_store %arg13[%c0_50, %c0_51], %84 {strides = array<i32>} : memref<32x128xbf16, #tpu.memory_space<vmem>>, vector<32x128xbf16>,
    } else {
    }
    return
  }
  func.func @transform_0(%arg0: i32, %arg1: i32) -> (i32, i32) {
    %c0_i32 = arith.constant 0 : i32
    %c0_i32_0 = arith.constant 0 : i32
    return %arg0, %c0_i32 : i32, i32
  }
  func.func @transform_1(%arg0: i32, %arg1: i32) -> (i32, i32) {
    %c0_i32 = arith.constant 0 : i32
    %c0_i32_0 = arith.constant 0 : i32
    return %arg1, %c0_i32 : i32, i32
  }
  func.func @transform_2(%arg0: i32, %arg1: i32) -> (i32, i32) {
    %c0_i32 = arith.constant 0 : i32
    %c0_i32_0 = arith.constant 0 : i32
    return %c0_i32, %arg1 : i32, i32
  }
  func.func @transform_3(%arg0: i32, %arg1: i32) -> (i32, i32) {
    %c0_i32 = arith.constant 0 : i32
    %c0_i32_0 = arith.constant 0 : i32
    %c0_i32_1 = arith.constant 0 : i32
    return %c0_i32, %c0_i32_0 : i32, i32
  }
  func.func @transform_4(%arg0: i32, %arg1: i32) -> (i32, i32) {
    %c0_i32 = arith.constant 0 : i32
    %c0_i32_0 = arith.constant 0 : i32
    %c0_i32_1 = arith.constant 0 : i32
    return %c0_i32, %c0_i32_0 : i32, i32
  }
  func.func @transform_5(%arg0: i32, %arg1: i32) -> (i32, i32) {
    %c0_i32 = arith.constant 0 : i32
    %c0_i32_0 = arith.constant 0 : i32
    %c0_i32_1 = arith.constant 0 : i32
    return %c0_i32, %c0_i32_0 : i32, i32
  }
  func.func @transform_6(%arg0: i32, %arg1: i32) -> (i32, i32) {
    %c0_i32 = arith.constant 0 : i32
    %c0_i32_0 = arith.constant 0 : i32
    %c0_i32_1 = arith.constant 0 : i32
    return %c0_i32, %c0_i32_0 : i32, i32
  }
  func.func @transform_7(%arg0: i32, %arg1: i32) -> (i32, i32) {
    %c0_i32 = arith.constant 0 : i32
    %c0_i32_0 = arith.constant 0 : i32
    %c0_i32_1 = arith.constant 0 : i32
    return %c0_i32, %c0_i32_0 : i32, i32
  }
  func.func @transform_8(%arg0: i32, %arg1: i32) -> (i32, i32) {
    %c0_i32 = arith.constant 0 : i32
    %c0_i32_0 = arith.constant 0 : i32
    %c0_i32_1 = arith.constant 0 : i32
    return %c0_i32, %c0_i32_0 : i32, i32
  }
  func.func @transform_9(%arg0: i32, %arg1: i32) -> (i32, i32) {
    %c0_i32 = arith.constant 0 : i32
    %c0_i32_0 = arith.constant 0 : i32
    %c0_i32_1 = arith.constant 0 : i32
    return %c0_i32, %c0_i32_0 : i32, i32
  }
  func.func @transform_10(%arg0: i32, %arg1: i32) -> (i32, i32) {
    %c0_i32 = arith.constant 0 : i32
    %c0_i32_0 = arith.constant 0 : i32
    %c0_i32_1 = arith.constant 0 : i32
    return %c0_i32, %c0_i32_0 : i32, i32
  }
  func.func @transform_11(%arg0: i32, %arg1: i32) -> (i32, i32) {
    %c0_i32 = arith.constant 0 : i32
    %c0_i32_0 = arith.constant 0 : i32
    return %arg0, %c0_i32 : i32, i32
  }
}

module attributes {stable_mosaic.version = 11 : i64} {
  func.func @_mlp_ln_kernel(%arg0: i32, %arg1: memref<32x128xbf16, #tpu.memory_space<vmem>>, %arg2: memref<128x128xbf16, #tpu.memory_space<vmem>>, %arg3: memref<1x128xf32, #tpu.memory_space<vmem>>, %arg4: memref<128x128xbf16, #tpu.memory_space<vmem>>, %arg5: memref<1x128xf32, #tpu.memory_space<vmem>>, %arg6: memref<128x128xbf16, #tpu.memory_space<vmem>>, %arg7: memref<1x128xf32, #tpu.memory_space<vmem>>, %arg8: memref<32x128xf32, #tpu.memory_space<vmem>>) attributes {dimension_semantics = [#tpu.dimension_semantics<parallel>], iteration_bounds = array<i64: 2>, scalar_prefetch = 0 : i64, scratch_operands = 0 : i64, tpu.core_type = #tpu.core_type<tc>, window_params = [{transform_indices = @transform_0, window_bounds = array<i64: 32, 128>}, {pipeline_mode = #tpu.pipeline_mode<synchronous>, transform_indices = @transform_1, window_bounds = array<i64: 128, 128>}, {pipeline_mode = #tpu.pipeline_mode<synchronous>, transform_indices = @transform_2, window_bounds = array<i64: 1, 128>}, {pipeline_mode = #tpu.pipeline_mode<synchronous>, transform_indices = @transform_3, window_bounds = array<i64: 128, 128>}, {pipeline_mode = #tpu.pipeline_mode<synchronous>, transform_indices = @transform_4, window_bounds = array<i64: 1, 128>}, {pipeline_mode = #tpu.pipeline_mode<synchronous>, transform_indices = @transform_5, window_bounds = array<i64: 128, 128>}, {pipeline_mode = #tpu.pipeline_mode<synchronous>, transform_indices = @transform_6, window_bounds = array<i64: 1, 128>}, {transform_indices = @transform_7, window_bounds = array<i64: 32, 128>}]} {
    %c0 = arith.constant 0 : index
    %c0_0 = arith.constant 0 : index
    %0 = vector.load %arg1[%c0, %c0_0] : memref<32x128xbf16, #tpu.memory_space<vmem>>, vector<32x128xbf16>
    %c0_1 = arith.constant 0 : index
    %c0_2 = arith.constant 0 : index
    %1 = vector.load %arg2[%c0_1, %c0_2] : memref<128x128xbf16, #tpu.memory_space<vmem>>, vector<128x128xbf16>
    %c0_3 = arith.constant 0 : index
    %c0_4 = arith.constant 0 : index
    %2 = vector.load %arg3[%c0_3, %c0_4] : memref<1x128xf32, #tpu.memory_space<vmem>>, vector<1x128xf32>
    %cst = arith.constant dense<0.000000e+00> : vector<32x128xf32>
    %3 = tpu.matmul %0, %1, %cst {dimension_numbers = #tpu.dot_dimension_numbers<[1], [0], [0], [1], [0, 0, 1, 1], [], []>} : vector<32x128xbf16>, vector<128x128xbf16>, vector<32x128xf32> -> vector<32x128xf32>
    %4 = vector.broadcast %2 : vector<1x128xf32> to vector<32x128xf32>
    %5 = arith.addf %3, %4 : vector<32x128xf32>
    %c0_5 = arith.constant 0 : index
    %c0_6 = arith.constant 0 : index
    %6 = vector.load %arg4[%c0_5, %c0_6] : memref<128x128xbf16, #tpu.memory_space<vmem>>, vector<128x128xbf16>
    %c0_7 = arith.constant 0 : index
    %c0_8 = arith.constant 0 : index
    %7 = vector.load %arg5[%c0_7, %c0_8] : memref<1x128xf32, #tpu.memory_space<vmem>>, vector<1x128xf32>
    %8 = arith.truncf %5 : vector<32x128xf32> to vector<32x128xbf16>
    %cst_9 = arith.constant dense<0.000000e+00> : vector<32x128xf32>
    %9 = tpu.matmul %8, %6, %cst_9 {dimension_numbers = #tpu.dot_dimension_numbers<[1], [0], [0], [1], [0, 0, 1, 1], [], []>} : vector<32x128xbf16>, vector<128x128xbf16>, vector<32x128xf32> -> vector<32x128xf32>
    %10 = vector.broadcast %7 : vector<1x128xf32> to vector<32x128xf32>
    %11 = arith.addf %9, %10 : vector<32x128xf32>
    %c0_10 = arith.constant 0 : index
    %c0_11 = arith.constant 0 : index
    %12 = vector.load %arg6[%c0_10, %c0_11] : memref<128x128xbf16, #tpu.memory_space<vmem>>, vector<128x128xbf16>
    %c0_12 = arith.constant 0 : index
    %c0_13 = arith.constant 0 : index
    %13 = vector.load %arg7[%c0_12, %c0_13] : memref<1x128xf32, #tpu.memory_space<vmem>>, vector<1x128xf32>
    %14 = arith.truncf %11 : vector<32x128xf32> to vector<32x128xbf16>
    %cst_14 = arith.constant dense<0.000000e+00> : vector<32x128xf32>
    %15 = tpu.matmul %14, %12, %cst_14 {dimension_numbers = #tpu.dot_dimension_numbers<[1], [0], [0], [1], [0, 0, 1, 1], [], []>} : vector<32x128xbf16>, vector<128x128xbf16>, vector<32x128xf32> -> vector<32x128xf32>
    %16 = vector.broadcast %13 : vector<1x128xf32> to vector<32x128xf32>
    %17 = arith.addf %15, %16 : vector<32x128xf32>
    %c0_15 = arith.constant 0 : index
    %c0_16 = arith.constant 0 : index
    %18 = vector.load %arg8[%c0_15, %c0_16] : memref<32x128xf32, #tpu.memory_space<vmem>>, vector<32x128xf32>
    tpu.vector_store %arg8[%c0_15, %c0_16], %17 {strides = array<i32>} : memref<32x128xf32, #tpu.memory_space<vmem>>, vector<32x128xf32>,
    return
  }
  func.func @transform_0(%arg0: i32) -> (i32, i32) {
    %c0_i32 = arith.constant 0 : i32
    %c0_i32_0 = arith.constant 0 : i32
    return %arg0, %c0_i32 : i32, i32
  }
  func.func @transform_1(%arg0: i32) -> (i32, i32) {
    %c0_i32 = arith.constant 0 : i32
    %c0_i32_0 = arith.constant 0 : i32
    %c0_i32_1 = arith.constant 0 : i32
    return %c0_i32, %c0_i32_0 : i32, i32
  }
  func.func @transform_2(%arg0: i32) -> (i32, i32) {
    %c0_i32 = arith.constant 0 : i32
    %c0_i32_0 = arith.constant 0 : i32
    %c0_i32_1 = arith.constant 0 : i32
    return %c0_i32, %c0_i32_0 : i32, i32
  }
  func.func @transform_3(%arg0: i32) -> (i32, i32) {
    %c0_i32 = arith.constant 0 : i32
    %c0_i32_0 = arith.constant 0 : i32
    %c0_i32_1 = arith.constant 0 : i32
    return %c0_i32, %c0_i32_0 : i32, i32
  }
  func.func @transform_4(%arg0: i32) -> (i32, i32) {
    %c0_i32 = arith.constant 0 : i32
    %c0_i32_0 = arith.constant 0 : i32
    %c0_i32_1 = arith.constant 0 : i32
    return %c0_i32, %c0_i32_0 : i32, i32
  }
  func.func @transform_5(%arg0: i32) -> (i32, i32) {
    %c0_i32 = arith.constant 0 : i32
    %c0_i32_0 = arith.constant 0 : i32
    %c0_i32_1 = arith.constant 0 : i32
    return %c0_i32, %c0_i32_0 : i32, i32
  }
  func.func @transform_6(%arg0: i32) -> (i32, i32) {
    %c0_i32 = arith.constant 0 : i32
    %c0_i32_0 = arith.constant 0 : i32
    %c0_i32_1 = arith.constant 0 : i32
    return %c0_i32, %c0_i32_0 : i32, i32
  }
  func.func @transform_7(%arg0: i32) -> (i32, i32) {
    %c0_i32 = arith.constant 0 : i32
    %c0_i32_0 = arith.constant 0 : i32
    return %arg0, %c0_i32 : i32, i32
  }
}

module attributes {stable_mosaic.version = 11 : i64} {
  func.func @_edge_update_kernel(%arg0: i32, %arg1: memref<128x1xi32, #tpu.memory_space<vmem>>, %arg2: memref<128x1xi32, #tpu.memory_space<vmem>>, %arg3: memref<64x128xbf16, #tpu.memory_space<vmem>>, %arg4: memref<128x128xbf16, #tpu.memory_space<vmem>>, %arg5: memref<384x128xbf16, #tpu.memory_space<vmem>>, %arg6: memref<1x128xf32, #tpu.memory_space<vmem>>, %arg7: memref<128x128xbf16, #tpu.memory_space<vmem>>, %arg8: memref<1x128xf32, #tpu.memory_space<vmem>>, %arg9: memref<128x128xbf16, #tpu.memory_space<vmem>>, %arg10: memref<1x128xf32, #tpu.memory_space<vmem>>, %arg11: memref<1x128xf32, #tpu.memory_space<vmem>>, %arg12: memref<1x128xf32, #tpu.memory_space<vmem>>, %arg13: memref<128x128xbf16, #tpu.memory_space<vmem>>, %arg14: memref<128x128xbf16, #tpu.memory_space<vmem>>, %arg15: memref<128x384xbf16, #tpu.memory_space<vmem>>) attributes {dimension_semantics = [#tpu.dimension_semantics<parallel>], iteration_bounds = array<i64: 2>, scalar_prefetch = 0 : i64, scratch_operands = 1 : i64, tpu.core_type = #tpu.core_type<tc>, window_params = [{transform_indices = @transform_0, window_bounds = array<i64: 128, 1>}, {transform_indices = @transform_1, window_bounds = array<i64: 128, 1>}, {pipeline_mode = #tpu.pipeline_mode<synchronous>, transform_indices = @transform_2, window_bounds = array<i64: 64, 128>}, {transform_indices = @transform_3, window_bounds = array<i64: 128, 128>}, {pipeline_mode = #tpu.pipeline_mode<synchronous>, transform_indices = @transform_4, window_bounds = array<i64: 384, 128>}, {pipeline_mode = #tpu.pipeline_mode<synchronous>, transform_indices = @transform_5, window_bounds = array<i64: 1, 128>}, {pipeline_mode = #tpu.pipeline_mode<synchronous>, transform_indices = @transform_6, window_bounds = array<i64: 128, 128>}, {pipeline_mode = #tpu.pipeline_mode<synchronous>, transform_indices = @transform_7, window_bounds = array<i64: 1, 128>}, {pipeline_mode = #tpu.pipeline_mode<synchronous>, transform_indices = @transform_8, window_bounds = array<i64: 128, 128>}, {pipeline_mode = #tpu.pipeline_mode<synchronous>, transform_indices = @transform_9, window_bounds = array<i64: 1, 128>}, {pipeline_mode = #tpu.pipeline_mode<synchronous>, transform_indices = @transform_10, window_bounds = array<i64: 1, 128>}, {pipeline_mode = #tpu.pipeline_mode<synchronous>, transform_indices = @transform_11, window_bounds = array<i64: 1, 128>}, {transform_indices = @transform_12, window_bounds = array<i64: 128, 128>}, {transform_indices = @transform_13, window_bounds = array<i64: 128, 128>}]} {
    %0 = tpu.iota {dimensions = array<i32: 1>} : vector<128x64xi32>
    %c0 = arith.constant 0 : index
    %c0_0 = arith.constant 0 : index
    %1 = vector.load %arg1[%c0, %c0_0] : memref<128x1xi32, #tpu.memory_space<vmem>>, vector<128x1xi32>
    %2 = vector.broadcast %1 : vector<128x1xi32> to vector<128x64xi32>
    %3 = arith.cmpi eq, %2, %0 : vector<128x64xi32>
    %4 = arith.extui %3 : vector<128x64xi1> to vector<128x64xi32>
    %5 = arith.sitofp %4 : vector<128x64xi32> to vector<128x64xf32>
    %6 = arith.truncf %5 : vector<128x64xf32> to vector<128x64xbf16>
    %c0_1 = arith.constant 0 : index
    %c0_2 = arith.constant 0 : index
    %7 = vector.load %arg2[%c0_1, %c0_2] : memref<128x1xi32, #tpu.memory_space<vmem>>, vector<128x1xi32>
    %8 = vector.broadcast %7 : vector<128x1xi32> to vector<128x64xi32>
    %9 = arith.cmpi eq, %8, %0 : vector<128x64xi32>
    %10 = arith.extui %9 : vector<128x64xi1> to vector<128x64xi32>
    %11 = arith.sitofp %10 : vector<128x64xi32> to vector<128x64xf32>
    %12 = arith.truncf %11 : vector<128x64xf32> to vector<128x64xbf16>
    %c0_3 = arith.constant 0 : index
    %c0_4 = arith.constant 0 : index
    %13 = vector.load %arg3[%c0_3, %c0_4] : memref<64x128xbf16, #tpu.memory_space<vmem>>, vector<64x128xbf16>
    %cst = arith.constant dense<0.000000e+00> : vector<128x128xf32>
    %14 = tpu.matmul %6, %13, %cst {dimension_numbers = #tpu.dot_dimension_numbers<[1], [0], [0], [1], [0, 0, 1, 1], [], []>} : vector<128x64xbf16>, vector<64x128xbf16>, vector<128x128xf32> -> vector<128x128xf32>
    %cst_5 = arith.constant dense<0.000000e+00> : vector<128x128xf32>
    %15 = tpu.matmul %12, %13, %cst_5 {dimension_numbers = #tpu.dot_dimension_numbers<[1], [0], [0], [1], [0, 0, 1, 1], [], []>} : vector<128x64xbf16>, vector<64x128xbf16>, vector<128x128xf32> -> vector<128x128xf32>
    %c0_6 = arith.constant 0 : index
    %c0_7 = arith.constant 0 : index
    %16 = vector.load %arg4[%c0_6, %c0_7] : memref<128x128xbf16, #tpu.memory_space<vmem>>, vector<128x128xbf16>
    %17 = arith.truncf %14 : vector<128x128xf32> to vector<128x128xbf16>
    %c0_8 = arith.constant 0 : index
    %c0_9 = arith.constant 0 : index
    %18 = vector.load %arg15[%c0_8, %c0_9] : memref<128x384xbf16, #tpu.memory_space<vmem>>, vector<128x128xbf16>
    tpu.vector_store %arg15[%c0_8, %c0_9], %17 {strides = array<i32>} : memref<128x384xbf16, #tpu.memory_space<vmem>>, vector<128x128xbf16>,
    %19 = arith.truncf %15 : vector<128x128xf32> to vector<128x128xbf16>
    %c0_10 = arith.constant 0 : index
    %c128 = arith.constant 128 : index
    %20 = vector.load %arg15[%c0_10, %c128] : memref<128x384xbf16, #tpu.memory_space<vmem>>, vector<128x128xbf16>
    tpu.vector_store %arg15[%c0_10, %c128], %19 {strides = array<i32>} : memref<128x384xbf16, #tpu.memory_space<vmem>>, vector<128x128xbf16>,
    %c0_11 = arith.constant 0 : index
    %c256 = arith.constant 256 : index
    %21 = vector.load %arg15[%c0_11, %c256] : memref<128x384xbf16, #tpu.memory_space<vmem>>, vector<128x128xbf16>
    tpu.vector_store %arg15[%c0_11, %c256], %16 {strides = array<i32>} : memref<128x384xbf16, #tpu.memory_space<vmem>>, vector<128x128xbf16>,
    %c0_12 = arith.constant 0 : index
    %c0_13 = arith.constant 0 : index
    %22 = vector.load %arg15[%c0_12, %c0_13] : memref<128x384xbf16, #tpu.memory_space<vmem>>, vector<128x384xbf16>
    %c0_14 = arith.constant 0 : index
    %c0_15 = arith.constant 0 : index
    %23 = vector.load %arg5[%c0_14, %c0_15] : memref<384x128xbf16, #tpu.memory_space<vmem>>, vector<384x128xbf16>
    %cst_16 = arith.constant dense<0.000000e+00> : vector<128x128xf32>
    %24 = tpu.matmul %22, %23, %cst_16 {dimension_numbers = #tpu.dot_dimension_numbers<[1], [0], [0], [1], [0, 0, 1, 1], [], []>} : vector<128x384xbf16>, vector<384x128xbf16>, vector<128x128xf32> -> vector<128x128xf32>
    %c0_17 = arith.constant 0 : index
    %c0_18 = arith.constant 0 : index
    %25 = vector.load %arg6[%c0_17, %c0_18] : memref<1x128xf32, #tpu.memory_space<vmem>>, vector<1x128xf32>
    %26 = vector.broadcast %25 : vector<1x128xf32> to vector<128x128xf32>
    %27 = arith.addf %24, %26 : vector<128x128xf32>
    %c0_19 = arith.constant 0 : index
    %c0_20 = arith.constant 0 : index
    %28 = vector.load %arg7[%c0_19, %c0_20] : memref<128x128xbf16, #tpu.memory_space<vmem>>, vector<128x128xbf16>
    %c0_21 = arith.constant 0 : index
    %c0_22 = arith.constant 0 : index
    %29 = vector.load %arg8[%c0_21, %c0_22] : memref<1x128xf32, #tpu.memory_space<vmem>>, vector<1x128xf32>
    %30 = arith.truncf %27 : vector<128x128xf32> to vector<128x128xbf16>
    %cst_23 = arith.constant dense<0.000000e+00> : vector<128x128xf32>
    %31 = tpu.matmul %30, %28, %cst_23 {dimension_numbers = #tpu.dot_dimension_numbers<[1], [0], [0], [1], [0, 0, 1, 1], [], []>} : vector<128x128xbf16>, vector<128x128xbf16>, vector<128x128xf32> -> vector<128x128xf32>
    %32 = vector.broadcast %29 : vector<1x128xf32> to vector<128x128xf32>
    %33 = arith.addf %31, %32 : vector<128x128xf32>
    %c0_24 = arith.constant 0 : index
    %c0_25 = arith.constant 0 : index
    %34 = vector.load %arg9[%c0_24, %c0_25] : memref<128x128xbf16, #tpu.memory_space<vmem>>, vector<128x128xbf16>
    %c0_26 = arith.constant 0 : index
    %c0_27 = arith.constant 0 : index
    %35 = vector.load %arg10[%c0_26, %c0_27] : memref<1x128xf32, #tpu.memory_space<vmem>>, vector<1x128xf32>
    %36 = arith.truncf %33 : vector<128x128xf32> to vector<128x128xbf16>
    %cst_28 = arith.constant dense<0.000000e+00> : vector<128x128xf32>
    %37 = tpu.matmul %36, %34, %cst_28 {dimension_numbers = #tpu.dot_dimension_numbers<[1], [0], [0], [1], [0, 0, 1, 1], [], []>} : vector<128x128xbf16>, vector<128x128xbf16>, vector<128x128xf32> -> vector<128x128xf32>
    %38 = vector.broadcast %35 : vector<1x128xf32> to vector<128x128xf32>
    %39 = arith.addf %37, %38 : vector<128x128xf32>
    %cst_29 = arith.constant dense<0.000000e+00> : vector<128xf32>
    %40 = vector.multi_reduction <add>, %39, %cst_29 [1] : vector<128x128xf32> to vector<128xf32>
    %41 = vector.shape_cast %40 : vector<128xf32> to vector<128x1xf32>
    %cst_30 = arith.constant 1.280000e+02 : f32
    %42 = vector.broadcast %cst_30 : f32 to vector<128x1xf32>
    %43 = arith.divf %41, %42 : vector<128x1xf32>
    %44 = vector.broadcast %43 : vector<128x1xf32> to vector<128x128xf32>
    %45 = arith.subf %39, %44 : vector<128x128xf32>
    %46 = arith.mulf %45, %45 : vector<128x128xf32>
    %cst_31 = arith.constant dense<0.000000e+00> : vector<128xf32>
    %47 = vector.multi_reduction <add>, %46, %cst_31 [1] : vector<128x128xf32> to vector<128xf32>
    %48 = vector.shape_cast %47 : vector<128xf32> to vector<128x1xf32>
    %cst_32 = arith.constant 1.280000e+02 : f32
    %49 = vector.broadcast %cst_32 : f32 to vector<128x1xf32>
    %50 = arith.divf %48, %49 : vector<128x1xf32>
    %51 = vector.broadcast %43 : vector<128x1xf32> to vector<128x128xf32>
    %52 = arith.subf %39, %51 : vector<128x128xf32>
    %cst_33 = arith.constant 9.99999974E-6 : f32
    %53 = vector.broadcast %cst_33 : f32 to vector<128x1xf32>
    %54 = arith.addf %50, %53 : vector<128x1xf32>
    %55 = math.rsqrt %54 : vector<128x1xf32>
    %56 = vector.broadcast %55 : vector<128x1xf32> to vector<128x128xf32>
    %57 = arith.mulf %52, %56 : vector<128x128xf32>
    %c0_34 = arith.constant 0 : index
    %c0_35 = arith.constant 0 : index
    %58 = vector.load %arg11[%c0_34, %c0_35] : memref<1x128xf32, #tpu.memory_space<vmem>>, vector<1x128xf32>
    %59 = vector.broadcast %58 : vector<1x128xf32> to vector<128x128xf32>
    %60 = arith.mulf %57, %59 : vector<128x128xf32>
    %c0_36 = arith.constant 0 : index
    %c0_37 = arith.constant 0 : index
    %61 = vector.load %arg12[%c0_36, %c0_37] : memref<1x128xf32, #tpu.memory_space<vmem>>, vector<1x128xf32>
    %62 = vector.broadcast %61 : vector<1x128xf32> to vector<128x128xf32>
    %63 = arith.addf %60, %62 : vector<128x128xf32>
    %64 = arith.truncf %63 : vector<128x128xf32> to vector<128x128xbf16>
    %c0_38 = arith.constant 0 : index
    %c0_39 = arith.constant 0 : index
    %65 = vector.load %arg13[%c0_38, %c0_39] : memref<128x128xbf16, #tpu.memory_space<vmem>>, vector<128x128xbf16>
    tpu.vector_store %arg13[%c0_38, %c0_39], %64 {strides = array<i32>} : memref<128x128xbf16, #tpu.memory_space<vmem>>, vector<128x128xbf16>,
    %66 = arith.extf %16 : vector<128x128xbf16> to vector<128x128xf32>
    %67 = arith.addf %66, %63 : vector<128x128xf32>
    %68 = arith.truncf %67 : vector<128x128xf32> to vector<128x128xbf16>
    %c0_40 = arith.constant 0 : index
    %c0_41 = arith.constant 0 : index
    %69 = vector.load %arg14[%c0_40, %c0_41] : memref<128x128xbf16, #tpu.memory_space<vmem>>, vector<128x128xbf16>
    tpu.vector_store %arg14[%c0_40, %c0_41], %68 {strides = array<i32>} : memref<128x128xbf16, #tpu.memory_space<vmem>>, vector<128x128xbf16>,
    return
  }
  func.func @transform_0(%arg0: i32) -> (i32, i32) {
    %c0_i32 = arith.constant 0 : i32
    %c0_i32_0 = arith.constant 0 : i32
    return %arg0, %c0_i32 : i32, i32
  }
  func.func @transform_1(%arg0: i32) -> (i32, i32) {
    %c0_i32 = arith.constant 0 : i32
    %c0_i32_0 = arith.constant 0 : i32
    return %arg0, %c0_i32 : i32, i32
  }
  func.func @transform_2(%arg0: i32) -> (i32, i32) {
    %c0_i32 = arith.constant 0 : i32
    %c0_i32_0 = arith.constant 0 : i32
    %c0_i32_1 = arith.constant 0 : i32
    return %c0_i32, %c0_i32_0 : i32, i32
  }
  func.func @transform_3(%arg0: i32) -> (i32, i32) {
    %c0_i32 = arith.constant 0 : i32
    %c0_i32_0 = arith.constant 0 : i32
    return %arg0, %c0_i32 : i32, i32
  }
  func.func @transform_4(%arg0: i32) -> (i32, i32) {
    %c0_i32 = arith.constant 0 : i32
    %c0_i32_0 = arith.constant 0 : i32
    %c0_i32_1 = arith.constant 0 : i32
    return %c0_i32, %c0_i32_0 : i32, i32
  }
  func.func @transform_5(%arg0: i32) -> (i32, i32) {
    %c0_i32 = arith.constant 0 : i32
    %c0_i32_0 = arith.constant 0 : i32
    %c0_i32_1 = arith.constant 0 : i32
    return %c0_i32, %c0_i32_0 : i32, i32
  }
  func.func @transform_6(%arg0: i32) -> (i32, i32) {
    %c0_i32 = arith.constant 0 : i32
    %c0_i32_0 = arith.constant 0 : i32
    %c0_i32_1 = arith.constant 0 : i32
    return %c0_i32, %c0_i32_0 : i32, i32
  }
  func.func @transform_7(%arg0: i32) -> (i32, i32) {
    %c0_i32 = arith.constant 0 : i32
    %c0_i32_0 = arith.constant 0 : i32
    %c0_i32_1 = arith.constant 0 : i32
    return %c0_i32, %c0_i32_0 : i32, i32
  }
  func.func @transform_8(%arg0: i32) -> (i32, i32) {
    %c0_i32 = arith.constant 0 : i32
    %c0_i32_0 = arith.constant 0 : i32
    %c0_i32_1 = arith.constant 0 : i32
    return %c0_i32, %c0_i32_0 : i32, i32
  }
  func.func @transform_9(%arg0: i32) -> (i32, i32) {
    %c0_i32 = arith.constant 0 : i32
    %c0_i32_0 = arith.constant 0 : i32
    %c0_i32_1 = arith.constant 0 : i32
    return %c0_i32, %c0_i32_0 : i32, i32
  }
  func.func @transform_10(%arg0: i32) -> (i32, i32) {
    %c0_i32 = arith.constant 0 : i32
    %c0_i32_0 = arith.constant 0 : i32
    %c0_i32_1 = arith.constant 0 : i32
    return %c0_i32, %c0_i32_0 : i32, i32
  }
  func.func @transform_11(%arg0: i32) -> (i32, i32) {
    %c0_i32 = arith.constant 0 : i32
    %c0_i32_0 = arith.constant 0 : i32
    %c0_i32_1 = arith.constant 0 : i32
    return %c0_i32, %c0_i32_0 : i32, i32
  }
  func.func @transform_12(%arg0: i32) -> (i32, i32) {
    %c0_i32 = arith.constant 0 : i32
    %c0_i32_0 = arith.constant 0 : i32
    return %arg0, %c0_i32 : i32, i32
  }
  func.func @transform_13(%arg0: i32) -> (i32, i32) {
    %c0_i32 = arith.constant 0 : i32
    %c0_i32_0 = arith.constant 0 : i32
    return %arg0, %c0_i32 : i32, i32
  }
}

</mosaic_0001>

<bundles_post_ra>
// kernel: epd_forward.10
= control target key start
LH: loop header
LB: loop body
LE: loop exit
PB: predicated region body
PF: predicated region fallthrough
CT: control target
= control target key end

     0   :  { %s1097_s30 = smov 0   ;;  %s1211_s0 = inlined_call_operand.vmem [shape: f32[64,128], index: 0, kind: input, shape index: {}]   ;;  %s1212_s1 = inlined_call_operand.vmem [shape: bf16[128,128], index: 1, kind: input, shape index: {}]   ;;  %s1213_s2 = inlined_call_operand.vmem [shape: f32[1,128], index: 2, kind: input, shape index: {}]   ;;  %s1214_s3 = inlined_call_operand.vmem [shape: bf16[128,128], index: 3, kind: input, shape index: {}]   ;;  %s1215_s4 = inlined_call_operand.vmem [shape: f32[1,128], index: 4, kind: input, shape index: {}]   ;;  %s1216_s5 = inlined_call_operand.vmem [shape: bf16[128,128], index: 5, kind: input, shape index: {}]   ;;  %s1217_s6 = inlined_call_operand.vmem [shape: f32[1,128], index: 6, kind: input, shape index: {}]   ;;  %s1218_s7 = inlined_call_operand.vmem [shape: f32[1,128], index: 7, kind: input, shape index: {}]   ;;  %s1219_s8 = inlined_call_operand.vmem [shape: f32[1,128], index: 8, kind: input, shape index: {}]   ;;  %s1220_s9 = inlined_call_operand.vmem [shape: bf16[64,128], index: 9, kind: output, shape index: {}]  }
   0x1 LB: > { %s850_s10 = sadd.s32 4294967295, %s1045_s30   ;;  %p854_p0 = scmp.ge.s32.totalorder %s1045_s30, 1  ;;  %s1045_s30 = sphi %s1097_s30, %s19_s30  }
   0x2   : > { %p288_p1 = scmp.lt.s32.totalorder %s1045_s30, 3 }
   0x4   : > { %p289_p2 = pnand %p854_p0, %p288_p1 }
   0x5   : > { %v1007_v0 = vld [vmem:[%s1212_s1] sm:$0xff] (!%p289_p2)   ;;  %s855_s13 = sshll.u32 (!%p289_p2), %s850_s10, 2  ;;  %v1008_v1 = vld [vmem:[%s1212_s1 + $0x8] sm:$0xff] (!%p289_p2)   ;;  %v1009_v2 = vld [vmem:[%s1212_s1 + $0x10] sm:$0xff] (!%p289_p2)  }
   0x6   : > { %292 = sbr.rel (%p289_p2) target bundleno = 1015 (0x3f7), region = 56  ;;  %p325_p3 = scmp.lt.s32.totalorder (!%p289_p2), %s855_s13, 7  ;;  %939 = vmatprep.subr.bf16.mxu0 (!%p289_p2), %v1007_v0  ;;  %v1010_v3 = vld [vmem:[%s1212_s1 + $0x18] sm:$0xff] (!%p289_p2)   ;;  %v1015_v7 = vld [vmem:[%s1214_s3] sm:$0xff] (!%p289_p2)   ;;  %v1016_v8 = vld [vmem:[%s1214_s3 + $0x8] sm:$0xff] (!%p289_p2)  }
   0x7   : > { %940 = vmatpush3.bf16.msra.mxu0 (!%p289_p2), %v1007_v0  ;;  %v1011_v9 = vld [vmem:[%s1212_s1 + $0x20] sm:$0xff] (!%p289_p2)   ;;  %959 = vmatprep.subr.bf16.mxu1 (!%p289_p2), %v1015_v7  ;;  %v1017_v10 = vld [vmem:[%s1214_s3 + $0x10] sm:$0xff] (!%p289_p2)   ;;  %v1012_v11 = vld [vmem:[%s1212_s1 + $0x28] sm:$0xff] (!%p289_p2)  }
   0x8   : > { %941 = vmatprep.subr.bf16.mxu0 (!%p289_p2), %v1008_v1  ;;  %960 = vmatpush3.bf16.msra.mxu1 (!%p289_p2), %v1015_v7  ;;  %v1018_v12 = vld [vmem:[%s1214_s3 + $0x18] sm:$0xff] (!%p289_p2)   ;;  %v1013_v13 = vld [vmem:[%s1212_s1 + $0x30] sm:$0xff] (!%p289_p2)   ;;  %v1019_v14 = vld [vmem:[%s1214_s3 + $0x20] sm:$0xff] (!%p289_p2)  }
   0x9   : > { %961 = vmatprep.subr.bf16.mxu1 (!%p289_p2), %v1016_v8  ;;  %v1014_v15 = vld [vmem:[%s1212_s1 + $0x38] sm:$0xff] (!%p289_p2)   ;;  %v1020_v16 = vld [vmem:[%s1214_s3 + $0x28] sm:$0xff] (!%p289_p2)   ;;  %v1021_v20 = vld [vmem:[%s1214_s3 + $0x30] sm:$0xff] (!%p289_p2)  }
   0xa   : > { %v1022_v21 = vld [vmem:[%s1214_s3 + $0x38] sm:$0xff] (!%p289_p2)   ;;  %v1023_v22 = vld [vmem:[%s1216_s5] sm:$0xff] (!%p289_p2)   ;;  %v1024_v23 = vld [vmem:[%s1216_s5 + $0x8] sm:$0xff] (!%p289_p2)  }
   0xb   : > { %942 = vmatpush3.bf16.msra.mxu0 (!%p289_p2), %v1008_v1  ;;  %v1025_v24 = vld [vmem:[%s1216_s5 + $0x10] sm:$0xff] (!%p289_p2)   ;;  %v1026_v25 = vld [vmem:[%s1216_s5 + $0x18] sm:$0xff] (!%p289_p2)   ;;  %v1027_v26 = vld [vmem:[%s1216_s5 + $0x20] sm:$0xff] (!%p289_p2)  }
   0xc   : > { %943 = vmatprep.subr.bf16.mxu0 (!%p289_p2), %v1009_v2  ;;  %962 = vmatpush3.bf16.msra.mxu1 (!%p289_p2), %v1016_v8  ;;  %v1028_v27 = vld [vmem:[%s1216_s5 + $0x28] sm:$0xff] (!%p289_p2)   ;;  %v859_v29 = vld [vmem:[%s1213_s2] ss:$0 sm:$0xff] (!%p289_p2)  ;;  %v1029_v39 = vld [vmem:[%s1216_s5 + $0x30] sm:$0xff] (!%p289_p2)  }
   0xd   : > { %s1222_s13 = smov (!%p325_p3, %s855_s13), 7  ;;  %963 = vmatprep.subr.bf16.mxu1 %v1017_v10  ;;  %v1030_v40 = vld [vmem:[%s1216_s5 + $0x38] sm:$0xff]   ;;  %v868_v42 = vld [vmem:[%s1215_s4] ss:$0 sm:$0xff] }
   0xe   : > { %s856_s18 = sshll.u32 %s1222_s13, 3  ;;  %v877_v52 = vld [vmem:[%s1217_s6] ss:$0 sm:$0xff]  ;;  %s858_s17 = sshll.u32 %s1222_s13, 2 }
   0xf   : > { %s1120_s21 = scalar_lea.vmem %s1211_s0, %s856_s18  ;;  %944 = vmatpush3.bf16.msra.mxu0 %v1009_v2  ;;  %s334_s20 = scalar_lea.vmem %s1220_s9, %s858_s17 }
  0x10   : > { %v337_v4 = vld [vmem:[%s1120_s21] sm:$0xff]  ;;  %v338_v5 = vld [vmem:[%s1120_s21 + $0x8] sm:$0xff]  ;;  %945 = vmatprep.subr.bf16.mxu0 %v1010_v3  ;;  %964 = vmatpush3.bf16.msra.mxu1 %v1017_v10  ;;  %v339_v17 = vld [vmem:[%s1120_s21 + $0x10] sm:$0xff] }
  0x11   : > { %v358_v6 = vpack.c.bf16 %v338_v5, %v337_v4  ;;  %965 = vmatprep.subr.bf16.mxu1 %v1018_v12  ;;  %v340_v18 = vld [vmem:[%s1120_s21 + $0x18] sm:$0xff] }
  0x12   : > { %v359_v19 = vpack.c.bf16 %v340_v18, %v339_v17 }
  0x13   : > { %955 = vmatprep.mubr.bf16.mxu0 %v358_v6  ;;  %946 = vmatpush3.bf16.msra.mxu0 %v1010_v3 }
  0x14   : > { %947 = vmatprep.subr.bf16.mxu0 %v1011_v9  ;;  %966 = vmatpush3.bf16.msra.mxu1 %v1018_v12 }
  0x15   : > { %967 = vmatprep.subr.bf16.mxu1 %v1019_v14 }
  0x17   : > { %948 = vmatpush3.bf16.msra.mxu0 %v1011_v9 }
  0x18   : > { %949 = vmatprep.subr.bf16.mxu0 %v1012_v11  ;;  %968 = vmatpush3.bf16.msra.mxu1 %v1019_v14 }
  0x19   : > { %969 = vmatprep.subr.bf16.mxu1 %v1020_v16 }
  0x1b   : > { %950 = vmatpush3.bf16.msra.mxu0 %v1012_v11 }
  0x1c   : > { %951 = vmatprep.subr.bf16.mxu0 %v1013_v13  ;;  %970 = vmatpush3.bf16.msra.mxu1 %v1020_v16 }
  0x1d   : > { %971 = vmatprep.subr.bf16.mxu1 %v1021_v20 }
  0x1f   : > { %952 = vmatpush3.bf16.msra.mxu0 %v1013_v13 }
  0x20   : > { %953 = vmatprep.subr.bf16.mxu0 %v1014_v15  ;;  %972 = vmatpush3.bf16.msra.mxu1 %v1021_v20 }
  0x21   : > { %973 = vmatprep.subr.bf16.mxu1 %v1022_v21 }
  0x23   : > { %954 = vmatpush3.bf16.msra.mxu0 %v1014_v15 }
  0x24   : > { %974 = vmatpush3.bf16.msra.mxu1 %v1022_v21  ;;  %979 = vmatprep.subr.bf16.mxu0 %v1023_v22 }
  0x26   : > { %956 = vmatmul.mubr.bf16.vlgmr.msra.gmra.mrb[0].mxu0 %v359_v19 }
  0x27   : > { %980 = vmatpush3.bf16.msra.mxu0 %v1023_v22 }
  0x28   : > { %981 = vmatprep.subr.bf16.mxu0 %v1024_v23 }
  0x2b   : > { %982 = vmatpush3.bf16.msra.mxu0 %v1024_v23 }
  0x2c   : > { %983 = vmatprep.subr.bf16.mxu0 %v1025_v24 }
  0x2f   : > { %984 = vmatpush3.bf16.msra.mxu0 %v1025_v24 }
  0x30   : > { %985 = vmatprep.subr.bf16.mxu0 %v1026_v25 }
  0x33   : > { %986 = vmatpush3.bf16.msra.mxu0 %v1026_v25 }
  0x34   : > { %987 = vmatprep.subr.bf16.mxu0 %v1027_v26 }
  0x37   : > { %988 = vmatpush3.bf16.msra.mxu0 %v1027_v26 }
  0x38   : > { %989 = vmatprep.subr.bf16.mxu0 %v1028_v27 }
  0x3b   : > { %990 = vmatpush3.bf16.msra.mxu0 %v1028_v27  ;;  %v886_v27 = vld [vmem:[%s1218_s7] ss:$0 sm:$0xff] }
  0x3c   : > { %991 = vmatprep.subr.bf16.mxu0 %v1029_v39 }
  0x3f   : > { %992 = vmatpush3.bf16.msra.mxu0 %v1029_v39 }
  0x40   : > { %993 = vmatprep.subr.bf16.mxu0 %v1030_v40 }
  0x43   : > { %994 = vmatpush3.bf16.msra.mxu0 %v1030_v40 }
  0xf9   : > { %v957_v28 = vpop.f32.mrb[0].mxu0 }
  0xfa   : > { %v448_v30 = vpop.f32.mrb[1].mxu0  ;;  %v457_v32 = vadd.f32 %v957_v28, %v859_v29 }
  0xfb   : > { %v958_v31 = vpop.f32.mrb[2].mxu0  ;;  %v449_v35 = vadd.f32 %v859_v29, %v448_v30 }
  0xfc   : > { %v460_v33 = vadd.f32 %v958_v31, %v859_v29  ;;  %v451_v34 = vpop.f32.mrb[3].mxu0 }
  0xfd   : > { %v452_v36 = vadd.f32 %v859_v29, %v451_v34 }
  0xfe   : > { %v481_v37 = vpack.c.bf16 %v460_v33, %v457_v32  ;;  %v887_v32 = vld [vmem:[%s1219_s8] ss:$0 sm:$0xff] }
  0xff   : > { %v480_v38 = vpack.c.bf16 %v452_v36, %v449_v35 }
 0x101   : > { %975 = vmatprep.mubr.bf16.mxu1 %v480_v38 }
 0x102   : > { %976 = vmatmul.mubr.bf16.vlgmr.msra.gmra.mrb[0].mxu1 %v481_v37 }
 0x1d5   : > { %v977_v41 = vpop.f32.mrb[0].mxu1 }
 0x1d6   : > { %v570_v43 = vpop.f32.mrb[1].mxu1  ;;  %v579_v45 = vadd.f32 %v977_v41, %v868_v42 }
 0x1d7   : > { %v978_v44 = vpop.f32.mrb[2].mxu1  ;;  %v571_v48 = vadd.f32 %v868_v42, %v570_v43 }
 0x1d8   : > { %v582_v46 = vadd.f32 %v978_v44, %v868_v42  ;;  %v573_v47 = vpop.f32.mrb[3].mxu1 }
 0x1d9   : > { %v574_v49 = vadd.f32 %v868_v42, %v573_v47 }
 0x1da   : > { %v603_v50 = vpack.c.bf16 %v582_v46, %v579_v45 }
 0x1db   : > { %v602_v51 = vpack.c.bf16 %v574_v49, %v571_v48 }
 0x1dd   : > { %995 = vmatprep.mubr.bf16.mxu0 %v602_v51 }
 0x1de   : > { %996 = vmatmul.mubr.bf16.vlgmr.msra.gmra.mrb[4].mxu0 %v603_v50 }
 0x2b1   : > { %v997_v53 = vpop.f32.mrb[4].mxu0 }
 0x2b2   : > { %v701_v54 = vadd.f32 %v997_v53, %v877_v52  ;;  %v692_v55 = vpop.f32.mrb[5].mxu0 }
 0x2b3   : > { %v693_v56 = vadd.f32 %v877_v52, %v692_v55  ;;  %v998_v57 = vpop.f32.mrb[6].mxu0 }
 0x2b4   : > { %713 = vadd.xlane.f32.xlu1 %v701_v54  ;;  %v695_v58 = vpop.f32.mrb[7].mxu0  ;;  %v704_v59 = vadd.f32 %v998_v57, %v877_v52 }
 0x2b5   : > { %709 = vadd.xlane.f32.xlu0 %v693_v56  ;;  %v696_v60 = vadd.f32 %v877_v52, %v695_v58 }
 0x2b8   : > { %715 = vadd.xlane.f32.xlu1 %v704_v59 }
 0x2b9   : > { %711 = vadd.xlane.f32.xlu0 %v696_v60 }
 0x341   : > { %v714_v61 = vpop.xlane.xlu1 %713 }
 0x342   : > { %v710_v62 = vpop.xlane.xlu0 %709  ;;  %v720_v63 = vmul.f32 0.0078125, %v714_v61 }
 0x343   : > { %v718_v0 = vmul.f32 0.0078125, %v710_v62 }
 0x344   : > { %v724_v4 = vsub.f32 %v701_v54, %v720_v63 }
 0x345   : > { %v722_v1 = vsub.f32 %v693_v56, %v718_v0  ;;  %v716_v2 = vpop.xlane.xlu1 %715 }
 0x346   : > { %v712_v3 = vpop.xlane.xlu0 %711  ;;  %v721_v5 = vmul.f32 0.0078125, %v716_v2  ;;  %v728_v10 = vmul.f32 %v724_v4, %v724_v4 }
 0x347   : > { %v719_v6 = vmul.f32 0.0078125, %v712_v3  ;;  %v726_v7 = vmul.f32 %v722_v1, %v722_v1 }
 0x348   : > { %v725_v9 = vsub.f32 %v704_v59, %v721_v5 }
 0x349   : > { %v723_v8 = vsub.f32 %v696_v60, %v719_v6  ;;  %730 = vadd.xlane.f32.xlu0 %v726_v7 }
 0x34a   : > { %v729_v12 = vmul.f32 %v725_v9, %v725_v9 }
 0x34b   : > { %v727_v11 = vmul.f32 %v723_v8, %v723_v8 }
 0x34d   : > { %734 = vadd.xlane.f32.xlu0 %v728_v10  ;;  %732 = vadd.xlane.f32.xlu1 %v727_v11 }
 0x351   : > { %736 = vadd.xlane.f32.xlu1 %v729_v12 }
 0x3d6   : > { %v731_v13 = vpop.xlane.xlu0 %730 }
 0x3d7   : > { %v738_v14 = vmul.f32 0.0078125, %v731_v13 }
 0x3d9   : > { %v742_v15 = vadd.f32 1e-05, %v738_v14 }
 0x3da   : > { %v733_v16 = vpop.xlane.xlu1 %732  ;;  %v735_v17 = vpop.xlane.xlu0 %734 }
 0x3db   : > { %1031 = vrsqrt.f32 %v742_v15  ;;  %v739_v18 = vmul.f32 0.0078125, %v733_v16  ;;  %v740_v19 = vmul.f32 0.0078125, %v735_v17 }
 0x3dd   : > { %v743_v20 = vadd.f32 1e-05, %v739_v18  ;;  %v744_v21 = vadd.f32 1e-05, %v740_v19 }
 0x3de   : > { %v737_v22 = vpop.xlane.xlu1 %736 }
 0x3df   : > { %1033 = vrsqrt.f32 %v743_v20  ;;  %v741_v23 = vmul.f32 0.0078125, %v737_v22 }
 0x3e0   : > { %1035 = vrsqrt.f32 %v744_v21 }
 0x3e1   : > { %v745_v24 = vadd.f32 1e-05, %v741_v23 }
 0x3e3   : > { %1037 = vrsqrt.f32 %v745_v24 }
 0x3e5   : > { %v1032_v25 = vpop.eup %1031 }
 0x3e6   : > { %v750_v26 = vmul.f32 %v1032_v25, %v722_v1 }
 0x3e8   : > { %v760_v30 = vmul.f32 %v886_v27, %v750_v26 }
 0x3e9   : > { %v1034_v28 = vpop.eup %1033 }
 0x3ea   : > { %v1036_v29 = vpop.eup %1035  ;;  %v751_v31 = vmul.f32 %v1034_v28, %v723_v8  ;;  %v770_v36 = vadd.f32 %v887_v32, %v760_v30 }
 0x3eb   : > { %v752_v33 = vmul.f32 %v1036_v29, %v724_v4 }
 0x3ec   : > { %v761_v34 = vmul.f32 %v886_v27, %v751_v31 }
 0x3ed   : > { %v1038_v35 = vpop.eup %1037  ;;  %v762_v38 = vmul.f32 %v886_v27, %v752_v33 }
 0x3ee   : > { %v771_v37 = vadd.f32 %v887_v32, %v761_v34  ;;  %v753_v39 = vmul.f32 %v1038_v35, %v725_v9 }
 0x3ef   : > { %v772_v42 = vadd.f32 %v887_v32, %v762_v38 }
 0x3f0   : > { %v901_v40 = vpack.c.bf16 %v771_v37, %v770_v36  ;;  %v763_v41 = vmul.f32 %v886_v27, %v753_v39 }
 0x3f2   : > { %902 = vst [vmem:[%s334_s20] sm:$0xff] %v901_v40   ;;  %v773_v43 = vadd.f32 %v887_v32, %v763_v41 }
 0x3f4   : > { %v906_v44 = vpack.c.bf16 %v773_v43, %v772_v42 }
 0x3f6   : > { %908 = vst [vmem:[%s334_s20 + $0x8] sm:$0xff] %v906_v44  }
 0x3f7 PF: > { %s19_s30 = sadd.s32 1, %s1045_s30  }
 0x3f8   : > { %p16_p4 = scmp.ge.s32.totalorder %s19_s30, 4  }
 0x3fa   :  { %18 = sbr.rel (!%p16_p4) target bundleno = 1 (0x1), region = 86 }

// kernel: epd_forward.11
= control target key start
LH: loop header
LB: loop body
LE: loop exit
PB: predicated region body
PF: predicated region fallthrough
CT: control target
= control target key end

     0   :  { %s1641_s30 = smov 0   ;;  %s1925_s0 = inlined_call_operand.vmem [shape: f32[256,128], index: 0, kind: input, shape index: {}]   ;;  %s1926_s1 = inlined_call_operand.vmem [shape: bf16[128,128], index: 1, kind: input, shape index: {}]   ;;  %s1927_s2 = inlined_call_operand.vmem [shape: f32[1,128], index: 2, kind: input, shape index: {}]   ;;  %s1928_s3 = inlined_call_operand.vmem [shape: bf16[128,128], index: 3, kind: input, shape index: {}]   ;;  %s1929_s4 = inlined_call_operand.vmem [shape: f32[1,128], index: 4, kind: input, shape index: {}]   ;;  %s1930_s5 = inlined_call_operand.vmem [shape: bf16[128,128], index: 5, kind: input, shape index: {}]   ;;  %s1931_s6 = inlined_call_operand.vmem [shape: f32[1,128], index: 6, kind: input, shape index: {}]   ;;  %s1932_s7 = inlined_call_operand.vmem [shape: f32[1,128], index: 7, kind: input, shape index: {}]   ;;  %s1933_s8 = inlined_call_operand.vmem [shape: f32[1,128], index: 8, kind: input, shape index: {}]   ;;  %s1934_s9 = inlined_call_operand.vmem [shape: bf16[256,128], index: 9, kind: output, shape index: {}]  }
   0x1 LB: > { %s1240_s10 = sadd.s32 4294967295, %s1589_s30   ;;  %p1244_p0 = scmp.ge.s32.totalorder %s1589_s30, 1  ;;  %s1589_s30 = sphi %s1641_s30, %s19_s30  }
   0x2   : > { %p288_p1 = scmp.lt.s32.totalorder %s1589_s30, 3 }
   0x4   : > { %p289_p2 = pnand %p1244_p0, %p288_p1 }
   0x5   : > { %v1527_v0 = vld [vmem:[%s1926_s1] sm:$0xff] (!%p289_p2)   ;;  %s1245_s13 = sshll.u32 (!%p289_p2), %s1240_s10, 4  ;;  %v1528_v1 = vld [vmem:[%s1926_s1 + $0x8] sm:$0xff] (!%p289_p2)   ;;  %v1529_v2 = vld [vmem:[%s1926_s1 + $0x10] sm:$0xff] (!%p289_p2)  }
   0x6   : > { %292 = sbr.rel (%p289_p2) target bundleno = 1038 (0x40e), region = 56  ;;  %p325_p3 = scmp.lt.s32.totalorder (!%p289_p2), %s1245_s13, 31  ;;  %1407 = vmatprep.subr.bf16.mxu0 (!%p289_p2), %v1527_v0  ;;  %v1530_v3 = vld [vmem:[%s1926_s1 + $0x18] sm:$0xff] (!%p289_p2)   ;;  %v1531_v7 = vld [vmem:[%s1926_s1 + $0x20] sm:$0xff] (!%p289_p2)   ;;  %v1536_v9 = vld [vmem:[%s1928_s3 + $0x8] sm:$0xff] (!%p289_p2)  }
   0x7   : > { %1408 = vmatpush3.bf16.msra.mxu0 (!%p289_p2), %v1527_v0  ;;  %v1535_v8 = vld [vmem:[%s1928_s3] sm:$0xff] (!%p289_p2)   ;;  %v1532_v10 = vld [vmem:[%s1926_s1 + $0x28] sm:$0xff] (!%p289_p2)   ;;  %v1537_v11 = vld [vmem:[%s1928_s3 + $0x10] sm:$0xff] (!%p289_p2)  }
   0x8   : > { %1409 = vmatprep.subr.bf16.mxu0 (!%p289_p2), %v1528_v1  ;;  %1439 = vmatprep.subr.bf16.mxu1 (!%p289_p2), %v1535_v8  ;;  %v1533_v12 = vld [vmem:[%s1926_s1 + $0x30] sm:$0xff] (!%p289_p2)   ;;  %v1538_v13 = vld [vmem:[%s1928_s3 + $0x18] sm:$0xff] (!%p289_p2)   ;;  %v1539_v15 = vld [vmem:[%s1928_s3 + $0x20] sm:$0xff] (!%p289_p2)  }
   0x9   : > { %1440 = vmatpush3.bf16.msra.mxu1 (!%p289_p2), %v1535_v8  ;;  %v1534_v14 = vld [vmem:[%s1926_s1 + $0x38] sm:$0xff] (!%p289_p2)   ;;  %v1540_v21 = vld [vmem:[%s1928_s3 + $0x28] sm:$0xff] (!%p289_p2)   ;;  %v1541_v38 = vld [vmem:[%s1928_s3 + $0x30] sm:$0xff] (!%p289_p2)  }
   0xa   : > { %1441 = vmatprep.subr.bf16.mxu1 (!%p289_p2), %v1536_v9  ;;  %v1542_v39 = vld [vmem:[%s1928_s3 + $0x38] sm:$0xff] (!%p289_p2)   ;;  %v1543_v40 = vld [vmem:[%s1930_s5] sm:$0xff] (!%p289_p2)   ;;  %v1544_v41 = vld [vmem:[%s1930_s5 + $0x8] sm:$0xff] (!%p289_p2)  }
   0xb   : > { %1410 = vmatpush3.bf16.msra.mxu0 (!%p289_p2), %v1528_v1  ;;  %v1545_v42 = vld [vmem:[%s1930_s5 + $0x10] sm:$0xff] (!%p289_p2)   ;;  %v1546_v43 = vld [vmem:[%s1930_s5 + $0x18] sm:$0xff] (!%p289_p2)   ;;  %v1547_v44 = vld [vmem:[%s1930_s5 + $0x20] sm:$0xff] (!%p289_p2)  }
   0xc   : > { %1411 = vmatprep.subr.bf16.mxu0 (!%p289_p2), %v1529_v2  ;;  %v1548_v45 = vld [vmem:[%s1930_s5 + $0x28] sm:$0xff] (!%p289_p2)   ;;  %v1249_v47 = vld [vmem:[%s1927_s2] ss:$0 sm:$0xff] (!%p289_p2) }
   0xd   : > { %s1936_s13 = smov (!%p325_p3, %s1245_s13), 31  ;;  %1442 = vmatpush3.bf16.msra.mxu1 %v1536_v9 }
   0xe   : > { %s1246_s18 = sshll.u32 %s1936_s13, 3  ;;  %1443 = vmatprep.subr.bf16.mxu1 %v1537_v11  ;;  %s1248_s17 = sshll.u32 %s1936_s13, 2 }
   0xf   : > { %s1664_s21 = scalar_lea.vmem %s1925_s0, %s1246_s18  ;;  %1412 = vmatpush3.bf16.msra.mxu0 %v1529_v2  ;;  %s1873_s13 = scalar_lea.vmem %s1934_s9, %s1248_s17 }
  0x10   : > { %v337_v4 = vld [vmem:[%s1664_s21] sm:$0xff]  ;;  %v338_v5 = vld [vmem:[%s1664_s21 + $0x8] sm:$0xff]  ;;  %1413 = vmatprep.subr.bf16.mxu0 %v1530_v3  ;;  %v339_v16 = vld [vmem:[%s1664_s21 + $0x10] sm:$0xff] }
  0x11   : > { %v370_v6 = vpack.c.bf16 %v338_v5, %v337_v4  ;;  %1444 = vmatpush3.bf16.msra.mxu1 %v1537_v11  ;;  %v340_v17 = vld [vmem:[%s1664_s21 + $0x18] sm:$0xff]  ;;  %v341_v18 = vld [vmem:[%s1664_s21 + $0x20] sm:$0xff]  ;;  %v342_v19 = vld [vmem:[%s1664_s21 + $0x28] sm:$0xff] }
  0x12   : > { %1445 = vmatprep.subr.bf16.mxu1 %v1538_v13  ;;  %v371_v20 = vpack.c.bf16 %v340_v17, %v339_v16  ;;  %v372_v22 = vpack.c.bf16 %v342_v19, %v341_v18  ;;  %v343_v23 = vld [vmem:[%s1664_s21 + $0x30] sm:$0xff]  ;;  %v344_v24 = vld [vmem:[%s1664_s21 + $0x38] sm:$0xff]  ;;  %v345_v25 = vld [vmem:[%s1664_s21 + $0x40] sm:$0xff] }
  0x13   : > { %1423 = vmatprep.mubr.bf16.mxu0 %v370_v6  ;;  %1414 = vmatpush3.bf16.msra.mxu0 %v1530_v3  ;;  %v346_v26 = vld [vmem:[%s1664_s21 + $0x48] sm:$0xff]  ;;  %v373_v27 = vpack.c.bf16 %v344_v24, %v343_v23  ;;  %v347_v29 = vld [vmem:[%s1664_s21 + $0x50] sm:$0xff]  ;;  %v348_v30 = vld [vmem:[%s1664_s21 + $0x58] sm:$0xff] }
  0x14   : > { %1415 = vmatprep.subr.bf16.mxu0 %v1531_v7  ;;  %v374_v28 = vpack.c.bf16 %v346_v26, %v345_v25  ;;  %v349_v31 = vld [vmem:[%s1664_s21 + $0x60] sm:$0xff]  ;;  %v350_v32 = vld [vmem:[%s1664_s21 + $0x68] sm:$0xff]  ;;  %v375_v33 = vpack.c.bf16 %v348_v30, %v347_v29  ;;  %v351_v35 = vld [vmem:[%s1664_s21 + $0x70] sm:$0xff] }
  0x15   : > { %1446 = vmatpush3.bf16.msra.mxu1 %v1538_v13  ;;  %v376_v34 = vpack.c.bf16 %v350_v32, %v349_v31  ;;  %v352_v36 = vld [vmem:[%s1664_s21 + $0x78] sm:$0xff]  ;;  %v1549_v23 = vld [vmem:[%s1930_s5 + $0x30] sm:$0xff]   ;;  %v1258_v26 = vld [vmem:[%s1929_s4] ss:$0 sm:$0xff] }
  0x16   : > { %1447 = vmatprep.subr.bf16.mxu1 %v1539_v15  ;;  %v377_v37 = vpack.c.bf16 %v352_v36, %v351_v35  ;;  %v1550_v24 = vld [vmem:[%s1930_s5 + $0x38] sm:$0xff]  }
  0x17   : > { %1416 = vmatpush3.bf16.msra.mxu0 %v1531_v7 }
  0x18   : > { %1417 = vmatprep.subr.bf16.mxu0 %v1532_v10 }
  0x19   : > { %1448 = vmatpush3.bf16.msra.mxu1 %v1539_v15 }
  0x1a   : > { %1449 = vmatprep.subr.bf16.mxu1 %v1540_v21 }
  0x1b   : > { %1418 = vmatpush3.bf16.msra.mxu0 %v1532_v10 }
  0x1c   : > { %1419 = vmatprep.subr.bf16.mxu0 %v1533_v12 }
  0x1d   : > { %1450 = vmatpush3.bf16.msra.mxu1 %v1540_v21 }
  0x1e   : > { %1451 = vmatprep.subr.bf16.mxu1 %v1541_v38 }
  0x1f   : > { %1420 = vmatpush3.bf16.msra.mxu0 %v1533_v12 }
  0x20   : > { %1421 = vmatprep.subr.bf16.mxu0 %v1534_v14 }
  0x21   : > { %1452 = vmatpush3.bf16.msra.mxu1 %v1541_v38 }
  0x22   : > { %1453 = vmatprep.subr.bf16.mxu1 %v1542_v39 }
  0x23   : > { %1422 = vmatpush3.bf16.msra.mxu0 %v1534_v14 }
  0x24   : > { %1471 = vmatprep.subr.bf16.mxu0 %v1543_v40 }
  0x25   : > { %1454 = vmatpush3.bf16.msra.mxu1 %v1542_v39 }
  0x26   : > { %1424 = vmatmul.mubr.bf16.vlgmr.msra.gmra.mrb[0].mxu0 %v371_v20  ;;  %1503 = vmatprep.subr.bf16.mxu1 %v1543_v40 }
  0x27   : > { %1427 = vmatprep.mubr.bf16.mxu0 %v372_v22  ;;  %1472 = vmatpush3.bf16.msra.mxu0 %v1543_v40 }
  0x28   : > { %1473 = vmatprep.subr.bf16.mxu0 %v1544_v41 }
  0x2b   : > { %1474 = vmatpush3.bf16.msra.mxu0 %v1544_v41 }
  0x2c   : > { %1475 = vmatprep.subr.bf16.mxu0 %v1545_v42 }
  0x2e   : > { %1428 = vmatmul.mubr.bf16.gmra.mrb[4].mxu0 %v373_v27 }
  0x2f   : > { %1431 = vmatprep.mubr.bf16.mxu0 %v374_v28  ;;  %1476 = vmatpush3.bf16.msra.mxu0 %v1545_v42 }
  0x30   : > { %1477 = vmatprep.subr.bf16.mxu0 %v1546_v43 }
  0x33   : > { %1478 = vmatpush3.bf16.msra.mxu0 %v1546_v43 }
  0x34   : > { %1479 = vmatprep.subr.bf16.mxu0 %v1547_v44 }
  0x36   : > { %1432 = vmatmul.mubr.bf16.gmra.mrb[8].mxu0 %v375_v33 }
  0x37   : > { %1435 = vmatprep.mubr.bf16.mxu0 %v376_v34  ;;  %1480 = vmatpush3.bf16.msra.mxu0 %v1547_v44 }
  0x38   : > { %1481 = vmatprep.subr.bf16.mxu0 %v1548_v45 }
  0x3b   : > { %1482 = vmatpush3.bf16.msra.mxu0 %v1548_v45 }
  0x3c   : > { %1483 = vmatprep.subr.bf16.mxu0 %v1549_v23 }
  0x3e   : > { %1436 = vmatmul.mubr.bf16.gmra.mrb[12].mxu0 %v377_v37 }
  0x3f   : > { %1484 = vmatpush3.bf16.msra.mxu0 %v1549_v23 }
  0x40   : > { %1485 = vmatprep.subr.bf16.mxu0 %v1550_v24 }
  0x43   : > { %1486 = vmatpush3.bf16.msra.mxu0 %v1550_v24 }
  0xf9   : > { %v1425_v46 = vpop.f32.mrb[0].mxu0 }
  0xfa   : > { %v466_v48 = vpop.f32.mrb[1].mxu0  ;;  %v475_v50 = vadd.f32 %v1425_v46, %v1249_v47 }
  0xfb   : > { %v1426_v49 = vpop.f32.mrb[2].mxu0  ;;  %v467_v53 = vadd.f32 %v1249_v47, %v466_v48 }
  0xfc   : > { %v478_v51 = vadd.f32 %v1426_v49, %v1249_v47  ;;  %v469_v52 = vpop.f32.mrb[3].mxu0 }
  0xfd   : > { %v470_v54 = vadd.f32 %v1249_v47, %v469_v52 }
  0xfe   : > { %v547_v55 = vpack.c.bf16 %v478_v51, %v475_v50 }
  0xff   : > { %v546_v56 = vpack.c.bf16 %v470_v54, %v467_v53 }
 0x101   : > { %v1429_v57 = vpop.f32.mrb[4].mxu0  ;;  %1455 = vmatprep.mubr.bf16.mxu1 %v546_v56 }
 0x102   : > { %v491_v58 = vadd.f32 %v1429_v57, %v1249_v47  ;;  %v482_v59 = vpop.f32.mrb[5].mxu0  ;;  %1456 = vmatmul.mubr.bf16.vlgmr.msra.gmra.mrb[0].mxu1 %v547_v55 }
 0x103   : > { %v1430_v60 = vpop.f32.mrb[6].mxu0  ;;  %1511 = vmatpush3.bf16.msra.mxu1 %v1543_v40  ;;  %v483_v63 = vadd.f32 %v1249_v47, %v482_v59 }
 0x104   : > { %v494_v61 = vadd.f32 %v1430_v60, %v1249_v47  ;;  %v485_v62 = vpop.f32.mrb[7].mxu0  ;;  %1504 = vmatprep.subr.bf16.mxu1 %v1544_v41 }
 0x105   : > { %v486_v0 = vadd.f32 %v1249_v47, %v485_v62 }
 0x106   : > { %v549_v1 = vpack.c.bf16 %v494_v61, %v491_v58 }
 0x107   : > { %v548_v2 = vpack.c.bf16 %v486_v0, %v483_v63  ;;  %1512 = vmatpush3.bf16.msra.mxu1 %v1544_v41 }
 0x108   : > { %1505 = vmatprep.subr.bf16.mxu1 %v1545_v42 }
 0x109   : > { %v1433_v3 = vpop.f32.mrb[8].mxu0  ;;  %1459 = vmatprep.mubr.bf16.mxu1 %v548_v2  ;;  %v1267_v2 = vld [vmem:[%s1931_s6] ss:$0 sm:$0xff] }
 0x10a   : > { %v507_v4 = vadd.f32 %v1433_v3, %v1249_v47  ;;  %v498_v5 = vpop.f32.mrb[9].mxu0  ;;  %1460 = vmatmul.mubr.bf16.gmra.mrb[4].mxu1 %v549_v1 }
 0x10b   : > { %v1434_v6 = vpop.f32.mrb[10].mxu0  ;;  %1513 = vmatpush3.bf16.msra.mxu1 %v1545_v42  ;;  %v499_v9 = vadd.f32 %v1249_v47, %v498_v5 }
 0x10c   : > { %v510_v7 = vadd.f32 %v1434_v6, %v1249_v47  ;;  %v501_v8 = vpop.f32.mrb[11].mxu0  ;;  %1506 = vmatprep.subr.bf16.mxu1 %v1546_v43 }
 0x10d   : > { %v502_v10 = vadd.f32 %v1249_v47, %v501_v8 }
 0x10e   : > { %v551_v11 = vpack.c.bf16 %v510_v7, %v507_v4 }
 0x10f   : > { %v550_v12 = vpack.c.bf16 %v502_v10, %v499_v9  ;;  %1514 = vmatpush3.bf16.msra.mxu1 %v1546_v43 }
 0x110   : > { %1507 = vmatprep.subr.bf16.mxu1 %v1547_v44 }
 0x111   : > { %v1437_v13 = vpop.f32.mrb[12].mxu0  ;;  %1463 = vmatprep.mubr.bf16.mxu1 %v550_v12 }
 0x112   : > { %v523_v14 = vadd.f32 %v1437_v13, %v1249_v47  ;;  %v514_v15 = vpop.f32.mrb[13].mxu0  ;;  %1464 = vmatmul.mubr.bf16.gmra.mrb[8].mxu1 %v551_v11 }
 0x113   : > { %v1438_v16 = vpop.f32.mrb[14].mxu0  ;;  %1515 = vmatpush3.bf16.msra.mxu1 %v1547_v44  ;;  %v515_v19 = vadd.f32 %v1249_v47, %v514_v15 }
 0x114   : > { %v526_v17 = vadd.f32 %v1438_v16, %v1249_v47  ;;  %v517_v18 = vpop.f32.mrb[15].mxu0  ;;  %1508 = vmatprep.subr.bf16.mxu1 %v1548_v45 }
 0x115   : > { %v518_v20 = vadd.f32 %v1249_v47, %v517_v18 }
 0x116   : > { %v553_v21 = vpack.c.bf16 %v526_v17, %v523_v14 }
 0x117   : > { %v552_v22 = vpack.c.bf16 %v518_v20, %v515_v19  ;;  %1516 = vmatpush3.bf16.msra.mxu1 %v1548_v45 }
 0x118   : > { %1509 = vmatprep.subr.bf16.mxu1 %v1549_v23 }
 0x119   : > { %1467 = vmatprep.mubr.bf16.mxu1 %v552_v22 }
 0x11a   : > { %1468 = vmatmul.mubr.bf16.gmra.mrb[12].mxu1 %v553_v21 }
 0x11b   : > { %1517 = vmatpush3.bf16.msra.mxu1 %v1549_v23 }
 0x11c   : > { %1510 = vmatprep.subr.bf16.mxu1 %v1550_v24 }
 0x11f   : > { %1518 = vmatpush3.bf16.msra.mxu1 %v1550_v24 }
 0x1d5   : > { %v1457_v25 = vpop.f32.mrb[0].mxu1 }
 0x1d6   : > { %v642_v27 = vpop.f32.mrb[1].mxu1  ;;  %v651_v29 = vadd.f32 %v1457_v25, %v1258_v26 }
 0x1d7   : > { %v1458_v28 = vpop.f32.mrb[2].mxu1  ;;  %v643_v32 = vadd.f32 %v1258_v26, %v642_v27 }
 0x1d8   : > { %v654_v30 = vadd.f32 %v1458_v28, %v1258_v26  ;;  %v645_v31 = vpop.f32.mrb[3].mxu1 }
 0x1d9   : > { %v646_v33 = vadd.f32 %v1258_v26, %v645_v31 }
 0x1da   : > { %v723_v34 = vpack.c.bf16 %v654_v30, %v651_v29 }
 0x1db   : > { %v722_v35 = vpack.c.bf16 %v646_v33, %v643_v32 }
 0x1dd   : > { %v1461_v36 = vpop.f32.mrb[4].mxu1  ;;  %1487 = vmatprep.mubr.bf16.mxu0 %v722_v35 }
 0x1de   : > { %v658_v37 = vpop.f32.mrb[5].mxu1  ;;  %1488 = vmatmul.mubr.bf16.vlgmr.msra.gmra.mrb[16].mxu0 %v723_v34  ;;  %v667_v39 = vadd.f32 %v1461_v36, %v1258_v26 }
 0x1df   : > { %v1462_v38 = vpop.f32.mrb[6].mxu1  ;;  %v659_v42 = vadd.f32 %v1258_v26, %v658_v37 }
 0x1e0   : > { %v670_v40 = vadd.f32 %v1462_v38, %v1258_v26  ;;  %v661_v41 = vpop.f32.mrb[7].mxu1 }
 0x1e1   : > { %v662_v43 = vadd.f32 %v1258_v26, %v661_v41 }
 0x1e2   : > { %v725_v44 = vpack.c.bf16 %v670_v40, %v667_v39 }
 0x1e3   : > { %v724_v45 = vpack.c.bf16 %v662_v43, %v659_v42 }
 0x1e5   : > { %v1465_v46 = vpop.f32.mrb[8].mxu1  ;;  %1491 = vmatprep.mubr.bf16.mxu0 %v724_v45 }
 0x1e6   : > { %v674_v47 = vpop.f32.mrb[9].mxu1  ;;  %1492 = vmatmul.mubr.bf16.gmra.mrb[20].mxu0 %v725_v44  ;;  %v683_v49 = vadd.f32 %v1465_v46, %v1258_v26 }
 0x1e7   : > { %v1466_v48 = vpop.f32.mrb[10].mxu1  ;;  %v675_v52 = vadd.f32 %v1258_v26, %v674_v47 }
 0x1e8   : > { %v686_v50 = vadd.f32 %v1466_v48, %v1258_v26  ;;  %v677_v51 = vpop.f32.mrb[11].mxu1 }
 0x1e9   : > { %v678_v53 = vadd.f32 %v1258_v26, %v677_v51 }
 0x1ea   : > { %v727_v54 = vpack.c.bf16 %v686_v50, %v683_v49 }
 0x1eb   : > { %v726_v55 = vpack.c.bf16 %v678_v53, %v675_v52 }
 0x1ed   : > { %v1469_v56 = vpop.f32.mrb[12].mxu1  ;;  %1495 = vmatprep.mubr.bf16.mxu1 %v726_v55 }
 0x1ee   : > { %v690_v57 = vpop.f32.mrb[13].mxu1  ;;  %1496 = vmatmul.mubr.bf16.vlgmr.msra.gmra.mrb[16].mxu1 %v727_v54  ;;  %v699_v59 = vadd.f32 %v1469_v56, %v1258_v26 }
 0x1ef   : > { %v1470_v58 = vpop.f32.mrb[14].mxu1  ;;  %v691_v62 = vadd.f32 %v1258_v26, %v690_v57 }
 0x1f0   : > { %v702_v60 = vadd.f32 %v1470_v58, %v1258_v26  ;;  %v693_v61 = vpop.f32.mrb[15].mxu1 }
 0x1f1   : > { %v694_v63 = vadd.f32 %v1258_v26, %v693_v61 }
 0x1f2   : > { %v729_v0 = vpack.c.bf16 %v702_v60, %v699_v59 }
 0x1f3   : > { %v728_v1 = vpack.c.bf16 %v694_v63, %v691_v62 }
 0x1f5   : > { %1499 = vmatprep.mubr.bf16.mxu1 %v728_v1 }
 0x1f6   : > { %1500 = vmatmul.mubr.bf16.gmra.mrb[20].mxu1 %v729_v0 }
 0x2b1   : > { %v1489_v3 = vpop.f32.mrb[16].mxu0 }
 0x2b2   : > { %v827_v4 = vadd.f32 %v1489_v3, %v1267_v2  ;;  %v818_v5 = vpop.f32.mrb[17].mxu0 }
 0x2b3   : > { %v819_v6 = vadd.f32 %v1267_v2, %v818_v5  ;;  %v1490_v7 = vpop.f32.mrb[18].mxu0 }
 0x2b4   : > { %887 = vadd.xlane.f32.xlu1 %v827_v4  ;;  %v821_v8 = vpop.f32.mrb[19].mxu0  ;;  %v830_v9 = vadd.f32 %v1490_v7, %v1267_v2 }
 0x2b5   : > { %883 = vadd.xlane.f32.xlu0 %v819_v6  ;;  %v822_v10 = vadd.f32 %v1267_v2, %v821_v8 }
 0x2b8   : > { %889 = vadd.xlane.f32.xlu1 %v830_v9 }
 0x2b9   : > { %v1493_v11 = vpop.f32.mrb[20].mxu0  ;;  %885 = vadd.xlane.f32.xlu0 %v822_v10 }
 0x2ba   : > { %v843_v12 = vadd.f32 %v1493_v11, %v1267_v2  ;;  %v834_v13 = vpop.f32.mrb[21].mxu0 }
 0x2bb   : > { %v1494_v14 = vpop.f32.mrb[22].mxu0  ;;  %v835_v17 = vadd.f32 %v1267_v2, %v834_v13 }
 0x2bc   : > { %v846_v15 = vadd.f32 %v1494_v14, %v1267_v2  ;;  %v837_v16 = vpop.f32.mrb[23].mxu0 }
 0x2bd   : > { %895 = vadd.xlane.f32.xlu0 %v843_v12  ;;  %v838_v18 = vadd.f32 %v1267_v2, %v837_v16 }
 0x2be   : > { %897 = vadd.xlane.f32.xlu1 %v846_v15 }
 0x2c1   : > { %v1497_v19 = vpop.f32.mrb[16].mxu1  ;;  %891 = vadd.xlane.f32.xlu0 %v835_v17 }
 0x2c2   : > { %v1754_v20 = vadd.f32 %v1497_v19, %v1267_v2  ;;  %v850_v21 = vpop.f32.mrb[17].mxu1  ;;  %893 = vadd.xlane.f32.xlu1 %v838_v18 }
 0x2c3   : > { %v1498_v22 = vpop.f32.mrb[18].mxu1  ;;  %v1760_v25 = vadd.f32 %v1267_v2, %v850_v21 }
 0x2c4   : > { %v1756_v23 = vadd.f32 %v1498_v22, %v1267_v2  ;;  %v853_v24 = vpop.f32.mrb[19].mxu1 }
 0x2c5   : > { %903 = vadd.xlane.f32.xlu0 %v1754_v20  ;;  %v1762_v26 = vadd.f32 %v1267_v2, %v853_v24 }
 0x2c6   : > { %905 = vadd.xlane.f32.xlu1 %v1756_v23 }
 0x2c9   : > { %v1501_v27 = vpop.f32.mrb[20].mxu1  ;;  %899 = vadd.xlane.f32.xlu0 %v1760_v25 }
 0x2ca   : > { %v866_v28 = vpop.f32.mrb[21].mxu1  ;;  %901 = vadd.xlane.f32.xlu1 %v1762_v26  ;;  %v1771_v33 = vadd.f32 %v1501_v27, %v1267_v2 }
 0x2cb   : > { %v1766_v29 = vadd.f32 %v1267_v2, %v866_v28  ;;  %v1502_v30 = vpop.f32.mrb[22].mxu1 }
 0x2cc   : > { %v869_v31 = vpop.f32.mrb[23].mxu1  ;;  %v1774_v34 = vadd.f32 %v1502_v30, %v1267_v2 }
 0x2cd   : > { %v1768_v32 = vadd.f32 %v1267_v2, %v869_v31  ;;  %907 = vadd.xlane.f32.xlu0 %v1766_v29 }
 0x2cf   : > { %909 = vadd.xlane.f32.xlu1 %v1768_v32 }
 0x2d1   : > { %911 = vadd.xlane.f32.xlu0 %v1771_v33 }
 0x2d3   : > { %913 = vadd.xlane.f32.xlu1 %v1774_v34 }
 0x341   : > { %v888_v35 = vpop.xlane.xlu1 %887 }
 0x342   : > { %v918_v36 = vmul.f32 0.0078125, %v888_v35  ;;  %v884_v37 = vpop.xlane.xlu0 %883 }
 0x343   : > { %v916_v38 = vmul.f32 0.0078125, %v884_v37 }
 0x344   : > { %v1778_v39 = vsub.f32 %v827_v4, %v918_v36 }
 0x345   : > { %v890_v40 = vpop.xlane.xlu1 %889  ;;  %v1780_v41 = vsub.f32 %v819_v6, %v916_v38 }
 0x346   : > { %v919_v42 = vmul.f32 0.0078125, %v890_v40  ;;  %v886_v43 = vpop.xlane.xlu0 %885  ;;  %v950_v44 = vmul.f32 %v1778_v39, %v1778_v39 }
 0x347   : > { %v917_v45 = vmul.f32 0.0078125, %v886_v43  ;;  %v948_v50 = vmul.f32 %v1780_v41, %v1780_v41 }
 0x348   : > { %v1784_v46 = vsub.f32 %v830_v9, %v919_v42  ;;  %968 = vadd.xlane.f32.xlu0 %v950_v44 }
 0x349   : > { %v1786_v47 = vsub.f32 %v822_v10, %v917_v45 }
 0x34a   : > { %v896_v48 = vpop.xlane.xlu0 %895  ;;  %v951_v49 = vmul.f32 %v1784_v46, %v1784_v46 }
 0x34b   : > { %v922_v51 = vmul.f32 0.0078125, %v896_v48  ;;  %v898_v52 = vpop.xlane.xlu1 %897  ;;  %v949_v57 = vmul.f32 %v1786_v47, %v1786_v47 }
 0x34c   : > { %v923_v53 = vmul.f32 0.0078125, %v898_v52  ;;  %970 = vadd.xlane.f32.xlu1 %v951_v49  ;;  %964 = vadd.xlane.f32.xlu0 %v948_v50 }
 0x34d   : > { %v1792_v54 = vsub.f32 %v843_v12, %v922_v51 }
 0x34e   : > { %v1794_v55 = vsub.f32 %v846_v15, %v923_v53  ;;  %v892_v56 = vpop.xlane.xlu0 %891 }
 0x34f   : > { %v920_v58 = vmul.f32 0.0078125, %v892_v56  ;;  %v894_v59 = vpop.xlane.xlu1 %893  ;;  %v954_v60 = vmul.f32 %v1792_v54, %v1792_v54 }
 0x350   : > { %v921_v61 = vmul.f32 0.0078125, %v894_v59  ;;  %966 = vadd.xlane.f32.xlu1 %v949_v57  ;;  %v955_v1 = vmul.f32 %v1794_v55, %v1794_v55 }
 0x351   : > { %v1800_v62 = vsub.f32 %v835_v17, %v920_v58  ;;  %976 = vadd.xlane.f32.xlu0 %v954_v60 }
 0x352   : > { %v1802_v63 = vsub.f32 %v838_v18, %v921_v61  ;;  %v904_v0 = vpop.xlane.xlu0 %903 }
 0x353   : > { %v926_v2 = vmul.f32 0.0078125, %v904_v0  ;;  %v906_v3 = vpop.xlane.xlu1 %905  ;;  %v952_v4 = vmul.f32 %v1800_v62, %v1800_v62  ;;  %v1853_v0 = vld [vmem:[%s1932_s7] ss:$0 sm:$0xff] }
 0x354   : > { %v927_v5 = vmul.f32 0.0078125, %v906_v3  ;;  %978 = vadd.xlane.f32.xlu1 %v955_v1  ;;  %v953_v9 = vmul.f32 %v1802_v63, %v1802_v63 }
 0x355   : > { %v1809_v6 = vsub.f32 %v1754_v20, %v926_v2  ;;  %972 = vadd.xlane.f32.xlu0 %v952_v4 }
 0x356   : > { %v1812_v7 = vsub.f32 %v1756_v23, %v927_v5  ;;  %v900_v8 = vpop.xlane.xlu0 %899 }
 0x357   : > { %v924_v10 = vmul.f32 0.0078125, %v900_v8  ;;  %v902_v11 = vpop.xlane.xlu1 %901  ;;  %v958_v12 = vmul.f32 %v1809_v6, %v1809_v6 }
 0x358   : > { %v925_v13 = vmul.f32 0.0078125, %v902_v11  ;;  %974 = vadd.xlane.f32.xlu1 %v953_v9  ;;  %v959_v17 = vmul.f32 %v1812_v7, %v1812_v7 }
 0x359   : > { %v1819_v14 = vsub.f32 %v1760_v25, %v924_v10  ;;  %984 = vadd.xlane.f32.xlu0 %v958_v12 }
 0x35a   : > { %v1822_v15 = vsub.f32 %v1762_v26, %v925_v13  ;;  %v908_v16 = vpop.xlane.xlu0 %907  ;;  %v1860_v13 = vld [vmem:[%s1933_s8] ss:$0 sm:$0xff] }
 0x35b   : > { %v928_v18 = vmul.f32 0.0078125, %v908_v16  ;;  %v956_v19 = vmul.f32 %v1819_v14, %v1819_v14 }
 0x35c   : > { %v910_v20 = vpop.xlane.xlu1 %909  ;;  %986 = vadd.xlane.f32.xlu1 %v959_v17  ;;  %v957_v24 = vmul.f32 %v1822_v15, %v1822_v15 }
 0x35d   : > { %v1829_v21 = vsub.f32 %v1766_v29, %v928_v18  ;;  %v929_v22 = vmul.f32 0.0078125, %v910_v20  ;;  %980 = vadd.xlane.f32.xlu0 %v956_v19 }
 0x35e   : > { %v912_v23 = vpop.xlane.xlu0 %911 }
 0x35f   : > { %v1834_v25 = vsub.f32 %v1768_v32, %v929_v22  ;;  %v930_v26 = vmul.f32 0.0078125, %v912_v23  ;;  %v960_v27 = vmul.f32 %v1829_v21, %v1829_v21 }
 0x360   : > { %v914_v28 = vpop.xlane.xlu1 %913  ;;  %982 = vadd.xlane.f32.xlu1 %v957_v24 }
 0x361   : > { %v1839_v30 = vsub.f32 %v1771_v33, %v930_v26  ;;  %v931_v29 = vmul.f32 0.0078125, %v914_v28  ;;  %988 = vadd.xlane.f32.xlu0 %v960_v27  ;;  %v961_v31 = vmul.f32 %v1834_v25, %v1834_v25 }
 0x363   : > { %v1844_v35 = vsub.f32 %v1774_v34, %v931_v29  ;;  %v962_v32 = vmul.f32 %v1839_v30, %v1839_v30 }
 0x364   : > { %990 = vadd.xlane.f32.xlu1 %v961_v31 }
 0x365   : > { %992 = vadd.xlane.f32.xlu0 %v962_v32  ;;  %v963_v36 = vmul.f32 %v1844_v35, %v1844_v35 }
 0x368   : > { %994 = vadd.xlane.f32.xlu1 %v963_v36 }
 0x3d5   : > { %v969_v37 = vpop.xlane.xlu0 %968 }
 0x3d6   : > { %v998_v33 = vmul.f32 0.0078125, %v969_v37 }
 0x3d8   : > { %v1014_v38 = vadd.f32 1e-05, %v998_v33 }
 0x3d9   : > { %v971_v40 = vpop.xlane.xlu1 %970  ;;  %v965_v42 = vpop.xlane.xlu0 %964 }
 0x3da   : > { %1551 = vrsqrt.f32 %v1014_v38  ;;  %v999_v43 = vmul.f32 0.0078125, %v971_v40  ;;  %v996_v44 = vmul.f32 0.0078125, %v965_v42 }
 0x3dc   : > { %v1015_v45 = vadd.f32 1e-05, %v999_v43  ;;  %v1012_v34 = vadd.f32 1e-05, %v996_v44 }
 0x3dd   : > { %v967_v48 = vpop.xlane.xlu1 %966 }
 0x3de   : > { %1553 = vrsqrt.f32 %v1015_v45  ;;  %v997_v49 = vmul.f32 0.0078125, %v967_v48  ;;  %v977_v50 = vpop.xlane.xlu0 %976 }
 0x3df   : > { %1555 = vrsqrt.f32 %v1012_v34  ;;  %v1002_v51 = vmul.f32 0.0078125, %v977_v50 }
 0x3e0   : > { %v1013_v52 = vadd.f32 1e-05, %v997_v49 }
 0x3e1   : > { %v1018_v53 = vadd.f32 1e-05, %v1002_v51  ;;  %v979_v56 = vpop.xlane.xlu1 %978 }
 0x3e2   : > { %1557 = vrsqrt.f32 %v1013_v52  ;;  %v1003_v57 = vmul.f32 0.0078125, %v979_v56  ;;  %v973_v58 = vpop.xlane.xlu0 %972 }
 0x3e3   : > { %1559 = vrsqrt.f32 %v1018_v53  ;;  %v1000_v59 = vmul.f32 0.0078125, %v973_v58 }
 0x3e4   : > { %v1552_v60 = vpop.eup %1551  ;;  %v1019_v61 = vadd.f32 1e-05, %v1003_v57 }
 0x3e5   : > { %v1046_v1 = vmul.f32 %v1552_v60, %v1778_v39  ;;  %v1016_v2 = vadd.f32 1e-05, %v1000_v59  ;;  %v975_v3 = vpop.xlane.xlu1 %974 }
 0x3e6   : > { %1561 = vrsqrt.f32 %v1019_v61  ;;  %v1001_v4 = vmul.f32 0.0078125, %v975_v3  ;;  %v985_v5 = vpop.xlane.xlu0 %984 }
 0x3e7   : > { %1563 = vrsqrt.f32 %v1016_v2  ;;  %v1006_v8 = vmul.f32 0.0078125, %v985_v5  ;;  %v1068_v10 = vmul.f32 %v1853_v0, %v1046_v1 }
 0x3e8   : > { %v1554_v9 = vpop.eup %1553  ;;  %v1017_v11 = vadd.f32 1e-05, %v1001_v4 }
 0x3e9   : > { %v1556_v12 = vpop.eup %1555  ;;  %v1047_v39 = vmul.f32 %v1554_v9, %v1784_v46  ;;  %v1022_v16 = vadd.f32 1e-05, %v1006_v8  ;;  %v987_v17 = vpop.xlane.xlu1 %986  ;;  %v1090_v26 = vadd.f32 %v1860_v13, %v1068_v10 }
 0x3ea   : > { %v1044_v18 = vmul.f32 %v1556_v12, %v1780_v41  ;;  %1565 = vrsqrt.f32 %v1017_v11  ;;  %v1007_v19 = vmul.f32 0.0078125, %v987_v17  ;;  %v981_v20 = vpop.xlane.xlu0 %980 }
 0x3eb   : > { %v1069_v22 = vmul.f32 %v1853_v0, %v1047_v39  ;;  %1567 = vrsqrt.f32 %v1022_v16  ;;  %v1004_v23 = vmul.f32 0.0078125, %v981_v20 }
 0x3ec   : > { %v1558_v24 = vpop.eup %1557  ;;  %v1023_v27 = vadd.f32 1e-05, %v1007_v19  ;;  %v1066_v46 = vmul.f32 %v1853_v0, %v1044_v18 }
 0x3ed   : > { %v1560_v28 = vpop.eup %1559  ;;  %v1091_v29 = vadd.f32 %v1860_v13, %v1069_v22  ;;  %v1045_v31 = vmul.f32 %v1558_v24, %v1786_v47  ;;  %v1020_v41 = vadd.f32 1e-05, %v1004_v23  ;;  %v983_v32 = vpop.xlane.xlu1 %982 }
 0x3ee   : > { %v1050_v36 = vmul.f32 %v1560_v28, %v1792_v54  ;;  %1569 = vrsqrt.f32 %v1023_v27  ;;  %v1005_v37 = vmul.f32 0.0078125, %v983_v32  ;;  %v989_v33 = vpop.xlane.xlu0 %988  ;;  %v1088_v34 = vadd.f32 %v1860_v13, %v1066_v46 }
 0x3ef   : > { %v1320_v38 = vpack.c.bf16 %v1091_v29, %v1090_v26  ;;  %v1067_v40 = vmul.f32 %v1853_v0, %v1045_v31  ;;  %1571 = vrsqrt.f32 %v1020_v41  ;;  %v1008_v42 = vmul.f32 0.0078125, %v989_v33 }
 0x3f0   : > { %v1562_v43 = vpop.eup %1561  ;;  %v1072_v47 = vmul.f32 %v1853_v0, %v1050_v36  ;;  %v1021_v44 = vadd.f32 1e-05, %v1005_v37 }
 0x3f1   : > { %v1564_v45 = vpop.eup %1563  ;;  %1352 = vst [vmem:[%s1873_s13 + $0x8] sm:$0xff] %v1320_v38   ;;  %v1089_v48 = vadd.f32 %v1860_v13, %v1067_v40  ;;  %v1051_v54 = vmul.f32 %v1562_v43, %v1794_v55  ;;  %v1024_v49 = vadd.f32 1e-05, %v1008_v42  ;;  %v991_v50 = vpop.xlane.xlu1 %990 }
 0x3f2   : > { %v1048_v51 = vmul.f32 %v1564_v45, %v1800_v62  ;;  %1573 = vrsqrt.f32 %v1021_v44  ;;  %v1009_v52 = vmul.f32 0.0078125, %v991_v50  ;;  %v993_v53 = vpop.xlane.xlu0 %992  ;;  %v1094_v60 = vadd.f32 %v1860_v13, %v1072_v47 }
 0x3f3   : > { %v1315_v56 = vpack.c.bf16 %v1089_v48, %v1088_v34  ;;  %v1073_v57 = vmul.f32 %v1853_v0, %v1051_v54  ;;  %1575 = vrsqrt.f32 %v1024_v49  ;;  %v1010_v58 = vmul.f32 0.0078125, %v993_v53 }
 0x3f4   : > { %v1566_v59 = vpop.eup %1565  ;;  %v1025_v61 = vadd.f32 1e-05, %v1009_v52  ;;  %v1070_v2 = vmul.f32 %v1853_v0, %v1048_v51 }
 0x3f5   : > { %v1568_v1 = vpop.eup %1567  ;;  %1316 = vst [vmem:[%s1873_s13] sm:$0xff] %v1315_v56   ;;  %v1095_v55 = vadd.f32 %v1860_v13, %v1073_v57  ;;  %v1049_v62 = vmul.f32 %v1566_v59, %v1802_v63  ;;  %v1026_v3 = vadd.f32 1e-05, %v1010_v58  ;;  %v995_v4 = vpop.xlane.xlu1 %994 }
 0x3f6   : > { %v1054_v5 = vmul.f32 %v1568_v1, %v1809_v6  ;;  %1577 = vrsqrt.f32 %v1025_v61  ;;  %v1011_v8 = vmul.f32 0.0078125, %v995_v4  ;;  %v1092_v16 = vadd.f32 %v1860_v13, %v1070_v2 }
 0x3f7   : > { %v1330_v9 = vpack.c.bf16 %v1095_v55, %v1094_v60  ;;  %v1071_v10 = vmul.f32 %v1853_v0, %v1049_v62  ;;  %1579 = vrsqrt.f32 %v1026_v3 }
 0x3f8   : > { %v1570_v11 = vpop.eup %1569  ;;  %v1027_v12 = vadd.f32 1e-05, %v1011_v8  ;;  %v1076_v63 = vmul.f32 %v1853_v0, %v1054_v5 }
 0x3f9   : > { %v1572_v39 = vpop.eup %1571  ;;  %1354 = vst [vmem:[%s1873_s13 + $0x18] sm:$0xff] %v1330_v9   ;;  %v1093_v17 = vadd.f32 %v1860_v13, %v1071_v10  ;;  %v1055_v18 = vmul.f32 %v1570_v11, %v1812_v7 }
 0x3fa   : > { %v1052_v6 = vmul.f32 %v1572_v39, %v1819_v14  ;;  %1581 = vrsqrt.f32 %v1027_v12  ;;  %v1098_v24 = vadd.f32 %v1860_v13, %v1076_v63 }
 0x3fb   : > { %v1325_v19 = vpack.c.bf16 %v1093_v17, %v1092_v16  ;;  %v1077_v20 = vmul.f32 %v1853_v0, %v1055_v18 }
 0x3fc   : > { %v1574_v22 = vpop.eup %1573  ;;  %v1074_v27 = vmul.f32 %v1853_v0, %v1052_v6 }
 0x3fd   : > { %v1576_v23 = vpop.eup %1575  ;;  %1353 = vst [vmem:[%s1873_s13 + $0x10] sm:$0xff] %v1325_v19   ;;  %v1099_v26 = vadd.f32 %v1860_v13, %v1077_v20  ;;  %v1053_v28 = vmul.f32 %v1574_v22, %v1822_v15 }
 0x3fe   : > { %v1056_v7 = vmul.f32 %v1576_v23, %v1829_v21  ;;  %v1096_v41 = vadd.f32 %v1860_v13, %v1074_v27 }
 0x3ff   : > { %v1340_v14 = vpack.c.bf16 %v1099_v26, %v1098_v24  ;;  %v1075_v29 = vmul.f32 %v1853_v0, %v1053_v28 }
 0x400   : > { %v1578_v46 = vpop.eup %1577  ;;  %v1078_v36 = vmul.f32 %v1853_v0, %v1056_v7 }
 0x401   : > { %v1580_v31 = vpop.eup %1579  ;;  %1356 = vst [vmem:[%s1873_s13 + $0x28] sm:$0xff] %v1340_v14   ;;  %v1097_v32 = vadd.f32 %v1860_v13, %v1075_v29  ;;  %v1057_v37 = vmul.f32 %v1578_v46, %v1834_v25 }
 0x402   : > { %v1058_v15 = vmul.f32 %v1580_v31, %v1839_v30  ;;  %v1100_v40 = vadd.f32 %v1860_v13, %v1078_v36 }
 0x403   : > { %v1335_v33 = vpack.c.bf16 %v1097_v32, %v1096_v41  ;;  %v1079_v21 = vmul.f32 %v1853_v0, %v1057_v37 }
 0x404   : > { %v1582_v38 = vpop.eup %1581  ;;  %v1080_v43 = vmul.f32 %v1853_v0, %v1058_v15 }
 0x405   : > { %1355 = vst [vmem:[%s1873_s13 + $0x20] sm:$0xff] %v1335_v33   ;;  %v1101_v42 = vadd.f32 %v1860_v13, %v1079_v21  ;;  %v1059_v47 = vmul.f32 %v1582_v38, %v1844_v35 }
 0x406   : > { %v1102_v25 = vadd.f32 %v1860_v13, %v1080_v43 }
 0x407   : > { %v1345_v44 = vpack.c.bf16 %v1101_v42, %v1100_v40  ;;  %v1081_v45 = vmul.f32 %v1853_v0, %v1059_v47 }
 0x409   : > { %1357 = vst [vmem:[%s1873_s13 + $0x30] sm:$0xff] %v1345_v44   ;;  %v1103_v30 = vadd.f32 %v1860_v13, %v1081_v45 }
 0x40b   : > { %v1350_v34 = vpack.c.bf16 %v1103_v30, %v1102_v25 }
 0x40d   : > { %1358 = vst [vmem:[%s1873_s13 + $0x38] sm:$0xff] %v1350_v34  }
 0x40e PF: > { %s19_s30 = sadd.s32 1, %s1589_s30  }
 0x40f   : > { %p16_p4 = scmp.ge.s32.totalorder %s19_s30, 4  }
 0x411   :  { %18 = sbr.rel (!%p16_p4) target bundleno = 1 (0x1), region = 86 }

// kernel: epd_forward.12
= control target key start
LH: loop header
LB: loop body
LE: loop exit
PB: predicated region body
PF: predicated region fallthrough
CT: control target
= control target key end

     0   :  { %s804_s12 = smov 0   ;;  %s806_s13 = smov 0   ;;  %s902_s0 = inlined_call_operand.vmem [shape: bf16[64,128], index: 0, kind: input, shape index: {}, may-alias: {0,3}]   ;;  %s903_s1 = inlined_call_operand.vmem [shape: bf16[256,128], index: 1, kind: input, shape index: {}]   ;;  %s904_s2 = inlined_call_operand.vmem [shape: s32[1,256], index: 2, kind: input, shape index: {}]   ;;  %s905_s3 = inlined_call_operand.vmem [shape: bf16[64,128], index: 3, kind: output, shape index: {}, may-alias: {0,3}]  }
   0x1   :  { %s808_s14 = smov 0   ;;  %s810_s15 = smov 0  }
   0x2   :  { %s812_s16 = smov 0  }
   0x3 LB: > { %s22_s17 = sadd.s32 1, %s770_s14  ;;  %s25_s18 = sadd.s32 1, %s774_s15  ;;  %s778_s16 = sphi %s812_s16, %s13_s16   ;;  %s774_s15 = sphi %s810_s15, %s909_s15   ;;  %s770_s14 = sphi %s808_s14, %s908_s14   ;;  %s766_s13 = sphi %s806_s13, %s907_s13   ;;  %s762_s12 = sphi %s804_s12, %s906_s12  }
   0x4   : > { %p23_p0 = scmp.ge.s32.totalorder %s22_s17, 2  ;;  %p591_p1 = scmp.ge.s32.totalorder %s778_s16, 1 }
   0x5   : > { %p169_p2 = scmp.lt.s32.totalorder %s778_s16, 5 }
   0x6   : > { %s911_s17 = smov (%p23_p0, %s22_s17), 0  ;;  %s913_s18 = smov (!%p23_p0, %s25_s18), %s774_s15 }
   0x7   : > { %p170_p3 = pnand %p591_p1, %p169_p2  ;;  %p27_p4 = scmp.ge.s32.totalorder %s913_s18, 2 }
   0x8   : > { %s592_s19 = sshll.u32 (!%p170_p3), %s766_s13, 2  ;;  %s594_s20 = sshll.u32 (!%p170_p3), %s762_s12, 4 }
   0x9   : > { %s915_s18 = smov (%p27_p4, %s913_s18), 0  ;;  %173 = sbr.rel (%p170_p3) target bundleno = 350 (0x15e), region = 32 }
   0xa   : > { %p202_p5 = scmp.lt.s32.totalorder (!%p170_p3), %s592_s19, 7  ;;  %p208_p6 = scmp.lt.s32.totalorder (!%p170_p3), %s594_s20, 31 }
   0xb   : > { %p213_p7 = scmp.lt.s32.totalorder (!%p170_p3), %s762_s12, 1  ;;  %p598_p8 = scmp.ne.s32.totalorder (!%p170_p3), %s762_s12, 0 }
  0x10   : > { %s917_s19 = smov (!%p202_p5, %s592_s19), 7  ;;  %s919_s20 = smov (!%p208_p6, %s594_s20), 31 }
  0x11   : > { %s593_s21 = sshll.u32 %s917_s19, 2  ;;  %s595_s25 = sshll.u32 %s919_s20, 2  ;;  %vm231_vm0 = vcmask (!%p598_p8), 7168   ;;  %v780_v0 = vmov (!%p598_p8), 0.0  }
  0x12   : > { %s844_s24 = scalar_lea.vmem %s902_s0, %s593_s21  ;;  %s849_s28 = scalar_lea.vmem %s903_s1, %s595_s25  ;;  %227 = vst [vmem:[#allocation2] sm:$0xff] (!%p598_p8), %v780_v0  ;;  %228 = vst [vmem:[#allocation2 + $0x8] sm:$0xff] (!%p598_p8), %v780_v0 }
  0x13   : > { %s854_s4 = scalar_lea.vmem %s905_s3, %s593_s21  ;;  %226 = sbr.rel (%p598_p8) target bundleno = 26 (0x1a), region = 36  ;;  %229 = vst [vmem:[#allocation2 + $0x10] sm:$0xff] (!%p598_p8), %v780_v0  ;;  %230 = vst [vmem:[#allocation2 + $0x18] sm:$0xff] (!%p598_p8), %v780_v0 }
  0x14   : > { %s857_s5 = scalar_select %p213_p7, %s762_s12, 1 }
  0x15   : > { %232 = vst.msk [vmem:[#allocation3] sm:$0xff] (!%p598_p8), %vm231_vm0, %v780_v0  ;;  %233 = vst.msk [vmem:[#allocation3 + $0x8] sm:$0xff] (!%p598_p8), %vm231_vm0, %v780_v0 }
  0x16   : > { %s215_s8 = scalar_lea.vmem %s904_s2, %s857_s5  ;;  %234 = vst.msk [vmem:[#allocation3 + $0x10] sm:$0xff] (!%p598_p8), %vm231_vm0, %v780_v0  ;;  %235 = vst.msk [vmem:[#allocation3 + $0x18] sm:$0xff] (!%p598_p8), %vm231_vm0, %v780_v0 }
  0x1a PF: > { %v722_v1 = vld [vmem:[%s849_s28] sm:$0xff]   ;;  %s599_s9 = sshll.u32 %s766_s13, 5  ;;  %v238_v2 = vlaneseq  ;;  %v723_v3 = vld [vmem:[%s849_s28 + $0x8] sm:$0xff]   ;;  %v724_v6 = vld [vmem:[%s849_s28 + $0x10] sm:$0xff]   ;;  %v781_v16 = vmov 0.0   ;;  %vm417_vm7 = vcmask 7168  }
  0x1b   : > { %658 = vmatprep.subr.bf16.mxu0 %v722_v1  ;;  %v243_v5 = vstv %s599_s9  ;;  %v725_v13 = vld [vmem:[%s849_s28 + $0x18] sm:$0xff]   ;;  %v600_v14 = vld [vmem:[%s215_s8] ss:$0 sm:$0xff]  ;;  %v782_v19 = vmov 1.0|1.0   ;;  %v727_v23 = vld [vmem:[%s849_s28 + $0x28] sm:$0xff]  }
  0x1c   : > { %v239_v4 = vshrl.u32 %v238_v2, 7  ;;  %659 = vmatpush3.bf16.msra.mxu0 %v722_v1  ;;  %v726_v20 = vld [vmem:[%s849_s28 + $0x20] sm:$0xff]   ;;  %v728_v24 = vld [vmem:[%s849_s28 + $0x30] sm:$0xff]   ;;  %v729_v25 = vld [vmem:[%s849_s28 + $0x38] sm:$0xff]   ;;  %p617_p9 = scmp.ne.s32.totalorder %s762_s12, 1 }
  0x1d   : > { %660 = vmatprep.subr.bf16.mxu0 %v723_v3  ;;  %v393_v31 = vld [vmem:[#allocation3 + $0x10] sm:$0xff]  ;;  %v394_v32 = vld [vmem:[#allocation3 + $0x18] sm:$0xff]  ;;  %v391_v36 = vld [vmem:[#allocation3] sm:$0xff]  ;;  %v783_v59 = vmov (!%p617_p9), 0  }
  0x1e   : > { %v240_v7 = vadd.s32 8, %v239_v4  ;;  %v244_v8 = vadd.s32 %v243_v5, %v239_v4  ;;  %v241_v9 = vadd.s32 16, %v239_v4  ;;  %v242_v11 = vadd.s32 24, %v239_v4  ;;  %v392_v37 = vld [vmem:[#allocation3 + $0x8] sm:$0xff]  ;;  %v268_v44 = vld [vmem:[#allocation2 + $0x10] sm:$0xff]  ;;  %v266_v45 = vld [vmem:[#allocation2] sm:$0xff]  ;;  %731 = vset.pattern.permute.xlu1 (!%p617_p9), %v783_v59  ;;  %730 = vset.pattern.permute.xlu0 (!%p617_p9), %v783_v59 }
  0x1f   : > { %v269_v47 = vld [vmem:[#allocation2 + $0x18] sm:$0xff]  ;;  %v267_v50 = vld [vmem:[#allocation2 + $0x8] sm:$0xff] }
  0x20   : > { %v245_v10 = vadd.s32 %v243_v5, %v240_v7  ;;  %661 = vmatpush3.bf16.msra.mxu0 %v723_v3  ;;  %v246_v12 = vadd.s32 %v243_v5, %v241_v9  ;;  %v247_v15 = vadd.s32 %v243_v5, %v242_v11  ;;  %vm252_vm1 = vcmp.eq.s32.totalorder %v244_v8, %v600_v14  ;;  %v646_v5 = vld [vmem:[%s844_s24 + $0x8] sm:$0xff] (!%p617_p9)   ;;  %v629_v8 = vld [vmem:[%s844_s24] sm:$0xff] (!%p617_p9)  }
  0x21   : > { %662 = vmatprep.subr.bf16.mxu0 %v724_v6  ;;  %v601_v18 = vsel %vm252_vm1, 1.0, %v781_v16 }
  0x22   : > { %vm253_vm2 = vcmp.eq.s32.totalorder %v245_v10, %v600_v14  ;;  %vm254_vm3 = vcmp.eq.s32.totalorder %v246_v12, %v600_v14  ;;  %vm255_vm5 = vcmp.eq.s32.totalorder %v247_v15, %v600_v14  ;;  %399 = vadd.xlane.f32.xlu0 %v601_v18  ;;  %v634_v12 = vunpack.c.l.bf16 (!%p617_p9), %v646_v5 }
  0x23   : > { %vm613_vm4 = vmpackc.low %vm253_vm2, %vm252_vm1  ;;  %v603_v17 = vsel %vm254_vm3, 1.0, %v781_v16  ;;  %v604_v21 = vsel %vm255_vm5, 1.0, %v781_v16  ;;  %v602_v22 = vsel %vm253_vm2, 1.0, %v781_v16  ;;  %v635_v14 = vunpack.c.h.bf16 (!%p617_p9), %v646_v5 }
  0x24   : > { %663 = vmatpush3.bf16.msra.mxu0 %v724_v6  ;;  %674 = vmatprep.mubr.msk.bf16.mxu0 %vm613_vm4, %v782_v19  ;;  %vm615_vm6 = vmpackc.low %vm255_vm5, %vm254_vm3  ;;  %v630_v16 = vunpack.c.l.bf16 (!%p617_p9), %v629_v8 }
  0x25   : > { %664 = vmatprep.subr.bf16.mxu0 %v725_v13  ;;  %403 = vadd.xlane.f32.xlu1 %v603_v17 }
  0x26   : > { %401 = vadd.xlane.f32.xlu0 %v602_v22 }
  0x28   : > { %665 = vmatpush3.bf16.msra.mxu0 %v725_v13 }
  0x29   : > { %666 = vmatprep.subr.bf16.mxu0 %v726_v20  ;;  %405 = vadd.xlane.f32.xlu1 %v604_v21 }
  0x2c   : > { %667 = vmatpush3.bf16.msra.mxu0 %v726_v20 }
  0x2d   : > { %668 = vmatprep.subr.bf16.mxu0 %v727_v23 }
  0x30   : > { %669 = vmatpush3.bf16.msra.mxu0 %v727_v23 }
  0x31   : > { %670 = vmatprep.subr.bf16.mxu0 %v728_v24 }
  0x34   : > { %671 = vmatpush3.bf16.msra.mxu0 %v728_v24 }
  0x35   : > { %672 = vmatprep.subr.bf16.mxu0 %v729_v25 }
  0x38   : > { %673 = vmatpush3.bf16.msra.mxu0 %v729_v25 }
  0x3b   : > { %675 = vmatmul.mubr.msk.bf16.vlgmr.msra.gmra.mrb[0].mxu0 %vm615_vm6, %v782_v19  ;;  %v631_v19 = vunpack.c.h.bf16 (!%p617_p9), %v629_v8 }
  0xaf   : > { %v400_v27 = vpop.xlane.xlu0 %399 }
  0xb2   : > { %v404_v26 = vpop.xlane.xlu1 %403 }
  0xb3   : > { %v402_v30 = vpop.xlane.xlu0 %401 }
  0xb4   : > { %v407_v33 = vpack.c.bf16 %v402_v30, %v400_v27 }
  0xb6   : > { %v406_v28 = vpop.xlane.xlu1 %405  ;;  %v409_v38 = vunpack.c.l.bf16 %v407_v33  ;;  %v410_v39 = vunpack.c.h.bf16 %v407_v33 }
  0xb7   : > { %v408_v29 = vpack.c.bf16 %v406_v28, %v404_v26 }
  0xb8   : > { %v413_v42 = vadd.f32 %v409_v38, %v391_v36  ;;  %v414_v43 = vadd.f32 %v410_v39, %v392_v37 }
  0xb9   : > { %v411_v34 = vunpack.c.l.bf16 %v408_v29  ;;  %v412_v35 = vunpack.c.h.bf16 %v408_v29 }
  0xba   : > { %418 = vst.msk [vmem:[#allocation3] sm:$0xff] %vm417_vm7, %v413_v42  ;;  %419 = vst.msk [vmem:[#allocation3 + $0x8] sm:$0xff] %vm417_vm7, %v414_v43 }
  0xbb   : > { %v415_v40 = vadd.f32 %v411_v34, %v393_v31  ;;  %v416_v41 = vadd.f32 %v412_v35, %v394_v32 }
  0xbd   : > { %420 = vst.msk [vmem:[#allocation3 + $0x10] sm:$0xff] %vm417_vm7, %v415_v40  ;;  %421 = vst.msk [vmem:[#allocation3 + $0x18] sm:$0xff] %vm417_vm7, %v416_v41 }
  0xc1   : > { %v426_v57 = vld [vmem:[#allocation3] sm:$0xff] (!%p617_p9)  ;;  %v427_v63 = vld [vmem:[#allocation3 + $0x8] sm:$0xff] (!%p617_p9) }
  0xc2   : > { %v430_v61 = vmax.f32 (!%p617_p9), %v426_v57, 1.0  ;;  %v431_v0 = vmax.f32 (!%p617_p9), %v427_v63, 1.0 }
  0xc4   : > { %v428_v56 = vld [vmem:[#allocation3 + $0x10] sm:$0xff] (!%p617_p9)  ;;  %v429_v58 = vld [vmem:[#allocation3 + $0x18] sm:$0xff] (!%p617_p9) }
  0xc5   : > { %v432_v60 = vmax.f32 (!%p617_p9), %v428_v56, 1.0  ;;  %v433_v62 = vmax.f32 (!%p617_p9), %v429_v58, 1.0 }
  0xc7   : > { %732 = vrcp.f32 (!%p617_p9), %v432_v60 }
  0xc8   : > { %734 = vrcp.f32 (!%p617_p9), %v430_v61 }
  0xc9   : > { %736 = vrcp.f32 (!%p617_p9), %v433_v62 }
  0xca   : > { %738 = vrcp.f32 (!%p617_p9), %v431_v0 }
  0xd1   : > { %v733_v1 = vpop.eup (!%p617_p9), %732 }
  0xd2   : > { %v735_v2 = vpop.eup (!%p617_p9), %734  ;;  %462 = vperm.xlu1 (!%p617_p9), %731, %v733_v1  }
  0xd3   : > { %v737_v3 = vpop.eup (!%p617_p9), %736  ;;  %452 = vperm.xlu0 (!%p617_p9), %730, %v735_v2  }
  0xd4   : > { %v739_v4 = vpop.eup (!%p617_p9), %738 }
  0xd6   : > { %467 = vperm.xlu1 (!%p617_p9), %731, %v737_v3  }
  0xd7   : > { %457 = vperm.xlu0 (!%p617_p9), %730, %v739_v4  }
 0x10e   : > { %v676_v46 = vpop.f32.mrb[0].mxu0  ;;  %425 = sbr.rel (%p617_p9) target bundleno = 350 (0x15e), region = 40 }
 0x10f   : > { %v385_v48 = vadd.f32 %v676_v46, %v268_v44  ;;  %v368_v49 = vpop.f32.mrb[1].mxu0 }
 0x110   : > { %v383_v51 = vadd.f32 %v368_v49, %v266_v45  ;;  %v677_v52 = vpop.f32.mrb[2].mxu0 }
 0x111   : > { %389 = vst [vmem:[#allocation2 + $0x10] sm:$0xff] %v385_v48  ;;  %v386_v53 = vadd.f32 %v677_v52, %v269_v47  ;;  %v371_v54 = vpop.f32.mrb[3].mxu0 }
 0x112   : > { %387 = vst [vmem:[#allocation2] sm:$0xff] %v383_v51  ;;  %v384_v55 = vadd.f32 %v371_v54, %v267_v50 }
 0x113   : > { %390 = vst [vmem:[#allocation2 + $0x18] sm:$0xff] %v386_v53 }
 0x114   : > { %388 = vst [vmem:[#allocation2 + $0x8] sm:$0xff] %v384_v55 }
 0x118   : > { %v448_v6 = vld [vmem:[#allocation2 + $0x10] sm:$0xff] }
 0x119   : > { %v446_v9 = vld [vmem:[#allocation2] sm:$0xff] }
 0x11a   : > { %v449_v11 = vld [vmem:[#allocation2 + $0x18] sm:$0xff] }
 0x11b   : > { %v447_v15 = vld [vmem:[#allocation2 + $0x8] sm:$0xff] }
 0x151   : > { %v463_v7 = vpop.permute.xlu1 %462 }
 0x152   : > { %v453_v10 = vpop.permute.xlu0 %452  ;;  %v472_v13 = vmul.f32 %v463_v7, %v448_v6 }
 0x153   : > { %v470_v17 = vmul.f32 %v453_v10, %v446_v9 }
 0x154   : > { %v476_v23 = vadd.f32 %v634_v12, %v472_v13 }
 0x155   : > { %v468_v18 = vpop.permute.xlu1 %467  ;;  %v474_v25 = vadd.f32 %v630_v16, %v470_v17 }
 0x156   : > { %v473_v20 = vmul.f32 %v468_v18, %v449_v11  ;;  %v458_v21 = vpop.permute.xlu0 %457 }
 0x157   : > { %v471_v22 = vmul.f32 %v458_v21, %v447_v15 }
 0x158   : > { %v477_v24 = vadd.f32 %v635_v14, %v473_v20 }
 0x159   : > { %v475_v26 = vadd.f32 %v631_v19, %v471_v22 }
 0x15a   : > { %v644_v27 = vpack.c.bf16 %v477_v24, %v476_v23 }
 0x15b   : > { %v639_v28 = vpack.c.bf16 %v475_v26, %v474_v25 }
 0x15c   : > { %647 = vst [vmem:[%s854_s4 + $0x8] sm:$0xff] %v644_v27  }
 0x15d   : > { %640 = vst [vmem:[%s854_s4] sm:$0xff] %v639_v28  }
 0x15e PF: > { %s13_s16 = sadd.s32 1, %s778_s16   ;;  %s906_s12 = smov %s770_s14 }
 0x15f   : > { %p10_p10 = scmp.ge.s32.totalorder %s13_s16, 6   ;;  %s907_s13 = smov %s774_s15 }
 0x160   : > { %s908_s14 = smov %s911_s17  ;;  %s909_s15 = smov %s915_s18 }
 0x161   :  { %12 = sbr.rel (!%p10_p10) target bundleno = 3 (0x3), region = 76 }

// kernel: epd_forward.13
= control target key start
LH: loop header
LB: loop body
LE: loop exit
PB: predicated region body
PF: predicated region fallthrough
CT: control target
= control target key end

     0   :  { %s3187_s25 = smov 0   ;;  %s3763_s0 = inlined_call_operand.vmem [shape: s32[256,1], index: 0, kind: input, shape index: {}]   ;;  %s3764_s1 = inlined_call_operand.vmem [shape: s32[256,1], index: 1, kind: input, shape index: {}]   ;;  %s3765_s2 = inlined_call_operand.vmem [shape: bf16[64,128], index: 2, kind: input, shape index: {}]   ;;  %s3766_s3 = inlined_call_operand.vmem [shape: bf16[256,128], index: 3, kind: input, shape index: {}]   ;;  %s3767_s4 = inlined_call_operand.vmem [shape: bf16[384,128], index: 4, kind: input, shape index: {}]   ;;  %s3768_s5 = inlined_call_operand.vmem [shape: f32[1,128], index: 5, kind: input, shape index: {}]   ;;  %s3769_s6 = inlined_call_operand.vmem [shape: bf16[128,128], index: 6, kind: input, shape index: {}]   ;;  %s3770_s7 = inlined_call_operand.vmem [shape: f32[1,128], index: 7, kind: input, shape index: {}]   ;;  %s3771_s8 = inlined_call_operand.vmem [shape: bf16[128,128], index: 8, kind: input, shape index: {}]   ;;  %s3772_s9 = inlined_call_operand.vmem [shape: f32[1,128], index: 9, kind: input, shape index: {}]   ;;  %s3773_s10 = inlined_call_operand.vmem [shape: f32[1,128], index: 10, kind: input, shape index: {}]   ;;  %s3774_s11 = inlined_call_operand.vmem [shape: f32[1,128], index: 11, kind: input, shape index: {}]   ;;  %s3775_s12 = inlined_call_operand.vmem [shape: bf16[256,128], index: 12, kind: output, shape index: {0}]   ;;  %s3776_s13 = inlined_call_operand.vmem [shape: bf16[256,128], index: 13, kind: output, shape index: {1}]  }
   0x1 LB: > { %s2422_s26 = sadd.s32 4294967295, %s3113_s25   ;;  %p2426_p0 = scmp.ge.s32.totalorder %s3113_s25, 1  ;;  %s3113_s25 = sphi %s3187_s25, %s24_s25  }
   0x2   : > { %p413_p1 = scmp.lt.s32.totalorder %s3113_s25, 3 }
   0x4   : > { %p414_p2 = pnand %p2426_p0, %p413_p1 }
   0x5   : > { %s2427_s27 = sshll.u32 (!%p414_p2), %s2422_s26, 4  ;;  %v3115_v0 = vmov (!%p414_p2), 0   ;;  %v3010_v1 = vld [vmem:[%s3765_s2] sm:$0xff] (!%p414_p2)   ;;  %v3011_v2 = vld [vmem:[%s3765_s2 + $0x8] sm:$0xff] (!%p414_p2)   ;;  %v3012_v11 = vld [vmem:[%s3765_s2 + $0x10] sm:$0xff] (!%p414_p2)   ;;  %v503_v39 = vlaneseq (!%p414_p2)  ;;  %vm777_vm4 = vcmask (!%p414_p2), 523264  }
   0x6   : > { %417 = sbr.rel (%p414_p2) target bundleno = 1416 (0x588), region = 68  ;;  %3009 = vset.pattern.permute.xlu1 (!%p414_p2), %v3115_v0  ;;  %3008 = vset.pattern.permute.xlu0 (!%p414_p2), %v3115_v0  ;;  %p473_p3 = scmp.lt.s32.totalorder (!%p414_p2), %s2427_s27, 31  ;;  %v3013_v12 = vld [vmem:[%s3765_s2 + $0x18] sm:$0xff] (!%p414_p2)   ;;  %v3014_v37 = vld [vmem:[%s3767_s4 + $0x40] sm:$0xff] (!%p414_p2)   ;;  %v3116_v45 = vmov (!%p414_p2), 0.0   ;;  %v3021_v57 = vld [vmem:[%s3767_s4 + $0x88] sm:$0xff] (!%p414_p2)  }
   0x7   : > { %2862 = vmatprep.subr.bf16.mxu1 (!%p414_p2), %v3010_v1  ;;  %2838 = vmatprep.subr.bf16.mxu0 (!%p414_p2), %v3010_v1  ;;  %v3018_v38 = vld [vmem:[%s3767_s4 + $0x80] sm:$0xff] (!%p414_p2)   ;;  %v3258_v40 = vand.u32 (!%p414_p2), 127, %v503_v39  ;;  %v3016_v0 = vld [vmem:[%s3767_s4 + $0x48] sm:$0xff] (!%p414_p2)  }
   0x8   : > { %2863 = vmatpush3.bf16.msra.mxu1 (!%p414_p2), %v3010_v1  ;;  %2839 = vmatpush3.bf16.msra.mxu0 (!%p414_p2), %v3010_v1  ;;  %v3015_v62 = vld [vmem:[%s3767_s4] sm:$0xff] (!%p414_p2)   ;;  %v3024_v1 = vld [vmem:[%s3767_s4 + $0x90] sm:$0xff] (!%p414_p2)  }
   0x9   : > { %2864 = vmatprep.subr.bf16.mxu1 (!%p414_p2), %v3011_v2  ;;  %2840 = vmatprep.subr.bf16.mxu0 (!%p414_p2), %v3011_v2 }
   0xc   : > { %2865 = vmatpush3.bf16.msra.mxu1 (!%p414_p2), %v3011_v2  ;;  %2841 = vmatpush3.bf16.msra.mxu0 (!%p414_p2), %v3011_v2 }
   0xd   : > { %s3778_s27 = smov (!%p473_p3, %s2427_s27), 31  ;;  %2866 = vmatprep.subr.bf16.mxu1 %v3012_v11  ;;  %2842 = vmatprep.subr.bf16.mxu0 %v3012_v11 }
   0xe   : > { %s2428_s30 = sshll.u32 %s3778_s27, 3  ;;  %s3404_s29 = sshll.u32 %s3778_s27, 2 }
   0xf   : > { %s3204_s16 = scalar_lea.vmem %s3764_s1, %s2428_s30  ;;  %s3209_s19 = scalar_lea.vmem %s3763_s0, %s2428_s30 }
  0x10   : > { %v625_v3 = vld [vmem:[%s3204_s16] sm:$0xff]  ;;  %v626_v5 = vld [vmem:[%s3204_s16 + $0x8] sm:$0xff]  ;;  %v627_v7 = vld [vmem:[%s3204_s16 + $0x10] sm:$0xff]  ;;  %2867 = vmatpush3.bf16.msra.mxu1 %v3012_v11  ;;  %2843 = vmatpush3.bf16.msra.mxu0 %v3012_v11  ;;  %s3413_s17 = scalar_lea.vmem %s3766_s3, %s3404_s29  ;;  %s3698_s22 = scalar_lea.vmem %s3776_s13, %s3404_s29 }
  0x11   : > { %v505_v4 = vld [vmem:[%s3209_s19] sm:$0xff]  ;;  %642 = vperm.xlu0 %3008, %v625_v3   ;;  %v506_v6 = vld [vmem:[%s3209_s19 + $0x8] sm:$0xff]  ;;  %v628_v8 = vld [vmem:[%s3204_s16 + $0x18] sm:$0xff]  ;;  %2868 = vmatprep.subr.bf16.mxu1 %v3013_v12 }
  0x12   : > { %522 = vperm.xlu1 %3009, %v505_v4   ;;  %v507_v9 = vld [vmem:[%s3209_s19 + $0x10] sm:$0xff]  ;;  %v508_v10 = vld [vmem:[%s3209_s19 + $0x18] sm:$0xff]  ;;  %v629_v13 = vld [vmem:[%s3204_s16 + $0x20] sm:$0xff]  ;;  %2844 = vmatprep.subr.bf16.mxu0 %v3013_v12 }
  0x13   : > { %v630_v14 = vld [vmem:[%s3204_s16 + $0x28] sm:$0xff]  ;;  %v509_v15 = vld [vmem:[%s3209_s19 + $0x20] sm:$0xff]  ;;  %v631_v17 = vld [vmem:[%s3204_s16 + $0x30] sm:$0xff] }
  0x14   : > { %v510_v16 = vld [vmem:[%s3209_s19 + $0x28] sm:$0xff]  ;;  %2869 = vmatpush3.bf16.msra.mxu1 %v3013_v12  ;;  %2845 = vmatpush3.bf16.msra.mxu0 %v3013_v12  ;;  %v632_v18 = vld [vmem:[%s3204_s16 + $0x38] sm:$0xff]  ;;  %v511_v19 = vld [vmem:[%s3209_s19 + $0x30] sm:$0xff] }
  0x15   : > { %645 = vperm.xlu0 %3008, %v626_v5   ;;  %v512_v20 = vld [vmem:[%s3209_s19 + $0x38] sm:$0xff]  ;;  %v633_v21 = vld [vmem:[%s3204_s16 + $0x40] sm:$0xff]  ;;  %v634_v22 = vld [vmem:[%s3204_s16 + $0x48] sm:$0xff]  ;;  %2726 = vmatprep.subr.bf16.mxu0 %v3014_v37 }
  0x16   : > { %525 = vperm.xlu1 %3009, %v506_v6   ;;  %v513_v23 = vld [vmem:[%s3209_s19 + $0x40] sm:$0xff]  ;;  %v514_v24 = vld [vmem:[%s3209_s19 + $0x48] sm:$0xff]  ;;  %v635_v25 = vld [vmem:[%s3204_s16 + $0x50] sm:$0xff]  ;;  %2886 = vmatprep.subr.bf16.mxu1 %v3018_v38 }
  0x17   : > { %v636_v26 = vld [vmem:[%s3204_s16 + $0x58] sm:$0xff]  ;;  %v515_v27 = vld [vmem:[%s3209_s19 + $0x50] sm:$0xff]  ;;  %v637_v29 = vld [vmem:[%s3204_s16 + $0x60] sm:$0xff] }
  0x18   : > { %v516_v28 = vld [vmem:[%s3209_s19 + $0x58] sm:$0xff]  ;;  %v638_v30 = vld [vmem:[%s3204_s16 + $0x68] sm:$0xff]  ;;  %v517_v31 = vld [vmem:[%s3209_s19 + $0x60] sm:$0xff] }
  0x19   : > { %648 = vperm.xlu0 %3008, %v627_v7   ;;  %v518_v32 = vld [vmem:[%s3209_s19 + $0x68] sm:$0xff]  ;;  %v639_v33 = vld [vmem:[%s3204_s16 + $0x70] sm:$0xff]  ;;  %v640_v34 = vld [vmem:[%s3204_s16 + $0x78] sm:$0xff] }
  0x1a   : > { %651 = vperm.xlu1 %3009, %v628_v8   ;;  %v519_v35 = vld [vmem:[%s3209_s19 + $0x70] sm:$0xff]  ;;  %v520_v36 = vld [vmem:[%s3209_s19 + $0x78] sm:$0xff]  ;;  %v3017_v6 = vld [vmem:[%s3767_s4 + $0x8] sm:$0xff]   ;;  %s3691_s19 = scalar_lea.vmem %s3775_s12, %s3404_s29 }
  0x1b   : > { %v3019_v8 = vld [vmem:[%s3767_s4 + $0x50] sm:$0xff]  }
  0x1d   : > { %528 = vperm.xlu0 %3008, %v507_v9   ;;  %v3027_v9 = vld [vmem:[%s3767_s4 + $0x98] sm:$0xff]  }
  0x1e   : > { %531 = vperm.xlu1 %3009, %v508_v10  }
  0x21   : > { %654 = vperm.xlu0 %3008, %v629_v13  }
  0x22   : > { %657 = vperm.xlu1 %3009, %v630_v14   ;;  %v3020_v14 = vld [vmem:[%s3767_s4 + $0x10] sm:$0xff]  }
  0x25   : > { %534 = vperm.xlu0 %3008, %v509_v15  }
  0x26   : > { %537 = vperm.xlu1 %3009, %v510_v16   ;;  %v3022_v16 = vld [vmem:[%s3767_s4 + $0x58] sm:$0xff]  }
  0x29   : > { %660 = vperm.xlu0 %3008, %v631_v17   ;;  %v3030_v17 = vld [vmem:[%s3767_s4 + $0xa0] sm:$0xff]  }
  0x2a   : > { %663 = vperm.xlu1 %3009, %v632_v18  }
  0x2d   : > { %540 = vperm.xlu0 %3008, %v511_v19  }
  0x2e   : > { %543 = vperm.xlu1 %3009, %v512_v20  }
  0x31   : > { %666 = vperm.xlu0 %3008, %v633_v21  }
  0x32   : > { %669 = vperm.xlu1 %3009, %v634_v22   ;;  %v3023_v22 = vld [vmem:[%s3767_s4 + $0x18] sm:$0xff]  }
  0x35   : > { %546 = vperm.xlu0 %3008, %v513_v23  }
  0x36   : > { %549 = vperm.xlu1 %3009, %v514_v24   ;;  %v3025_v24 = vld [vmem:[%s3767_s4 + $0x60] sm:$0xff]  }
  0x39   : > { %672 = vperm.xlu0 %3008, %v635_v25  }
  0x3a   : > { %675 = vperm.xlu1 %3009, %v636_v26  }
  0x3d   : > { %552 = vperm.xlu0 %3008, %v515_v27  }
  0x3e   : > { %555 = vperm.xlu1 %3009, %v516_v28  }
  0x41   : > { %678 = vperm.xlu0 %3008, %v637_v29   ;;  %v3026_v29 = vld [vmem:[%s3767_s4 + $0x20] sm:$0xff]  }
  0x42   : > { %681 = vperm.xlu1 %3009, %v638_v30  }
  0x45   : > { %558 = vperm.xlu0 %3008, %v517_v31   ;;  %v3028_v31 = vld [vmem:[%s3767_s4 + $0x68] sm:$0xff]  }
  0x46   : > { %561 = vperm.xlu1 %3009, %v518_v32  }
  0x49   : > { %684 = vperm.xlu0 %3008, %v639_v33  }
  0x4a   : > { %687 = vperm.xlu1 %3009, %v640_v34  }
  0x4d   : > { %564 = vperm.xlu0 %3008, %v519_v35  }
  0x4e   : > { %567 = vperm.xlu1 %3009, %v520_v36   ;;  %v3029_v36 = vld [vmem:[%s3767_s4 + $0x28] sm:$0xff]  }
  0x90   : > { %v643_v41 = vpop.permute.xlu0 %642 }
  0x91   : > { %v523_v42 = vpop.permute.xlu1 %522  ;;  %vm689_vm0 = vcmp.eq.s32.totalorder %v643_v41, %v3258_v40 }
  0x92   : > { %vm569_vm1 = vcmp.eq.s32.totalorder %v523_v42, %v3258_v40  ;;  %v2453_v46 = vsel %vm689_vm0, 1.0, %v3116_v45 }
  0x93   : > { %v2437_v47 = vsel %vm569_vm1, 1.0, %v3116_v45 }
  0x94   : > { %v646_v43 = vpop.permute.xlu0 %645 }
  0x95   : > { %v526_v44 = vpop.permute.xlu1 %525  ;;  %vm690_vm2 = vcmp.eq.s32.totalorder %v646_v43, %v3258_v40 }
  0x96   : > { %vm570_vm3 = vcmp.eq.s32.totalorder %v526_v44, %v3258_v40  ;;  %v2454_v48 = vsel %vm690_vm2, 1.0, %v3116_v45 }
  0x97   : > { %v2438_v49 = vsel %vm570_vm3, 1.0, %v3116_v45  ;;  %v737_v51 = vpack.c.bf16 %v2454_v48, %v2453_v46 }
  0x98   : > { %v617_v50 = vpack.c.bf16 %v2438_v49, %v2437_v47  ;;  %v649_v52 = vpop.permute.xlu0 %648 }
  0x99   : > { %v652_v53 = vpop.permute.xlu1 %651  ;;  %vm691_vm5 = vcmp.eq.s32.totalorder %v649_v52, %v3258_v40  ;;  %2870 = vmatprep.mubr.msk.bf16.mxu1 %vm777_vm4, %v737_v51 }
  0x9a   : > { %vm692_vm6 = vcmp.eq.s32.totalorder %v652_v53, %v3258_v40  ;;  %2846 = vmatprep.mubr.msk.bf16.mxu0 %vm777_vm4, %v617_v50  ;;  %v2455_v54 = vsel %vm691_vm5, 1.0, %v3116_v45 }
  0x9b   : > { %v2456_v55 = vsel %vm692_vm6, 1.0, %v3116_v45 }
  0x9c   : > { %v738_v56 = vpack.c.bf16 %v2456_v55, %v2455_v54  ;;  %v529_v58 = vpop.permute.xlu0 %528 }
  0x9d   : > { %v532_v59 = vpop.permute.xlu1 %531  ;;  %vm571_vm7 = vcmp.eq.s32.totalorder %v529_v58, %v3258_v40 }
  0x9e   : > { %vm572_vm8 = vcmp.eq.s32.totalorder %v532_v59, %v3258_v40  ;;  %2871 = vmatmul.mubr.msk.bf16.vlgmr.msra.gmra.mrb[0].mxu1 %vm777_vm4, %v738_v56  ;;  %v2439_v60 = vsel %vm571_vm7, 1.0, %v3116_v45 }
  0x9f   : > { %v2440_v61 = vsel %vm572_vm8, 1.0, %v3116_v45  ;;  %2887 = vmatpush3.bf16.msra.mxu1 %v3018_v38 }
  0xa0   : > { %v618_v63 = vpack.c.bf16 %v2440_v61, %v2439_v60  ;;  %2888 = vmatprep.subr.bf16.mxu1 %v3021_v57  ;;  %v655_v2 = vpop.permute.xlu0 %654 }
  0xa1   : > { %v658_v3 = vpop.permute.xlu1 %657  ;;  %vm693_vm9 = vcmp.eq.s32.totalorder %v655_v2, %v3258_v40 }
  0xa2   : > { %vm694_vm10 = vcmp.eq.s32.totalorder %v658_v3, %v3258_v40  ;;  %2847 = vmatmul.mubr.msk.bf16.vlgmr.msra.gmra.mrb[0].mxu0 %vm777_vm4, %v618_v63  ;;  %v2457_v4 = vsel %vm693_vm9, 1.0, %v3116_v45 }
  0xa3   : > { %v2458_v5 = vsel %vm694_vm10, 1.0, %v3116_v45  ;;  %2727 = vmatpush3.bf16.msra.mxu0 %v3015_v62  ;;  %2889 = vmatpush3.bf16.msra.mxu1 %v3021_v57 }
  0xa4   : > { %v739_v7 = vpack.c.bf16 %v2458_v5, %v2457_v4  ;;  %2728 = vmatprep.subr.bf16.mxu0 %v3016_v0  ;;  %2890 = vmatprep.subr.bf16.mxu1 %v3024_v1  ;;  %v535_v10 = vpop.permute.xlu0 %534 }
  0xa5   : > { %v538_v11 = vpop.permute.xlu1 %537  ;;  %vm573_vm11 = vcmp.eq.s32.totalorder %v535_v10, %v3258_v40 }
  0xa6   : > { %vm574_vm12 = vcmp.eq.s32.totalorder %v538_v11, %v3258_v40  ;;  %2874 = vmatprep.mubr.msk.bf16.mxu1 %vm777_vm4, %v739_v7  ;;  %v2441_v12 = vsel %vm573_vm11, 1.0, %v3116_v45  ;;  %v3031_v11 = vld [vmem:[%s3767_s4 + $0x70] sm:$0xff]  }
  0xa7   : > { %v2442_v13 = vsel %vm574_vm12, 1.0, %v3116_v45  ;;  %2729 = vmatpush3.bf16.msra.mxu0 %v3017_v6  ;;  %2891 = vmatpush3.bf16.msra.mxu1 %v3024_v1 }
  0xa8   : > { %v619_v15 = vpack.c.bf16 %v2442_v13, %v2441_v12  ;;  %2730 = vmatprep.subr.bf16.mxu0 %v3019_v8  ;;  %2892 = vmatprep.subr.bf16.mxu1 %v3027_v9  ;;  %v661_v18 = vpop.permute.xlu0 %660  ;;  %v3033_v12 = vld [vmem:[%s3767_s4 + $0xa8] sm:$0xff]   ;;  %v3036_v13 = vld [vmem:[%s3767_s4 + $0xb0] sm:$0xff]  }
  0xa9   : > { %v664_v19 = vpop.permute.xlu1 %663  ;;  %vm695_vm13 = vcmp.eq.s32.totalorder %v661_v18, %v3258_v40  ;;  %v1024_v18 = vld [vmem:[%s3413_s17 + $0x10] sm:$0xff]  }
  0xaa   : > { %vm696_vm14 = vcmp.eq.s32.totalorder %v664_v19, %v3258_v40  ;;  %2850 = vmatprep.mubr.msk.bf16.mxu0 %vm777_vm4, %v619_v15  ;;  %v2459_v20 = vsel %vm695_vm13, 1.0, %v3116_v45  ;;  %v3037_v15 = vld [vmem:[%s3767_s4 + $0xb8] sm:$0xff]  }
  0xab   : > { %v2460_v21 = vsel %vm696_vm14, 1.0, %v3116_v45  ;;  %2731 = vmatpush3.bf16.msra.mxu0 %v3020_v14  ;;  %2893 = vmatpush3.bf16.msra.mxu1 %v3027_v9  ;;  %v3035_v14 = vld [vmem:[%s3767_s4 + $0x38] sm:$0xff]  }
  0xac   : > { %v740_v23 = vpack.c.bf16 %v2460_v21, %v2459_v20  ;;  %2732 = vmatprep.subr.bf16.mxu0 %v3022_v16  ;;  %2894 = vmatprep.subr.bf16.mxu1 %v3030_v17  ;;  %v541_v25 = vpop.permute.xlu0 %540  ;;  %v3416_v16 = vld [vmem:[%s3413_s17] sm:$0xff]   ;;  %v3425_v19 = vld [vmem:[%s3413_s17 + $0x18] sm:$0xff]   ;;  %v1030_v21 = vld [vmem:[%s3413_s17 + $0x28] sm:$0xff]  }
  0xad   : > { %v544_v26 = vpop.permute.xlu1 %543  ;;  %vm575_vm15 = vcmp.eq.s32.totalorder %v541_v25, %v3258_v40  ;;  %v1028_v20 = vld [vmem:[%s3413_s17 + $0x20] sm:$0xff]   ;;  %v3047_v25 = vld [vmem:[%s3769_s6 + $0x8] sm:$0xff]  }
  0xae   : > { %vm576_vm0 = vcmp.eq.s32.totalorder %v544_v26, %v3258_v40  ;;  %2875 = vmatmul.mubr.msk.bf16.gmra.mrb[4].mxu1 %vm777_vm4, %v740_v23  ;;  %v2443_v27 = vsel %vm575_vm15, 1.0, %v3116_v45  ;;  %v1034_v23 = vld [vmem:[%s3413_s17 + $0x38] sm:$0xff]   ;;  %v3048_v26 = vld [vmem:[%s3769_s6 + $0x10] sm:$0xff]  }
  0xaf   : > { %v2444_v28 = vsel %vm576_vm0, 1.0, %v3116_v45  ;;  %2733 = vmatpush3.bf16.msra.mxu0 %v3023_v22  ;;  %2895 = vmatpush3.bf16.msra.mxu1 %v3030_v17  ;;  %v3419_v17 = vld [vmem:[%s3413_s17 + $0x8] sm:$0xff]   ;;  %v1032_v22 = vld [vmem:[%s3413_s17 + $0x30] sm:$0xff]  }
  0xb0   : > { %v620_v30 = vpack.c.bf16 %v2444_v28, %v2443_v27  ;;  %2734 = vmatprep.subr.bf16.mxu0 %v3025_v24  ;;  %v667_v32 = vpop.permute.xlu0 %666  ;;  %2896 = vmatprep.subr.bf16.mxu1 %v3033_v12  ;;  %v3046_v24 = vld [vmem:[%s3769_s6] sm:$0xff]  }
  0xb1   : > { %v670_v33 = vpop.permute.xlu1 %669  ;;  %vm697_vm1 = vcmp.eq.s32.totalorder %v667_v32, %v3258_v40 }
  0xb2   : > { %vm698_vm2 = vcmp.eq.s32.totalorder %v670_v33, %v3258_v40  ;;  %2851 = vmatmul.mubr.msk.bf16.gmra.mrb[4].mxu0 %vm777_vm4, %v620_v30  ;;  %v2461_v34 = vsel %vm697_vm1, 1.0, %v3116_v45 }
  0xb3   : > { %v2462_v35 = vsel %vm698_vm2, 1.0, %v3116_v45  ;;  %2735 = vmatpush3.bf16.msra.mxu0 %v3026_v29  ;;  %2897 = vmatpush3.bf16.msra.mxu1 %v3033_v12 }
  0xb4   : > { %v741_v37 = vpack.c.bf16 %v2462_v35, %v2461_v34  ;;  %2736 = vmatprep.subr.bf16.mxu0 %v3028_v31  ;;  %v547_v38 = vpop.permute.xlu0 %546  ;;  %2898 = vmatprep.subr.bf16.mxu1 %v3036_v13 }
  0xb5   : > { %v550_v39 = vpop.permute.xlu1 %549  ;;  %vm577_vm3 = vcmp.eq.s32.totalorder %v547_v38, %v3258_v40 }
  0xb6   : > { %vm578_vm5 = vcmp.eq.s32.totalorder %v550_v39, %v3258_v40  ;;  %2878 = vmatprep.mubr.msk.bf16.mxu1 %vm777_vm4, %v741_v37  ;;  %v2445_v41 = vsel %vm577_vm3, 1.0, %v3116_v45 }
  0xb7   : > { %v2446_v42 = vsel %vm578_vm5, 1.0, %v3116_v45  ;;  %2737 = vmatpush3.bf16.msra.mxu0 %v3029_v36  ;;  %2899 = vmatpush3.bf16.msra.mxu1 %v3036_v13 }
  0xb8   : > { %v621_v43 = vpack.c.bf16 %v2446_v42, %v2445_v41  ;;  %v673_v44 = vpop.permute.xlu0 %672  ;;  %2738 = vmatprep.subr.bf16.mxu0 %v3031_v11  ;;  %2900 = vmatprep.subr.bf16.mxu1 %v3037_v15 }
  0xb9   : > { %v676_v46 = vpop.permute.xlu1 %675  ;;  %vm699_vm6 = vcmp.eq.s32.totalorder %v673_v44, %v3258_v40 }
  0xba   : > { %vm700_vm7 = vcmp.eq.s32.totalorder %v676_v46, %v3258_v40  ;;  %2854 = vmatprep.mubr.msk.bf16.mxu0 %vm777_vm4, %v621_v43  ;;  %v2463_v47 = vsel %vm699_vm6, 1.0, %v3116_v45 }
  0xbb   : > { %v2464_v48 = vsel %vm700_vm7, 1.0, %v3116_v45  ;;  %2901 = vmatpush3.bf16.msra.mxu1 %v3037_v15 }
  0xbc   : > { %v742_v49 = vpack.c.bf16 %v2464_v48, %v2463_v47  ;;  %v553_v50 = vpop.permute.xlu0 %552  ;;  %2918 = vmatprep.subr.bf16.mxu1 %v3046_v24 }
  0xbd   : > { %v556_v51 = vpop.permute.xlu1 %555  ;;  %vm579_vm8 = vcmp.eq.s32.totalorder %v553_v50, %v3258_v40 }
  0xbe   : > { %vm580_vm9 = vcmp.eq.s32.totalorder %v556_v51, %v3258_v40  ;;  %2879 = vmatmul.mubr.msk.bf16.gmra.mrb[8].mxu1 %vm777_vm4, %v742_v49  ;;  %v2447_v52 = vsel %vm579_vm8, 1.0, %v3116_v45 }
  0xbf   : > { %v2448_v53 = vsel %vm580_vm9, 1.0, %v3116_v45 }
  0xc0   : > { %v622_v54 = vpack.c.bf16 %v2448_v53, %v2447_v52  ;;  %v679_v55 = vpop.permute.xlu0 %678 }
  0xc1   : > { %v682_v56 = vpop.permute.xlu1 %681  ;;  %vm701_vm10 = vcmp.eq.s32.totalorder %v679_v55, %v3258_v40 }
  0xc2   : > { %vm702_vm11 = vcmp.eq.s32.totalorder %v682_v56, %v3258_v40  ;;  %2855 = vmatmul.mubr.msk.bf16.gmra.mrb[8].mxu0 %vm777_vm4, %v622_v54  ;;  %v2465_v57 = vsel %vm701_vm10, 1.0, %v3116_v45 }
  0xc3   : > { %v2466_v58 = vsel %vm702_vm11, 1.0, %v3116_v45 }
  0xc4   : > { %v743_v59 = vpack.c.bf16 %v2466_v58, %v2465_v57  ;;  %v559_v60 = vpop.permute.xlu0 %558 }
  0xc5   : > { %v562_v61 = vpop.permute.xlu1 %561  ;;  %vm581_vm12 = vcmp.eq.s32.totalorder %v559_v60, %v3258_v40 }
  0xc6   : > { %vm582_vm13 = vcmp.eq.s32.totalorder %v562_v61, %v3258_v40  ;;  %2882 = vmatprep.mubr.msk.bf16.mxu1 %vm777_vm4, %v743_v59  ;;  %v2449_v62 = vsel %vm581_vm12, 1.0, %v3116_v45 }
  0xc7   : > { %v2450_v63 = vsel %vm582_vm13, 1.0, %v3116_v45 }
  0xc8   : > { %v623_v0 = vpack.c.bf16 %v2450_v63, %v2449_v62  ;;  %v685_v1 = vpop.permute.xlu0 %684 }
  0xc9   : > { %v688_v2 = vpop.permute.xlu1 %687  ;;  %vm703_vm14 = vcmp.eq.s32.totalorder %v685_v1, %v3258_v40 }
  0xca   : > { %vm704_vm15 = vcmp.eq.s32.totalorder %v688_v2, %v3258_v40  ;;  %2858 = vmatprep.mubr.msk.bf16.mxu0 %vm777_vm4, %v623_v0  ;;  %v2467_v3 = vsel %vm703_vm14, 1.0, %v3116_v45 }
  0xcb   : > { %v2468_v4 = vsel %vm704_vm15, 1.0, %v3116_v45 }
  0xcc   : > { %v744_v5 = vpack.c.bf16 %v2468_v4, %v2467_v3  ;;  %v565_v6 = vpop.permute.xlu0 %564 }
  0xcd   : > { %v568_v7 = vpop.permute.xlu1 %567  ;;  %vm583_vm0 = vcmp.eq.s32.totalorder %v565_v6, %v3258_v40 }
  0xce   : > { %vm584_vm1 = vcmp.eq.s32.totalorder %v568_v7, %v3258_v40  ;;  %2883 = vmatmul.mubr.msk.bf16.gmra.mrb[12].mxu1 %vm777_vm4, %v744_v5  ;;  %v2451_v8 = vsel %vm583_vm0, 1.0, %v3116_v45  ;;  %v3032_v40 = vld [vmem:[%s3767_s4 + $0x30] sm:$0xff]  }
  0xcf   : > { %v2452_v9 = vsel %vm584_vm1, 1.0, %v3116_v45  ;;  %2739 = vmatpush3.bf16.msra.mxu0 %v3032_v40  ;;  %v3034_v45 = vld [vmem:[%s3767_s4 + $0x78] sm:$0xff]   ;;  %2902 = vmatprep.mubr.bf16.mxu1 %v3416_v16 }
  0xd0   : > { %v624_v10 = vpack.c.bf16 %v2452_v9, %v2451_v8  ;;  %2740 = vmatprep.subr.bf16.mxu0 %v3034_v45  ;;  %v3049_v40 = vld [vmem:[%s3769_s6 + $0x18] sm:$0xff]   ;;  %v3050_v45 = vld [vmem:[%s3769_s6 + $0x20] sm:$0xff]  }
  0xd2   : > { %2859 = vmatmul.mubr.msk.bf16.gmra.mrb[12].mxu0 %vm777_vm4, %v624_v10 }
  0xd3   : > { %2741 = vmatpush3.bf16.msra.mxu0 %v3035_v14 }
  0xd6   : > { %2903 = vmatmul.mubr.bf16.vlgmr.msra.gmra.mrb[16].mxu1 %v3419_v17 }
  0xd7   : > { %2906 = vmatprep.mubr.bf16.mxu1 %v1024_v18  ;;  %2919 = vmatpush3.bf16.msra.mxu1 %v3046_v24  ;;  %v3051_v18 = vld [vmem:[%s3769_s6 + $0x28] sm:$0xff]  }
  0xd8   : > { %2920 = vmatprep.subr.bf16.mxu1 %v3047_v25 }
  0xdb   : > { %2921 = vmatpush3.bf16.msra.mxu1 %v3047_v25 }
  0xdc   : > { %2922 = vmatprep.subr.bf16.mxu1 %v3048_v26 }
  0xde   : > { %2907 = vmatmul.mubr.bf16.gmra.mrb[20].mxu1 %v3425_v19 }
  0xdf   : > { %2910 = vmatprep.mubr.bf16.mxu1 %v1028_v20  ;;  %2923 = vmatpush3.bf16.msra.mxu1 %v3048_v26 }
  0xe0   : > { %2924 = vmatprep.subr.bf16.mxu1 %v3049_v40 }
  0xe3   : > { %2925 = vmatpush3.bf16.msra.mxu1 %v3049_v40 }
  0xe4   : > { %2926 = vmatprep.subr.bf16.mxu1 %v3050_v45 }
  0xe6   : > { %2911 = vmatmul.mubr.bf16.gmra.mrb[24].mxu1 %v1030_v21  ;;  %v3052_v21 = vld [vmem:[%s3769_s6 + $0x30] sm:$0xff]  }
  0xe7   : > { %2914 = vmatprep.mubr.bf16.mxu1 %v1032_v22  ;;  %2927 = vmatpush3.bf16.msra.mxu1 %v3050_v45  ;;  %v3053_v22 = vld [vmem:[%s3769_s6 + $0x38] sm:$0xff]  }
  0xe8   : > { %2928 = vmatprep.subr.bf16.mxu1 %v3051_v18 }
  0xeb   : > { %2929 = vmatpush3.bf16.msra.mxu1 %v3051_v18 }
  0xec   : > { %2930 = vmatprep.subr.bf16.mxu1 %v3052_v21 }
  0xee   : > { %2915 = vmatmul.mubr.bf16.gmra.mrb[28].mxu1 %v1034_v23 }
  0xef   : > { %2931 = vmatpush3.bf16.msra.mxu1 %v3052_v21 }
  0xf0   : > { %2932 = vmatprep.subr.bf16.mxu1 %v3053_v22 }
  0xf3   : > { %2933 = vmatpush3.bf16.msra.mxu1 %v3053_v22 }
 0x171   : > { %v2872_v27 = vpop.f32.mrb[0].mxu1 }
 0x172   : > { %v957_v28 = vpop.f32.mrb[1].mxu1 }
 0x173   : > { %v2873_v29 = vpop.f32.mrb[2].mxu1 }
 0x174   : > { %v1053_v30 = vpack.c.bf16 %v2873_v29, %v2872_v27  ;;  %v960_v31 = vpop.f32.mrb[3].mxu1 }
 0x175   : > { %v1052_v32 = vpack.c.bf16 %v960_v31, %v957_v28  ;;  %v2848_v33 = vpop.f32.mrb[0].mxu0 }
 0x176   : > { %v836_v34 = vpop.f32.mrb[1].mxu0 }
 0x177   : > { %v2849_v35 = vpop.f32.mrb[2].mxu0  ;;  %1379 = vmatprep.mubr.bf16.mxu0 %v1052_v32 }
 0x178   : > { %v1037_v36 = vpack.c.bf16 %v2849_v35, %v2848_v33  ;;  %v839_v37 = vpop.f32.mrb[3].mxu0  ;;  %v3054_v35 = vld [vmem:[%s3771_s8] sm:$0xff]  }
 0x179   : > { %v1036_v38 = vpack.c.bf16 %v839_v37, %v836_v34  ;;  %2950 = vmatprep.subr.bf16.mxu0 %v3054_v35  ;;  %2982 = vmatprep.subr.bf16.mxu1 %v3054_v35  ;;  %v3056_v37 = vld [vmem:[%s3771_s8 + $0x10] sm:$0xff]  }
 0x17b   : > { %1380 = vmatmul.mubr.bf16.vlgmr.msra.gmra.mrb[16].mxu0 %v1036_v38  ;;  %v3496_v38 = vld [vmem:[%s3771_s8 + $0x18] sm:$0xff]  }
 0x17c   : > { %1387 = vmatprep.mubr.bf16.mxu0 %v1053_v30  ;;  %2951 = vmatpush3.bf16.msra.mxu0 %v3054_v35 }
 0x181   : > { %v2876_v39 = vpop.f32.mrb[4].mxu1 }
 0x182   : > { %v973_v41 = vpop.f32.mrb[5].mxu1 }
 0x183   : > { %v2877_v42 = vpop.f32.mrb[6].mxu1  ;;  %1388 = vmatmul.mubr.bf16.gmra.mrb[20].mxu0 %v1037_v36  ;;  %v3055_v36 = vld [vmem:[%s3771_s8 + $0x8] sm:$0xff]  }
 0x184   : > { %v1055_v43 = vpack.c.bf16 %v2877_v42, %v2876_v39  ;;  %v976_v44 = vpop.f32.mrb[7].mxu1  ;;  %2952 = vmatprep.subr.bf16.mxu0 %v3055_v36  ;;  %v3502_v39 = vld [vmem:[%s3771_s8 + $0x20] sm:$0xff]  }
 0x185   : > { %v1054_v46 = vpack.c.bf16 %v976_v44, %v973_v41  ;;  %v2852_v47 = vpop.f32.mrb[4].mxu0  ;;  %2953 = vmatpush3.bf16.msra.mxu0 %v3055_v36  ;;  %v3509_v41 = vld [vmem:[%s3771_s8 + $0x28] sm:$0xff]   ;;  %v3517_v44 = vld [vmem:[%s3768_s5] ss:$0 sm:$0xff] }
 0x186   : > { %v852_v48 = vpop.f32.mrb[5].mxu0  ;;  %2954 = vmatprep.subr.bf16.mxu0 %v3056_v37 }
 0x187   : > { %v2853_v49 = vpop.f32.mrb[6].mxu0  ;;  %1395 = vmatprep.mubr.bf16.mxu0 %v1054_v46 }
 0x188   : > { %v1039_v50 = vpack.c.bf16 %v2853_v49, %v2852_v47  ;;  %v855_v51 = vpop.f32.mrb[7].mxu0 }
 0x189   : > { %v1038_v52 = vpack.c.bf16 %v855_v51, %v852_v48  ;;  %2955 = vmatpush3.bf16.msra.mxu0 %v3056_v37 }
 0x18a   : > { %2956 = vmatprep.subr.bf16.mxu0 %v3496_v38 }
 0x18b   : > { %1396 = vmatmul.mubr.bf16.gmra.mrb[24].mxu0 %v1038_v52 }
 0x18c   : > { %1403 = vmatprep.mubr.bf16.mxu0 %v1055_v43 }
 0x18d   : > { %2957 = vmatpush3.bf16.msra.mxu0 %v3496_v38 }
 0x18e   : > { %2958 = vmatprep.subr.bf16.mxu0 %v3502_v39 }
 0x191   : > { %v2880_v53 = vpop.f32.mrb[8].mxu1  ;;  %2959 = vmatpush3.bf16.msra.mxu0 %v3502_v39 }
 0x192   : > { %v989_v54 = vpop.f32.mrb[9].mxu1  ;;  %2960 = vmatprep.subr.bf16.mxu0 %v3509_v41 }
 0x193   : > { %v2881_v55 = vpop.f32.mrb[10].mxu1  ;;  %1404 = vmatmul.mubr.bf16.gmra.mrb[28].mxu0 %v1039_v50 }
 0x194   : > { %v1057_v56 = vpack.c.bf16 %v2881_v55, %v2880_v53  ;;  %v992_v57 = vpop.f32.mrb[11].mxu1 }
 0x195   : > { %v1056_v58 = vpack.c.bf16 %v992_v57, %v989_v54  ;;  %v2856_v59 = vpop.f32.mrb[8].mxu0  ;;  %2961 = vmatpush3.bf16.msra.mxu0 %v3509_v41 }
 0x196   : > { %v868_v60 = vpop.f32.mrb[9].mxu0 }
 0x197   : > { %v2857_v61 = vpop.f32.mrb[10].mxu0  ;;  %1411 = vmatprep.mubr.bf16.mxu0 %v1056_v58 }
 0x198   : > { %v1041_v62 = vpack.c.bf16 %v2857_v61, %v2856_v59  ;;  %v871_v63 = vpop.f32.mrb[11].mxu0 }
 0x199   : > { %v1040_v0 = vpack.c.bf16 %v871_v63, %v868_v60 }
 0x19b   : > { %1412 = vmatmul.mubr.bf16.gmra.mrb[32].mxu0 %v1040_v0 }
 0x19c   : > { %1419 = vmatprep.mubr.bf16.mxu0 %v1057_v56 }
 0x1a1   : > { %v2884_v1 = vpop.f32.mrb[12].mxu1 }
 0x1a2   : > { %v1005_v2 = vpop.f32.mrb[13].mxu1 }
 0x1a3   : > { %v2885_v3 = vpop.f32.mrb[14].mxu1  ;;  %1420 = vmatmul.mubr.bf16.gmra.mrb[36].mxu0 %v1041_v62 }
 0x1a4   : > { %v1059_v4 = vpack.c.bf16 %v2885_v3, %v2884_v1  ;;  %v1008_v5 = vpop.f32.mrb[15].mxu1 }
 0x1a5   : > { %v1058_v6 = vpack.c.bf16 %v1008_v5, %v1005_v2  ;;  %v2860_v7 = vpop.f32.mrb[12].mxu0 }
 0x1a6   : > { %v884_v8 = vpop.f32.mrb[13].mxu0 }
 0x1a7   : > { %v2861_v9 = vpop.f32.mrb[14].mxu0  ;;  %1427 = vmatprep.mubr.bf16.mxu0 %v1058_v6 }
 0x1a8   : > { %v1043_v10 = vpack.c.bf16 %v2861_v9, %v2860_v7  ;;  %v887_v11 = vpop.f32.mrb[15].mxu0 }
 0x1a9   : > { %v1042_v12 = vpack.c.bf16 %v887_v11, %v884_v8  ;;  %v3447_v13 = vpop.f32.mrb[16].mxu1 }
 0x1aa   : > { %v1478_v14 = vpop.f32.mrb[17].mxu1 }
 0x1ab   : > { %1428 = vmatmul.mubr.bf16.gmra.mrb[40].mxu0 %v1042_v12  ;;  %v3449_v15 = vpop.f32.mrb[18].mxu1 }
 0x1ac   : > { %1435 = vmatprep.mubr.bf16.mxu0 %v1059_v4  ;;  %v1481_v20 = vpop.f32.mrb[19].mxu1 }
 0x1b1   : > { %v3460_v23 = vpop.f32.mrb[20].mxu1 }
 0x1b2   : > { %v3462_v24 = vpop.f32.mrb[21].mxu1 }
 0x1b3   : > { %1436 = vmatmul.mubr.bf16.gmra.mrb[44].mxu0 %v1043_v10  ;;  %v3464_v25 = vpop.f32.mrb[22].mxu1 }
 0x1b4   : > { %v3466_v26 = vpop.f32.mrb[23].mxu1 }
 0x1b9   : > { %v3468_v27 = vpop.f32.mrb[24].mxu1 }
 0x1ba   : > { %v3470_v28 = vpop.f32.mrb[25].mxu1 }
 0x1bb   : > { %v3472_v29 = vpop.f32.mrb[26].mxu1 }
 0x1bc   : > { %v3474_v30 = vpop.f32.mrb[27].mxu1 }
 0x1c1   : > { %v3476_v31 = vpop.f32.mrb[28].mxu1 }
 0x1c2   : > { %v3478_v32 = vpop.f32.mrb[29].mxu1 }
 0x1c3   : > { %v3480_v33 = vpop.f32.mrb[30].mxu1 }
 0x1c4   : > { %v3482_v34 = vpop.f32.mrb[31].mxu1 }
 0x24e   : > { %v2742_v42 = vpop.f32.mrb[16].mxu0 }
 0x24f   : > { %v2743_v43 = vpop.f32.mrb[17].mxu0 }
 0x250   : > { %v2744_v46 = vadd.f32 %v2743_v43, %v2742_v42  ;;  %v2745_v47 = vpop.f32.mrb[18].mxu0 }
 0x251   : > { %v2746_v48 = vpop.f32.mrb[19].mxu0 }
 0x252   : > { %v2747_v49 = vadd.f32 %v2746_v48, %v2745_v47  ;;  %v1382_v50 = vadd.f32 %v2744_v46, %v3517_v44 }
 0x254   : > { %v1479_v51 = vadd.f32 %v1478_v14, %v1382_v50  ;;  %v1385_v52 = vadd.f32 %v2747_v49, %v3517_v44 }
 0x256   : > { %v1482_v53 = vadd.f32 %v1481_v20, %v1385_v52  ;;  %v2748_v54 = vpop.f32.mrb[20].mxu0 }
 0x257   : > { %v2749_v55 = vpop.f32.mrb[21].mxu0 }
 0x258   : > { %v1558_v56 = vpack.c.bf16 %v1482_v53, %v1479_v51  ;;  %v2750_v57 = vadd.f32 %v2749_v55, %v2748_v54  ;;  %v2751_v58 = vpop.f32.mrb[22].mxu0 }
 0x259   : > { %v2752_v59 = vpop.f32.mrb[23].mxu0 }
 0x25a   : > { %v1390_v60 = vadd.f32 %v2750_v57, %v3517_v44  ;;  %v2753_v61 = vadd.f32 %v2752_v59, %v2751_v58  ;;  %2934 = vmatprep.mubr.bf16.mxu1 %v1558_v56 }
 0x25c   : > { %v1487_v62 = vadd.f32 %v3447_v13, %v1390_v60  ;;  %v1393_v63 = vadd.f32 %v2753_v61, %v3517_v44 }
 0x25e   : > { %v1490_v0 = vadd.f32 %v3449_v15, %v1393_v63  ;;  %v2754_v1 = vpop.f32.mrb[24].mxu0 }
 0x25f   : > { %v2755_v2 = vpop.f32.mrb[25].mxu0 }
 0x260   : > { %v1559_v3 = vpack.c.bf16 %v1490_v0, %v1487_v62  ;;  %v2756_v4 = vadd.f32 %v2755_v2, %v2754_v1  ;;  %v2757_v5 = vpop.f32.mrb[26].mxu0 }
 0x261   : > { %v2758_v6 = vpop.f32.mrb[27].mxu0 }
 0x262   : > { %v2759_v7 = vadd.f32 %v2758_v6, %v2757_v5  ;;  %2935 = vmatmul.mubr.bf16.vlgmr.msra.gmra.mrb[32].mxu1 %v1559_v3  ;;  %v1398_v8 = vadd.f32 %v2756_v4, %v3517_v44 }
 0x263   : > { %2990 = vmatpush3.bf16.msra.mxu1 %v3054_v35 }
 0x264   : > { %v1495_v9 = vadd.f32 %v3462_v24, %v1398_v8  ;;  %v1401_v10 = vadd.f32 %v2759_v7, %v3517_v44  ;;  %2983 = vmatprep.subr.bf16.mxu1 %v3055_v36 }
 0x266   : > { %v1498_v11 = vadd.f32 %v3466_v26, %v1401_v10  ;;  %v2760_v12 = vpop.f32.mrb[28].mxu0 }
 0x267   : > { %v2761_v40 = vpop.f32.mrb[29].mxu0  ;;  %2991 = vmatpush3.bf16.msra.mxu1 %v3055_v36 }
 0x268   : > { %v1560_v45 = vpack.c.bf16 %v1498_v11, %v1495_v9  ;;  %v2762_v13 = vadd.f32 %v2761_v40, %v2760_v12  ;;  %v2763_v14 = vpop.f32.mrb[30].mxu0  ;;  %2984 = vmatprep.subr.bf16.mxu1 %v3056_v37  ;;  %v3061_v11 = vld [vmem:[%s3771_s8 + $0x38] sm:$0xff]  }
 0x269   : > { %v2764_v15 = vpop.f32.mrb[31].mxu0 }
 0x26a   : > { %v1406_v18 = vadd.f32 %v2762_v13, %v3517_v44  ;;  %v2765_v20 = vadd.f32 %v2764_v15, %v2763_v14  ;;  %2938 = vmatprep.mubr.bf16.mxu1 %v1560_v45 }
 0x26b   : > { %2992 = vmatpush3.bf16.msra.mxu1 %v3056_v37 }
 0x26c   : > { %v1503_v21 = vadd.f32 %v3460_v23, %v1406_v18  ;;  %v1409_v22 = vadd.f32 %v2765_v20, %v3517_v44  ;;  %2985 = vmatprep.subr.bf16.mxu1 %v3496_v38 }
 0x26e   : > { %v1506_v24 = vadd.f32 %v3464_v25, %v1409_v22  ;;  %v2766_v26 = vpop.f32.mrb[32].mxu0 }
 0x26f   : > { %v2767_v35 = vpop.f32.mrb[33].mxu0  ;;  %2993 = vmatpush3.bf16.msra.mxu1 %v3496_v38 }
 0x270   : > { %v2768_v36 = vadd.f32 %v2767_v35, %v2766_v26  ;;  %v2769_v42 = vpop.f32.mrb[34].mxu0  ;;  %v1561_v43 = vpack.c.bf16 %v1506_v24, %v1503_v21  ;;  %2986 = vmatprep.subr.bf16.mxu1 %v3502_v39 }
 0x271   : > { %v2770_v46 = vpop.f32.mrb[35].mxu0 }
 0x272   : > { %v2771_v47 = vadd.f32 %v2770_v46, %v2769_v42  ;;  %2939 = vmatmul.mubr.bf16.gmra.mrb[36].mxu1 %v1561_v43  ;;  %v1414_v23 = vadd.f32 %v2768_v36, %v3517_v44 }
 0x273   : > { %2994 = vmatpush3.bf16.msra.mxu1 %v3502_v39 }
 0x274   : > { %v1511_v37 = vadd.f32 %v3470_v28, %v1414_v23  ;;  %v1417_v25 = vadd.f32 %v2771_v47, %v3517_v44  ;;  %2987 = vmatprep.subr.bf16.mxu1 %v3509_v41 }
 0x276   : > { %v1514_v38 = vadd.f32 %v3474_v30, %v1417_v25  ;;  %v2772_v48 = vpop.f32.mrb[36].mxu0 }
 0x277   : > { %v2773_v49 = vpop.f32.mrb[37].mxu0  ;;  %2995 = vmatpush3.bf16.msra.mxu1 %v3509_v41 }
 0x278   : > { %v1562_v50 = vpack.c.bf16 %v1514_v38, %v1511_v37  ;;  %v2774_v51 = vadd.f32 %v2773_v49, %v2772_v48  ;;  %v2775_v52 = vpop.f32.mrb[38].mxu0 }
 0x279   : > { %v2776_v53 = vpop.f32.mrb[39].mxu0 }
 0x27a   : > { %v1422_v54 = vadd.f32 %v2774_v51, %v3517_v44  ;;  %v2777_v55 = vadd.f32 %v2776_v53, %v2775_v52  ;;  %2942 = vmatprep.mubr.bf16.mxu1 %v1562_v50 }
 0x27c   : > { %v1519_v28 = vadd.f32 %v3468_v27, %v1422_v54  ;;  %v1425_v39 = vadd.f32 %v2777_v55, %v3517_v44 }
 0x27e   : > { %v1522_v56 = vadd.f32 %v3472_v29, %v1425_v39  ;;  %v2778_v57 = vpop.f32.mrb[40].mxu0 }
 0x27f   : > { %v2779_v30 = vpop.f32.mrb[41].mxu0 }
 0x280   : > { %v2780_v58 = vadd.f32 %v2779_v30, %v2778_v57  ;;  %v2781_v59 = vpop.f32.mrb[42].mxu0  ;;  %v1563_v60 = vpack.c.bf16 %v1522_v56, %v1519_v28 }
 0x281   : > { %v2782_v41 = vpop.f32.mrb[43].mxu0 }
 0x282   : > { %v2783_v61 = vadd.f32 %v2782_v41, %v2781_v59  ;;  %2943 = vmatmul.mubr.bf16.gmra.mrb[40].mxu1 %v1563_v60  ;;  %v1430_v62 = vadd.f32 %v2780_v58, %v3517_v44  ;;  %v2531_v41 = vld [vmem:[%s3772_s9] ss:$0 sm:$0xff] }
 0x284   : > { %v1527_v63 = vadd.f32 %v3478_v32, %v1430_v62  ;;  %v1433_v0 = vadd.f32 %v2783_v61, %v3517_v44 }
 0x286   : > { %v1530_v27 = vadd.f32 %v3482_v34, %v1433_v0  ;;  %v2784_v1 = vpop.f32.mrb[44].mxu0  ;;  %v3060_v34 = vld [vmem:[%s3771_s8 + $0x30] sm:$0xff]  }
 0x287   : > { %v2785_v2 = vpop.f32.mrb[45].mxu0  ;;  %2962 = vmatprep.subr.bf16.mxu0 %v3060_v34  ;;  %2988 = vmatprep.subr.bf16.mxu1 %v3060_v34 }
 0x288   : > { %v1564_v3 = vpack.c.bf16 %v1530_v27, %v1527_v63  ;;  %v2786_v29 = vadd.f32 %v2785_v2, %v2784_v1  ;;  %v2787_v4 = vpop.f32.mrb[46].mxu0  ;;  %2963 = vmatpush3.bf16.msra.mxu0 %v3060_v34  ;;  %2996 = vmatpush3.bf16.msra.mxu1 %v3060_v34 }
 0x289   : > { %v2788_v5 = vpop.f32.mrb[47].mxu0  ;;  %2964 = vmatprep.subr.bf16.mxu0 %v3061_v11  ;;  %2989 = vmatprep.subr.bf16.mxu1 %v3061_v11 }
 0x28a   : > { %v1438_v6 = vadd.f32 %v2786_v29, %v3517_v44  ;;  %v2789_v7 = vadd.f32 %v2788_v5, %v2787_v4  ;;  %2946 = vmatprep.mubr.bf16.mxu1 %v1564_v3 }
 0x28c   : > { %v1535_v8 = vadd.f32 %v3476_v31, %v1438_v6  ;;  %v1441_v9 = vadd.f32 %v2789_v7, %v3517_v44  ;;  %2965 = vmatpush3.bf16.msra.mxu0 %v3061_v11  ;;  %2997 = vmatpush3.bf16.msra.mxu1 %v3061_v11 }
 0x28e   : > { %v1538_v32 = vadd.f32 %v3480_v33, %v1441_v9  ;;  %v2522_v33 = vld [vmem:[%s3770_s7] ss:$0 sm:$0xff] }
 0x290   : > { %v1565_v10 = vpack.c.bf16 %v1538_v32, %v1535_v8 }
 0x292   : > { %2947 = vmatmul.mubr.bf16.gmra.mrb[44].mxu1 %v1565_v10 }
 0x335   : > { %v2936_v31 = vpop.f32.mrb[32].mxu1 }
 0x336   : > { %v1654_v44 = vpop.f32.mrb[33].mxu1  ;;  %v1663_v40 = vadd.f32 %v2936_v31, %v2522_v33 }
 0x337   : > { %v2937_v12 = vpop.f32.mrb[34].mxu1  ;;  %v1655_v14 = vadd.f32 %v2522_v33, %v1654_v44 }
 0x338   : > { %v1666_v45 = vadd.f32 %v2937_v12, %v2522_v33  ;;  %v1657_v13 = vpop.f32.mrb[35].mxu1 }
 0x339   : > { %v1658_v15 = vadd.f32 %v2522_v33, %v1657_v13 }
 0x33a   : > { %v1735_v18 = vpack.c.bf16 %v1666_v45, %v1663_v40 }
 0x33b   : > { %v1734_v20 = vpack.c.bf16 %v1658_v15, %v1655_v14 }
 0x33d   : > { %2966 = vmatprep.mubr.bf16.mxu0 %v1734_v20 }
 0x33e   : > { %2967 = vmatmul.mubr.bf16.vlgmr.msra.gmra.mrb[48].mxu0 %v1735_v18 }
 0x345   : > { %v2940_v21 = vpop.f32.mrb[36].mxu1 }
 0x346   : > { %v1670_v22 = vpop.f32.mrb[37].mxu1  ;;  %v1679_v26 = vadd.f32 %v2940_v21, %v2522_v33 }
 0x347   : > { %v2941_v24 = vpop.f32.mrb[38].mxu1  ;;  %v1671_v42 = vadd.f32 %v2522_v33, %v1670_v22 }
 0x348   : > { %v1682_v35 = vadd.f32 %v2941_v24, %v2522_v33  ;;  %v1673_v36 = vpop.f32.mrb[39].mxu1 }
 0x349   : > { %v1674_v43 = vadd.f32 %v2522_v33, %v1673_v36 }
 0x34a   : > { %v1737_v46 = vpack.c.bf16 %v1682_v35, %v1679_v26 }
 0x34b   : > { %v1736_v47 = vpack.c.bf16 %v1674_v43, %v1671_v42 }
 0x34d   : > { %2970 = vmatprep.mubr.bf16.mxu0 %v1736_v47 }
 0x34e   : > { %2971 = vmatmul.mubr.bf16.gmra.mrb[52].mxu0 %v1737_v46 }
 0x355   : > { %v2944_v23 = vpop.f32.mrb[40].mxu1 }
 0x356   : > { %v1686_v37 = vpop.f32.mrb[41].mxu1  ;;  %v1695_v38 = vadd.f32 %v2944_v23, %v2522_v33 }
 0x357   : > { %v2945_v25 = vpop.f32.mrb[42].mxu1  ;;  %v1687_v50 = vadd.f32 %v2522_v33, %v1686_v37 }
 0x358   : > { %v1698_v48 = vadd.f32 %v2945_v25, %v2522_v33  ;;  %v1689_v49 = vpop.f32.mrb[43].mxu1 }
 0x359   : > { %v1690_v51 = vadd.f32 %v2522_v33, %v1689_v49 }
 0x35a   : > { %v1739_v52 = vpack.c.bf16 %v1698_v48, %v1695_v38 }
 0x35b   : > { %v1738_v53 = vpack.c.bf16 %v1690_v51, %v1687_v50 }
 0x35d   : > { %2974 = vmatprep.mubr.bf16.mxu1 %v1738_v53 }
 0x35e   : > { %2975 = vmatmul.mubr.bf16.vlgmr.msra.gmra.mrb[48].mxu1 %v1739_v52 }
 0x365   : > { %v2948_v54 = vpop.f32.mrb[44].mxu1 }
 0x366   : > { %v1702_v55 = vpop.f32.mrb[45].mxu1  ;;  %v1711_v39 = vadd.f32 %v2948_v54, %v2522_v33 }
 0x367   : > { %v2949_v28 = vpop.f32.mrb[46].mxu1  ;;  %v1703_v30 = vadd.f32 %v2522_v33, %v1702_v55 }
 0x368   : > { %v1714_v56 = vadd.f32 %v2949_v28, %v2522_v33  ;;  %v1705_v57 = vpop.f32.mrb[47].mxu1 }
 0x369   : > { %v1706_v58 = vadd.f32 %v2522_v33, %v1705_v57 }
 0x36a   : > { %v1741_v59 = vpack.c.bf16 %v1714_v56, %v1711_v39 }
 0x36b   : > { %v1740_v60 = vpack.c.bf16 %v1706_v58, %v1703_v30 }
 0x36d   : > { %2978 = vmatprep.mubr.bf16.mxu1 %v1740_v60 }
 0x36e   : > { %2979 = vmatmul.mubr.bf16.gmra.mrb[52].mxu1 %v1741_v59 }
 0x411   : > { %v2968_v61 = vpop.f32.mrb[48].mxu0 }
 0x412   : > { %v1839_v62 = vadd.f32 %v2968_v61, %v2531_v41  ;;  %v1830_v63 = vpop.f32.mrb[49].mxu0 }
 0x413   : > { %v2969_v0 = vpop.f32.mrb[50].mxu0  ;;  %v1831_v2 = vadd.f32 %v2531_v41, %v1830_v63 }
 0x414   : > { %1897 = vadd.xlane.f32.xlu0 %v1839_v62  ;;  %v1833_v27 = vpop.f32.mrb[51].mxu0  ;;  %v1842_v3 = vadd.f32 %v2969_v0, %v2531_v41 }
 0x415   : > { %v1834_v1 = vadd.f32 %v2531_v41, %v1833_v27 }
 0x417   : > { %1895 = vadd.xlane.f32.xlu1 %v1834_v1 }
 0x418   : > { %1893 = vadd.xlane.f32.xlu0 %v1831_v2 }
 0x41c   : > { %1899 = vadd.xlane.f32.xlu0 %v1842_v3 }
 0x421   : > { %v2972_v29 = vpop.f32.mrb[52].mxu0 }
 0x422   : > { %v1855_v4 = vadd.f32 %v2972_v29, %v2531_v41  ;;  %v1846_v5 = vpop.f32.mrb[53].mxu0 }
 0x423   : > { %v2973_v6 = vpop.f32.mrb[54].mxu0  ;;  %v1847_v9 = vadd.f32 %v2531_v41, %v1846_v5 }
 0x424   : > { %v1858_v7 = vadd.f32 %v2973_v6, %v2531_v41  ;;  %v1849_v8 = vpop.f32.mrb[55].mxu0  ;;  %1905 = vadd.xlane.f32.xlu1 %v1855_v4 }
 0x425   : > { %v1850_v32 = vadd.f32 %v2531_v41, %v1849_v8 }
 0x426   : > { %1907 = vadd.xlane.f32.xlu0 %v1858_v7 }
 0x428   : > { %1901 = vadd.xlane.f32.xlu1 %v1847_v9 }
 0x42a   : > { %1903 = vadd.xlane.f32.xlu0 %v1850_v32 }
 0x431   : > { %v2976_v10 = vpop.f32.mrb[48].mxu1 }
 0x432   : > { %v3567_v34 = vadd.f32 %v2976_v10, %v2531_v41  ;;  %v1862_v11 = vpop.f32.mrb[49].mxu1 }
 0x433   : > { %v2977_v31 = vpop.f32.mrb[50].mxu1  ;;  %v3572_v12 = vadd.f32 %v2531_v41, %v1862_v11 }
 0x434   : > { %v3569_v33 = vadd.f32 %v2977_v31, %v2531_v41  ;;  %1913 = vadd.xlane.f32.xlu1 %v3567_v34  ;;  %v1865_v44 = vpop.f32.mrb[51].mxu1 }
 0x435   : > { %v3575_v40 = vadd.f32 %v2531_v41, %v1865_v44 }
 0x436   : > { %1915 = vadd.xlane.f32.xlu0 %v3569_v33 }
 0x438   : > { %1909 = vadd.xlane.f32.xlu1 %v3572_v12 }
 0x43a   : > { %1911 = vadd.xlane.f32.xlu0 %v3575_v40 }
 0x441   : > { %v2980_v45 = vpop.f32.mrb[52].mxu1 }
 0x442   : > { %v1878_v13 = vpop.f32.mrb[53].mxu1  ;;  %v3584_v21 = vadd.f32 %v2980_v45, %v2531_v41 }
 0x443   : > { %v3579_v14 = vadd.f32 %v2531_v41, %v1878_v13  ;;  %v2981_v15 = vpop.f32.mrb[54].mxu1 }
 0x444   : > { %v1881_v18 = vpop.f32.mrb[55].mxu1  ;;  %v3587_v22 = vadd.f32 %v2981_v15, %v2531_v41 }
 0x445   : > { %v3581_v20 = vadd.f32 %v2531_v41, %v1881_v18  ;;  %1917 = vadd.xlane.f32.xlu1 %v3579_v14 }
 0x447   : > { %1919 = vadd.xlane.f32.xlu0 %v3581_v20 }
 0x449   : > { %1921 = vadd.xlane.f32.xlu1 %v3584_v21 }
 0x44b   : > { %1923 = vadd.xlane.f32.xlu0 %v3587_v22 }
 0x4a1   : > { %v1898_v24 = vpop.xlane.xlu0 %1897 }
 0x4a2   : > { %v1928_v26 = vmul.f32 0.0078125, %v1898_v24 }
 0x4a4   : > { %v3591_v35 = vsub.f32 %v1839_v62, %v1928_v26  ;;  %v1896_v46 = vpop.xlane.xlu1 %1895 }
 0x4a5   : > { %v1894_v36 = vpop.xlane.xlu0 %1893  ;;  %v1927_v37 = vmul.f32 0.0078125, %v1896_v46 }
 0x4a6   : > { %v1926_v42 = vmul.f32 0.0078125, %v1894_v36  ;;  %v1960_v43 = vmul.f32 %v3591_v35, %v3591_v35 }
 0x4a7   : > { %v3601_v49 = vsub.f32 %v1834_v1, %v1927_v37 }
 0x4a8   : > { %v3595_v47 = vsub.f32 %v1831_v2, %v1926_v42  ;;  %1978 = vadd.xlane.f32.xlu1 %v1960_v43 }
 0x4a9   : > { %v1900_v23 = vpop.xlane.xlu0 %1899  ;;  %v1959_v53 = vmul.f32 %v3601_v49, %v3601_v49 }
 0x4aa   : > { %v1929_v25 = vmul.f32 0.0078125, %v1900_v23  ;;  %v1958_v38 = vmul.f32 %v3595_v47, %v3595_v47 }
 0x4ac   : > { %v3599_v48 = vsub.f32 %v1842_v3, %v1929_v25  ;;  %1974 = vadd.xlane.f32.xlu1 %v1958_v38 }
 0x4ae   : > { %v1961_v50 = vmul.f32 %v3599_v48, %v3599_v48 }
 0x4b0   : > { %1980 = vadd.xlane.f32.xlu0 %v1961_v50 }
 0x4b1   : > { %v1906_v51 = vpop.xlane.xlu1 %1905 }
 0x4b2   : > { %v1932_v52 = vmul.f32 0.0078125, %v1906_v51 }
 0x4b3   : > { %v1908_v54 = vpop.xlane.xlu0 %1907 }
 0x4b4   : > { %v3607_v55 = vsub.f32 %v1855_v4, %v1932_v52  ;;  %v1933_v28 = vmul.f32 0.0078125, %v1908_v54  ;;  %1976 = vadd.xlane.f32.xlu0 %v1959_v53 }
 0x4b5   : > { %v1902_v39 = vpop.xlane.xlu1 %1901 }
 0x4b6   : > { %v3609_v56 = vsub.f32 %v1858_v7, %v1933_v28  ;;  %v1930_v57 = vmul.f32 0.0078125, %v1902_v39  ;;  %v1964_v30 = vmul.f32 %v3607_v55, %v3607_v55 }
 0x4b7   : > { %v1904_v58 = vpop.xlane.xlu0 %1903 }
 0x4b8   : > { %v3613_v59 = vsub.f32 %v1847_v9, %v1930_v57  ;;  %v1931_v60 = vmul.f32 0.0078125, %v1904_v58  ;;  %1986 = vadd.xlane.f32.xlu1 %v1964_v30  ;;  %v1965_v41 = vmul.f32 %v3609_v56, %v3609_v56 }
 0x4ba   : > { %v3617_v61 = vsub.f32 %v1850_v32, %v1931_v60  ;;  %1988 = vadd.xlane.f32.xlu0 %v1965_v41  ;;  %v1962_v62 = vmul.f32 %v3613_v59, %v3613_v59  ;;  %v3667_v41 = vld [vmem:[%s3773_s10] ss:$0 sm:$0xff] }
 0x4bc   : > { %1982 = vadd.xlane.f32.xlu1 %v1962_v62  ;;  %v1963_v63 = vmul.f32 %v3617_v61, %v3617_v61 }
 0x4be   : > { %1984 = vadd.xlane.f32.xlu0 %v1963_v63 }
 0x4c1   : > { %v1914_v0 = vpop.xlane.xlu1 %1913 }
 0x4c2   : > { %v1936_v27 = vmul.f32 0.0078125, %v1914_v0 }
 0x4c3   : > { %v1916_v1 = vpop.xlane.xlu0 %1915 }
 0x4c4   : > { %v3624_v2 = vsub.f32 %v3567_v34, %v1936_v27  ;;  %v1937_v3 = vmul.f32 0.0078125, %v1916_v1 }
 0x4c5   : > { %v1910_v29 = vpop.xlane.xlu1 %1909 }
 0x4c6   : > { %v3627_v4 = vsub.f32 %v3569_v33, %v1937_v3  ;;  %v1934_v5 = vmul.f32 0.0078125, %v1910_v29  ;;  %v1968_v6 = vmul.f32 %v3624_v2, %v3624_v2 }
 0x4c7   : > { %v1912_v7 = vpop.xlane.xlu0 %1911 }
 0x4c8   : > { %v3632_v8 = vsub.f32 %v3572_v12, %v1934_v5  ;;  %v1935_v9 = vmul.f32 0.0078125, %v1912_v7  ;;  %1994 = vadd.xlane.f32.xlu1 %v1968_v6  ;;  %v1969_v32 = vmul.f32 %v3627_v4, %v3627_v4 }
 0x4ca   : > { %v3637_v10 = vsub.f32 %v3575_v40, %v1935_v9  ;;  %1996 = vadd.xlane.f32.xlu0 %v1969_v32  ;;  %v1966_v34 = vmul.f32 %v3632_v8, %v3632_v8 }
 0x4cc   : > { %1990 = vadd.xlane.f32.xlu1 %v1966_v34  ;;  %v1967_v11 = vmul.f32 %v3637_v10, %v3637_v10 }
 0x4ce   : > { %1992 = vadd.xlane.f32.xlu0 %v1967_v11  ;;  %v2198_v11 = vunpack.c.l.bf16 %v3419_v17 }
 0x4d2   : > { %v1918_v31 = vpop.xlane.xlu1 %1917 }
 0x4d3   : > { %v1938_v33 = vmul.f32 0.0078125, %v1918_v31  ;;  %v2199_v31 = vunpack.c.h.bf16 %v3419_v17 }
 0x4d4   : > { %v1920_v44 = vpop.xlane.xlu0 %1919 }
 0x4d5   : > { %v3644_v12 = vsub.f32 %v3579_v14, %v1938_v33  ;;  %v1939_v45 = vmul.f32 0.0078125, %v1920_v44 }
 0x4d6   : > { %v1922_v13 = vpop.xlane.xlu1 %1921 }
 0x4d7   : > { %v3647_v40 = vsub.f32 %v3581_v20, %v1939_v45  ;;  %v1940_v15 = vmul.f32 0.0078125, %v1922_v13  ;;  %v1970_v18 = vmul.f32 %v3644_v12, %v3644_v12 }
 0x4d8   : > { %v1924_v24 = vpop.xlane.xlu0 %1923 }
 0x4d9   : > { %v3652_v26 = vsub.f32 %v3584_v21, %v1940_v15  ;;  %v1941_v36 = vmul.f32 0.0078125, %v1924_v24  ;;  %1998 = vadd.xlane.f32.xlu1 %v1970_v18  ;;  %v1971_v42 = vmul.f32 %v3647_v40, %v3647_v40  ;;  %v2197_v18 = vunpack.c.h.bf16 %v3416_v16 }
 0x4db   : > { %v3657_v14 = vsub.f32 %v3587_v22, %v1941_v36  ;;  %2000 = vadd.xlane.f32.xlu0 %v1971_v42  ;;  %v1972_v20 = vmul.f32 %v3652_v26, %v3652_v26 }
 0x4dd   : > { %2002 = vadd.xlane.f32.xlu1 %v1972_v20  ;;  %v1973_v43 = vmul.f32 %v3657_v14, %v3657_v14 }
 0x4df   : > { %2004 = vadd.xlane.f32.xlu0 %v1973_v43 }
 0x535   : > { %v1979_v46 = vpop.xlane.xlu1 %1978 }
 0x536   : > { %v2008_v21 = vmul.f32 0.0078125, %v1979_v46 }
 0x538   : > { %v2024_v23 = vadd.f32 1e-05, %v2008_v21 }
 0x539   : > { %v1975_v37 = vpop.xlane.xlu1 %1974 }
 0x53a   : > { %3070 = vrsqrt.f32 %v2024_v23  ;;  %v2006_v25 = vmul.f32 0.0078125, %v1975_v37 }
 0x53c   : > { %v2022_v38 = vadd.f32 1e-05, %v2006_v25 }
 0x53d   : > { %v1981_v50 = vpop.xlane.xlu0 %1980 }
 0x53e   : > { %3072 = vrsqrt.f32 %v2022_v38  ;;  %v2009_v22 = vmul.f32 0.0078125, %v1981_v50 }
 0x540   : > { %v2025_v51 = vadd.f32 1e-05, %v2009_v22 }
 0x541   : > { %v1977_v52 = vpop.xlane.xlu0 %1976 }
 0x542   : > { %3074 = vrsqrt.f32 %v2025_v51  ;;  %v2007_v53 = vmul.f32 0.0078125, %v1977_v52 }
 0x544   : > { %v3071_v54 = vpop.eup %3070  ;;  %v2023_v28 = vadd.f32 1e-05, %v2007_v53 }
 0x545   : > { %v1987_v39 = vpop.xlane.xlu1 %1986  ;;  %v2056_v30 = vmul.f32 %v3071_v54, %v3591_v35  ;;  %v3674_v35 = vld [vmem:[%s3774_s11] ss:$0 sm:$0xff]  ;;  %v2202_v54 = vunpack.c.l.bf16 %v3425_v19 }
 0x546   : > { %3076 = vrsqrt.f32 %v2023_v28  ;;  %v2012_v57 = vmul.f32 0.0078125, %v1987_v39  ;;  %v2203_v28 = vunpack.c.h.bf16 %v3425_v19 }
 0x547   : > { %v1989_v58 = vpop.xlane.xlu0 %1988  ;;  %v2079_v29 = vmul.f32 %v3667_v41, %v2056_v30 }
 0x548   : > { %v3073_v60 = vpop.eup %3072  ;;  %v2028_v62 = vadd.f32 1e-05, %v2012_v57  ;;  %v2013_v63 = vmul.f32 0.0078125, %v1989_v58 }
 0x549   : > { %v1983_v0 = vpop.xlane.xlu1 %1982  ;;  %v2054_v27 = vmul.f32 %v3073_v60, %v3595_v47  ;;  %v2102_v33 = vadd.f32 %v3674_v35, %v2079_v29 }
 0x54a   : > { %3078 = vrsqrt.f32 %v2028_v62  ;;  %v2029_v1 = vadd.f32 1e-05, %v2013_v63  ;;  %v2010_v3 = vmul.f32 0.0078125, %v1983_v0 }
 0x54b   : > { %v1985_v5 = vpop.xlane.xlu0 %1984  ;;  %v2077_v47 = vmul.f32 %v3667_v41, %v2054_v27  ;;  %v2214_v17 = vadd.f32 %v2198_v11, %v2102_v33 }
 0x54c   : > { %v3075_v6 = vpop.eup %3074  ;;  %3080 = vrsqrt.f32 %v2029_v1  ;;  %v2026_v7 = vadd.f32 1e-05, %v2010_v3  ;;  %v2011_v9 = vmul.f32 0.0078125, %v1985_v5 }
 0x54d   : > { %v2057_v32 = vmul.f32 %v3075_v6, %v3599_v48  ;;  %v2196_v48 = vunpack.c.l.bf16 %v3416_v16  ;;  %v2100_v24 = vadd.f32 %v3674_v35, %v2077_v47 }
 0x54e   : > { %3082 = vrsqrt.f32 %v2026_v7  ;;  %v2027_v34 = vadd.f32 1e-05, %v2011_v9 }
 0x54f   : > { %v2080_v44 = vmul.f32 %v3667_v41, %v2057_v32  ;;  %v2212_v37 = vadd.f32 %v2196_v48, %v2100_v24 }
 0x550   : > { %v3077_v45 = vpop.eup %3076  ;;  %3084 = vrsqrt.f32 %v2027_v34 }
 0x551   : > { %v2103_v13 = vadd.f32 %v3674_v35, %v2080_v44  ;;  %v2055_v15 = vmul.f32 %v3077_v45, %v3601_v49 }
 0x553   : > { %v2616_v36 = vpack.c.bf16 %v2103_v13, %v2102_v33  ;;  %v2215_v42 = vadd.f32 %v2199_v31, %v2103_v13  ;;  %v2078_v20 = vmul.f32 %v3667_v41, %v2055_v15 }
 0x554   : > { %v3079_v43 = vpop.eup %3078 }
 0x555   : > { %2688 = vst [vmem:[%s3691_s19 + $0x8] sm:$0xff] %v2616_v36   ;;  %v2656_v16 = vpack.c.bf16 %v2215_v42, %v2214_v17  ;;  %v2101_v49 = vadd.f32 %v3674_v35, %v2078_v20  ;;  %v2060_v46 = vmul.f32 %v3079_v43, %v3607_v55  ;;  %v1995_v21 = vpop.xlane.xlu1 %1994 }
 0x556   : > { %v3081_v23 = vpop.eup %3080  ;;  %v2016_v25 = vmul.f32 0.0078125, %v1995_v21 }
 0x557   : > { %2695 = vst [vmem:[%s3698_s22 + $0x8] sm:$0xff] %v2656_v16   ;;  %v2611_v38 = vpack.c.bf16 %v2101_v49, %v2100_v24  ;;  %v2213_v50 = vadd.f32 %v2197_v18, %v2101_v49  ;;  %v2083_v22 = vmul.f32 %v3667_v41, %v2060_v46  ;;  %v2061_v51 = vmul.f32 %v3081_v23, %v3609_v56  ;;  %v1997_v52 = vpop.xlane.xlu0 %1996  ;;  %v3102_v56 = vld [vmem:[%s3413_s17 + $0x10] sm:$0xff]   ;;  %v3103_v16 = vld [vmem:[%s3413_s17 + $0x28] sm:$0xff]  }
 0x558   : > { %v3083_v53 = vpop.eup %3082  ;;  %v2032_v55 = vadd.f32 1e-05, %v2016_v25  ;;  %v2017_v39 = vmul.f32 0.0078125, %v1997_v52  ;;  %v2200_v0 = vunpack.c.l.bf16 %v3102_v56  ;;  %v2201_v3 = vunpack.c.h.bf16 %v3102_v56 }
 0x559   : > { %2612 = vst [vmem:[%s3691_s19] sm:$0xff] %v2611_v38   ;;  %v2651_v57 = vpack.c.bf16 %v2213_v50, %v2212_v37  ;;  %v2106_v30 = vadd.f32 %v3674_v35, %v2083_v22  ;;  %v2084_v58 = vmul.f32 %v3667_v41, %v2061_v51  ;;  %v2058_v60 = vmul.f32 %v3083_v53, %v3613_v59  ;;  %v1991_v62 = vpop.xlane.xlu1 %1990  ;;  %v3104_v50 = vld [vmem:[%s3413_s17 + $0x20] sm:$0xff]  }
 0x55a   : > { %v3085_v63 = vpop.eup %3084  ;;  %3086 = vrsqrt.f32 %v2032_v55  ;;  %v2033_v27 = vadd.f32 1e-05, %v2017_v39  ;;  %v2014_v1 = vmul.f32 0.0078125, %v1991_v62  ;;  %v2206_v49 = vunpack.c.l.bf16 %v3103_v16 }
 0x55b   : > { %2652 = vst [vmem:[%s3698_s22] sm:$0xff] %v2651_v57   ;;  %v2107_v19 = vadd.f32 %v3674_v35, %v2084_v58  ;;  %v2081_v29 = vmul.f32 %v3667_v41, %v2058_v60  ;;  %v2059_v5 = vmul.f32 %v3085_v63, %v3617_v61  ;;  %v1993_v6 = vpop.xlane.xlu0 %1992  ;;  %v2218_v7 = vadd.f32 %v2202_v54, %v2106_v30 }
 0x55c   : > { %3088 = vrsqrt.f32 %v2033_v27  ;;  %v2030_v59 = vadd.f32 1e-05, %v2014_v1  ;;  %v2015_v9 = vmul.f32 0.0078125, %v1993_v6  ;;  %v2207_v46 = vunpack.c.h.bf16 %v3103_v16 }
 0x55d   : > { %v2626_v32 = vpack.c.bf16 %v2107_v19, %v2106_v30  ;;  %v2219_v47 = vadd.f32 %v2203_v28, %v2107_v19  ;;  %v2104_v34 = vadd.f32 %v3674_v35, %v2081_v29  ;;  %v2082_v11 = vmul.f32 %v3667_v41, %v2059_v5 }
 0x55e   : > { %3090 = vrsqrt.f32 %v2030_v59  ;;  %v2031_v31 = vadd.f32 1e-05, %v2015_v9  ;;  %v2204_v22 = vunpack.c.l.bf16 %v3104_v50  ;;  %v2205_v53 = vunpack.c.h.bf16 %v3104_v50 }
 0x55f   : > { %2690 = vst [vmem:[%s3691_s19 + $0x18] sm:$0xff] %v2626_v32   ;;  %v2666_v33 = vpack.c.bf16 %v2219_v47, %v2218_v7  ;;  %v2105_v61 = vadd.f32 %v3674_v35, %v2082_v11  ;;  %v2216_v44 = vadd.f32 %v2200_v0, %v2104_v34  ;;  %v3105_v47 = vld [vmem:[%s3413_s17 + $0x30] sm:$0xff]  }
 0x560   : > { %3092 = vrsqrt.f32 %v2031_v31  ;;  %v2209_v11 = vunpack.c.h.bf16 %v3105_v47 }
 0x561   : > { %2697 = vst [vmem:[%s3698_s22 + $0x18] sm:$0xff] %v2666_v33   ;;  %v2621_v45 = vpack.c.bf16 %v2105_v61, %v2104_v34  ;;  %v2217_v13 = vadd.f32 %v2201_v3, %v2105_v61  ;;  %v2208_v34 = vunpack.c.l.bf16 %v3105_v47 }
 0x563   : > { %2689 = vst [vmem:[%s3691_s19 + $0x10] sm:$0xff] %v2621_v45   ;;  %v2661_v15 = vpack.c.bf16 %v2217_v13, %v2216_v44 }
 0x564   : > { %v3087_v48 = vpop.eup %3086 }
 0x565   : > { %2696 = vst [vmem:[%s3698_s22 + $0x10] sm:$0xff] %v2661_v15   ;;  %v2064_v18 = vmul.f32 %v3087_v48, %v3624_v2 }
 0x566   : > { %v3089_v24 = vpop.eup %3088  ;;  %v1999_v17 = vpop.xlane.xlu1 %1998 }
 0x567   : > { %v2087_v36 = vmul.f32 %v3667_v41, %v2064_v18  ;;  %v2065_v42 = vmul.f32 %v3089_v24, %v3627_v4  ;;  %v2018_v20 = vmul.f32 0.0078125, %v1999_v17 }
 0x568   : > { %v3091_v43 = vpop.eup %3090  ;;  %v2001_v21 = vpop.xlane.xlu0 %2000 }
 0x569   : > { %v2110_v23 = vadd.f32 %v3674_v35, %v2087_v36  ;;  %v2088_v37 = vmul.f32 %v3667_v41, %v2065_v42  ;;  %v2062_v25 = vmul.f32 %v3091_v43, %v3632_v8  ;;  %v2034_v2 = vadd.f32 1e-05, %v2018_v20 }
 0x56a   : > { %v3093_v38 = vpop.eup %3092  ;;  %v2019_v51 = vmul.f32 0.0078125, %v2001_v21  ;;  %v2003_v52 = vpop.xlane.xlu1 %2002 }
 0x56b   : > { %v2111_v4 = vadd.f32 %v3674_v35, %v2088_v37  ;;  %v2085_v54 = vmul.f32 %v3667_v41, %v2062_v25  ;;  %v2063_v28 = vmul.f32 %v3093_v38, %v3637_v10  ;;  %v2222_v55 = vadd.f32 %v2206_v49, %v2110_v23 }
 0x56c   : > { %3094 = vrsqrt.f32 %v2034_v2  ;;  %v2035_v39 = vadd.f32 1e-05, %v2019_v51  ;;  %v2020_v57 = vmul.f32 0.0078125, %v2003_v52  ;;  %v2005_v8 = vpop.xlane.xlu0 %2004 }
 0x56d   : > { %v2636_v30 = vpack.c.bf16 %v2111_v4, %v2110_v23  ;;  %v2223_v58 = vadd.f32 %v2207_v46, %v2111_v4  ;;  %v2108_v60 = vadd.f32 %v3674_v35, %v2085_v54  ;;  %v2086_v62 = vmul.f32 %v3667_v41, %v2063_v28 }
 0x56e   : > { %3096 = vrsqrt.f32 %v2035_v39  ;;  %v2036_v63 = vadd.f32 1e-05, %v2020_v57  ;;  %v2021_v56 = vmul.f32 0.0078125, %v2005_v8 }
 0x56f   : > { %2692 = vst [vmem:[%s3691_s19 + $0x28] sm:$0xff] %v2636_v30   ;;  %v2676_v0 = vpack.c.bf16 %v2223_v58, %v2222_v55  ;;  %v2109_v10 = vadd.f32 %v3674_v35, %v2086_v62  ;;  %v2220_v1 = vadd.f32 %v2204_v22, %v2108_v60 }
 0x570   : > { %3098 = vrsqrt.f32 %v2036_v63  ;;  %v2037_v27 = vadd.f32 1e-05, %v2021_v56 }
 0x571   : > { %2699 = vst [vmem:[%s3698_s22 + $0x28] sm:$0xff] %v2676_v0   ;;  %v2631_v3 = vpack.c.bf16 %v2109_v10, %v2108_v60  ;;  %v2221_v19 = vadd.f32 %v2205_v53, %v2109_v10 }
 0x572   : > { %3100 = vrsqrt.f32 %v2037_v27 }
 0x573   : > { %2691 = vst [vmem:[%s3691_s19 + $0x20] sm:$0xff] %v2631_v3   ;;  %v2671_v29 = vpack.c.bf16 %v2221_v19, %v2220_v1 }
 0x575   : > { %2698 = vst [vmem:[%s3698_s22 + $0x20] sm:$0xff] %v2671_v29  }
 0x576   : > { %v3095_v5 = vpop.eup %3094 }
 0x577   : > { %v2066_v6 = vmul.f32 %v3095_v5, %v3644_v12 }
 0x578   : > { %v3097_v7 = vpop.eup %3096 }
 0x579   : > { %v2089_v59 = vmul.f32 %v3667_v41, %v2066_v6  ;;  %v2067_v9 = vmul.f32 %v3097_v7, %v3647_v40  ;;  %v3106_v40 = vld [vmem:[%s3413_s17 + $0x38] sm:$0xff]  }
 0x57a   : > { %v3099_v32 = vpop.eup %3098  ;;  %v2210_v15 = vunpack.c.l.bf16 %v3106_v40  ;;  %v2211_v48 = vunpack.c.h.bf16 %v3106_v40 }
 0x57b   : > { %v2112_v31 = vadd.f32 %v3674_v35, %v2089_v59  ;;  %v2090_v33 = vmul.f32 %v3667_v41, %v2067_v9  ;;  %v2068_v61 = vmul.f32 %v3099_v32, %v3652_v26 }
 0x57c   : > { %v3101_v44 = vpop.eup %3100 }
 0x57d   : > { %v2113_v12 = vadd.f32 %v3674_v35, %v2090_v33  ;;  %v2091_v45 = vmul.f32 %v3667_v41, %v2068_v61  ;;  %v2069_v13 = vmul.f32 %v3101_v44, %v3657_v14  ;;  %v2224_v18 = vadd.f32 %v2208_v34, %v2112_v31 }
 0x57f   : > { %v2641_v24 = vpack.c.bf16 %v2113_v12, %v2112_v31  ;;  %v2225_v17 = vadd.f32 %v2209_v11, %v2113_v12  ;;  %v2114_v36 = vadd.f32 %v3674_v35, %v2091_v45  ;;  %v2092_v26 = vmul.f32 %v3667_v41, %v2069_v13 }
 0x581   : > { %2693 = vst [vmem:[%s3691_s19 + $0x30] sm:$0xff] %v2641_v24   ;;  %v2681_v42 = vpack.c.bf16 %v2225_v17, %v2224_v18  ;;  %v2115_v20 = vadd.f32 %v3674_v35, %v2092_v26  ;;  %v2226_v43 = vadd.f32 %v2210_v15, %v2114_v36 }
 0x583   : > { %2700 = vst [vmem:[%s3698_s22 + $0x30] sm:$0xff] %v2681_v42   ;;  %v2646_v16 = vpack.c.bf16 %v2115_v20, %v2114_v36  ;;  %v2227_v14 = vadd.f32 %v2211_v48, %v2115_v20 }
 0x585   : > { %2694 = vst [vmem:[%s3691_s19 + $0x38] sm:$0xff] %v2646_v16   ;;  %v2686_v49 = vpack.c.bf16 %v2227_v14, %v2226_v43 }
 0x587   : > { %2701 = vst [vmem:[%s3698_s22 + $0x38] sm:$0xff] %v2686_v49  }
 0x588 PF: > { %s24_s25 = sadd.s32 1, %s3113_s25  }
 0x589   : > { %p21_p4 = scmp.ge.s32.totalorder %s24_s25, 4  }
 0x58b   :  { %23 = sbr.rel (!%p21_p4) target bundleno = 1 (0x1), region = 116 }

// kernel: epd_forward.19
= control target key start
LH: loop header
LB: loop body
LE: loop exit
PB: predicated region body
PF: predicated region fallthrough
CT: control target
= control target key end

     0   :  { %s935_s24 = smov 0   ;;  %s1041_s0 = inlined_call_operand.vmem [shape: bf16[64,128], index: 0, kind: input, shape index: {}]   ;;  %s1042_s1 = inlined_call_operand.vmem [shape: bf16[128,128], index: 1, kind: input, shape index: {}]   ;;  %s1043_s2 = inlined_call_operand.vmem [shape: f32[1,128], index: 2, kind: input, shape index: {}]   ;;  %s1044_s3 = inlined_call_operand.vmem [shape: bf16[128,128], index: 3, kind: input, shape index: {}]   ;;  %s1045_s4 = inlined_call_operand.vmem [shape: f32[1,128], index: 4, kind: input, shape index: {}]   ;;  %s1046_s5 = inlined_call_operand.vmem [shape: bf16[128,128], index: 5, kind: input, shape index: {}]   ;;  %s1047_s6 = inlined_call_operand.vmem [shape: f32[1,128], index: 6, kind: input, shape index: {}]   ;;  %s1048_s7 = inlined_call_operand.vmem [shape: f32[64,128], index: 7, kind: output, shape index: {}]  }
   0x1 LB: > { %s723_s25 = sadd.s32 4294967295, %s893_s24   ;;  %p727_p0 = scmp.ge.s32.totalorder %s893_s24, 1  ;;  %s893_s24 = sphi %s935_s24, %s17_s24  }
   0x2   : > { %p238_p1 = scmp.lt.s32.totalorder %s893_s24, 3 }
   0x4   : > { %p239_p2 = pnand %p727_p0, %p238_p1 }
   0x5   : > { %v861_v0 = vld [vmem:[%s1042_s1] sm:$0xff] (!%p239_p2)   ;;  %s728_s28 = sshll.u32 (!%p239_p2), %s723_s25, 2  ;;  %v862_v1 = vld [vmem:[%s1042_s1 + $0x8] sm:$0xff] (!%p239_p2)   ;;  %v863_v2 = vld [vmem:[%s1042_s1 + $0x10] sm:$0xff] (!%p239_p2)  }
   0x6   : > { %242 = sbr.rel (%p239_p2) target bundleno = 696 (0x2b8), region = 48  ;;  %p271_p3 = scmp.lt.s32.totalorder (!%p239_p2), %s728_s28, 7  ;;  %793 = vmatprep.subr.bf16.mxu0 (!%p239_p2), %v861_v0  ;;  %v864_v3 = vld [vmem:[%s1042_s1 + $0x18] sm:$0xff] (!%p239_p2)   ;;  %v871_v5 = vld [vmem:[%s1044_s3] sm:$0xff] (!%p239_p2)   ;;  %v872_v6 = vld [vmem:[%s1044_s3 + $0x8] sm:$0xff] (!%p239_p2)  }
   0x7   : > { %794 = vmatpush3.bf16.msra.mxu0 (!%p239_p2), %v861_v0  ;;  %v865_v7 = vld [vmem:[%s1042_s1 + $0x20] sm:$0xff] (!%p239_p2)   ;;  %813 = vmatprep.subr.bf16.mxu1 (!%p239_p2), %v871_v5  ;;  %v873_v8 = vld [vmem:[%s1044_s3 + $0x10] sm:$0xff] (!%p239_p2)   ;;  %v866_v9 = vld [vmem:[%s1042_s1 + $0x28] sm:$0xff] (!%p239_p2)  }
   0x8   : > { %795 = vmatprep.subr.bf16.mxu0 (!%p239_p2), %v862_v1  ;;  %814 = vmatpush3.bf16.msra.mxu1 (!%p239_p2), %v871_v5  ;;  %v874_v10 = vld [vmem:[%s1044_s3 + $0x18] sm:$0xff] (!%p239_p2)   ;;  %v867_v11 = vld [vmem:[%s1042_s1 + $0x30] sm:$0xff] (!%p239_p2)   ;;  %v875_v12 = vld [vmem:[%s1044_s3 + $0x20] sm:$0xff] (!%p239_p2)  }
   0x9   : > { %815 = vmatprep.subr.bf16.mxu1 (!%p239_p2), %v872_v6  ;;  %v868_v13 = vld [vmem:[%s1042_s1 + $0x38] sm:$0xff] (!%p239_p2)   ;;  %v876_v14 = vld [vmem:[%s1044_s3 + $0x28] sm:$0xff] (!%p239_p2)   ;;  %v877_v16 = vld [vmem:[%s1044_s3 + $0x30] sm:$0xff] (!%p239_p2)  }
   0xa   : > { %v878_v17 = vld [vmem:[%s1044_s3 + $0x38] sm:$0xff] (!%p239_p2)   ;;  %v879_v18 = vld [vmem:[%s1046_s5] sm:$0xff] (!%p239_p2)   ;;  %v880_v19 = vld [vmem:[%s1046_s5 + $0x8] sm:$0xff] (!%p239_p2)  }
   0xb   : > { %796 = vmatpush3.bf16.msra.mxu0 (!%p239_p2), %v862_v1  ;;  %v881_v20 = vld [vmem:[%s1046_s5 + $0x10] sm:$0xff] (!%p239_p2)   ;;  %v882_v21 = vld [vmem:[%s1046_s5 + $0x18] sm:$0xff] (!%p239_p2)   ;;  %v883_v22 = vld [vmem:[%s1046_s5 + $0x20] sm:$0xff] (!%p239_p2)  }
   0xc   : > { %797 = vmatprep.subr.bf16.mxu0 (!%p239_p2), %v863_v2  ;;  %816 = vmatpush3.bf16.msra.mxu1 (!%p239_p2), %v872_v6  ;;  %v884_v23 = vld [vmem:[%s1046_s5 + $0x28] sm:$0xff] (!%p239_p2)   ;;  %v732_v25 = vld [vmem:[%s1043_s2] ss:$0 sm:$0xff] (!%p239_p2)  ;;  %v885_v35 = vld [vmem:[%s1046_s5 + $0x30] sm:$0xff] (!%p239_p2)  }
   0xd   : > { %s1050_s28 = smov (!%p271_p3, %s728_s28), 7  ;;  %817 = vmatprep.subr.bf16.mxu1 %v873_v8  ;;  %v886_v36 = vld [vmem:[%s1046_s5 + $0x38] sm:$0xff]   ;;  %v743_v38 = vld [vmem:[%s1045_s4] ss:$0 sm:$0xff] }
   0xe   : > { %s729_s10 = sshll.u32 %s1050_s28, 2  ;;  %s731_s19 = sshll.u32 %s1050_s28, 3  ;;  %v752_v48 = vld [vmem:[%s1047_s6] ss:$0 sm:$0xff] }
   0xf   : > { %s958_s13 = scalar_lea.vmem %s1041_s0, %s729_s10  ;;  %798 = vmatpush3.bf16.msra.mxu0 %v863_v2  ;;  %s280_s23 = scalar_lea.vmem %s1048_s7, %s731_s19 }
  0x10   : > { %v869_v4 = vld [vmem:[%s958_s13] sm:$0xff]   ;;  %799 = vmatprep.subr.bf16.mxu0 %v864_v3  ;;  %818 = vmatpush3.bf16.msra.mxu1 %v873_v8  ;;  %v870_v15 = vld [vmem:[%s958_s13 + $0x8] sm:$0xff]  }
  0x11   : > { %809 = vmatprep.mubr.bf16.mxu0 %v869_v4  ;;  %819 = vmatprep.subr.bf16.mxu1 %v874_v10 }
  0x13   : > { %800 = vmatpush3.bf16.msra.mxu0 %v864_v3 }
  0x14   : > { %801 = vmatprep.subr.bf16.mxu0 %v865_v7  ;;  %820 = vmatpush3.bf16.msra.mxu1 %v874_v10 }
  0x15   : > { %821 = vmatprep.subr.bf16.mxu1 %v875_v12 }
  0x17   : > { %802 = vmatpush3.bf16.msra.mxu0 %v865_v7 }
  0x18   : > { %803 = vmatprep.subr.bf16.mxu0 %v866_v9  ;;  %822 = vmatpush3.bf16.msra.mxu1 %v875_v12 }
  0x19   : > { %823 = vmatprep.subr.bf16.mxu1 %v876_v14 }
  0x1b   : > { %804 = vmatpush3.bf16.msra.mxu0 %v866_v9 }
  0x1c   : > { %805 = vmatprep.subr.bf16.mxu0 %v867_v11  ;;  %824 = vmatpush3.bf16.msra.mxu1 %v876_v14 }
  0x1d   : > { %825 = vmatprep.subr.bf16.mxu1 %v877_v16 }
  0x1f   : > { %806 = vmatpush3.bf16.msra.mxu0 %v867_v11 }
  0x20   : > { %807 = vmatprep.subr.bf16.mxu0 %v868_v13  ;;  %826 = vmatpush3.bf16.msra.mxu1 %v877_v16 }
  0x21   : > { %827 = vmatprep.subr.bf16.mxu1 %v878_v17 }
  0x23   : > { %808 = vmatpush3.bf16.msra.mxu0 %v868_v13 }
  0x24   : > { %828 = vmatpush3.bf16.msra.mxu1 %v878_v17  ;;  %833 = vmatprep.subr.bf16.mxu0 %v879_v18 }
  0x26   : > { %810 = vmatmul.mubr.bf16.vlgmr.msra.gmra.mrb[0].mxu0 %v870_v15 }
  0x27   : > { %834 = vmatpush3.bf16.msra.mxu0 %v879_v18 }
  0x28   : > { %835 = vmatprep.subr.bf16.mxu0 %v880_v19 }
  0x2b   : > { %836 = vmatpush3.bf16.msra.mxu0 %v880_v19 }
  0x2c   : > { %837 = vmatprep.subr.bf16.mxu0 %v881_v20 }
  0x2f   : > { %838 = vmatpush3.bf16.msra.mxu0 %v881_v20 }
  0x30   : > { %839 = vmatprep.subr.bf16.mxu0 %v882_v21 }
  0x33   : > { %840 = vmatpush3.bf16.msra.mxu0 %v882_v21 }
  0x34   : > { %841 = vmatprep.subr.bf16.mxu0 %v883_v22 }
  0x37   : > { %842 = vmatpush3.bf16.msra.mxu0 %v883_v22 }
  0x38   : > { %843 = vmatprep.subr.bf16.mxu0 %v884_v23 }
  0x3b   : > { %844 = vmatpush3.bf16.msra.mxu0 %v884_v23 }
  0x3c   : > { %845 = vmatprep.subr.bf16.mxu0 %v885_v35 }
  0x3f   : > { %846 = vmatpush3.bf16.msra.mxu0 %v885_v35 }
  0x40   : > { %847 = vmatprep.subr.bf16.mxu0 %v886_v36 }
  0x43   : > { %848 = vmatpush3.bf16.msra.mxu0 %v886_v36 }
  0xf9   : > { %v811_v24 = vpop.f32.mrb[0].mxu0 }
  0xfa   : > { %v404_v26 = vpop.f32.mrb[1].mxu0  ;;  %v413_v28 = vadd.f32 %v811_v24, %v732_v25 }
  0xfb   : > { %v812_v27 = vpop.f32.mrb[2].mxu0  ;;  %v405_v31 = vadd.f32 %v732_v25, %v404_v26 }
  0xfc   : > { %v416_v29 = vadd.f32 %v812_v27, %v732_v25  ;;  %v407_v30 = vpop.f32.mrb[3].mxu0 }
  0xfd   : > { %v408_v32 = vadd.f32 %v732_v25, %v407_v30 }
  0xfe   : > { %v437_v33 = vpack.c.bf16 %v416_v29, %v413_v28 }
  0xff   : > { %v436_v34 = vpack.c.bf16 %v408_v32, %v405_v31 }
 0x101   : > { %829 = vmatprep.mubr.bf16.mxu1 %v436_v34 }
 0x102   : > { %830 = vmatmul.mubr.bf16.vlgmr.msra.gmra.mrb[0].mxu1 %v437_v33 }
 0x1d5   : > { %v831_v37 = vpop.f32.mrb[0].mxu1 }
 0x1d6   : > { %v526_v39 = vpop.f32.mrb[1].mxu1  ;;  %v535_v41 = vadd.f32 %v831_v37, %v743_v38 }
 0x1d7   : > { %v832_v40 = vpop.f32.mrb[2].mxu1  ;;  %v527_v44 = vadd.f32 %v743_v38, %v526_v39 }
 0x1d8   : > { %v538_v42 = vadd.f32 %v832_v40, %v743_v38  ;;  %v529_v43 = vpop.f32.mrb[3].mxu1 }
 0x1d9   : > { %v530_v45 = vadd.f32 %v743_v38, %v529_v43 }
 0x1da   : > { %v559_v46 = vpack.c.bf16 %v538_v42, %v535_v41 }
 0x1db   : > { %v558_v47 = vpack.c.bf16 %v530_v45, %v527_v44 }
 0x1dd   : > { %849 = vmatprep.mubr.bf16.mxu0 %v558_v47 }
 0x1de   : > { %850 = vmatmul.mubr.bf16.vlgmr.msra.gmra.mrb[4].mxu0 %v559_v46 }
 0x2b1   : > { %v851_v49 = vpop.f32.mrb[4].mxu0 }
 0x2b2   : > { %v648_v50 = vpop.f32.mrb[5].mxu0  ;;  %v657_v55 = vadd.f32 %v851_v49, %v752_v48 }
 0x2b3   : > { %v649_v51 = vadd.f32 %v752_v48, %v648_v50  ;;  %v852_v52 = vpop.f32.mrb[6].mxu0 }
 0x2b4   : > { %v651_v53 = vpop.f32.mrb[7].mxu0  ;;  %v660_v56 = vadd.f32 %v852_v52, %v752_v48  ;;  %665 = vst [vmem:[%s280_s23 + $0x10] sm:$0xff] %v657_v55 }
 0x2b5   : > { %663 = vst [vmem:[%s280_s23] sm:$0xff] %v649_v51  ;;  %v652_v54 = vadd.f32 %v752_v48, %v651_v53 }
 0x2b6   : > { %666 = vst [vmem:[%s280_s23 + $0x18] sm:$0xff] %v660_v56 }
 0x2b7   : > { %664 = vst [vmem:[%s280_s23 + $0x8] sm:$0xff] %v652_v54 }
 0x2b8 PF: > { %s17_s24 = sadd.s32 1, %s893_s24  }
 0x2b9   : > { %p14_p4 = scmp.ge.s32.totalorder %s17_s24, 4  }
 0x2bb   :  { %16 = sbr.rel (!%p14_p4) target bundleno = 1 (0x1), region = 78 }

// kernel: epd_forward.14
= control target key start
LH: loop header
LB: loop body
LE: loop exit
PB: predicated region body
PF: predicated region fallthrough
CT: control target
= control target key end

     0   :  { %s1739_s17 = smov 0   ;;  %s1741_s18 = smov 0   ;;  %s1958_s0 = inlined_call_operand.vmem [shape: bf16[64,128], index: 0, kind: input, shape index: {}, may-alias: {0,11}]   ;;  %s1959_s1 = inlined_call_operand.vmem [shape: bf16[256,128], index: 1, kind: input, shape index: {}]   ;;  %s1960_s2 = inlined_call_operand.vmem [shape: s32[1,256], index: 2, kind: input, shape index: {}]   ;;  %s1961_s3 = inlined_call_operand.vmem [shape: bf16[256,128], index: 3, kind: input, shape index: {}]   ;;  %s1962_s4 = inlined_call_operand.vmem [shape: f32[1,128], index: 4, kind: input, shape index: {}]   ;;  %s1963_s5 = inlined_call_operand.vmem [shape: bf16[128,128], index: 5, kind: input, shape index: {}]   ;;  %s1964_s6 = inlined_call_operand.vmem [shape: f32[1,128], index: 6, kind: input, shape index: {}]   ;;  %s1965_s7 = inlined_call_operand.vmem [shape: bf16[128,128], index: 7, kind: input, shape index: {}]   ;;  %s1966_s8 = inlined_call_operand.vmem [shape: f32[1,128], index: 8, kind: input, shape index: {}]   ;;  %s1967_s9 = inlined_call_operand.vmem [shape: f32[1,128], index: 9, kind: input, shape index: {}]   ;;  %s1968_s10 = inlined_call_operand.vmem [shape: f32[1,128], index: 10, kind: input, shape index: {}]   ;;  %s1969_s11 = inlined_call_operand.vmem [shape: bf16[64,128], index: 11, kind: output, shape index: {}, may-alias: {0,11}]  }
   0x1   :  { %s1743_s19 = smov 0   ;;  %s1745_s20 = smov 0  }
   0x2   :  { %s1747_s21 = smov 0  }
   0x3 LB: > { %1971 = sst [smem:[#allocation5_spill]] %s1669_s20  ;;  %s30_s22 = sadd.s32 1, %s1665_s19  ;;  %s1673_s21 = sphi %s1747_s21, %s21_s21   ;;  %s1669_s20 = sphi %s1745_s20, %s1979_s20   ;;  %s1665_s19 = sphi %s1743_s19, %s1978_s19   ;;  %s1661_s18 = sphi %s1741_s18, %s1974_s18   ;;  %s1657_s17 = sphi %s1739_s17, %s1977_s17  }
   0x4   : > { %s33_s23 = sadd.s32 1, %s1669_s20  ;;  %p31_p0 = scmp.ge.s32.totalorder %s30_s22, 2 }
   0x5   : > { %p1324_p1 = scmp.ge.s32.totalorder %s1673_s21, 1  ;;  %p369_p2 = scmp.lt.s32.totalorder %s1673_s21, 5 }
   0x6   : > { %s1981_s22 = smov (%p31_p0, %s30_s22), 0  ;;  %s1983_s23 = smov (!%p31_p0, %s33_s23), %s1669_s20 }
   0x7   : > { %1972 = sst [smem:[#allocation6_spill]] %s1981_s22  ;;  %p370_p3 = pnand %p1324_p1, %p369_p2 }
   0x8   : > { %p35_p4 = scmp.ge.s32.totalorder %s1983_s23, 2  ;;  %s1325_s24 = sshll.u32 (!%p370_p3), %s1661_s18, 2 }
   0x9   : > { %373 = sbr.rel (%p370_p3) target bundleno = 1332 (0x534), region = 64  ;;  %s1327_s25 = sshll.u32 (!%p370_p3), %s1657_s17, 4 }
   0xa   : > { %s1985_s23 = smov (%p35_p4, %s1983_s23), 0  ;;  %p418_p5 = scmp.lt.s32.totalorder (!%p370_p3), %s1325_s24, 7 }
   0xb   : > { %1973 = sst [smem:[#allocation7_spill]] %s1985_s23  ;;  %p424_p6 = scmp.lt.s32.totalorder (!%p370_p3), %s1327_s25, 31 }
   0xc   : > { %p429_p7 = scmp.lt.s32.totalorder (!%p370_p3), %s1657_s17, 1  ;;  %p1331_p8 = scmp.ne.s32.totalorder (!%p370_p3), %s1657_s17, 0 }
  0x10   : > { %s1987_s24 = smov (!%p418_p5, %s1325_s24), 7  ;;  %s1989_s25 = smov (!%p424_p6, %s1327_s25), 31 }
  0x11   : > { %s1326_s26 = sshll.u32 %s1987_s24, 2  ;;  %s1328_s30 = sshll.u32 %s1989_s25, 2  ;;  %vm447_vm0 = vcmask (!%p1331_p8), 7168   ;;  %v1675_v0 = vmov (!%p1331_p8), 0.0  }
  0x12   : > { %s1779_s29 = scalar_lea.vmem %s1958_s0, %s1326_s26  ;;  %s1784_s14 = scalar_lea.vmem %s1959_s1, %s1328_s30  ;;  %443 = vst [vmem:[#allocation2] sm:$0xff] (!%p1331_p8), %v1675_v0  ;;  %444 = vst [vmem:[#allocation2 + $0x8] sm:$0xff] (!%p1331_p8), %v1675_v0 }
  0x13   : > { %s1789_s23 = scalar_lea.vmem %s1969_s11, %s1326_s26  ;;  %442 = sbr.rel (%p1331_p8) target bundleno = 26 (0x1a), region = 68  ;;  %445 = vst [vmem:[#allocation2 + $0x10] sm:$0xff] (!%p1331_p8), %v1675_v0  ;;  %446 = vst [vmem:[#allocation2 + $0x18] sm:$0xff] (!%p1331_p8), %v1675_v0 }
  0x14   : > { %s1792_s22 = scalar_select %p429_p7, %s1657_s17, 1 }
  0x15   : > { %448 = vst.msk [vmem:[#allocation3] sm:$0xff] (!%p1331_p8), %vm447_vm0, %v1675_v0  ;;  %449 = vst.msk [vmem:[#allocation3 + $0x8] sm:$0xff] (!%p1331_p8), %vm447_vm0, %v1675_v0 }
  0x16   : > { %s431_s27 = scalar_lea.vmem %s1960_s2, %s1792_s22  ;;  %450 = vst.msk [vmem:[#allocation3 + $0x10] sm:$0xff] (!%p1331_p8), %vm447_vm0, %v1675_v0  ;;  %451 = vst.msk [vmem:[#allocation3 + $0x18] sm:$0xff] (!%p1331_p8), %vm447_vm0, %v1675_v0 }
  0x1a PF: > { %v1573_v1 = vld [vmem:[%s1784_s14] sm:$0xff]   ;;  %s1332_s20 = sshll.u32 %s1661_s18, 5  ;;  %v454_v2 = vlaneseq  ;;  %v1574_v3 = vld [vmem:[%s1784_s14 + $0x8] sm:$0xff]   ;;  %v1575_v6 = vld [vmem:[%s1784_s14 + $0x10] sm:$0xff]   ;;  %v1676_v16 = vmov 0.0   ;;  %vm633_vm7 = vcmask 7168  }
  0x1b   : > { %1469 = vmatprep.subr.bf16.mxu0 %v1573_v1  ;;  %v459_v5 = vstv %s1332_s20  ;;  %v1576_v13 = vld [vmem:[%s1784_s14 + $0x18] sm:$0xff]   ;;  %v1333_v14 = vld [vmem:[%s431_s27] ss:$0 sm:$0xff]  ;;  %v1677_v19 = vmov 1.0|1.0   ;;  %v1578_v23 = vld [vmem:[%s1784_s14 + $0x28] sm:$0xff]  }
  0x1c   : > { %v455_v4 = vshrl.u32 %v454_v2, 7  ;;  %1470 = vmatpush3.bf16.msra.mxu0 %v1573_v1  ;;  %v1577_v20 = vld [vmem:[%s1784_s14 + $0x20] sm:$0xff]   ;;  %v1579_v24 = vld [vmem:[%s1784_s14 + $0x30] sm:$0xff]   ;;  %v1580_v25 = vld [vmem:[%s1784_s14 + $0x38] sm:$0xff]   ;;  %p1350_p9 = scmp.ne.s32.totalorder %s1657_s17, 1 }
  0x1d   : > { %1471 = vmatprep.subr.bf16.mxu0 %v1574_v3  ;;  %v609_v31 = vld [vmem:[#allocation3 + $0x10] sm:$0xff]  ;;  %v610_v32 = vld [vmem:[#allocation3 + $0x18] sm:$0xff]  ;;  %v607_v36 = vld [vmem:[#allocation3] sm:$0xff]  ;;  %v1678_v59 = vmov (!%p1350_p9), 0  }
  0x1e   : > { %v456_v7 = vadd.s32 8, %v455_v4  ;;  %v460_v8 = vadd.s32 %v459_v5, %v455_v4  ;;  %v457_v9 = vadd.s32 16, %v455_v4  ;;  %v458_v11 = vadd.s32 24, %v455_v4  ;;  %v608_v37 = vld [vmem:[#allocation3 + $0x8] sm:$0xff]  ;;  %v484_v44 = vld [vmem:[#allocation2 + $0x10] sm:$0xff]  ;;  %v482_v45 = vld [vmem:[#allocation2] sm:$0xff]  ;;  %1581 = vset.pattern.permute.xlu0 (!%p1350_p9), %v1678_v59  ;;  %1582 = vset.pattern.permute.xlu1 (!%p1350_p9), %v1678_v59 }
  0x1f   : > { %v485_v47 = vld [vmem:[#allocation2 + $0x18] sm:$0xff]  ;;  %v483_v50 = vld [vmem:[#allocation2 + $0x8] sm:$0xff]  ;;  %v1583_v1 = vld [vmem:[%s1961_s3 + $0x40] sm:$0xff] (!%p1350_p9)  }
  0x20   : > { %v461_v10 = vadd.s32 %v459_v5, %v456_v7  ;;  %1472 = vmatpush3.bf16.msra.mxu0 %v1574_v3  ;;  %v462_v12 = vadd.s32 %v459_v5, %v457_v9  ;;  %v463_v15 = vadd.s32 %v459_v5, %v458_v11  ;;  %vm468_vm1 = vcmp.eq.s32.totalorder %v460_v8, %v1333_v14  ;;  %v1584_v2 = vld [vmem:[%s1961_s3] sm:$0xff] (!%p1350_p9)   ;;  %v1585_v3 = vld [vmem:[%s1961_s3 + $0x48] sm:$0xff] (!%p1350_p9)   ;;  %v1587_v5 = vld [vmem:[%s1961_s3 + $0x50] sm:$0xff] (!%p1350_p9)  }
  0x21   : > { %1473 = vmatprep.subr.bf16.mxu0 %v1575_v6  ;;  %v1334_v18 = vsel %vm468_vm1, 1.0, %v1676_v16  ;;  %v1586_v4 = vld [vmem:[%s1961_s3 + $0x8] sm:$0xff] (!%p1350_p9)   ;;  %v1589_v7 = vld [vmem:[%s1961_s3 + $0x58] sm:$0xff] (!%p1350_p9)   ;;  %v1591_v11 = vld [vmem:[%s1961_s3 + $0x60] sm:$0xff] (!%p1350_p9)  }
  0x22   : > { %vm469_vm2 = vcmp.eq.s32.totalorder %v461_v10, %v1333_v14  ;;  %vm470_vm3 = vcmp.eq.s32.totalorder %v462_v12, %v1333_v14  ;;  %vm471_vm5 = vcmp.eq.s32.totalorder %v463_v15, %v1333_v14  ;;  %615 = vadd.xlane.f32.xlu0 %v1334_v18  ;;  %v1590_v9 = vld [vmem:[%s1961_s3 + $0x18] sm:$0xff] (!%p1350_p9)   ;;  %v1592_v14 = vld [vmem:[%s1961_s3 + $0x20] sm:$0xff] (!%p1350_p9)   ;;  %v1593_v15 = vld [vmem:[%s1961_s3 + $0x68] sm:$0xff] (!%p1350_p9)  }
  0x23   : > { %vm1346_vm4 = vmpackc.low %vm469_vm2, %vm468_vm1  ;;  %v1336_v17 = vsel %vm470_vm3, 1.0, %v1676_v16  ;;  %v1337_v21 = vsel %vm471_vm5, 1.0, %v1676_v16  ;;  %v1335_v22 = vsel %vm469_vm2, 1.0, %v1676_v16  ;;  %v1594_v16 = vld [vmem:[%s1961_s3 + $0x28] sm:$0xff] (!%p1350_p9)   ;;  %v1596_v18 = vld [vmem:[%s1961_s3 + $0x30] sm:$0xff] (!%p1350_p9)  }
  0x24   : > { %1474 = vmatpush3.bf16.msra.mxu0 %v1575_v6  ;;  %1485 = vmatprep.mubr.msk.bf16.mxu0 %vm1346_vm4, %v1677_v19  ;;  %vm1348_vm6 = vmpackc.low %vm471_vm5, %vm470_vm3  ;;  %v1588_v6 = vld [vmem:[%s1961_s3 + $0x10] sm:$0xff] (!%p1350_p9)  }
  0x25   : > { %1475 = vmatprep.subr.bf16.mxu0 %v1576_v13  ;;  %619 = vadd.xlane.f32.xlu1 %v1336_v17  ;;  %v1595_v17 = vld [vmem:[%s1961_s3 + $0x70] sm:$0xff] (!%p1350_p9)  }
  0x26   : > { %617 = vadd.xlane.f32.xlu0 %v1335_v22  ;;  %v1602_v22 = vld [vmem:[%s1963_s5 + $0x8] sm:$0xff] (!%p1350_p9)  }
  0x28   : > { %1476 = vmatpush3.bf16.msra.mxu0 %v1576_v13 }
  0x29   : > { %1477 = vmatprep.subr.bf16.mxu0 %v1577_v20  ;;  %621 = vadd.xlane.f32.xlu1 %v1337_v21  ;;  %v1601_v21 = vld [vmem:[%s1963_s5] sm:$0xff] (!%p1350_p9)  }
  0x2a   : > { %1489 = vmatprep.subr.bf16.mxu1 (!%p1350_p9), %v1601_v21 }
  0x2b   : > { %1490 = vmatpush3.bf16.msra.mxu1 (!%p1350_p9), %v1601_v21 }
  0x2c   : > { %1478 = vmatpush3.bf16.msra.mxu0 %v1577_v20  ;;  %v1598_v20 = vld [vmem:[%s1961_s3 + $0x38] sm:$0xff] (!%p1350_p9)   ;;  %1491 = vmatprep.subr.bf16.mxu1 (!%p1350_p9), %v1602_v22 }
  0x2d   : > { %1479 = vmatprep.subr.bf16.mxu0 %v1578_v23 }
  0x2f   : > { %1492 = vmatpush3.bf16.msra.mxu1 (!%p1350_p9), %v1602_v22 }
  0x30   : > { %1480 = vmatpush3.bf16.msra.mxu0 %v1578_v23  ;;  %v1603_v23 = vld [vmem:[%s1963_s5 + $0x10] sm:$0xff] (!%p1350_p9)  }
  0x31   : > { %1481 = vmatprep.subr.bf16.mxu0 %v1579_v24  ;;  %1493 = vmatprep.subr.bf16.mxu1 (!%p1350_p9), %v1603_v23 }
  0x33   : > { %1494 = vmatpush3.bf16.msra.mxu1 (!%p1350_p9), %v1603_v23 }
  0x34   : > { %1482 = vmatpush3.bf16.msra.mxu0 %v1579_v24  ;;  %v1604_v24 = vld [vmem:[%s1963_s5 + $0x18] sm:$0xff] (!%p1350_p9)  }
  0x35   : > { %1483 = vmatprep.subr.bf16.mxu0 %v1580_v25  ;;  %1495 = vmatprep.subr.bf16.mxu1 (!%p1350_p9), %v1604_v24 }
  0x37   : > { %1496 = vmatpush3.bf16.msra.mxu1 (!%p1350_p9), %v1604_v24 }
  0x38   : > { %1484 = vmatpush3.bf16.msra.mxu0 %v1580_v25 }
  0x39   : > { %1421 = vmatprep.subr.bf16.mxu0 (!%p1350_p9), %v1583_v1 }
  0x3b   : > { %1486 = vmatmul.mubr.msk.bf16.vlgmr.msra.gmra.mrb[0].mxu0 %vm1348_vm6, %v1677_v19  ;;  %v1597_v19 = vld [vmem:[%s1961_s3 + $0x78] sm:$0xff] (!%p1350_p9)  }
  0x3c   : > { %1422 = vmatpush3.bf16.msra.mxu0 (!%p1350_p9), %v1584_v2 }
  0x3d   : > { %1423 = vmatprep.subr.bf16.mxu0 (!%p1350_p9), %v1585_v3 }
  0x40   : > { %1424 = vmatpush3.bf16.msra.mxu0 (!%p1350_p9), %v1586_v4 }
  0x41   : > { %1425 = vmatprep.subr.bf16.mxu0 (!%p1350_p9), %v1587_v5 }
  0x44   : > { %1426 = vmatpush3.bf16.msra.mxu0 (!%p1350_p9), %v1588_v6  ;;  %v1615_v6 = vld [vmem:[%s1965_s7 + $0x30] sm:$0xff] (!%p1350_p9)  }
  0x45   : > { %1427 = vmatprep.subr.bf16.mxu0 (!%p1350_p9), %v1589_v7  ;;  %v1616_v7 = vld [vmem:[%s1965_s7 + $0x38] sm:$0xff] (!%p1350_p9)  }
  0x48   : > { %1428 = vmatpush3.bf16.msra.mxu0 (!%p1350_p9), %v1590_v9  ;;  %v1370_v9 = vld [vmem:[%s1964_s6] ss:$0 sm:$0xff] (!%p1350_p9) }
  0x49   : > { %1429 = vmatprep.subr.bf16.mxu0 (!%p1350_p9), %v1591_v11 }
  0x4c   : > { %1430 = vmatpush3.bf16.msra.mxu0 (!%p1350_p9), %v1592_v14 }
  0x4d   : > { %1431 = vmatprep.subr.bf16.mxu0 (!%p1350_p9), %v1593_v15 }
  0x50   : > { %1432 = vmatpush3.bf16.msra.mxu0 (!%p1350_p9), %v1594_v16 }
  0x51   : > { %1433 = vmatprep.subr.bf16.mxu0 (!%p1350_p9), %v1595_v17 }
  0x54   : > { %1434 = vmatpush3.bf16.msra.mxu0 (!%p1350_p9), %v1596_v18 }
  0x55   : > { %1435 = vmatprep.subr.bf16.mxu0 (!%p1350_p9), %v1597_v19  ;;  %v1379_v19 = vld [vmem:[%s1966_s8] ss:$0 sm:$0xff] (!%p1350_p9) }
  0x58   : > { %1436 = vmatpush3.bf16.msra.mxu0 (!%p1350_p9), %v1598_v20 }
  0xaf   : > { %v616_v27 = vpop.xlane.xlu0 %615 }
  0xb2   : > { %v620_v26 = vpop.xlane.xlu1 %619 }
  0xb3   : > { %v618_v30 = vpop.xlane.xlu0 %617 }
  0xb4   : > { %v623_v33 = vpack.c.bf16 %v618_v30, %v616_v27 }
  0xb6   : > { %v622_v28 = vpop.xlane.xlu1 %621  ;;  %v625_v38 = vunpack.c.l.bf16 %v623_v33  ;;  %v626_v39 = vunpack.c.h.bf16 %v623_v33 }
  0xb7   : > { %v624_v29 = vpack.c.bf16 %v622_v28, %v620_v26 }
  0xb8   : > { %v629_v42 = vadd.f32 %v625_v38, %v607_v36  ;;  %v630_v43 = vadd.f32 %v626_v39, %v608_v37 }
  0xb9   : > { %v627_v34 = vunpack.c.l.bf16 %v624_v29  ;;  %v628_v35 = vunpack.c.h.bf16 %v624_v29 }
  0xba   : > { %634 = vst.msk [vmem:[#allocation3] sm:$0xff] %vm633_vm7, %v629_v42  ;;  %635 = vst.msk [vmem:[#allocation3 + $0x8] sm:$0xff] %vm633_vm7, %v630_v43  ;;  %v1606_v42 = vld [vmem:[%s1963_s5 + $0x28] sm:$0xff] (!%p1350_p9)   ;;  %v1607_v43 = vld [vmem:[%s1963_s5 + $0x30] sm:$0xff] (!%p1350_p9)  }
  0xbb   : > { %v631_v40 = vadd.f32 %v627_v34, %v609_v31  ;;  %v632_v41 = vadd.f32 %v628_v35, %v610_v32  ;;  %v1879_v31 = vld [vmem:[%s1779_s29] sm:$0xff] (!%p1350_p9)  }
  0xbd   : > { %636 = vst.msk [vmem:[#allocation3 + $0x10] sm:$0xff] %vm633_vm7, %v631_v40  ;;  %637 = vst.msk [vmem:[#allocation3 + $0x18] sm:$0xff] %vm633_vm7, %v632_v41  ;;  %v1883_v40 = vld [vmem:[%s1779_s29 + $0x8] sm:$0xff] (!%p1350_p9)   ;;  %v1605_v41 = vld [vmem:[%s1963_s5 + $0x20] sm:$0xff] (!%p1350_p9)  }
  0xbe   : > { %1497 = vmatprep.subr.bf16.mxu1 (!%p1350_p9), %v1605_v41 }
  0xbf   : > { %1498 = vmatpush3.bf16.msra.mxu1 (!%p1350_p9), %v1605_v41 }
  0xc0   : > { %1499 = vmatprep.subr.bf16.mxu1 (!%p1350_p9), %v1606_v42 }
  0xc1   : > { %v646_v56 = vld [vmem:[#allocation3] sm:$0xff] (!%p1350_p9)  ;;  %v647_v58 = vld [vmem:[#allocation3 + $0x8] sm:$0xff] (!%p1350_p9) }
  0xc2   : > { %v650_v60 = vmax.f32 (!%p1350_p9), %v646_v56, 1.0  ;;  %v651_v62 = vmax.f32 (!%p1350_p9), %v647_v58, 1.0  ;;  %v1353_v56 = vld [vmem:[%s1962_s4] ss:$0 sm:$0xff] (!%p1350_p9) }
  0xc3   : > { %1500 = vmatpush3.bf16.msra.mxu1 (!%p1350_p9), %v1606_v42 }
  0xc4   : > { %v648_v57 = vld [vmem:[#allocation3 + $0x10] sm:$0xff] (!%p1350_p9)  ;;  %v649_v63 = vld [vmem:[#allocation3 + $0x18] sm:$0xff] (!%p1350_p9)  ;;  %1619 = vrcp.f32 (!%p1350_p9), %v650_v60  ;;  %1501 = vmatprep.subr.bf16.mxu1 (!%p1350_p9), %v1607_v43 }
  0xc5   : > { %v652_v61 = vmax.f32 (!%p1350_p9), %v648_v57, 1.0  ;;  %v653_v0 = vmax.f32 (!%p1350_p9), %v649_v63, 1.0 }
  0xc7   : > { %1621 = vrcp.f32 (!%p1350_p9), %v652_v61  ;;  %1502 = vmatpush3.bf16.msra.mxu1 (!%p1350_p9), %v1607_v43 }
  0xc8   : > { %1623 = vrcp.f32 (!%p1350_p9), %v651_v62 }
  0xc9   : > { %1625 = vrcp.f32 (!%p1350_p9), %v653_v0 }
  0xce   : > { %v1620_v8 = vpop.eup (!%p1350_p9), %1619 }
  0xcf   : > { %660 = vperm.xlu0 (!%p1350_p9), %1581, %v1620_v8  }
  0xd1   : > { %v1622_v10 = vpop.eup (!%p1350_p9), %1621 }
  0xd2   : > { %v1624_v12 = vpop.eup (!%p1350_p9), %1623  ;;  %670 = vperm.xlu1 (!%p1350_p9), %1582, %v1622_v10  }
  0xd3   : > { %v1626_v13 = vpop.eup (!%p1350_p9), %1625  ;;  %665 = vperm.xlu0 (!%p1350_p9), %1581, %v1624_v12  }
  0xd6   : > { %675 = vperm.xlu1 (!%p1350_p9), %1582, %v1626_v13  }
 0x10e   : > { %v1487_v46 = vpop.f32.mrb[0].mxu0  ;;  %641 = sbr.rel (%p1350_p9) target bundleno = 1332 (0x534), region = 72 }
 0x10f   : > { %v601_v48 = vadd.f32 %v1487_v46, %v484_v44  ;;  %v584_v49 = vpop.f32.mrb[1].mxu0  ;;  %v1608_v44 = vld [vmem:[%s1963_s5 + $0x38] sm:$0xff] (!%p1350_p9)   ;;  %v1610_v46 = vld [vmem:[%s1965_s7 + $0x8] sm:$0xff] (!%p1350_p9)  }
 0x110   : > { %v599_v51 = vadd.f32 %v584_v49, %v482_v45  ;;  %v1488_v52 = vpop.f32.mrb[2].mxu0  ;;  %1503 = vmatprep.subr.bf16.mxu1 (!%p1350_p9), %v1608_v44  ;;  %v1609_v45 = vld [vmem:[%s1965_s7] sm:$0xff] (!%p1350_p9)  }
 0x111   : > { %605 = vst [vmem:[#allocation2 + $0x10] sm:$0xff] %v601_v48  ;;  %v602_v53 = vadd.f32 %v1488_v52, %v485_v47  ;;  %v587_v54 = vpop.f32.mrb[3].mxu0  ;;  %1504 = vmatpush3.bf16.msra.mxu1 (!%p1350_p9), %v1608_v44  ;;  %1509 = vmatprep.subr.bf16.mxu0 (!%p1350_p9), %v1609_v45  ;;  %v1611_v47 = vld [vmem:[%s1965_s7 + $0x10] sm:$0xff] (!%p1350_p9)   ;;  %v1612_v48 = vld [vmem:[%s1965_s7 + $0x18] sm:$0xff] (!%p1350_p9)   ;;  %v1613_v49 = vld [vmem:[%s1965_s7 + $0x20] sm:$0xff] (!%p1350_p9)  }
 0x112   : > { %603 = vst [vmem:[#allocation2] sm:$0xff] %v599_v51  ;;  %v600_v55 = vadd.f32 %v587_v54, %v483_v50  ;;  %v1614_v50 = vld [vmem:[%s1965_s7 + $0x28] sm:$0xff] (!%p1350_p9)  }
 0x113   : > { %606 = vst [vmem:[#allocation2 + $0x18] sm:$0xff] %v602_v53 }
 0x114   : > { %604 = vst [vmem:[#allocation2 + $0x8] sm:$0xff] %v600_v55 }
 0x118   : > { %v644_v27 = vld [vmem:[#allocation2 + $0x10] sm:$0xff] }
 0x119   : > { %v642_v28 = vld [vmem:[#allocation2] sm:$0xff] }
 0x11a   : > { %v645_v30 = vld [vmem:[#allocation2 + $0x18] sm:$0xff] }
 0x11b   : > { %v643_v29 = vld [vmem:[#allocation2 + $0x8] sm:$0xff] }
 0x14e   : > { %v661_v25 = vpop.permute.xlu0 %660 }
 0x14f   : > { %v678_v34 = vmul.f32 %v661_v25, %v642_v28 }
 0x151   : > { %v671_v26 = vpop.permute.xlu1 %670 }
 0x152   : > { %v680_v32 = vmul.f32 %v671_v26, %v644_v27  ;;  %v666_v33 = vpop.permute.xlu0 %665 }
 0x153   : > { %v679_v35 = vmul.f32 %v666_v33, %v643_v29 }
 0x155   : > { %v676_v36 = vpop.permute.xlu1 %675  ;;  %v700_v38 = vpack.c.bf16 %v679_v35, %v678_v34 }
 0x156   : > { %v681_v37 = vmul.f32 %v676_v36, %v645_v30 }
 0x157   : > { %875 = vmatprep.mubr.bf16.mxu0 %v700_v38 }
 0x158   : > { %v701_v39 = vpack.c.bf16 %v681_v37, %v680_v32  ;;  %876 = vmatmul.mubr.bf16.vlgmr.msra.gmra.mrb[0].mxu0 %v1879_v31 }
 0x159   : > { %1510 = vmatpush3.bf16.msra.mxu0 %v1609_v45 }
 0x15a   : > { %883 = vmatprep.mubr.bf16.mxu0 %v701_v39  ;;  %1511 = vmatprep.subr.bf16.mxu0 %v1610_v46 }
 0x15d   : > { %1512 = vmatpush3.bf16.msra.mxu0 %v1610_v46 }
 0x15e   : > { %1513 = vmatprep.subr.bf16.mxu0 %v1611_v47 }
 0x160   : > { %884 = vmatmul.mubr.bf16.gmra.mrb[4].mxu0 %v1883_v40 }
 0x161   : > { %1514 = vmatpush3.bf16.msra.mxu0 %v1611_v47 }
 0x162   : > { %1515 = vmatprep.subr.bf16.mxu0 %v1612_v48 }
 0x165   : > { %1516 = vmatpush3.bf16.msra.mxu0 %v1612_v48 }
 0x166   : > { %1517 = vmatprep.subr.bf16.mxu0 %v1613_v49 }
 0x169   : > { %1518 = vmatpush3.bf16.msra.mxu0 %v1613_v49 }
 0x16a   : > { %1519 = vmatprep.subr.bf16.mxu0 %v1614_v50 }
 0x16d   : > { %1520 = vmatpush3.bf16.msra.mxu0 %v1614_v50 }
 0x16e   : > { %1521 = vmatprep.subr.bf16.mxu0 %v1615_v6 }
 0x171   : > { %1522 = vmatpush3.bf16.msra.mxu0 %v1615_v6 }
 0x172   : > { %1523 = vmatprep.subr.bf16.mxu0 %v1616_v7 }
 0x175   : > { %1524 = vmatpush3.bf16.msra.mxu0 %v1616_v7 }
 0x22b   : > { %v1437_v51 = vpop.f32.mrb[0].mxu0 }
 0x22c   : > { %v1438_v52 = vpop.f32.mrb[1].mxu0 }
 0x22d   : > { %v1439_v53 = vadd.f32 %v1438_v52, %v1437_v51  ;;  %v1440_v54 = vpop.f32.mrb[2].mxu0 }
 0x22e   : > { %v1441_v55 = vpop.f32.mrb[3].mxu0 }
 0x22f   : > { %v1442_v57 = vadd.f32 %v1441_v55, %v1440_v54  ;;  %v878_v58 = vadd.f32 %v1439_v53, %v1353_v56 }
 0x231   : > { %v881_v59 = vadd.f32 %v1442_v57, %v1353_v56 }
 0x233   : > { %v1443_v60 = vpop.f32.mrb[4].mxu0  ;;  %v909_v61 = vpack.c.bf16 %v881_v59, %v878_v58  ;;  %v1388_v59 = vld [vmem:[%s1967_s9] ss:$0 sm:$0xff] }
 0x234   : > { %v1444_v62 = vpop.f32.mrb[5].mxu0 }
 0x235   : > { %v1445_v63 = vadd.f32 %v1444_v62, %v1443_v60  ;;  %v1446_v0 = vpop.f32.mrb[6].mxu0  ;;  %1505 = vmatprep.mubr.bf16.mxu1 %v909_v61  ;;  %v1389_v62 = vld [vmem:[%s1968_s10] ss:$0 sm:$0xff] }
 0x236   : > { %v1447_v1 = vpop.f32.mrb[7].mxu0 }
 0x237   : > { %v1448_v2 = vadd.f32 %v1447_v1, %v1446_v0  ;;  %v886_v3 = vadd.f32 %v1445_v63, %v1353_v56 }
 0x239   : > { %v889_v4 = vadd.f32 %v1448_v2, %v1353_v56  ;;  %v1203_v2 = vunpack.c.l.bf16 %v1879_v31 }
 0x23b   : > { %v910_v5 = vpack.c.bf16 %v889_v4, %v886_v3  ;;  %v1204_v3 = vunpack.c.h.bf16 %v1879_v31 }
 0x23d   : > { %1506 = vmatmul.mubr.bf16.vlgmr.msra.gmra.mrb[0].mxu1 %v910_v5 }
 0x310   : > { %v1507_v8 = vpop.f32.mrb[0].mxu1 }
 0x311   : > { %v999_v10 = vpop.f32.mrb[1].mxu1  ;;  %v1008_v12 = vadd.f32 %v1507_v8, %v1370_v9 }
 0x312   : > { %v1508_v11 = vpop.f32.mrb[2].mxu1  ;;  %v1000_v15 = vadd.f32 %v1370_v9, %v999_v10 }
 0x313   : > { %v1011_v13 = vadd.f32 %v1508_v11, %v1370_v9  ;;  %v1002_v14 = vpop.f32.mrb[3].mxu1 }
 0x314   : > { %v1003_v16 = vadd.f32 %v1370_v9, %v1002_v14  ;;  %v1206_v14 = vunpack.c.h.bf16 %v1883_v40 }
 0x315   : > { %v1032_v17 = vpack.c.bf16 %v1011_v13, %v1008_v12  ;;  %v1205_v13 = vunpack.c.l.bf16 %v1883_v40 }
 0x316   : > { %v1031_v18 = vpack.c.bf16 %v1003_v16, %v1000_v15 }
 0x318   : > { %1525 = vmatprep.mubr.bf16.mxu0 %v1031_v18 }
 0x319   : > { %1526 = vmatmul.mubr.bf16.vlgmr.msra.gmra.mrb[8].mxu0 %v1032_v17 }
 0x3ec   : > { %v1527_v20 = vpop.f32.mrb[8].mxu0 }
 0x3ed   : > { %v1121_v21 = vpop.f32.mrb[9].mxu0  ;;  %v1130_v26 = vadd.f32 %v1527_v20, %v1379_v19 }
 0x3ee   : > { %v1122_v22 = vadd.f32 %v1379_v19, %v1121_v21  ;;  %v1528_v23 = vpop.f32.mrb[10].mxu0 }
 0x3ef   : > { %v1124_v24 = vpop.f32.mrb[11].mxu0  ;;  %v1133_v27 = vadd.f32 %v1528_v23, %v1379_v19 }
 0x3f0   : > { %v1125_v25 = vadd.f32 %v1379_v19, %v1124_v24  ;;  %1136 = vadd.xlane.f32.xlu0 %v1122_v22 }
 0x3f2   : > { %1138 = vadd.xlane.f32.xlu1 %v1125_v25 }
 0x3f4   : > { %1140 = vadd.xlane.f32.xlu0 %v1130_v26 }
 0x3f8   : > { %1142 = vadd.xlane.f32.xlu0 %v1133_v27 }
 0x47d   : > { %v1137_v28 = vpop.xlane.xlu0 %1136 }
 0x47e   : > { %v1145_v29 = vmul.f32 0.0078125, %v1137_v28 }
 0x47f   : > { %v1139_v30 = vpop.xlane.xlu1 %1138 }
 0x480   : > { %v1149_v32 = vsub.f32 %v1122_v22, %v1145_v29  ;;  %v1146_v33 = vmul.f32 0.0078125, %v1139_v30 }
 0x481   : > { %v1141_v34 = vpop.xlane.xlu0 %1140 }
 0x482   : > { %v1150_v35 = vsub.f32 %v1125_v25, %v1146_v33  ;;  %v1147_v36 = vmul.f32 0.0078125, %v1141_v34  ;;  %v1153_v37 = vmul.f32 %v1149_v32, %v1149_v32 }
 0x484   : > { %v1151_v38 = vsub.f32 %v1130_v26, %v1147_v36  ;;  %1157 = vadd.xlane.f32.xlu1 %v1153_v37  ;;  %v1154_v39 = vmul.f32 %v1150_v35, %v1150_v35 }
 0x485   : > { %v1143_v41 = vpop.xlane.xlu0 %1142 }
 0x486   : > { %v1148_v42 = vmul.f32 0.0078125, %v1143_v41  ;;  %1159 = vadd.xlane.f32.xlu0 %v1154_v39  ;;  %v1155_v43 = vmul.f32 %v1151_v38, %v1151_v38 }
 0x488   : > { %v1152_v44 = vsub.f32 %v1133_v27, %v1148_v42  ;;  %1161 = vadd.xlane.f32.xlu1 %v1155_v43 }
 0x48a   : > { %v1156_v45 = vmul.f32 %v1152_v44, %v1152_v44 }
 0x48c   : > { %1163 = vadd.xlane.f32.xlu0 %v1156_v45 }
 0x511   : > { %v1158_v46 = vpop.xlane.xlu1 %1157 }
 0x512   : > { %v1165_v47 = vmul.f32 0.0078125, %v1158_v46 }
 0x513   : > { %v1160_v48 = vpop.xlane.xlu0 %1159 }
 0x514   : > { %v1169_v49 = vadd.f32 1e-05, %v1165_v47  ;;  %v1166_v50 = vmul.f32 0.0078125, %v1160_v48 }
 0x515   : > { %v1162_v51 = vpop.xlane.xlu1 %1161 }
 0x516   : > { %1627 = vrsqrt.f32 %v1169_v49  ;;  %v1170_v52 = vadd.f32 1e-05, %v1166_v50  ;;  %v1167_v53 = vmul.f32 0.0078125, %v1162_v51 }
 0x518   : > { %1629 = vrsqrt.f32 %v1170_v52  ;;  %v1171_v54 = vadd.f32 1e-05, %v1167_v53 }
 0x519   : > { %v1164_v55 = vpop.xlane.xlu0 %1163 }
 0x51a   : > { %1631 = vrsqrt.f32 %v1171_v54  ;;  %v1168_v56 = vmul.f32 0.0078125, %v1164_v55 }
 0x51c   : > { %v1172_v57 = vadd.f32 1e-05, %v1168_v56 }
 0x51e   : > { %1633 = vrsqrt.f32 %v1172_v57 }
 0x520   : > { %v1628_v58 = vpop.eup %1627 }
 0x521   : > { %v1177_v60 = vmul.f32 %v1628_v58, %v1149_v32 }
 0x522   : > { %v1630_v61 = vpop.eup %1629 }
 0x523   : > { %v1188_v63 = vmul.f32 %v1388_v59, %v1177_v60  ;;  %v1178_v0 = vmul.f32 %v1630_v61, %v1150_v35 }
 0x524   : > { %v1632_v1 = vpop.eup %1631 }
 0x525   : > { %v1199_v4 = vadd.f32 %v1389_v62, %v1188_v63  ;;  %v1189_v5 = vmul.f32 %v1388_v59, %v1178_v0  ;;  %v1179_v6 = vmul.f32 %v1632_v1, %v1151_v38 }
 0x527   : > { %v1200_v7 = vadd.f32 %v1389_v62, %v1189_v5  ;;  %v1190_v8 = vmul.f32 %v1388_v59, %v1179_v6  ;;  %v1207_v10 = vadd.f32 %v1203_v2, %v1199_v4 }
 0x528   : > { %v1634_v9 = vpop.eup %1633 }
 0x529   : > { %v1208_v11 = vadd.f32 %v1204_v3, %v1200_v7  ;;  %v1180_v12 = vmul.f32 %v1634_v9, %v1152_v44  ;;  %v1201_v16 = vadd.f32 %v1389_v62, %v1190_v8 }
 0x52b   : > { %v1403_v15 = vpack.c.bf16 %v1208_v11, %v1207_v10  ;;  %v1191_v17 = vmul.f32 %v1388_v59, %v1180_v12  ;;  %v1209_v31 = vadd.f32 %v1205_v13, %v1201_v16 }
 0x52d   : > { %1404 = vst [vmem:[%s1789_s23] sm:$0xff] %v1403_v15   ;;  %v1202_v18 = vadd.f32 %v1389_v62, %v1191_v17 }
 0x52f   : > { %v1210_v19 = vadd.f32 %v1206_v14, %v1202_v18 }
 0x531   : > { %v1408_v20 = vpack.c.bf16 %v1210_v19, %v1209_v31 }
 0x533   : > { %1410 = vst [vmem:[%s1789_s23 + $0x8] sm:$0xff] %v1408_v20  }
 0x534 PF: > { %s21_s21 = sadd.s32 1, %s1673_s21   ;;  %s1974_s18 = sld [smem:[#allocation5_spill]] }
 0x535   : > { %p18_p10 = scmp.ge.s32.totalorder %s21_s21, 6   ;;  %s1975_s20 = sld [smem:[#allocation6_spill]] }
 0x536   : > { %s1976_s25 = sld [smem:[#allocation7_spill]]  ;;  %s1977_s17 = smov %s1665_s19 }
 0x537   :  { %20 = sbr.rel (!%p18_p10) target bundleno = 3 (0x3), region = 108 }
 0x53b   : > { %s1978_s19 = smov %s1975_s20 }
 0x53c   : > { %s1979_s20 = smov %s1976_s25 }

// kernel: epd_forward.17
= control target key start
LH: loop header
LB: loop body
LE: loop exit
PB: predicated region body
PF: predicated region fallthrough
CT: control target
= control target key end

     0   :  { %s3965_s0 = inlined_call_operand.vmem [shape: s32[256,1], index: 0, kind: input, shape index: {}]   ;;  %s3966_s1 = inlined_call_operand.vmem [shape: s32[256,1], index: 1, kind: input, shape index: {}]   ;;  %s3967_s2 = inlined_call_operand.vmem [shape: bf16[64,128], index: 2, kind: input, shape index: {}]   ;;  %s3968_s3 = inlined_call_operand.vmem [shape: bf16[256,128], index: 3, kind: input, shape index: {}]   ;;  %s3969_s4 = inlined_call_operand.vmem [shape: bf16[384,128], index: 4, kind: input, shape index: {}]   ;;  %s3970_s5 = inlined_call_operand.vmem [shape: f32[1,128], index: 5, kind: input, shape index: {}]   ;;  %s3971_s6 = inlined_call_operand.vmem [shape: bf16[128,128], index: 6, kind: input, shape index: {}]   ;;  %s3972_s7 = inlined_call_operand.vmem [shape: f32[1,128], index: 7, kind: input, shape index: {}]   ;;  %s3973_s8 = inlined_call_operand.vmem [shape: bf16[128,128], index: 8, kind: input, shape index: {}]   ;;  %s3974_s9 = inlined_call_operand.vmem [shape: f32[1,128], index: 9, kind: input, shape index: {}]   ;;  %s3975_s10 = inlined_call_operand.vmem [shape: f32[1,128], index: 10, kind: input, shape index: {}]   ;;  %s3976_s11 = inlined_call_operand.vmem [shape: f32[1,128], index: 11, kind: input, shape index: {}]   ;;  %s3977_s12 = inlined_call_operand.vmem [shape: bf16[256,128], index: 12, kind: output, shape index: {0}]   ;;  %s3978_s13 = inlined_call_operand.hbm [shape: bf16[256,128], index: 13, kind: output, shape index: {1}]  }
   0x1   :  { %3980 = sst [smem:[#allocation8_spill]] %s3965_s0 }
   0x2   :  { %19 = vsyncpa [#allocation4], 0 }
   0x3   :  { %21 = vsyncpa [#allocation4 + $0x1], 0  ;;  %s3300_s25 = smov 0   ;;  %s3302_s26 = smov 0  }
   0x4   :  { %s3304_s27 = smov 0   ;;  %s3306_s28 = smov 0  }
   0x5 LB: > { %3981 = sst [smem:[#allocation6_spill]] %s3219_s27  ;;  %s3321_s29 = sadd.s32 4294967295, %s3223_s28   ;;  %s3223_s28 = sphi %s3306_s28, %s3990_s28   ;;  %s3219_s27 = sphi %s3304_s27, %s3987_s27   ;;  %s3215_s26 = sphi %s3302_s26, %s3989_s26   ;;  %s3211_s25 = sphi %s3300_s25, %s3988_s25  }
   0x6   : > { %s2440_s30 = sadd.s32 4294967294, %s3223_s28   ;;  %s3325_s14 = sadd.s32 1, %s3223_s28  }
   0x7   : > { %s327_s15 = sadd.s32 1, %s3219_s27  ;;  %s324_s16 = ssub.s32 %s3223_s28, %s3325_s14 }
   0x8   : > { %p337_p0 = scmp.ne.s32.totalorder %s3219_s27, %s3215_s26  ;;  %p325_p1 = scmp.eq.s32.totalorder %s324_s16, 0 }
   0x9   : > { %p338_p2 = scmp.eq.s32.totalorder %s3321_s29, 1  ;;  %p343_p3 = scmp.ne.s32.totalorder %s3215_s26, %s3211_s25 }
   0xa   : > { %p344_p4 = scmp.eq.s32.totalorder %s2440_s30, 1  ;;  %p2443_p7 = scmp.ge.s32.totalorder %s3223_s28, 1 }
   0xb   : > { %s3336_s17 = scalar_select %p325_p1, %s3219_s27, %s327_s15  }
   0xc   : > { %p3338_p5 = por %p338_p2, %p337_p0  ;;  %p3342_p6 = por %p344_p4, %p343_p3 }
   0xd   : > { %3982 = sst [smem:[#allocation7_spill]] %s3336_s17  ;;  %p416_p8 = scmp.lt.s32.totalorder %s3223_s28, 3 }
   0xf   : > { %p417_p9 = pnand %p2443_p7, %p416_p8 }
  0x10   : > { %s2445_s20 = sshll.u32 (!%p417_p9), %s3321_s29, 4  ;;  %v3225_v0 = vmov (!%p417_p9), 0   ;;  %v3063_v1 = vld [vmem:[%s3967_s2] sm:$0xff] (!%p417_p9)   ;;  %s3985_s0 = sld [smem:[#allocation8_spill]] (!%p417_p9)  ;;  %v3064_v2 = vld [vmem:[%s3967_s2 + $0x8] sm:$0xff] (!%p417_p9)   ;;  %v3065_v11 = vld [vmem:[%s3967_s2 + $0x10] sm:$0xff] (!%p417_p9)   ;;  %v501_v39 = vlaneseq (!%p417_p9) }
  0x11   : > { %420 = sbr.rel (%p417_p9) target bundleno = 1441 (0x5a1), region = 68  ;;  %3062 = vset.pattern.permute.xlu1 (!%p417_p9), %v3225_v0  ;;  %3061 = vset.pattern.permute.xlu0 (!%p417_p9), %v3225_v0  ;;  %p476_p10 = scmp.lt.s32.totalorder (!%p417_p9), %s2445_s20, 31  ;;  %v3066_v12 = vld [vmem:[%s3967_s2 + $0x18] sm:$0xff] (!%p417_p9)   ;;  %v3067_v37 = vld [vmem:[%s3969_s4 + $0x40] sm:$0xff] (!%p417_p9)   ;;  %vm775_vm4 = vcmask (!%p417_p9), 523264   ;;  %v3226_v45 = vmov (!%p417_p9), 0.0  }
  0x12   : > { %2882 = vmatprep.subr.bf16.mxu1 (!%p417_p9), %v3063_v1  ;;  %2858 = vmatprep.subr.bf16.mxu0 (!%p417_p9), %v3063_v1  ;;  %v3071_v38 = vld [vmem:[%s3969_s4 + $0x80] sm:$0xff] (!%p417_p9)   ;;  %v3412_v40 = vand.u32 (!%p417_p9), 127, %v501_v39  ;;  %v3074_v57 = vld [vmem:[%s3969_s4 + $0x88] sm:$0xff] (!%p417_p9)   ;;  %s472_s24 = sand.u32 (!%p417_p9), 1, %s3215_s26   ;;  %s3227_s22 = smov (!%p417_p9), [#allocation3]  }
  0x13   : > { %2883 = vmatpush3.bf16.msra.mxu1 (!%p417_p9), %v3063_v1  ;;  %2859 = vmatpush3.bf16.msra.mxu0 (!%p417_p9), %v3063_v1  ;;  %v3068_v62 = vld [vmem:[%s3969_s4] sm:$0xff] (!%p417_p9)   ;;  %v3069_v0 = vld [vmem:[%s3969_s4 + $0x48] sm:$0xff] (!%p417_p9)   ;;  %v3077_v1 = vld [vmem:[%s3969_s4 + $0x90] sm:$0xff] (!%p417_p9)   ;;  %s2444_s30 = sshll.u32 (!%p417_p9), %s472_s24, 6  ;;  %s3165_s27 = sshll.u32 (!%p417_p9), %s3227_s22, 4  ;;  %s3166_s27 = int_to_ptr.vmem [resolvable:$false] %s3165_s27 }
  0x14   : > { %2884 = vmatprep.subr.bf16.mxu1 (!%p417_p9), %v3064_v2  ;;  %2860 = vmatprep.subr.bf16.mxu0 (!%p417_p9), %v3064_v2 }
  0x17   : > { %2885 = vmatpush3.bf16.msra.mxu1 (!%p417_p9), %v3064_v2  ;;  %2861 = vmatpush3.bf16.msra.mxu0 (!%p417_p9), %v3064_v2 }
  0x18   : > { %s3992_s20 = smov (!%p476_p10, %s2445_s20), 31  ;;  %2886 = vmatprep.subr.bf16.mxu1 %v3065_v11  ;;  %2862 = vmatprep.subr.bf16.mxu0 %v3065_v11 }
  0x19   : > { %s2446_s23 = sshll.u32 %s3992_s20, 3  ;;  %s2450_s16 = sshll.u32 %s3992_s20, 2 }
  0x1a   : > { %s3358_s15 = scalar_lea.vmem %s3966_s1, %s2446_s23  ;;  %s3363_s21 = scalar_lea.vmem %s3985_s0, %s2446_s23 }
  0x1b   : > { %v623_v3 = vld [vmem:[%s3358_s15] sm:$0xff]  ;;  %v624_v5 = vld [vmem:[%s3358_s15 + $0x8] sm:$0xff]  ;;  %v625_v7 = vld [vmem:[%s3358_s15 + $0x10] sm:$0xff]  ;;  %2887 = vmatpush3.bf16.msra.mxu1 %v3065_v11  ;;  %2863 = vmatpush3.bf16.msra.mxu0 %v3065_v11  ;;  %s3566_s0 = scalar_lea.vmem %s3968_s3, %s2450_s16  ;;  %s3854_s20 = scalar_lea.vmem [#allocation3], %s2444_s30 }
  0x1c   : > { %v503_v4 = vld [vmem:[%s3363_s21] sm:$0xff]  ;;  %640 = vperm.xlu0 %3061, %v623_v3   ;;  %v504_v6 = vld [vmem:[%s3363_s21 + $0x8] sm:$0xff]  ;;  %v626_v8 = vld [vmem:[%s3358_s15 + $0x18] sm:$0xff]  ;;  %2888 = vmatprep.subr.bf16.mxu1 %v3066_v12 }
  0x1d   : > { %520 = vperm.xlu1 %3062, %v503_v4   ;;  %v505_v9 = vld [vmem:[%s3363_s21 + $0x10] sm:$0xff]  ;;  %v506_v10 = vld [vmem:[%s3363_s21 + $0x18] sm:$0xff]  ;;  %v627_v13 = vld [vmem:[%s3358_s15 + $0x20] sm:$0xff]  ;;  %2864 = vmatprep.subr.bf16.mxu0 %v3066_v12 }
  0x1e   : > { %v628_v14 = vld [vmem:[%s3358_s15 + $0x28] sm:$0xff]  ;;  %v507_v15 = vld [vmem:[%s3363_s21 + $0x20] sm:$0xff]  ;;  %v629_v17 = vld [vmem:[%s3358_s15 + $0x30] sm:$0xff] }
  0x1f   : > { %v508_v16 = vld [vmem:[%s3363_s21 + $0x28] sm:$0xff]  ;;  %2889 = vmatpush3.bf16.msra.mxu1 %v3066_v12  ;;  %2865 = vmatpush3.bf16.msra.mxu0 %v3066_v12  ;;  %v630_v18 = vld [vmem:[%s3358_s15 + $0x38] sm:$0xff]  ;;  %v509_v19 = vld [vmem:[%s3363_s21 + $0x30] sm:$0xff] }
  0x20   : > { %643 = vperm.xlu0 %3061, %v624_v5   ;;  %v510_v20 = vld [vmem:[%s3363_s21 + $0x38] sm:$0xff]  ;;  %v631_v21 = vld [vmem:[%s3358_s15 + $0x40] sm:$0xff]  ;;  %v632_v22 = vld [vmem:[%s3358_s15 + $0x48] sm:$0xff]  ;;  %2746 = vmatprep.subr.bf16.mxu0 %v3067_v37 }
  0x21   : > { %523 = vperm.xlu1 %3062, %v504_v6   ;;  %v511_v23 = vld [vmem:[%s3363_s21 + $0x40] sm:$0xff]  ;;  %v512_v24 = vld [vmem:[%s3363_s21 + $0x48] sm:$0xff]  ;;  %v633_v25 = vld [vmem:[%s3358_s15 + $0x50] sm:$0xff]  ;;  %2906 = vmatprep.subr.bf16.mxu1 %v3071_v38 }
  0x22   : > { %v634_v26 = vld [vmem:[%s3358_s15 + $0x58] sm:$0xff]  ;;  %v513_v27 = vld [vmem:[%s3363_s21 + $0x50] sm:$0xff]  ;;  %v635_v29 = vld [vmem:[%s3358_s15 + $0x60] sm:$0xff] }
  0x23   : > { %v514_v28 = vld [vmem:[%s3363_s21 + $0x58] sm:$0xff]  ;;  %v636_v30 = vld [vmem:[%s3358_s15 + $0x68] sm:$0xff]  ;;  %v515_v31 = vld [vmem:[%s3363_s21 + $0x60] sm:$0xff] }
  0x24   : > { %646 = vperm.xlu0 %3061, %v625_v7   ;;  %v516_v32 = vld [vmem:[%s3363_s21 + $0x68] sm:$0xff]  ;;  %v637_v33 = vld [vmem:[%s3358_s15 + $0x70] sm:$0xff]  ;;  %v638_v34 = vld [vmem:[%s3358_s15 + $0x78] sm:$0xff]  ;;  %s3848_s15 = scalar_lea.vmem %s3977_s12, %s2450_s16  ;;  %s2627_s16 = sshll.u32 %s3321_s29, 10 }
  0x25   : > { %649 = vperm.xlu1 %3062, %v626_v8   ;;  %v517_v35 = vld [vmem:[%s3363_s21 + $0x70] sm:$0xff]  ;;  %v518_v36 = vld [vmem:[%s3363_s21 + $0x78] sm:$0xff]  ;;  %v3070_v6 = vld [vmem:[%s3969_s4 + $0x8] sm:$0xff]   ;;  %s2329_s21 = sshll.u32 %s3854_s20, 4  ;;  %s3916_s23 = scalar_lea.hbm %s3978_s13, %s2627_s16  ;;  %s3918_s21 = int_to_ptr.vmem [resolvable:$true] %s2329_s21 }
  0x26   : > { %v3072_v8 = vld [vmem:[%s3969_s4 + $0x50] sm:$0xff]   ;;  %s3924_s29 = scalar_lea.sflag [#allocation4], %s472_s24  ;;  %s3161_s30 = scalar_lea.vmem %s3918_s21, 1024 }
  0x27   : > { %p3162_p11 = scmp.ne.s32.totalorder %s3918_s21, %s3161_s30  ;;  %s3167_s16 = scalar_lea.vmem %s3166_s27, 2048 }
  0x28   : > { %526 = vperm.xlu0 %3061, %v505_v9   ;;  %v3080_v9 = vld [vmem:[%s3969_s4 + $0x98] sm:$0xff]   ;;  %p3168_p0 = scmp.lt.s32.totalorder %s3918_s21, %s3166_s27  ;;  %p3169_p1 = scmp.lt.s32.totalorder %s3167_s16, %s3161_s30 }
  0x29   : > { %529 = vperm.xlu1 %3062, %v506_v10   ;;  %p3163_p12 = pnand %p3162_p11, %p3338_p5 }
  0x2a   : > { %p3170_p2 = por %p3169_p1, %p3168_p0 }
  0x2b   : > { %p3164_p13 = pneg %p3163_p12 }
  0x2c   : > { %652 = vperm.xlu0 %3061, %v627_v13  }
  0x2d   : > { %655 = vperm.xlu1 %3062, %v628_v14   ;;  %v3073_v14 = vld [vmem:[%s3969_s4 + $0x10] sm:$0xff]   ;;  %p3171_p3 = pnand %p3170_p2, %p3164_p13 }
  0x30   : > { %532 = vperm.xlu0 %3061, %v507_v15  }
  0x31   : > { %535 = vperm.xlu1 %3062, %v508_v16   ;;  %v3075_v16 = vld [vmem:[%s3969_s4 + $0x58] sm:$0xff]  }
  0x34   : > { %658 = vperm.xlu0 %3061, %v629_v17   ;;  %v3083_v17 = vld [vmem:[%s3969_s4 + $0xa0] sm:$0xff]  }
  0x35   : > { %661 = vperm.xlu1 %3062, %v630_v18  }
  0x38   : > { %538 = vperm.xlu0 %3061, %v509_v19  }
  0x39   : > { %541 = vperm.xlu1 %3062, %v510_v20  }
  0x3c   : > { %664 = vperm.xlu0 %3061, %v631_v21  }
  0x3d   : > { %667 = vperm.xlu1 %3062, %v632_v22   ;;  %v3076_v22 = vld [vmem:[%s3969_s4 + $0x18] sm:$0xff]  }
  0x40   : > { %544 = vperm.xlu0 %3061, %v511_v23  }
  0x41   : > { %547 = vperm.xlu1 %3062, %v512_v24   ;;  %v3078_v24 = vld [vmem:[%s3969_s4 + $0x60] sm:$0xff]  }
  0x44   : > { %670 = vperm.xlu0 %3061, %v633_v25  }
  0x45   : > { %673 = vperm.xlu1 %3062, %v634_v26  }
  0x48   : > { %550 = vperm.xlu0 %3061, %v513_v27  }
  0x49   : > { %553 = vperm.xlu1 %3062, %v514_v28  }
  0x4c   : > { %676 = vperm.xlu0 %3061, %v635_v29   ;;  %v3079_v29 = vld [vmem:[%s3969_s4 + $0x20] sm:$0xff]  }
  0x4d   : > { %679 = vperm.xlu1 %3062, %v636_v30  }
  0x50   : > { %556 = vperm.xlu0 %3061, %v515_v31   ;;  %v3081_v31 = vld [vmem:[%s3969_s4 + $0x68] sm:$0xff]  }
  0x51   : > { %559 = vperm.xlu1 %3062, %v516_v32  }
  0x54   : > { %682 = vperm.xlu0 %3061, %v637_v33  }
  0x55   : > { %685 = vperm.xlu1 %3062, %v638_v34  }
  0x58   : > { %562 = vperm.xlu0 %3061, %v517_v35  }
  0x59   : > { %565 = vperm.xlu1 %3062, %v518_v36   ;;  %v3082_v36 = vld [vmem:[%s3969_s4 + $0x28] sm:$0xff]  }
  0x9b   : > { %v641_v41 = vpop.permute.xlu0 %640 }
  0x9c   : > { %v521_v42 = vpop.permute.xlu1 %520  ;;  %vm687_vm0 = vcmp.eq.s32.totalorder %v641_v41, %v3412_v40 }
  0x9d   : > { %vm567_vm1 = vcmp.eq.s32.totalorder %v521_v42, %v3412_v40  ;;  %v2469_v46 = vsel %vm687_vm0, 1.0, %v3226_v45 }
  0x9e   : > { %v2453_v47 = vsel %vm567_vm1, 1.0, %v3226_v45 }
  0x9f   : > { %v644_v43 = vpop.permute.xlu0 %643 }
  0xa0   : > { %v524_v44 = vpop.permute.xlu1 %523  ;;  %vm688_vm2 = vcmp.eq.s32.totalorder %v644_v43, %v3412_v40 }
  0xa1   : > { %vm568_vm3 = vcmp.eq.s32.totalorder %v524_v44, %v3412_v40  ;;  %v2470_v48 = vsel %vm688_vm2, 1.0, %v3226_v45 }
  0xa2   : > { %v2454_v49 = vsel %vm568_vm3, 1.0, %v3226_v45  ;;  %v735_v51 = vpack.c.bf16 %v2470_v48, %v2469_v46 }
  0xa3   : > { %v615_v50 = vpack.c.bf16 %v2454_v49, %v2453_v47  ;;  %v647_v52 = vpop.permute.xlu0 %646 }
  0xa4   : > { %v650_v53 = vpop.permute.xlu1 %649  ;;  %vm689_vm5 = vcmp.eq.s32.totalorder %v647_v52, %v3412_v40  ;;  %2890 = vmatprep.mubr.msk.bf16.mxu1 %vm775_vm4, %v735_v51 }
  0xa5   : > { %vm690_vm6 = vcmp.eq.s32.totalorder %v650_v53, %v3412_v40  ;;  %2866 = vmatprep.mubr.msk.bf16.mxu0 %vm775_vm4, %v615_v50  ;;  %v2471_v54 = vsel %vm689_vm5, 1.0, %v3226_v45 }
  0xa6   : > { %v2472_v55 = vsel %vm690_vm6, 1.0, %v3226_v45 }
  0xa7   : > { %v736_v56 = vpack.c.bf16 %v2472_v55, %v2471_v54  ;;  %v527_v58 = vpop.permute.xlu0 %526 }
  0xa8   : > { %v530_v59 = vpop.permute.xlu1 %529  ;;  %vm569_vm7 = vcmp.eq.s32.totalorder %v527_v58, %v3412_v40 }
  0xa9   : > { %vm570_vm8 = vcmp.eq.s32.totalorder %v530_v59, %v3412_v40  ;;  %2891 = vmatmul.mubr.msk.bf16.vlgmr.msra.gmra.mrb[0].mxu1 %vm775_vm4, %v736_v56  ;;  %v2455_v60 = vsel %vm569_vm7, 1.0, %v3226_v45 }
  0xaa   : > { %v2456_v61 = vsel %vm570_vm8, 1.0, %v3226_v45  ;;  %2907 = vmatpush3.bf16.msra.mxu1 %v3071_v38 }
  0xab   : > { %v616_v63 = vpack.c.bf16 %v2456_v61, %v2455_v60  ;;  %2908 = vmatprep.subr.bf16.mxu1 %v3074_v57  ;;  %v653_v2 = vpop.permute.xlu0 %652 }
  0xac   : > { %v656_v3 = vpop.permute.xlu1 %655  ;;  %vm691_vm9 = vcmp.eq.s32.totalorder %v653_v2, %v3412_v40 }
  0xad   : > { %vm692_vm10 = vcmp.eq.s32.totalorder %v656_v3, %v3412_v40  ;;  %2867 = vmatmul.mubr.msk.bf16.vlgmr.msra.gmra.mrb[0].mxu0 %vm775_vm4, %v616_v63  ;;  %v2473_v4 = vsel %vm691_vm9, 1.0, %v3226_v45 }
  0xae   : > { %v2474_v5 = vsel %vm692_vm10, 1.0, %v3226_v45  ;;  %2747 = vmatpush3.bf16.msra.mxu0 %v3068_v62  ;;  %2909 = vmatpush3.bf16.msra.mxu1 %v3074_v57 }
  0xaf   : > { %v737_v7 = vpack.c.bf16 %v2474_v5, %v2473_v4  ;;  %2748 = vmatprep.subr.bf16.mxu0 %v3069_v0  ;;  %2910 = vmatprep.subr.bf16.mxu1 %v3077_v1  ;;  %v533_v10 = vpop.permute.xlu0 %532 }
  0xb0   : > { %v536_v11 = vpop.permute.xlu1 %535  ;;  %vm571_vm11 = vcmp.eq.s32.totalorder %v533_v10, %v3412_v40 }
  0xb1   : > { %vm572_vm12 = vcmp.eq.s32.totalorder %v536_v11, %v3412_v40  ;;  %2894 = vmatprep.mubr.msk.bf16.mxu1 %vm775_vm4, %v737_v7  ;;  %v2457_v12 = vsel %vm571_vm11, 1.0, %v3226_v45  ;;  %v3084_v11 = vld [vmem:[%s3969_s4 + $0x70] sm:$0xff]  }
  0xb2   : > { %v2458_v13 = vsel %vm572_vm12, 1.0, %v3226_v45  ;;  %2749 = vmatpush3.bf16.msra.mxu0 %v3070_v6  ;;  %2911 = vmatpush3.bf16.msra.mxu1 %v3077_v1 }
  0xb3   : > { %v617_v15 = vpack.c.bf16 %v2458_v13, %v2457_v12  ;;  %2750 = vmatprep.subr.bf16.mxu0 %v3072_v8  ;;  %2912 = vmatprep.subr.bf16.mxu1 %v3080_v9  ;;  %v659_v18 = vpop.permute.xlu0 %658  ;;  %v3086_v12 = vld [vmem:[%s3969_s4 + $0xa8] sm:$0xff]   ;;  %v3089_v13 = vld [vmem:[%s3969_s4 + $0xb0] sm:$0xff]  }
  0xb4   : > { %v662_v19 = vpop.permute.xlu1 %661  ;;  %vm693_vm13 = vcmp.eq.s32.totalorder %v659_v18, %v3412_v40  ;;  %v1022_v18 = vld [vmem:[%s3566_s0 + $0x10] sm:$0xff]  }
  0xb5   : > { %vm694_vm14 = vcmp.eq.s32.totalorder %v662_v19, %v3412_v40  ;;  %2870 = vmatprep.mubr.msk.bf16.mxu0 %vm775_vm4, %v617_v15  ;;  %v2475_v20 = vsel %vm693_vm13, 1.0, %v3226_v45  ;;  %v3090_v15 = vld [vmem:[%s3969_s4 + $0xb8] sm:$0xff]  }
  0xb6   : > { %v2476_v21 = vsel %vm694_vm14, 1.0, %v3226_v45  ;;  %2751 = vmatpush3.bf16.msra.mxu0 %v3073_v14  ;;  %2913 = vmatpush3.bf16.msra.mxu1 %v3080_v9  ;;  %v3088_v14 = vld [vmem:[%s3969_s4 + $0x38] sm:$0xff]  }
  0xb7   : > { %v738_v23 = vpack.c.bf16 %v2476_v21, %v2475_v20  ;;  %2752 = vmatprep.subr.bf16.mxu0 %v3075_v16  ;;  %2914 = vmatprep.subr.bf16.mxu1 %v3083_v17  ;;  %v539_v25 = vpop.permute.xlu0 %538  ;;  %v3569_v16 = vld [vmem:[%s3566_s0] sm:$0xff]   ;;  %v3578_v19 = vld [vmem:[%s3566_s0 + $0x18] sm:$0xff]   ;;  %v1028_v21 = vld [vmem:[%s3566_s0 + $0x28] sm:$0xff]  }
  0xb8   : > { %v542_v26 = vpop.permute.xlu1 %541  ;;  %vm573_vm15 = vcmp.eq.s32.totalorder %v539_v25, %v3412_v40  ;;  %v1026_v20 = vld [vmem:[%s3566_s0 + $0x20] sm:$0xff]   ;;  %v3100_v25 = vld [vmem:[%s3971_s6 + $0x8] sm:$0xff]  }
  0xb9   : > { %vm574_vm0 = vcmp.eq.s32.totalorder %v542_v26, %v3412_v40  ;;  %2895 = vmatmul.mubr.msk.bf16.gmra.mrb[4].mxu1 %vm775_vm4, %v738_v23  ;;  %v2459_v27 = vsel %vm573_vm15, 1.0, %v3226_v45  ;;  %v1032_v23 = vld [vmem:[%s3566_s0 + $0x38] sm:$0xff]   ;;  %v3101_v26 = vld [vmem:[%s3971_s6 + $0x10] sm:$0xff]  }
  0xba   : > { %v2460_v28 = vsel %vm574_vm0, 1.0, %v3226_v45  ;;  %2753 = vmatpush3.bf16.msra.mxu0 %v3076_v22  ;;  %2915 = vmatpush3.bf16.msra.mxu1 %v3083_v17  ;;  %v3572_v17 = vld [vmem:[%s3566_s0 + $0x8] sm:$0xff]   ;;  %v1030_v22 = vld [vmem:[%s3566_s0 + $0x30] sm:$0xff]  }
  0xbb   : > { %v618_v30 = vpack.c.bf16 %v2460_v28, %v2459_v27  ;;  %2754 = vmatprep.subr.bf16.mxu0 %v3078_v24  ;;  %v665_v32 = vpop.permute.xlu0 %664  ;;  %2916 = vmatprep.subr.bf16.mxu1 %v3086_v12  ;;  %v3099_v24 = vld [vmem:[%s3971_s6] sm:$0xff]  }
  0xbc   : > { %v668_v33 = vpop.permute.xlu1 %667  ;;  %vm695_vm1 = vcmp.eq.s32.totalorder %v665_v32, %v3412_v40 }
  0xbd   : > { %vm696_vm2 = vcmp.eq.s32.totalorder %v668_v33, %v3412_v40  ;;  %2871 = vmatmul.mubr.msk.bf16.gmra.mrb[4].mxu0 %vm775_vm4, %v618_v30  ;;  %v2477_v34 = vsel %vm695_vm1, 1.0, %v3226_v45 }
  0xbe   : > { %v2478_v35 = vsel %vm696_vm2, 1.0, %v3226_v45  ;;  %2755 = vmatpush3.bf16.msra.mxu0 %v3079_v29  ;;  %2917 = vmatpush3.bf16.msra.mxu1 %v3086_v12 }
  0xbf   : > { %v739_v37 = vpack.c.bf16 %v2478_v35, %v2477_v34  ;;  %2756 = vmatprep.subr.bf16.mxu0 %v3081_v31  ;;  %v545_v38 = vpop.permute.xlu0 %544  ;;  %2918 = vmatprep.subr.bf16.mxu1 %v3089_v13 }
  0xc0   : > { %v548_v39 = vpop.permute.xlu1 %547  ;;  %vm575_vm3 = vcmp.eq.s32.totalorder %v545_v38, %v3412_v40 }
  0xc1   : > { %vm576_vm5 = vcmp.eq.s32.totalorder %v548_v39, %v3412_v40  ;;  %2898 = vmatprep.mubr.msk.bf16.mxu1 %vm775_vm4, %v739_v37  ;;  %v2461_v41 = vsel %vm575_vm3, 1.0, %v3226_v45 }
  0xc2   : > { %v2462_v42 = vsel %vm576_vm5, 1.0, %v3226_v45  ;;  %2757 = vmatpush3.bf16.msra.mxu0 %v3082_v36  ;;  %2919 = vmatpush3.bf16.msra.mxu1 %v3089_v13 }
  0xc3   : > { %v619_v43 = vpack.c.bf16 %v2462_v42, %v2461_v41  ;;  %v671_v44 = vpop.permute.xlu0 %670  ;;  %2758 = vmatprep.subr.bf16.mxu0 %v3084_v11  ;;  %2920 = vmatprep.subr.bf16.mxu1 %v3090_v15 }
  0xc4   : > { %v674_v46 = vpop.permute.xlu1 %673  ;;  %vm697_vm6 = vcmp.eq.s32.totalorder %v671_v44, %v3412_v40 }
  0xc5   : > { %vm698_vm7 = vcmp.eq.s32.totalorder %v674_v46, %v3412_v40  ;;  %2874 = vmatprep.mubr.msk.bf16.mxu0 %vm775_vm4, %v619_v43  ;;  %v2479_v47 = vsel %vm697_vm6, 1.0, %v3226_v45 }
  0xc6   : > { %v2480_v48 = vsel %vm698_vm7, 1.0, %v3226_v45  ;;  %2921 = vmatpush3.bf16.msra.mxu1 %v3090_v15 }
  0xc7   : > { %v740_v49 = vpack.c.bf16 %v2480_v48, %v2479_v47  ;;  %v551_v50 = vpop.permute.xlu0 %550  ;;  %2938 = vmatprep.subr.bf16.mxu1 %v3099_v24 }
  0xc8   : > { %v554_v51 = vpop.permute.xlu1 %553  ;;  %vm577_vm8 = vcmp.eq.s32.totalorder %v551_v50, %v3412_v40 }
  0xc9   : > { %vm578_vm9 = vcmp.eq.s32.totalorder %v554_v51, %v3412_v40  ;;  %2899 = vmatmul.mubr.msk.bf16.gmra.mrb[8].mxu1 %vm775_vm4, %v740_v49  ;;  %v2463_v52 = vsel %vm577_vm8, 1.0, %v3226_v45 }
  0xca   : > { %v2464_v53 = vsel %vm578_vm9, 1.0, %v3226_v45 }
  0xcb   : > { %v620_v54 = vpack.c.bf16 %v2464_v53, %v2463_v52  ;;  %v677_v55 = vpop.permute.xlu0 %676 }
  0xcc   : > { %v680_v56 = vpop.permute.xlu1 %679  ;;  %vm699_vm10 = vcmp.eq.s32.totalorder %v677_v55, %v3412_v40 }
  0xcd   : > { %vm700_vm11 = vcmp.eq.s32.totalorder %v680_v56, %v3412_v40  ;;  %2875 = vmatmul.mubr.msk.bf16.gmra.mrb[8].mxu0 %vm775_vm4, %v620_v54  ;;  %v2481_v57 = vsel %vm699_vm10, 1.0, %v3226_v45 }
  0xce   : > { %v2482_v58 = vsel %vm700_vm11, 1.0, %v3226_v45 }
  0xcf   : > { %v741_v59 = vpack.c.bf16 %v2482_v58, %v2481_v57  ;;  %v557_v60 = vpop.permute.xlu0 %556 }
  0xd0   : > { %v560_v61 = vpop.permute.xlu1 %559  ;;  %vm579_vm12 = vcmp.eq.s32.totalorder %v557_v60, %v3412_v40 }
  0xd1   : > { %vm580_vm13 = vcmp.eq.s32.totalorder %v560_v61, %v3412_v40  ;;  %2902 = vmatprep.mubr.msk.bf16.mxu1 %vm775_vm4, %v741_v59  ;;  %v2465_v62 = vsel %vm579_vm12, 1.0, %v3226_v45 }
  0xd2   : > { %v2466_v63 = vsel %vm580_vm13, 1.0, %v3226_v45 }
  0xd3   : > { %v621_v0 = vpack.c.bf16 %v2466_v63, %v2465_v62  ;;  %v683_v1 = vpop.permute.xlu0 %682 }
  0xd4   : > { %v686_v2 = vpop.permute.xlu1 %685  ;;  %vm701_vm14 = vcmp.eq.s32.totalorder %v683_v1, %v3412_v40 }
  0xd5   : > { %vm702_vm15 = vcmp.eq.s32.totalorder %v686_v2, %v3412_v40  ;;  %2878 = vmatprep.mubr.msk.bf16.mxu0 %vm775_vm4, %v621_v0  ;;  %v2483_v3 = vsel %vm701_vm14, 1.0, %v3226_v45 }
  0xd6   : > { %v2484_v4 = vsel %vm702_vm15, 1.0, %v3226_v45 }
  0xd7   : > { %v742_v5 = vpack.c.bf16 %v2484_v4, %v2483_v3  ;;  %v563_v6 = vpop.permute.xlu0 %562 }
  0xd8   : > { %v566_v7 = vpop.permute.xlu1 %565  ;;  %vm581_vm0 = vcmp.eq.s32.totalorder %v563_v6, %v3412_v40 }
  0xd9   : > { %vm582_vm1 = vcmp.eq.s32.totalorder %v566_v7, %v3412_v40  ;;  %2903 = vmatmul.mubr.msk.bf16.gmra.mrb[12].mxu1 %vm775_vm4, %v742_v5  ;;  %v2467_v8 = vsel %vm581_vm0, 1.0, %v3226_v45  ;;  %v3085_v40 = vld [vmem:[%s3969_s4 + $0x30] sm:$0xff]  }
  0xda   : > { %v2468_v9 = vsel %vm582_vm1, 1.0, %v3226_v45  ;;  %2759 = vmatpush3.bf16.msra.mxu0 %v3085_v40  ;;  %v3087_v45 = vld [vmem:[%s3969_s4 + $0x78] sm:$0xff]   ;;  %2922 = vmatprep.mubr.bf16.mxu1 %v3569_v16 }
  0xdb   : > { %v622_v10 = vpack.c.bf16 %v2468_v9, %v2467_v8  ;;  %2760 = vmatprep.subr.bf16.mxu0 %v3087_v45  ;;  %v3102_v40 = vld [vmem:[%s3971_s6 + $0x18] sm:$0xff]   ;;  %v3103_v45 = vld [vmem:[%s3971_s6 + $0x20] sm:$0xff]  }
  0xdd   : > { %2879 = vmatmul.mubr.msk.bf16.gmra.mrb[12].mxu0 %vm775_vm4, %v622_v10 }
  0xde   : > { %2761 = vmatpush3.bf16.msra.mxu0 %v3088_v14 }
  0xe1   : > { %2923 = vmatmul.mubr.bf16.vlgmr.msra.gmra.mrb[16].mxu1 %v3572_v17 }
  0xe2   : > { %2926 = vmatprep.mubr.bf16.mxu1 %v1022_v18  ;;  %2939 = vmatpush3.bf16.msra.mxu1 %v3099_v24  ;;  %v3104_v18 = vld [vmem:[%s3971_s6 + $0x28] sm:$0xff]  }
  0xe3   : > { %2940 = vmatprep.subr.bf16.mxu1 %v3100_v25 }
  0xe6   : > { %2941 = vmatpush3.bf16.msra.mxu1 %v3100_v25 }
  0xe7   : > { %2942 = vmatprep.subr.bf16.mxu1 %v3101_v26 }
  0xe9   : > { %2927 = vmatmul.mubr.bf16.gmra.mrb[20].mxu1 %v3578_v19 }
  0xea   : > { %2930 = vmatprep.mubr.bf16.mxu1 %v1026_v20  ;;  %2943 = vmatpush3.bf16.msra.mxu1 %v3101_v26 }
  0xeb   : > { %2944 = vmatprep.subr.bf16.mxu1 %v3102_v40 }
  0xee   : > { %2945 = vmatpush3.bf16.msra.mxu1 %v3102_v40 }
  0xef   : > { %2946 = vmatprep.subr.bf16.mxu1 %v3103_v45 }
  0xf1   : > { %2931 = vmatmul.mubr.bf16.gmra.mrb[24].mxu1 %v1028_v21  ;;  %v3105_v21 = vld [vmem:[%s3971_s6 + $0x30] sm:$0xff]  }
  0xf2   : > { %2934 = vmatprep.mubr.bf16.mxu1 %v1030_v22  ;;  %2947 = vmatpush3.bf16.msra.mxu1 %v3103_v45  ;;  %v3106_v22 = vld [vmem:[%s3971_s6 + $0x38] sm:$0xff]  }
  0xf3   : > { %2948 = vmatprep.subr.bf16.mxu1 %v3104_v18 }
  0xf6   : > { %2949 = vmatpush3.bf16.msra.mxu1 %v3104_v18 }
  0xf7   : > { %2950 = vmatprep.subr.bf16.mxu1 %v3105_v21 }
  0xf9   : > { %2935 = vmatmul.mubr.bf16.gmra.mrb[28].mxu1 %v1032_v23 }
  0xfa   : > { %2951 = vmatpush3.bf16.msra.mxu1 %v3105_v21 }
  0xfb   : > { %2952 = vmatprep.subr.bf16.mxu1 %v3106_v22 }
  0xfe   : > { %2953 = vmatpush3.bf16.msra.mxu1 %v3106_v22 }
 0x17c   : > { %v2892_v27 = vpop.f32.mrb[0].mxu1 }
 0x17d   : > { %v955_v28 = vpop.f32.mrb[1].mxu1 }
 0x17e   : > { %v2893_v29 = vpop.f32.mrb[2].mxu1 }
 0x17f   : > { %v1051_v30 = vpack.c.bf16 %v2893_v29, %v2892_v27  ;;  %v958_v31 = vpop.f32.mrb[3].mxu1 }
 0x180   : > { %v1050_v32 = vpack.c.bf16 %v958_v31, %v955_v28  ;;  %v2868_v33 = vpop.f32.mrb[0].mxu0 }
 0x181   : > { %v834_v34 = vpop.f32.mrb[1].mxu0 }
 0x182   : > { %v2869_v35 = vpop.f32.mrb[2].mxu0  ;;  %1377 = vmatprep.mubr.bf16.mxu0 %v1050_v32 }
 0x183   : > { %v1035_v36 = vpack.c.bf16 %v2869_v35, %v2868_v33  ;;  %v837_v37 = vpop.f32.mrb[3].mxu0  ;;  %v3107_v35 = vld [vmem:[%s3973_s8] sm:$0xff]  }
 0x184   : > { %v1034_v38 = vpack.c.bf16 %v837_v37, %v834_v34  ;;  %2970 = vmatprep.subr.bf16.mxu0 %v3107_v35  ;;  %3002 = vmatprep.subr.bf16.mxu1 %v3107_v35  ;;  %v3109_v37 = vld [vmem:[%s3973_s8 + $0x10] sm:$0xff]  }
 0x186   : > { %1378 = vmatmul.mubr.bf16.vlgmr.msra.gmra.mrb[16].mxu0 %v1034_v38  ;;  %v3649_v38 = vld [vmem:[%s3973_s8 + $0x18] sm:$0xff]  }
 0x187   : > { %1385 = vmatprep.mubr.bf16.mxu0 %v1051_v30  ;;  %2971 = vmatpush3.bf16.msra.mxu0 %v3107_v35 }
 0x18c   : > { %v2896_v39 = vpop.f32.mrb[4].mxu1 }
 0x18d   : > { %v971_v41 = vpop.f32.mrb[5].mxu1 }
 0x18e   : > { %v2897_v42 = vpop.f32.mrb[6].mxu1  ;;  %1386 = vmatmul.mubr.bf16.gmra.mrb[20].mxu0 %v1035_v36  ;;  %v3108_v36 = vld [vmem:[%s3973_s8 + $0x8] sm:$0xff]  }
 0x18f   : > { %v1053_v43 = vpack.c.bf16 %v2897_v42, %v2896_v39  ;;  %v974_v44 = vpop.f32.mrb[7].mxu1  ;;  %2972 = vmatprep.subr.bf16.mxu0 %v3108_v36  ;;  %v3655_v39 = vld [vmem:[%s3973_s8 + $0x20] sm:$0xff]  }
 0x190   : > { %v1052_v46 = vpack.c.bf16 %v974_v44, %v971_v41  ;;  %v2872_v47 = vpop.f32.mrb[4].mxu0  ;;  %2973 = vmatpush3.bf16.msra.mxu0 %v3108_v36  ;;  %v3662_v41 = vld [vmem:[%s3973_s8 + $0x28] sm:$0xff]   ;;  %v3670_v44 = vld [vmem:[%s3970_s5] ss:$0 sm:$0xff] }
 0x191   : > { %v850_v48 = vpop.f32.mrb[5].mxu0  ;;  %2974 = vmatprep.subr.bf16.mxu0 %v3109_v37 }
 0x192   : > { %v2873_v49 = vpop.f32.mrb[6].mxu0  ;;  %1393 = vmatprep.mubr.bf16.mxu0 %v1052_v46 }
 0x193   : > { %v1037_v50 = vpack.c.bf16 %v2873_v49, %v2872_v47  ;;  %v853_v51 = vpop.f32.mrb[7].mxu0 }
 0x194   : > { %v1036_v52 = vpack.c.bf16 %v853_v51, %v850_v48  ;;  %2975 = vmatpush3.bf16.msra.mxu0 %v3109_v37 }
 0x195   : > { %2976 = vmatprep.subr.bf16.mxu0 %v3649_v38 }
 0x196   : > { %1394 = vmatmul.mubr.bf16.gmra.mrb[24].mxu0 %v1036_v52 }
 0x197   : > { %1401 = vmatprep.mubr.bf16.mxu0 %v1053_v43 }
 0x198   : > { %2977 = vmatpush3.bf16.msra.mxu0 %v3649_v38 }
 0x199   : > { %2978 = vmatprep.subr.bf16.mxu0 %v3655_v39 }
 0x19c   : > { %v2900_v53 = vpop.f32.mrb[8].mxu1  ;;  %2979 = vmatpush3.bf16.msra.mxu0 %v3655_v39 }
 0x19d   : > { %v987_v54 = vpop.f32.mrb[9].mxu1  ;;  %2980 = vmatprep.subr.bf16.mxu0 %v3662_v41 }
 0x19e   : > { %v2901_v55 = vpop.f32.mrb[10].mxu1  ;;  %1402 = vmatmul.mubr.bf16.gmra.mrb[28].mxu0 %v1037_v50 }
 0x19f   : > { %v1055_v56 = vpack.c.bf16 %v2901_v55, %v2900_v53  ;;  %v990_v57 = vpop.f32.mrb[11].mxu1 }
 0x1a0   : > { %v1054_v58 = vpack.c.bf16 %v990_v57, %v987_v54  ;;  %v2876_v59 = vpop.f32.mrb[8].mxu0  ;;  %2981 = vmatpush3.bf16.msra.mxu0 %v3662_v41 }
 0x1a1   : > { %v866_v60 = vpop.f32.mrb[9].mxu0 }
 0x1a2   : > { %v2877_v61 = vpop.f32.mrb[10].mxu0  ;;  %1409 = vmatprep.mubr.bf16.mxu0 %v1054_v58 }
 0x1a3   : > { %v1039_v62 = vpack.c.bf16 %v2877_v61, %v2876_v59  ;;  %v869_v63 = vpop.f32.mrb[11].mxu0 }
 0x1a4   : > { %v1038_v0 = vpack.c.bf16 %v869_v63, %v866_v60 }
 0x1a6   : > { %1410 = vmatmul.mubr.bf16.gmra.mrb[32].mxu0 %v1038_v0 }
 0x1a7   : > { %1417 = vmatprep.mubr.bf16.mxu0 %v1055_v56 }
 0x1ac   : > { %v2904_v1 = vpop.f32.mrb[12].mxu1 }
 0x1ad   : > { %v1003_v2 = vpop.f32.mrb[13].mxu1 }
 0x1ae   : > { %v2905_v3 = vpop.f32.mrb[14].mxu1  ;;  %1418 = vmatmul.mubr.bf16.gmra.mrb[36].mxu0 %v1039_v62 }
 0x1af   : > { %v1057_v4 = vpack.c.bf16 %v2905_v3, %v2904_v1  ;;  %v1006_v5 = vpop.f32.mrb[15].mxu1 }
 0x1b0   : > { %v1056_v6 = vpack.c.bf16 %v1006_v5, %v1003_v2  ;;  %v2880_v7 = vpop.f32.mrb[12].mxu0 }
 0x1b1   : > { %v882_v8 = vpop.f32.mrb[13].mxu0 }
 0x1b2   : > { %v2881_v9 = vpop.f32.mrb[14].mxu0  ;;  %1425 = vmatprep.mubr.bf16.mxu0 %v1056_v6 }
 0x1b3   : > { %v1041_v10 = vpack.c.bf16 %v2881_v9, %v2880_v7  ;;  %v885_v11 = vpop.f32.mrb[15].mxu0 }
 0x1b4   : > { %v1040_v12 = vpack.c.bf16 %v885_v11, %v882_v8  ;;  %v3600_v13 = vpop.f32.mrb[16].mxu1 }
 0x1b5   : > { %v1476_v14 = vpop.f32.mrb[17].mxu1 }
 0x1b6   : > { %1426 = vmatmul.mubr.bf16.gmra.mrb[40].mxu0 %v1040_v12  ;;  %v3602_v15 = vpop.f32.mrb[18].mxu1 }
 0x1b7   : > { %1433 = vmatprep.mubr.bf16.mxu0 %v1057_v4  ;;  %v1479_v20 = vpop.f32.mrb[19].mxu1 }
 0x1bc   : > { %v3613_v23 = vpop.f32.mrb[20].mxu1 }
 0x1bd   : > { %v3615_v24 = vpop.f32.mrb[21].mxu1 }
 0x1be   : > { %1434 = vmatmul.mubr.bf16.gmra.mrb[44].mxu0 %v1041_v10  ;;  %v3617_v25 = vpop.f32.mrb[22].mxu1 }
 0x1bf   : > { %v3619_v26 = vpop.f32.mrb[23].mxu1 }
 0x1c4   : > { %v3621_v27 = vpop.f32.mrb[24].mxu1 }
 0x1c5   : > { %v3623_v28 = vpop.f32.mrb[25].mxu1 }
 0x1c6   : > { %v3625_v29 = vpop.f32.mrb[26].mxu1 }
 0x1c7   : > { %v3627_v30 = vpop.f32.mrb[27].mxu1 }
 0x1cc   : > { %v3629_v31 = vpop.f32.mrb[28].mxu1 }
 0x1cd   : > { %v3631_v32 = vpop.f32.mrb[29].mxu1 }
 0x1ce   : > { %v3633_v33 = vpop.f32.mrb[30].mxu1 }
 0x1cf   : > { %v3635_v34 = vpop.f32.mrb[31].mxu1 }
 0x259   : > { %v2762_v42 = vpop.f32.mrb[16].mxu0 }
 0x25a   : > { %v2763_v43 = vpop.f32.mrb[17].mxu0 }
 0x25b   : > { %v2764_v46 = vadd.f32 %v2763_v43, %v2762_v42  ;;  %v2765_v47 = vpop.f32.mrb[18].mxu0 }
 0x25c   : > { %v2766_v48 = vpop.f32.mrb[19].mxu0 }
 0x25d   : > { %v2767_v49 = vadd.f32 %v2766_v48, %v2765_v47  ;;  %v1380_v50 = vadd.f32 %v2764_v46, %v3670_v44 }
 0x25f   : > { %v1477_v51 = vadd.f32 %v1476_v14, %v1380_v50  ;;  %v1383_v52 = vadd.f32 %v2767_v49, %v3670_v44 }
 0x261   : > { %v1480_v53 = vadd.f32 %v1479_v20, %v1383_v52  ;;  %v2768_v54 = vpop.f32.mrb[20].mxu0 }
 0x262   : > { %v2769_v55 = vpop.f32.mrb[21].mxu0 }
 0x263   : > { %v1556_v56 = vpack.c.bf16 %v1480_v53, %v1477_v51  ;;  %v2770_v57 = vadd.f32 %v2769_v55, %v2768_v54  ;;  %v2771_v58 = vpop.f32.mrb[22].mxu0 }
 0x264   : > { %v2772_v59 = vpop.f32.mrb[23].mxu0 }
 0x265   : > { %v1388_v60 = vadd.f32 %v2770_v57, %v3670_v44  ;;  %v2773_v61 = vadd.f32 %v2772_v59, %v2771_v58  ;;  %2954 = vmatprep.mubr.bf16.mxu1 %v1556_v56 }
 0x267   : > { %v1485_v62 = vadd.f32 %v3600_v13, %v1388_v60  ;;  %v1391_v63 = vadd.f32 %v2773_v61, %v3670_v44 }
 0x269   : > { %v1488_v0 = vadd.f32 %v3602_v15, %v1391_v63  ;;  %v2774_v1 = vpop.f32.mrb[24].mxu0 }
 0x26a   : > { %v2775_v2 = vpop.f32.mrb[25].mxu0 }
 0x26b   : > { %v1557_v3 = vpack.c.bf16 %v1488_v0, %v1485_v62  ;;  %v2776_v4 = vadd.f32 %v2775_v2, %v2774_v1  ;;  %v2777_v5 = vpop.f32.mrb[26].mxu0 }
 0x26c   : > { %v2778_v6 = vpop.f32.mrb[27].mxu0 }
 0x26d   : > { %v2779_v7 = vadd.f32 %v2778_v6, %v2777_v5  ;;  %2955 = vmatmul.mubr.bf16.vlgmr.msra.gmra.mrb[32].mxu1 %v1557_v3  ;;  %v1396_v8 = vadd.f32 %v2776_v4, %v3670_v44 }
 0x26e   : > { %3010 = vmatpush3.bf16.msra.mxu1 %v3107_v35 }
 0x26f   : > { %v1493_v9 = vadd.f32 %v3615_v24, %v1396_v8  ;;  %v1399_v10 = vadd.f32 %v2779_v7, %v3670_v44  ;;  %3003 = vmatprep.subr.bf16.mxu1 %v3108_v36 }
 0x271   : > { %v1496_v11 = vadd.f32 %v3619_v26, %v1399_v10  ;;  %v2780_v12 = vpop.f32.mrb[28].mxu0 }
 0x272   : > { %v2781_v40 = vpop.f32.mrb[29].mxu0  ;;  %3011 = vmatpush3.bf16.msra.mxu1 %v3108_v36 }
 0x273   : > { %v1558_v45 = vpack.c.bf16 %v1496_v11, %v1493_v9  ;;  %v2782_v13 = vadd.f32 %v2781_v40, %v2780_v12  ;;  %v2783_v14 = vpop.f32.mrb[30].mxu0  ;;  %3004 = vmatprep.subr.bf16.mxu1 %v3109_v37  ;;  %v3114_v11 = vld [vmem:[%s3973_s8 + $0x38] sm:$0xff]  }
 0x274   : > { %v2784_v15 = vpop.f32.mrb[31].mxu0 }
 0x275   : > { %v1404_v18 = vadd.f32 %v2782_v13, %v3670_v44  ;;  %v2785_v20 = vadd.f32 %v2784_v15, %v2783_v14  ;;  %2958 = vmatprep.mubr.bf16.mxu1 %v1558_v45 }
 0x276   : > { %3012 = vmatpush3.bf16.msra.mxu1 %v3109_v37 }
 0x277   : > { %v1501_v21 = vadd.f32 %v3613_v23, %v1404_v18  ;;  %v1407_v22 = vadd.f32 %v2785_v20, %v3670_v44  ;;  %3005 = vmatprep.subr.bf16.mxu1 %v3649_v38 }
 0x279   : > { %v1504_v24 = vadd.f32 %v3617_v25, %v1407_v22  ;;  %v2786_v26 = vpop.f32.mrb[32].mxu0 }
 0x27a   : > { %v2787_v35 = vpop.f32.mrb[33].mxu0  ;;  %3013 = vmatpush3.bf16.msra.mxu1 %v3649_v38 }
 0x27b   : > { %v2788_v36 = vadd.f32 %v2787_v35, %v2786_v26  ;;  %v2789_v42 = vpop.f32.mrb[34].mxu0  ;;  %v1559_v43 = vpack.c.bf16 %v1504_v24, %v1501_v21  ;;  %3006 = vmatprep.subr.bf16.mxu1 %v3655_v39 }
 0x27c   : > { %v2790_v46 = vpop.f32.mrb[35].mxu0 }
 0x27d   : > { %v2791_v47 = vadd.f32 %v2790_v46, %v2789_v42  ;;  %2959 = vmatmul.mubr.bf16.gmra.mrb[36].mxu1 %v1559_v43  ;;  %v1412_v23 = vadd.f32 %v2788_v36, %v3670_v44 }
 0x27e   : > { %3014 = vmatpush3.bf16.msra.mxu1 %v3655_v39 }
 0x27f   : > { %v1509_v37 = vadd.f32 %v3623_v28, %v1412_v23  ;;  %v1415_v25 = vadd.f32 %v2791_v47, %v3670_v44  ;;  %3007 = vmatprep.subr.bf16.mxu1 %v3662_v41 }
 0x281   : > { %v1512_v38 = vadd.f32 %v3627_v30, %v1415_v25  ;;  %v2792_v48 = vpop.f32.mrb[36].mxu0 }
 0x282   : > { %v2793_v49 = vpop.f32.mrb[37].mxu0  ;;  %3015 = vmatpush3.bf16.msra.mxu1 %v3662_v41 }
 0x283   : > { %v1560_v50 = vpack.c.bf16 %v1512_v38, %v1509_v37  ;;  %v2794_v51 = vadd.f32 %v2793_v49, %v2792_v48  ;;  %v2795_v52 = vpop.f32.mrb[38].mxu0 }
 0x284   : > { %v2796_v53 = vpop.f32.mrb[39].mxu0 }
 0x285   : > { %v1420_v54 = vadd.f32 %v2794_v51, %v3670_v44  ;;  %v2797_v55 = vadd.f32 %v2796_v53, %v2795_v52  ;;  %2962 = vmatprep.mubr.bf16.mxu1 %v1560_v50 }
 0x287   : > { %v1517_v28 = vadd.f32 %v3621_v27, %v1420_v54  ;;  %v1423_v39 = vadd.f32 %v2797_v55, %v3670_v44 }
 0x289   : > { %v1520_v56 = vadd.f32 %v3625_v29, %v1423_v39  ;;  %v2798_v57 = vpop.f32.mrb[40].mxu0 }
 0x28a   : > { %v2799_v30 = vpop.f32.mrb[41].mxu0 }
 0x28b   : > { %v2800_v58 = vadd.f32 %v2799_v30, %v2798_v57  ;;  %v2801_v59 = vpop.f32.mrb[42].mxu0  ;;  %v1561_v60 = vpack.c.bf16 %v1520_v56, %v1517_v28 }
 0x28c   : > { %v2802_v41 = vpop.f32.mrb[43].mxu0 }
 0x28d   : > { %v2803_v61 = vadd.f32 %v2802_v41, %v2801_v59  ;;  %2963 = vmatmul.mubr.bf16.gmra.mrb[40].mxu1 %v1561_v60  ;;  %v1428_v62 = vadd.f32 %v2800_v58, %v3670_v44  ;;  %v2547_v41 = vld [vmem:[%s3974_s9] ss:$0 sm:$0xff] }
 0x28f   : > { %v1525_v63 = vadd.f32 %v3631_v32, %v1428_v62  ;;  %v1431_v0 = vadd.f32 %v2803_v61, %v3670_v44 }
 0x291   : > { %v1528_v27 = vadd.f32 %v3635_v34, %v1431_v0  ;;  %v2804_v1 = vpop.f32.mrb[44].mxu0  ;;  %v3113_v34 = vld [vmem:[%s3973_s8 + $0x30] sm:$0xff]  }
 0x292   : > { %v2805_v2 = vpop.f32.mrb[45].mxu0  ;;  %2982 = vmatprep.subr.bf16.mxu0 %v3113_v34  ;;  %3008 = vmatprep.subr.bf16.mxu1 %v3113_v34 }
 0x293   : > { %v1562_v3 = vpack.c.bf16 %v1528_v27, %v1525_v63  ;;  %v2806_v29 = vadd.f32 %v2805_v2, %v2804_v1  ;;  %v2807_v4 = vpop.f32.mrb[46].mxu0  ;;  %2983 = vmatpush3.bf16.msra.mxu0 %v3113_v34  ;;  %3016 = vmatpush3.bf16.msra.mxu1 %v3113_v34 }
 0x294   : > { %v2808_v5 = vpop.f32.mrb[47].mxu0  ;;  %2984 = vmatprep.subr.bf16.mxu0 %v3114_v11  ;;  %3009 = vmatprep.subr.bf16.mxu1 %v3114_v11 }
 0x295   : > { %v1436_v6 = vadd.f32 %v2806_v29, %v3670_v44  ;;  %v2809_v7 = vadd.f32 %v2808_v5, %v2807_v4  ;;  %2966 = vmatprep.mubr.bf16.mxu1 %v1562_v3 }
 0x297   : > { %v1533_v8 = vadd.f32 %v3629_v31, %v1436_v6  ;;  %v1439_v9 = vadd.f32 %v2809_v7, %v3670_v44  ;;  %2985 = vmatpush3.bf16.msra.mxu0 %v3114_v11  ;;  %3017 = vmatpush3.bf16.msra.mxu1 %v3114_v11 }
 0x299   : > { %v1536_v32 = vadd.f32 %v3633_v33, %v1439_v9  ;;  %v2538_v33 = vld [vmem:[%s3972_s7] ss:$0 sm:$0xff] }
 0x29b   : > { %v1563_v10 = vpack.c.bf16 %v1536_v32, %v1533_v8 }
 0x29d   : > { %2967 = vmatmul.mubr.bf16.gmra.mrb[44].mxu1 %v1563_v10 }
 0x340   : > { %v2956_v31 = vpop.f32.mrb[32].mxu1 }
 0x341   : > { %v1652_v44 = vpop.f32.mrb[33].mxu1  ;;  %v1661_v40 = vadd.f32 %v2956_v31, %v2538_v33 }
 0x342   : > { %v2957_v12 = vpop.f32.mrb[34].mxu1  ;;  %v1653_v14 = vadd.f32 %v2538_v33, %v1652_v44 }
 0x343   : > { %v1664_v45 = vadd.f32 %v2957_v12, %v2538_v33  ;;  %v1655_v13 = vpop.f32.mrb[35].mxu1 }
 0x344   : > { %v1656_v15 = vadd.f32 %v2538_v33, %v1655_v13 }
 0x345   : > { %v1733_v18 = vpack.c.bf16 %v1664_v45, %v1661_v40 }
 0x346   : > { %v1732_v20 = vpack.c.bf16 %v1656_v15, %v1653_v14 }
 0x348   : > { %2986 = vmatprep.mubr.bf16.mxu0 %v1732_v20 }
 0x349   : > { %2987 = vmatmul.mubr.bf16.vlgmr.msra.gmra.mrb[48].mxu0 %v1733_v18 }
 0x350   : > { %v2960_v21 = vpop.f32.mrb[36].mxu1 }
 0x351   : > { %v1668_v22 = vpop.f32.mrb[37].mxu1  ;;  %v1677_v26 = vadd.f32 %v2960_v21, %v2538_v33 }
 0x352   : > { %v2961_v24 = vpop.f32.mrb[38].mxu1  ;;  %v1669_v42 = vadd.f32 %v2538_v33, %v1668_v22 }
 0x353   : > { %v1680_v35 = vadd.f32 %v2961_v24, %v2538_v33  ;;  %v1671_v36 = vpop.f32.mrb[39].mxu1 }
 0x354   : > { %v1672_v43 = vadd.f32 %v2538_v33, %v1671_v36 }
 0x355   : > { %v1735_v46 = vpack.c.bf16 %v1680_v35, %v1677_v26 }
 0x356   : > { %v1734_v47 = vpack.c.bf16 %v1672_v43, %v1669_v42 }
 0x358   : > { %2990 = vmatprep.mubr.bf16.mxu0 %v1734_v47 }
 0x359   : > { %2991 = vmatmul.mubr.bf16.gmra.mrb[52].mxu0 %v1735_v46 }
 0x360   : > { %v2964_v23 = vpop.f32.mrb[40].mxu1 }
 0x361   : > { %v1684_v37 = vpop.f32.mrb[41].mxu1  ;;  %v1693_v38 = vadd.f32 %v2964_v23, %v2538_v33 }
 0x362   : > { %v2965_v25 = vpop.f32.mrb[42].mxu1  ;;  %v1685_v50 = vadd.f32 %v2538_v33, %v1684_v37 }
 0x363   : > { %v1696_v48 = vadd.f32 %v2965_v25, %v2538_v33  ;;  %v1687_v49 = vpop.f32.mrb[43].mxu1 }
 0x364   : > { %v1688_v51 = vadd.f32 %v2538_v33, %v1687_v49 }
 0x365   : > { %v1737_v52 = vpack.c.bf16 %v1696_v48, %v1693_v38 }
 0x366   : > { %v1736_v53 = vpack.c.bf16 %v1688_v51, %v1685_v50 }
 0x368   : > { %2994 = vmatprep.mubr.bf16.mxu1 %v1736_v53 }
 0x369   : > { %2995 = vmatmul.mubr.bf16.vlgmr.msra.gmra.mrb[48].mxu1 %v1737_v52 }
 0x370   : > { %v2968_v54 = vpop.f32.mrb[44].mxu1 }
 0x371   : > { %v1700_v55 = vpop.f32.mrb[45].mxu1  ;;  %v1709_v39 = vadd.f32 %v2968_v54, %v2538_v33 }
 0x372   : > { %v2969_v28 = vpop.f32.mrb[46].mxu1  ;;  %v1701_v30 = vadd.f32 %v2538_v33, %v1700_v55 }
 0x373   : > { %v1712_v56 = vadd.f32 %v2969_v28, %v2538_v33  ;;  %v1703_v57 = vpop.f32.mrb[47].mxu1 }
 0x374   : > { %v1704_v58 = vadd.f32 %v2538_v33, %v1703_v57 }
 0x375   : > { %v1739_v59 = vpack.c.bf16 %v1712_v56, %v1709_v39 }
 0x376   : > { %v1738_v60 = vpack.c.bf16 %v1704_v58, %v1701_v30 }
 0x378   : > { %2998 = vmatprep.mubr.bf16.mxu1 %v1738_v60 }
 0x379   : > { %2999 = vmatmul.mubr.bf16.gmra.mrb[52].mxu1 %v1739_v59 }
 0x41c   : > { %v2988_v61 = vpop.f32.mrb[48].mxu0 }
 0x41d   : > { %v1837_v62 = vadd.f32 %v2988_v61, %v2547_v41  ;;  %v1828_v63 = vpop.f32.mrb[49].mxu0 }
 0x41e   : > { %v2989_v0 = vpop.f32.mrb[50].mxu0  ;;  %v1829_v2 = vadd.f32 %v2547_v41, %v1828_v63 }
 0x41f   : > { %1895 = vadd.xlane.f32.xlu0 %v1837_v62  ;;  %v1831_v27 = vpop.f32.mrb[51].mxu0  ;;  %v1840_v3 = vadd.f32 %v2989_v0, %v2547_v41 }
 0x420   : > { %v1832_v1 = vadd.f32 %v2547_v41, %v1831_v27 }
 0x422   : > { %1893 = vadd.xlane.f32.xlu1 %v1832_v1 }
 0x423   : > { %1891 = vadd.xlane.f32.xlu0 %v1829_v2 }
 0x427   : > { %1897 = vadd.xlane.f32.xlu0 %v1840_v3 }
 0x42c   : > { %v2992_v29 = vpop.f32.mrb[52].mxu0 }
 0x42d   : > { %v1853_v4 = vadd.f32 %v2992_v29, %v2547_v41  ;;  %v1844_v5 = vpop.f32.mrb[53].mxu0 }
 0x42e   : > { %v2993_v6 = vpop.f32.mrb[54].mxu0  ;;  %v1845_v9 = vadd.f32 %v2547_v41, %v1844_v5 }
 0x42f   : > { %v1856_v7 = vadd.f32 %v2993_v6, %v2547_v41  ;;  %v1847_v8 = vpop.f32.mrb[55].mxu0  ;;  %1903 = vadd.xlane.f32.xlu1 %v1853_v4 }
 0x430   : > { %v1848_v32 = vadd.f32 %v2547_v41, %v1847_v8 }
 0x431   : > { %1905 = vadd.xlane.f32.xlu0 %v1856_v7 }
 0x433   : > { %1899 = vadd.xlane.f32.xlu1 %v1845_v9 }
 0x435   : > { %1901 = vadd.xlane.f32.xlu0 %v1848_v32 }
 0x43c   : > { %v2996_v10 = vpop.f32.mrb[48].mxu1 }
 0x43d   : > { %v3720_v34 = vadd.f32 %v2996_v10, %v2547_v41  ;;  %v1860_v11 = vpop.f32.mrb[49].mxu1 }
 0x43e   : > { %v2997_v31 = vpop.f32.mrb[50].mxu1  ;;  %v3725_v12 = vadd.f32 %v2547_v41, %v1860_v11 }
 0x43f   : > { %v3722_v33 = vadd.f32 %v2997_v31, %v2547_v41  ;;  %1911 = vadd.xlane.f32.xlu1 %v3720_v34  ;;  %v1863_v44 = vpop.f32.mrb[51].mxu1 }
 0x440   : > { %v3728_v40 = vadd.f32 %v2547_v41, %v1863_v44 }
 0x441   : > { %1913 = vadd.xlane.f32.xlu0 %v3722_v33 }
 0x443   : > { %1907 = vadd.xlane.f32.xlu1 %v3725_v12 }
 0x445   : > { %1909 = vadd.xlane.f32.xlu0 %v3728_v40 }
 0x44c   : > { %v3000_v45 = vpop.f32.mrb[52].mxu1 }
 0x44d   : > { %v1876_v13 = vpop.f32.mrb[53].mxu1  ;;  %v3737_v21 = vadd.f32 %v3000_v45, %v2547_v41 }
 0x44e   : > { %v3732_v14 = vadd.f32 %v2547_v41, %v1876_v13  ;;  %v3001_v15 = vpop.f32.mrb[54].mxu1 }
 0x44f   : > { %v1879_v18 = vpop.f32.mrb[55].mxu1  ;;  %v3740_v22 = vadd.f32 %v3001_v15, %v2547_v41 }
 0x450   : > { %v3734_v20 = vadd.f32 %v2547_v41, %v1879_v18  ;;  %1915 = vadd.xlane.f32.xlu1 %v3732_v14 }
 0x452   : > { %1917 = vadd.xlane.f32.xlu0 %v3734_v20 }
 0x454   : > { %1919 = vadd.xlane.f32.xlu1 %v3737_v21 }
 0x456   : > { %1921 = vadd.xlane.f32.xlu0 %v3740_v22 }
 0x4ac   : > { %v1896_v24 = vpop.xlane.xlu0 %1895 }
 0x4ad   : > { %v1926_v26 = vmul.f32 0.0078125, %v1896_v24 }
 0x4af   : > { %v3744_v35 = vsub.f32 %v1837_v62, %v1926_v26  ;;  %v1894_v46 = vpop.xlane.xlu1 %1893 }
 0x4b0   : > { %v1892_v36 = vpop.xlane.xlu0 %1891  ;;  %v1925_v37 = vmul.f32 0.0078125, %v1894_v46 }
 0x4b1   : > { %v1924_v42 = vmul.f32 0.0078125, %v1892_v36  ;;  %v1958_v43 = vmul.f32 %v3744_v35, %v3744_v35 }
 0x4b2   : > { %v3754_v49 = vsub.f32 %v1832_v1, %v1925_v37 }
 0x4b3   : > { %v3748_v47 = vsub.f32 %v1829_v2, %v1924_v42  ;;  %1976 = vadd.xlane.f32.xlu1 %v1958_v43 }
 0x4b4   : > { %v1898_v23 = vpop.xlane.xlu0 %1897  ;;  %v1957_v53 = vmul.f32 %v3754_v49, %v3754_v49 }
 0x4b5   : > { %v1927_v25 = vmul.f32 0.0078125, %v1898_v23  ;;  %v1956_v38 = vmul.f32 %v3748_v47, %v3748_v47 }
 0x4b7   : > { %v3752_v48 = vsub.f32 %v1840_v3, %v1927_v25  ;;  %1972 = vadd.xlane.f32.xlu1 %v1956_v38 }
 0x4b9   : > { %v1959_v50 = vmul.f32 %v3752_v48, %v3752_v48 }
 0x4bb   : > { %1978 = vadd.xlane.f32.xlu0 %v1959_v50 }
 0x4bc   : > { %v1904_v51 = vpop.xlane.xlu1 %1903 }
 0x4bd   : > { %v1930_v52 = vmul.f32 0.0078125, %v1904_v51 }
 0x4be   : > { %v1906_v54 = vpop.xlane.xlu0 %1905 }
 0x4bf   : > { %v3760_v55 = vsub.f32 %v1853_v4, %v1930_v52  ;;  %v1931_v28 = vmul.f32 0.0078125, %v1906_v54  ;;  %1974 = vadd.xlane.f32.xlu0 %v1957_v53 }
 0x4c0   : > { %v1900_v39 = vpop.xlane.xlu1 %1899 }
 0x4c1   : > { %v3762_v56 = vsub.f32 %v1856_v7, %v1931_v28  ;;  %v1928_v57 = vmul.f32 0.0078125, %v1900_v39  ;;  %v1962_v30 = vmul.f32 %v3760_v55, %v3760_v55 }
 0x4c2   : > { %v1902_v58 = vpop.xlane.xlu0 %1901 }
 0x4c3   : > { %v3766_v59 = vsub.f32 %v1845_v9, %v1928_v57  ;;  %v1929_v60 = vmul.f32 0.0078125, %v1902_v58  ;;  %1984 = vadd.xlane.f32.xlu1 %v1962_v30  ;;  %v1963_v41 = vmul.f32 %v3762_v56, %v3762_v56 }
 0x4c5   : > { %v3770_v61 = vsub.f32 %v1848_v32, %v1929_v60  ;;  %1986 = vadd.xlane.f32.xlu0 %v1963_v41  ;;  %v1960_v62 = vmul.f32 %v3766_v59, %v3766_v59  ;;  %v3820_v41 = vld [vmem:[%s3975_s10] ss:$0 sm:$0xff] }
 0x4c7   : > { %1980 = vadd.xlane.f32.xlu1 %v1960_v62  ;;  %v1961_v63 = vmul.f32 %v3770_v61, %v3770_v61 }
 0x4c9   : > { %1982 = vadd.xlane.f32.xlu0 %v1961_v63 }
 0x4cc   : > { %v1912_v0 = vpop.xlane.xlu1 %1911 }
 0x4cd   : > { %v1934_v27 = vmul.f32 0.0078125, %v1912_v0 }
 0x4ce   : > { %v1914_v1 = vpop.xlane.xlu0 %1913 }
 0x4cf   : > { %v3777_v2 = vsub.f32 %v3720_v34, %v1934_v27  ;;  %v1935_v3 = vmul.f32 0.0078125, %v1914_v1 }
 0x4d0   : > { %v1908_v29 = vpop.xlane.xlu1 %1907 }
 0x4d1   : > { %v3780_v4 = vsub.f32 %v3722_v33, %v1935_v3  ;;  %v1932_v5 = vmul.f32 0.0078125, %v1908_v29  ;;  %v1966_v6 = vmul.f32 %v3777_v2, %v3777_v2 }
 0x4d2   : > { %v1910_v7 = vpop.xlane.xlu0 %1909 }
 0x4d3   : > { %v3785_v8 = vsub.f32 %v3725_v12, %v1932_v5  ;;  %v1933_v9 = vmul.f32 0.0078125, %v1910_v7  ;;  %1992 = vadd.xlane.f32.xlu1 %v1966_v6  ;;  %v1967_v32 = vmul.f32 %v3780_v4, %v3780_v4  ;;  %v3827_v6 = vld [vmem:[%s3976_s11] ss:$0 sm:$0xff] }
 0x4d5   : > { %v3790_v10 = vsub.f32 %v3728_v40, %v1933_v9  ;;  %1994 = vadd.xlane.f32.xlu0 %v1967_v32  ;;  %v1964_v34 = vmul.f32 %v3785_v8, %v3785_v8 }
 0x4d7   : > { %1988 = vadd.xlane.f32.xlu1 %v1964_v34  ;;  %v1965_v11 = vmul.f32 %v3790_v10, %v3790_v10 }
 0x4d9   : > { %1990 = vadd.xlane.f32.xlu0 %v1965_v11  ;;  %v2196_v11 = vunpack.c.l.bf16 %v3572_v17 }
 0x4dd   : > { %v1916_v31 = vpop.xlane.xlu1 %1915 }
 0x4de   : > { %v1936_v33 = vmul.f32 0.0078125, %v1916_v31  ;;  %v2197_v31 = vunpack.c.h.bf16 %v3572_v17 }
 0x4df   : > { %v1918_v44 = vpop.xlane.xlu0 %1917 }
 0x4e0   : > { %v3797_v12 = vsub.f32 %v3732_v14, %v1936_v33  ;;  %v1937_v45 = vmul.f32 0.0078125, %v1918_v44 }
 0x4e1   : > { %v1920_v13 = vpop.xlane.xlu1 %1919 }
 0x4e2   : > { %v3800_v40 = vsub.f32 %v3734_v20, %v1937_v45  ;;  %v1938_v15 = vmul.f32 0.0078125, %v1920_v13  ;;  %v1968_v18 = vmul.f32 %v3797_v12, %v3797_v12 }
 0x4e3   : > { %v1922_v24 = vpop.xlane.xlu0 %1921 }
 0x4e4   : > { %v3805_v26 = vsub.f32 %v3737_v21, %v1938_v15  ;;  %v1939_v36 = vmul.f32 0.0078125, %v1922_v24  ;;  %1996 = vadd.xlane.f32.xlu1 %v1968_v18  ;;  %v1969_v42 = vmul.f32 %v3800_v40, %v3800_v40  ;;  %v2194_v15 = vunpack.c.l.bf16 %v3569_v16 }
 0x4e5   : > { %v2195_v18 = vunpack.c.h.bf16 %v3569_v16 }
 0x4e6   : > { %v3810_v14 = vsub.f32 %v3740_v22, %v1939_v36  ;;  %1998 = vadd.xlane.f32.xlu0 %v1969_v42  ;;  %v1970_v20 = vmul.f32 %v3805_v26, %v3805_v26 }
 0x4e8   : > { %2000 = vadd.xlane.f32.xlu1 %v1970_v20  ;;  %v1971_v43 = vmul.f32 %v3810_v14, %v3810_v14 }
 0x4ea   : > { %2002 = vadd.xlane.f32.xlu0 %v1971_v43 }
 0x540   : > { %v1977_v46 = vpop.xlane.xlu1 %1976 }
 0x541   : > { %v2006_v21 = vmul.f32 0.0078125, %v1977_v46 }
 0x543   : > { %v2022_v23 = vadd.f32 1e-05, %v2006_v21 }
 0x544   : > { %v1973_v37 = vpop.xlane.xlu1 %1972 }
 0x545   : > { %3123 = vrsqrt.f32 %v2022_v23  ;;  %v2004_v25 = vmul.f32 0.0078125, %v1973_v37 }
 0x547   : > { %v2020_v38 = vadd.f32 1e-05, %v2004_v25 }
 0x548   : > { %v1979_v50 = vpop.xlane.xlu0 %1978 }
 0x549   : > { %3125 = vrsqrt.f32 %v2020_v38  ;;  %v2007_v22 = vmul.f32 0.0078125, %v1979_v50 }
 0x54b   : > { %v2023_v51 = vadd.f32 1e-05, %v2007_v22 }
 0x54c   : > { %v1975_v52 = vpop.xlane.xlu0 %1974 }
 0x54d   : > { %3127 = vrsqrt.f32 %v2023_v51  ;;  %v2005_v53 = vmul.f32 0.0078125, %v1975_v52 }
 0x54f   : > { %v3124_v54 = vpop.eup %3123  ;;  %v2021_v28 = vadd.f32 1e-05, %v2005_v53 }
 0x550   : > { %v1985_v39 = vpop.xlane.xlu1 %1984  ;;  %v2054_v30 = vmul.f32 %v3124_v54, %v3744_v35  ;;  %v3155_v54 = vld [vmem:[%s3566_s0 + $0x18] sm:$0xff]  }
 0x551   : > { %3129 = vrsqrt.f32 %v2021_v28  ;;  %v2010_v57 = vmul.f32 0.0078125, %v1985_v39  ;;  %v2201_v28 = vunpack.c.h.bf16 %v3155_v54 }
 0x552   : > { %v1987_v58 = vpop.xlane.xlu0 %1986  ;;  %v2077_v29 = vmul.f32 %v3820_v41, %v2054_v30 }
 0x553   : > { %v3126_v60 = vpop.eup %3125  ;;  %v2026_v62 = vadd.f32 1e-05, %v2010_v57  ;;  %v2011_v63 = vmul.f32 0.0078125, %v1987_v58 }
 0x554   : > { %v1981_v0 = vpop.xlane.xlu1 %1980  ;;  %v2052_v27 = vmul.f32 %v3126_v60, %v3748_v47  ;;  %v2100_v33 = vadd.f32 %v3827_v6, %v2077_v29 }
 0x555   : > { %3131 = vrsqrt.f32 %v2026_v62  ;;  %v2027_v1 = vadd.f32 1e-05, %v2011_v63  ;;  %v2008_v3 = vmul.f32 0.0078125, %v1981_v0 }
 0x556   : > { %v1983_v5 = vpop.xlane.xlu0 %1982  ;;  %v2075_v47 = vmul.f32 %v3820_v41, %v2052_v27  ;;  %v2212_v17 = vadd.f32 %v2196_v11, %v2100_v33 }
 0x557   : > { %v3128_v35 = vpop.eup %3127  ;;  %3133 = vrsqrt.f32 %v2027_v1  ;;  %v2024_v7 = vadd.f32 1e-05, %v2008_v3  ;;  %v2009_v9 = vmul.f32 0.0078125, %v1983_v5 }
 0x558   : > { %v2055_v32 = vmul.f32 %v3128_v35, %v3752_v48  ;;  %v2098_v24 = vadd.f32 %v3827_v6, %v2075_v47 }
 0x559   : > { %3135 = vrsqrt.f32 %v2024_v7  ;;  %v2025_v34 = vadd.f32 1e-05, %v2009_v9 }
 0x55a   : > { %v2078_v44 = vmul.f32 %v3820_v41, %v2055_v32  ;;  %v2210_v37 = vadd.f32 %v2194_v15, %v2098_v24 }
 0x55b   : > { %v3130_v45 = vpop.eup %3129  ;;  %3137 = vrsqrt.f32 %v2025_v34 }
 0x55c   : > { %v2101_v48 = vadd.f32 %v3827_v6, %v2078_v44  ;;  %v2053_v13 = vmul.f32 %v3130_v45, %v3754_v49 }
 0x55e   : > { %v2636_v36 = vpack.c.bf16 %v2101_v48, %v2100_v33  ;;  %v2213_v42 = vadd.f32 %v2197_v31, %v2101_v48  ;;  %v2076_v20 = vmul.f32 %v3820_v41, %v2053_v13 }
 0x55f   : > { %v3132_v43 = vpop.eup %3131 }
 0x560   : > { %2708 = vst [vmem:[%s3848_s15 + $0x8] sm:$0xff] %v2636_v36   ;;  %v2676_v49 = vpack.c.bf16 %v2213_v42, %v2212_v17  ;;  %v2099_v16 = vadd.f32 %v3827_v6, %v2076_v20  ;;  %v2058_v46 = vmul.f32 %v3132_v43, %v3760_v55  ;;  %v1993_v21 = vpop.xlane.xlu1 %1992  ;;  %v2200_v55 = vunpack.c.l.bf16 %v3578_v19 }
 0x561   : > { %v3134_v23 = vpop.eup %3133  ;;  %v2014_v25 = vmul.f32 0.0078125, %v1993_v21 }
 0x562   : > { %2715 = vst [vmem:[%s3854_s20 + $0x8] sm:$0xff] %v2676_v49   ;;  %v2631_v38 = vpack.c.bf16 %v2099_v16, %v2098_v24  ;;  %v2211_v50 = vadd.f32 %v2195_v18, %v2099_v16  ;;  %v2081_v22 = vmul.f32 %v3820_v41, %v2058_v46  ;;  %v2059_v51 = vmul.f32 %v3134_v23, %v3762_v56  ;;  %v1995_v52 = vpop.xlane.xlu0 %1994  ;;  %v3156_v56 = vld [vmem:[%s3566_s0 + $0x10] sm:$0xff]   ;;  %v3157_v16 = vld [vmem:[%s3566_s0 + $0x28] sm:$0xff]  }
 0x563   : > { %v3136_v53 = vpop.eup %3135  ;;  %v2030_v39 = vadd.f32 1e-05, %v2014_v25  ;;  %v2015_v57 = vmul.f32 0.0078125, %v1995_v52  ;;  %v2198_v27 = vunpack.c.l.bf16 %v3156_v56  ;;  %v2199_v3 = vunpack.c.h.bf16 %v3156_v56 }
 0x564   : > { %2632 = vst [vmem:[%s3848_s15] sm:$0xff] %v2631_v38   ;;  %v2671_v30 = vpack.c.bf16 %v2211_v50, %v2210_v37  ;;  %v2104_v58 = vadd.f32 %v3827_v6, %v2081_v22  ;;  %v2082_v60 = vmul.f32 %v3820_v41, %v2059_v51  ;;  %v2056_v62 = vmul.f32 %v3136_v53, %v3766_v59  ;;  %v1989_v63 = vpop.xlane.xlu1 %1988  ;;  %v3158_v22 = vld [vmem:[%s3566_s0 + $0x20] sm:$0xff]  }
 0x565   : > { %v3138_v0 = vpop.eup %3137  ;;  %3139 = vrsqrt.f32 %v2030_v39  ;;  %v2031_v1 = vadd.f32 1e-05, %v2015_v57  ;;  %v2012_v19 = vmul.f32 0.0078125, %v1989_v63  ;;  %v2204_v46 = vunpack.c.l.bf16 %v3157_v16 }
 0x566   : > { %2672 = vst [vmem:[%s3854_s20] sm:$0xff] %v2671_v30   ;;  %v2105_v29 = vadd.f32 %v3827_v6, %v2082_v60  ;;  %v2079_v5 = vmul.f32 %v3820_v41, %v2056_v62  ;;  %v2057_v35 = vmul.f32 %v3138_v0, %v3770_v61  ;;  %v1991_v7 = vpop.xlane.xlu0 %1990  ;;  %v2216_v9 = vadd.f32 %v2200_v55, %v2104_v58 }
 0x567   : > { %3141 = vrsqrt.f32 %v2031_v1  ;;  %v2028_v59 = vadd.f32 1e-05, %v2012_v19  ;;  %v2013_v32 = vmul.f32 0.0078125, %v1991_v7  ;;  %v2205_v21 = vunpack.c.h.bf16 %v3157_v16 }
 0x568   : > { %v2646_v47 = vpack.c.bf16 %v2105_v29, %v2104_v58  ;;  %v2217_v34 = vadd.f32 %v2201_v28, %v2105_v29  ;;  %v2102_v11 = vadd.f32 %v3827_v6, %v2079_v5  ;;  %v2080_v31 = vmul.f32 %v3820_v41, %v2057_v35 }
 0x569   : > { %3143 = vrsqrt.f32 %v2028_v59  ;;  %v2029_v33 = vadd.f32 1e-05, %v2013_v32  ;;  %v2202_v51 = vunpack.c.l.bf16 %v3158_v22  ;;  %v2203_v55 = vunpack.c.h.bf16 %v3158_v22 }
 0x56a   : > { %2710 = vst [vmem:[%s3848_s15 + $0x18] sm:$0xff] %v2646_v47   ;;  %v2686_v44 = vpack.c.bf16 %v2217_v34, %v2216_v9  ;;  %v2103_v61 = vadd.f32 %v3827_v6, %v2080_v31  ;;  %v2214_v45 = vadd.f32 %v2198_v27, %v2102_v11  ;;  %v3159_v34 = vld [vmem:[%s3566_s0 + $0x30] sm:$0xff]  }
 0x56b   : > { %3145 = vrsqrt.f32 %v2029_v33  ;;  %v2207_v31 = vunpack.c.h.bf16 %v3159_v34 }
 0x56c   : > { %2717 = vst [vmem:[%s3854_s20 + $0x18] sm:$0xff] %v2686_v44   ;;  %v2641_v48 = vpack.c.bf16 %v2103_v61, %v2102_v11  ;;  %v2215_v13 = vadd.f32 %v2199_v3, %v2103_v61  ;;  %v2206_v11 = vunpack.c.l.bf16 %v3159_v34 }
 0x56e   : > { %2709 = vst [vmem:[%s3848_s15 + $0x10] sm:$0xff] %v2641_v48   ;;  %v2681_v15 = vpack.c.bf16 %v2215_v13, %v2214_v45  ;;  %v3160_v13 = vld [vmem:[%s3566_s0 + $0x38] sm:$0xff]  }
 0x56f   : > { %v3140_v18 = vpop.eup %3139 }
 0x570   : > { %2716 = vst [vmem:[%s3854_s20 + $0x10] sm:$0xff] %v2681_v15   ;;  %v2062_v24 = vmul.f32 %v3140_v18, %v3777_v2  ;;  %v2208_v15 = vunpack.c.l.bf16 %v3160_v13  ;;  %v2209_v18 = vunpack.c.h.bf16 %v3160_v13 }
 0x571   : > { %v3142_v17 = vpop.eup %3141  ;;  %v1997_v36 = vpop.xlane.xlu1 %1996 }
 0x572   : > { %v2085_v42 = vmul.f32 %v3820_v41, %v2062_v24  ;;  %v2063_v20 = vmul.f32 %v3142_v17, %v3780_v4  ;;  %v2016_v43 = vmul.f32 0.0078125, %v1997_v36 }
 0x573   : > { %v3144_v49 = vpop.eup %3143  ;;  %v1999_v23 = vpop.xlane.xlu0 %1998 }
 0x574   : > { %v2108_v37 = vadd.f32 %v3827_v6, %v2085_v42  ;;  %v2086_v25 = vmul.f32 %v3820_v41, %v2063_v20  ;;  %v2060_v38 = vmul.f32 %v3144_v49, %v3785_v8  ;;  %v2032_v2 = vadd.f32 1e-05, %v2016_v43 }
 0x575   : > { %v3146_v50 = vpop.eup %3145  ;;  %v2017_v52 = vmul.f32 0.0078125, %v1999_v23  ;;  %v2001_v53 = vpop.xlane.xlu1 %2000 }
 0x576   : > { %v2109_v4 = vadd.f32 %v3827_v6, %v2086_v25  ;;  %v2083_v54 = vmul.f32 %v3820_v41, %v2060_v38  ;;  %v2061_v28 = vmul.f32 %v3146_v50, %v3790_v10  ;;  %v2220_v39 = vadd.f32 %v2204_v46, %v2108_v37 }
 0x577   : > { %3147 = vrsqrt.f32 %v2032_v2  ;;  %v2033_v57 = vadd.f32 1e-05, %v2017_v52  ;;  %v2018_v30 = vmul.f32 0.0078125, %v2001_v53  ;;  %v2003_v8 = vpop.xlane.xlu0 %2002 }
 0x578   : > { %v2656_v58 = vpack.c.bf16 %v2109_v4, %v2108_v37  ;;  %v2221_v60 = vadd.f32 %v2205_v21, %v2109_v4  ;;  %v2106_v62 = vadd.f32 %v3827_v6, %v2083_v54  ;;  %v2084_v63 = vmul.f32 %v3820_v41, %v2061_v28 }
 0x579   : > { %3149 = vrsqrt.f32 %v2033_v57  ;;  %v2034_v0 = vadd.f32 1e-05, %v2018_v30  ;;  %v2019_v56 = vmul.f32 0.0078125, %v2003_v8 }
 0x57a   : > { %2712 = vst [vmem:[%s3848_s15 + $0x28] sm:$0xff] %v2656_v58   ;;  %v2696_v27 = vpack.c.bf16 %v2221_v60, %v2220_v39  ;;  %v2107_v10 = vadd.f32 %v3827_v6, %v2084_v63  ;;  %v2218_v19 = vadd.f32 %v2202_v51, %v2106_v62 }
 0x57b   : > { %3151 = vrsqrt.f32 %v2034_v0  ;;  %v2035_v1 = vadd.f32 1e-05, %v2019_v56 }
 0x57c   : > { %2719 = vst [vmem:[%s3854_s20 + $0x28] sm:$0xff] %v2696_v27   ;;  %v2651_v3 = vpack.c.bf16 %v2107_v10, %v2106_v62  ;;  %v2219_v29 = vadd.f32 %v2203_v55, %v2107_v10 }
 0x57d   : > { %3153 = vrsqrt.f32 %v2035_v1 }
 0x57e   : > { %2711 = vst [vmem:[%s3848_s15 + $0x20] sm:$0xff] %v2651_v3   ;;  %v2691_v5 = vpack.c.bf16 %v2219_v29, %v2218_v19 }
 0x580   : > { %2718 = vst [vmem:[%s3854_s20 + $0x20] sm:$0xff] %v2691_v5  }
 0x581   : > { %v3148_v35 = vpop.eup %3147 }
 0x582   : > { %v2064_v7 = vmul.f32 %v3148_v35, %v3797_v12 }
 0x583   : > { %v3150_v9 = vpop.eup %3149 }
 0x584   : > { %v2087_v59 = vmul.f32 %v3820_v41, %v2064_v7  ;;  %v2065_v32 = vmul.f32 %v3150_v9, %v3800_v40 }
 0x585   : > { %v3152_v47 = vpop.eup %3151 }
 0x586   : > { %v2110_v33 = vadd.f32 %v3827_v6, %v2087_v59  ;;  %v2088_v44 = vmul.f32 %v3820_v41, %v2065_v32  ;;  %v2066_v61 = vmul.f32 %v3152_v47, %v3805_v26 }
 0x587   : > { %v3154_v45 = vpop.eup %3153 }
 0x588   : > { %v2111_v12 = vadd.f32 %v3827_v6, %v2088_v44  ;;  %v2089_v48 = vmul.f32 %v3820_v41, %v2066_v61  ;;  %v2067_v40 = vmul.f32 %v3154_v45, %v3810_v14  ;;  %v2222_v24 = vadd.f32 %v2206_v11, %v2110_v33 }
 0x58a   : > { %v2661_v17 = vpack.c.bf16 %v2111_v12, %v2110_v33  ;;  %v2223_v36 = vadd.f32 %v2207_v31, %v2111_v12  ;;  %v2112_v26 = vadd.f32 %v3827_v6, %v2089_v48  ;;  %v2090_v42 = vmul.f32 %v3820_v41, %v2067_v40 }
 0x58c   : > { %2713 = vst [vmem:[%s3848_s15 + $0x30] sm:$0xff] %v2661_v17   ;;  %v2701_v20 = vpack.c.bf16 %v2223_v36, %v2222_v24  ;;  %v2113_v43 = vadd.f32 %v3827_v6, %v2090_v42  ;;  %v2224_v14 = vadd.f32 %v2208_v15, %v2112_v26 }
 0x58e   : > { %2720 = vst [vmem:[%s3854_s20 + $0x30] sm:$0xff] %v2701_v20   ;;  %v2666_v49 = vpack.c.bf16 %v2113_v43, %v2112_v26  ;;  %v2225_v16 = vadd.f32 %v2209_v18, %v2113_v43 }
 0x590   : > { %2714 = vst [vmem:[%s3848_s15 + $0x38] sm:$0xff] %v2666_v49   ;;  %v2706_v41 = vpack.c.bf16 %v2225_v16, %v2224_v14 }
 0x592   : > { %2721 = vst [vmem:[%s3854_s20 + $0x38] sm:$0xff] %v2706_v41  }
 0x593   : > { %3174 = shalt.err (!%p3171_p3)
}
 0x594   : > { %s3175_s24 = scalar_lea.hbm %s3916_s23, 1024  ;;  %s3179_s0 = scalar_lea.hbm %s3978_s13, 2048 }
 0x595   : > { %p3176_p4 = scmp.ne.s32.totalorder %s3916_s23, %s3175_s24  ;;  %p3180_p9 = scmp.lt.u32.totalorder %s3916_s23, %s3978_s13 }
 0x596   : > { %p3181_p10 = scmp.lt.u32.totalorder %s3179_s0, %s3175_s24  ;;  %p3183_p12 = scmp.lt.u32.totalorder %s3175_s24, %s3916_s23 }
 0x597   : > { %p3177_p7 = pnand %p3176_p4, %p3338_p5 }
 0x598   : > { %p3182_p11 = por %p3181_p10, %p3180_p9 }
 0x599   : > { %p3178_p8 = pneg %p3177_p7 }
 0x59a   : > { %p3184_p13 = por %p3183_p12, %p3182_p11 }
 0x59c   : > { %p3185_p0 = pnand %p3184_p13, %p3178_p8 }
 0x59e   : > { %3188 = shalt.err (!%p3185_p0)
}
 0x59f   : > { %s3228_s30 = smov 64   ;;  %s3229_s27 = smov 4  }
 0x5a0   : > { %3018 = dma.vmem_to_hbm [thread:$0]  (%p3338_p5), %s3918_s21, 1024, %s3916_s23, %s3924_s29, %s3228_s30, %s3228_s30, %s3229_s27  }
 0x5a1 PF: > { %p3024_p1 = scmp.ge.s32.totalorder %s3223_s28, 2  ;;  %s2352_s16 = sand.u32 1, %s3211_s25  }
 0x5a2   : > { %s2353_s24 = scalar_lea.sflag [#allocation4], %s2352_s16 }
 0x5a3   : > { %p3021_p2 = pnand %p3024_p1, %p3342_p6 }
 0x5a5   : > { %3206 = dma.done.wait (!%p3021_p2), %s2353_s24, 1024  }
 0x5a6   : > { %3208 = vsyncadd (!%p3021_p2), %s2353_s24, 4294966272  ;;  %s3986_s15 = sld [smem:[#allocation6_spill]]  ;;  %s3987_s27 = sld [smem:[#allocation7_spill]] }
 0x5a7   : > { %p24_p3 = scmp.ge.s32.totalorder %s3325_s14, 4   ;;  %s3988_s25 = smov %s3215_s26 }
 0x5a8   : > { %s3990_s28 = smov %s3325_s14 }
 0x5a9   :  { %26 = sbr.rel (!%p24_p3) target bundleno = 5 (0x5), region = 121 }
 0x5ac   : > { %s3989_s26 = smov %s3986_s15 }
 0x5b0   :  { %2358 = vsyncpa [#allocation4], 1 }
 0x5b1   :  { %2360 = vsyncpa [#allocation4 + $0x1], 1 }

</bundles_post_ra>
